<compile_context>
chip_gen: v7x
topology: tpu7x:2x2x1
jax: 0.10.0
libtpu: 0.0.40
codegen_flags: <defaults>
</compile_context>

<pallas_src>
import jax
import jax.numpy as jnp
import numpy as np
from jax.experimental import pallas as pl
from jax.experimental.pallas import tpu as pltpu


LIN1_K = 27 * 27 * 32        # 23328 flattened features feeding linear1
LIN1_TK = 7808               # K tile = 61 * 128
LIN1_KP = 3 * LIN1_TK        # 23424 = 183 * 128 (tight 128-multiple padding)


# ----------------------------- Pallas kernels ------------------------------

def _conv_relu_kernel(p_ref, w_ref, b_ref, o_ref):
    # out (Cout, TN) = W (Cout, K) @ patches (K, TN), + bias, ReLU, bf16 store.
    y = jnp.dot(w_ref[...], p_ref[...], preferred_element_type=jnp.float32)
    y = y + b_ref[...]                           # (Cout, 1) broadcast over lanes
    o_ref[...] = jnp.maximum(y, 0.0).astype(o_ref.dtype)


def conv_relu_t(patches_t, w_t, b_col, *, n_tiles=1):
    """Conv-as-matmul in transposed layout.  patches_t: (K, M), w_t: (Cout, K),
    b_col: (Cout, 1).  Returns bf16 (Cout, M)."""
    Cout, K = w_t.shape
    K2, M = patches_t.shape
    assert K == K2
    if n_tiles > 1 and M % (n_tiles * 128) != 0:
        n_tiles = 1                              # fall back to a single block
    TN = M // n_tiles
    return pl.pallas_call(
        _conv_relu_kernel,
        out_shape=jax.ShapeDtypeStruct((Cout, M), jnp.bfloat16),
        grid=(n_tiles,),
        in_specs=[
            pl.BlockSpec((K, TN), lambda i: (0, i)),
            pl.BlockSpec((Cout, K), lambda i: (0, 0)),
            pl.BlockSpec((Cout, 1), lambda i: (0, 0)),
        ],
        out_specs=pl.BlockSpec((Cout, TN), lambda i: (0, i)),
        compiler_params=pltpu.CompilerParams(
            dimension_semantics=("parallel",)),   # 4 conv1 tiles -> 2 per v7x TC
    )(patches_t, w_t, b_col)


def _conv_bn_relu_kernel(p_ref, w_ref, b_ref, g_ref, bt_ref, o_ref):
    # conv2 matmul + bias, then training-mode BatchNorm over the lane axis
    # (= batch*spatial), affine, ReLU.  Channel axis = rows.
    y = jnp.dot(w_ref[...], p_ref[...], preferred_element_type=jnp.float32)
    y = y + b_ref[...]
    m = y.shape[1]                               # exact N*H*W count (no padding)
    mean = jnp.sum(y, axis=1, keepdims=True) * (1.0 / m)
    d = y - mean
    var = jnp.sum(d * d, axis=1, keepdims=True) * (1.0 / m)   # centered: var >= 0
    inv = jax.lax.rsqrt(var + 1e-5)
    o_ref[...] = jnp.maximum(d * inv * g_ref[...] + bt_ref[...], 0.0).astype(o_ref.dtype)


def conv_bn_relu_t(patches_t, w_t, b_col, gamma_col, beta_col):
    Cout, K = w_t.shape
    K2, M = patches_t.shape
    assert K == K2
    return pl.pallas_call(
        _conv_bn_relu_kernel,
        out_shape=jax.ShapeDtypeStruct((Cout, M), jnp.bfloat16),
        grid=(1,),
        in_specs=[
            pl.BlockSpec((K, M), lambda i: (0, 0)),
            pl.BlockSpec((Cout, K), lambda i: (0, 0)),
            pl.BlockSpec((Cout, 1), lambda i: (0, 0)),
            pl.BlockSpec((Cout, 1), lambda i: (0, 0)),
            pl.BlockSpec((Cout, 1), lambda i: (0, 0)),
        ],
        out_specs=pl.BlockSpec((Cout, M), lambda i: (0, 0)),
    )(patches_t, w_t, b_col, gamma_col, beta_col)


def _tail_kernel(x_ref, w1_ref, b1_ref, wmu_ref, bmu_ref, wls_ref, bls_ref,
                 eps_ref, z_ref, kl_ref, acc_ref):
    # K-tiled linear1 (+ReLU), mu / log_sigma heads, reparameterization and the
    # KL reduction, all fused; the heads run in the finalize epilogue.
    k = pl.program_id(0)

    @pl.when(k == 0)
    def _():
        acc_ref[...] = jnp.zeros_like(acc_ref)

    acc_ref[...] += jnp.dot(x_ref[...], w1_ref[...],
                            preferred_element_type=jnp.float32)

    @pl.when(k == pl.num_programs(0) - 1)
    def _():
        h = jnp.maximum(acc_ref[...] + b1_ref[...], 0.0)             # (B, 128)
        mu = jnp.dot(h, wmu_ref[...], preferred_element_type=jnp.float32) + bmu_ref[...]
        log_sigma = jnp.dot(h, wls_ref[...], preferred_element_type=jnp.float32) + bls_ref[...]
        sigma = jnp.exp(log_sigma)
        z_ref[...] = (mu + sigma * eps_ref[...]).astype(z_ref.dtype)
        # kl = sum(sigma^2 + mu^2 - log(sigma) - 1/2)   (exactly as in the module)
        kl_ref[...] = jnp.sum(sigma * sigma + mu * mu - log_sigma - 0.5).reshape(1, 1)


def linear_tail(flat, w1, b1, w_mu, b_mu, w_ls, b_ls, eps, *, tk=LIN1_TK):
    B, Kp = flat.shape
    Kp2, H = w1.shape
    assert Kp == Kp2 and Kp % tk == 0
    latent = w_mu.shape[1]
    z, kl = pl.pallas_call(
        _tail_kernel,
        out_shape=(jax.ShapeDtypeStruct((B, latent), jnp.float32),
                   jax.ShapeDtypeStruct((1, 1), jnp.float32)),
        grid=(Kp // tk,),
        in_specs=[
            pl.BlockSpec((B, tk), lambda k: (0, k)),
            pl.BlockSpec((tk, H), lambda k: (k, 0)),
            pl.BlockSpec((1, H), lambda k: (0, 0)),
            pl.BlockSpec((H, latent), lambda k: (0, 0)),
            pl.BlockSpec((1, latent), lambda k: (0, 0)),
            pl.BlockSpec((H, latent), lambda k: (0, 0)),
            pl.BlockSpec((1, latent), lambda k: (0, 0)),
            pl.BlockSpec((B, latent), lambda k: (0, 0)),
        ],
        out_specs=(pl.BlockSpec((B, latent), lambda k: (0, 0)),
                   pl.BlockSpec((1, 1), lambda k: (0, 0))),
        scratch_shapes=[pltpu.VMEM((B, H), jnp.float32)],
        compiler_params=pltpu.CompilerParams(
            dimension_semantics=("arbitrary",)),
    )(flat, w1, b1, w_mu, b_mu, w_ls, b_ls, eps)
    return z, kl[0, 0]


# ------------------------------ JAX glue ------------------------------------

def im2col_t(x, ksize, stride, padding):
    """x: (C, N, H, W) -> transposed patch matrix (k*k*C, N*Ho*Wo).
    Row ordering is (kh, kw, c_in) to match the packed conv weights; the large
    N*Ho*Wo axis stays last (lane-dense)."""
    # TODO(synk): patch extraction stays as XLA glue; fusing it into the conv
    # kernels would also remove the patch-matrix HBM round trip.
    if padding:
        x = jnp.pad(x, ((0, 0), (0, 0), (padding, padding), (padding, padding)))
    C, N, Hp, Wp = x.shape
    Ho = (Hp - ksize) // stride + 1
    Wo = (Wp - ksize) // stride + 1
    rows = []
    for i in range(ksize):
        for j in range(ksize):
            sl = jax.lax.slice(
                x, (0, 0, i, j),
                (C, N, i + (Ho - 1) * stride + 1, j + (Wo - 1) * stride + 1),
                strides=(1, 1, stride, stride))            # (C, N, Ho, Wo)
            rows.append(sl.reshape(C, N * Ho * Wo))
    patches = jnp.concatenate(rows, axis=0)                # (k*k*C, N*Ho*Wo)
    return patches, (N, Ho, Wo)


def init_params(key, latent_dims):
    """PyTorch-layout parameters (as a state_dict would hold them)."""
    keys = jax.random.split(key, 6)

    def rnd(k, shape, fan_in):
        return jax.random.normal(k, shape, dtype=jnp.float32) / np.sqrt(fan_in)

    p = {}
    p["w_conv1"] = rnd(keys[0], (8, 3, 3, 3), 3 * 9)
    p["b_conv1"] = jnp.zeros((8,), jnp.float32)
    p["w_conv2"] = rnd(keys[1], (16, 8, 3, 3), 8 * 9)
    p["b_conv2"] = jnp.zeros((16,), jnp.float32)
    p["bn_gamma"] = jnp.ones((16,), jnp.float32)    # BatchNorm2d default affine
    p["bn_beta"] = jnp.zeros((16,), jnp.float32)
    p["w_conv3"] = rnd(keys[2], (32, 16, 3, 3), 16 * 9)
    p["b_conv3"] = jnp.zeros((32,), jnp.float32)
    p["w_lin1"] = rnd(keys[3], (128, LIN1_K), LIN1_K)
    p["b_lin1"] = jnp.zeros((128,), jnp.float32)
    p["w_lin2"] = rnd(keys[4], (latent_dims, 128), 128)
    p["b_lin2"] = jnp.zeros((latent_dims,), jnp.float32)
    p["w_lin3"] = rnd(keys[5], (latent_dims, 128), 128)
    p["b_lin3"] = jnp.zeros((latent_dims,), jnp.float32)
    return p


def pack_params(raw):
    """One-time weight packing: conv weights -> bf16 (Cout, k*k*Cin) with
    (kh, kw, cin) column order; biases/BN params as column vectors; linear1
    weight transposed to (K, 128), bf16, zero-padded K -> 23424; head weights
    transposed to (128, latent)."""
    def conv_w(w):
        cout = w.shape[0]
        return (jnp.transpose(w, (2, 3, 1, 0)).reshape(-1, cout).T
                .astype(jnp.bfloat16))

    w1 = raw["w_lin1"].T                                        # (23328, 128)
    w1 = jnp.pad(w1, ((0, LIN1_KP - LIN1_K), (0, 0))).astype(jnp.bfloat16)

    return {
        "w_conv1": conv_w(raw["w_conv1"]), "b_conv1": raw["b_conv1"].reshape(-1, 1),
        "w_conv2": conv_w(raw["w_conv2"]), "b_conv2": raw["b_conv2"].reshape(-1, 1),
        "bn_gamma": raw["bn_gamma"].reshape(-1, 1),
        "bn_beta": raw["bn_beta"].reshape(-1, 1),
        "w_conv3": conv_w(raw["w_conv3"]), "b_conv3": raw["b_conv3"].reshape(-1, 1),
        "w_lin1": w1, "b_lin1": raw["b_lin1"].reshape(1, -1),
        "w_mu": raw["w_lin2"].T, "b_mu": raw["b_lin2"].reshape(1, -1),
        "w_ls": raw["w_lin3"].T, "b_ls": raw["b_lin3"].reshape(1, -1),
    }


def encoder_forward(params, x_nchw, noise_key):
    # NCHW -> (C, N, H, W) bf16: channels on sublanes, batch*spatial on lanes.
    x = jnp.transpose(x_nchw, (1, 0, 2, 3)).astype(jnp.bfloat16)

    # conv1 (3->8, k3, s2, p1) + ReLU.   patches (27, 25088), 4 lane tiles.
    p1, (n, h1, w1) = im2col_t(x, 3, 2, 1)
    y1 = conv_relu_t(p1, params["w_conv1"], params["b_conv1"], n_tiles=4)
    y1 = y1.reshape(8, n, h1, w1)

    # conv2 (8->16, k3, s2, p1) + BatchNorm2d(batch stats) + ReLU, one kernel.
    p2, (n, h2, w2) = im2col_t(y1, 3, 2, 1)
    y2 = conv_bn_relu_t(p2, params["w_conv2"], params["b_conv2"],
                        params["bn_gamma"], params["bn_beta"])
    y2 = y2.reshape(16, n, h2, w2)

    # conv3 (16->32, k3, s2, p0) + ReLU.   patches (144, 1458), single block.
    p3, (n, h3, w3) = im2col_t(y2, 3, 2, 0)
    y3 = conv_relu_t(p3, params["w_conv3"], params["b_conv3"], n_tiles=1)

    # torch.flatten(x, 1) on NCHW -> channel-major feature order, pad K to 23424.
    flat = y3.reshape(32, n, h3 * w3).transpose(1, 0, 2).reshape(n, 32 * h3 * w3)
    flat = jnp.pad(flat, ((0, 0), (0, LIN1_KP - flat.shape[1])))

    latent = params["w_mu"].shape[1]
    # TODO(synk): torch.distributions.Normal(0,1).sample() uses torch's RNG
    # stream; the standard-normal noise here comes from jax.random instead.
    eps = jax.random.normal(noise_key, (n, latent), dtype=jnp.float32)

    # linear1 (K-tiled, bf16) + ReLU + mu/log_sigma heads + reparam + KL, fused.
    z, kl = linear_tail(flat, params["w_lin1"], params["b_lin1"],
                        params["w_mu"], params["b_mu"],
                        params["w_ls"], params["b_ls"], eps)
    return z, kl


if __name__ == "__main__":
    latent_dims = 4
    key = jax.random.PRNGKey(0)
    k_params, k_x, k_noise = jax.random.split(key, 3)

    raw_params = init_params(k_params, latent_dims)
    params = pack_params(raw_params)            # one-time weight packing

    # 224x224x3 input is what the module implies (224 -> 112 -> 56 -> 27 and
    # linear1 expects 27*27*32 flattened features).  Batch kept small (2).
    x = jax.random.normal(k_x, (2, 3, 224, 224), dtype=jnp.float32)

    fwd = jax.jit(encoder_forward)
    z, kl = fwd(params, x, k_noise)
    z = jax.block_until_ready(z)
    kl = jax.block_until_ready(kl)

    assert z.shape == (2, latent_dims)
    assert bool(jnp.all(jnp.isfinite(z))) and bool(jnp.isfinite(kl))
    print("KERNEL_OK")
</pallas_src>

<mosaic_0001>
module attributes {stable_mosaic.version = 11 : i64} {
  func.func @_conv_relu_kernel(%arg0: i32, %arg1: memref<27x6272xbf16, #tpu.memory_space<vmem>>, %arg2: memref<8x27xbf16, #tpu.memory_space<vmem>>, %arg3: memref<8x1xf32, #tpu.memory_space<vmem>>, %arg4: memref<8x6272xbf16, #tpu.memory_space<vmem>>) attributes {dimension_semantics = [#tpu.dimension_semantics<parallel>], iteration_bounds = array<i64: 4>, scalar_prefetch = 0 : i64, scratch_operands = 0 : i64, tpu.core_type = #tpu.core_type<tc>, window_params = [{transform_indices = @transform_0, window_bounds = array<i64: 27, 6272>}, {pipeline_mode = #tpu.pipeline_mode<synchronous>, transform_indices = @transform_1, window_bounds = array<i64: 8, 27>}, {pipeline_mode = #tpu.pipeline_mode<synchronous>, transform_indices = @transform_2, window_bounds = array<i64: 8, 1>}, {transform_indices = @transform_3, window_bounds = array<i64: 8, 6272>}]} {
    %c0 = arith.constant 0 : index
    %c0_0 = arith.constant 0 : index
    %0 = vector.load %arg2[%c0, %c0_0] : memref<8x27xbf16, #tpu.memory_space<vmem>>, vector<8x27xbf16>
    %c0_1 = arith.constant 0 : index
    %c0_2 = arith.constant 0 : index
    %1 = vector.load %arg1[%c0_1, %c0_2] : memref<27x6272xbf16, #tpu.memory_space<vmem>>, vector<27x6272xbf16>
    %cst = arith.constant dense<0.000000e+00> : vector<8x6272xf32>
    %2 = tpu.matmul %0, %1, %cst {dimension_numbers = #tpu.dot_dimension_numbers<[1], [0], [0], [1], [0, 0, 1, 1], [], []>} : vector<8x27xbf16>, vector<27x6272xbf16>, vector<8x6272xf32> -> vector<8x6272xf32>
    %c0_3 = arith.constant 0 : index
    %c0_4 = arith.constant 0 : index
    %3 = vector.load %arg3[%c0_3, %c0_4] : memref<8x1xf32, #tpu.memory_space<vmem>>, vector<8x1xf32>
    %4 = vector.broadcast %3 : vector<8x1xf32> to vector<8x6272xf32>
    %5 = arith.addf %2, %4 : vector<8x6272xf32>
    %cst_5 = arith.constant 0.000000e+00 : f32
    %6 = vector.broadcast %cst_5 : f32 to vector<8x6272xf32>
    %7 = arith.maximumf %5, %6 : vector<8x6272xf32>
    %8 = arith.truncf %7 : vector<8x6272xf32> to vector<8x6272xbf16>
    %c0_6 = arith.constant 0 : index
    %c0_7 = arith.constant 0 : index
    %9 = vector.load %arg4[%c0_6, %c0_7] : memref<8x6272xbf16, #tpu.memory_space<vmem>>, vector<8x6272xbf16>
    tpu.vector_store %arg4[%c0_6, %c0_7], %8 {strides = array<i32>} : memref<8x6272xbf16, #tpu.memory_space<vmem>>, vector<8x6272xbf16>,
    return
  }
  func.func @transform_0(%arg0: i32) -> (i32, i32) {
    %c0_i32 = arith.constant 0 : i32
    %c0_i32_0 = arith.constant 0 : i32
    return %c0_i32, %arg0 : i32, i32
  }
  func.func @transform_1(%arg0: i32) -> (i32, i32) {
    %c0_i32 = arith.constant 0 : i32
    %c0_i32_0 = arith.constant 0 : i32
    %c0_i32_1 = arith.constant 0 : i32
    return %c0_i32, %c0_i32_0 : i32, i32
  }
  func.func @transform_2(%arg0: i32) -> (i32, i32) {
    %c0_i32 = arith.constant 0 : i32
    %c0_i32_0 = arith.constant 0 : i32
    %c0_i32_1 = arith.constant 0 : i32
    return %c0_i32, %c0_i32_0 : i32, i32
  }
  func.func @transform_3(%arg0: i32) -> (i32, i32) {
    %c0_i32 = arith.constant 0 : i32
    %c0_i32_0 = arith.constant 0 : i32
    return %c0_i32, %arg0 : i32, i32
  }
}

module attributes {stable_mosaic.version = 11 : i64} {
  func.func @_conv_bn_relu_kernel(%arg0: i32, %arg1: memref<72x6272xbf16, #tpu.memory_space<vmem>>, %arg2: memref<16x72xbf16, #tpu.memory_space<vmem>>, %arg3: memref<16x1xf32, #tpu.memory_space<vmem>>, %arg4: memref<16x1xf32, #tpu.memory_space<vmem>>, %arg5: memref<16x1xf32, #tpu.memory_space<vmem>>, %arg6: memref<16x6272xbf16, #tpu.memory_space<vmem>>) attributes {dimension_semantics = [#tpu.dimension_semantics<arbitrary>], iteration_bounds = array<i64: 1>, scalar_prefetch = 0 : i64, scratch_operands = 0 : i64, tpu.core_type = #tpu.core_type<tc>, window_params = [{pipeline_mode = #tpu.pipeline_mode<synchronous>, transform_indices = @transform_0, window_bounds = array<i64: 72, 6272>}, {pipeline_mode = #tpu.pipeline_mode<synchronous>, transform_indices = @transform_1, window_bounds = array<i64: 16, 72>}, {pipeline_mode = #tpu.pipeline_mode<synchronous>, transform_indices = @transform_2, window_bounds = array<i64: 16, 1>}, {pipeline_mode = #tpu.pipeline_mode<synchronous>, transform_indices = @transform_3, window_bounds = array<i64: 16, 1>}, {pipeline_mode = #tpu.pipeline_mode<synchronous>, transform_indices = @transform_4, window_bounds = array<i64: 16, 1>}, {pipeline_mode = #tpu.pipeline_mode<synchronous>, transform_indices = @transform_5, window_bounds = array<i64: 16, 6272>}]} {
    %c0 = arith.constant 0 : index
    %c0_0 = arith.constant 0 : index
    %0 = vector.load %arg2[%c0, %c0_0] : memref<16x72xbf16, #tpu.memory_space<vmem>>, vector<16x72xbf16>
    %c0_1 = arith.constant 0 : index
    %c0_2 = arith.constant 0 : index
    %1 = vector.load %arg1[%c0_1, %c0_2] : memref<72x6272xbf16, #tpu.memory_space<vmem>>, vector<72x6272xbf16>
    %cst = arith.constant dense<0.000000e+00> : vector<16x6272xf32>
    %2 = tpu.matmul %0, %1, %cst {dimension_numbers = #tpu.dot_dimension_numbers<[1], [0], [0], [1], [0, 0, 1, 1], [], []>} : vector<16x72xbf16>, vector<72x6272xbf16>, vector<16x6272xf32> -> vector<16x6272xf32>
    %c0_3 = arith.constant 0 : index
    %c0_4 = arith.constant 0 : index
    %3 = vector.load %arg3[%c0_3, %c0_4] : memref<16x1xf32, #tpu.memory_space<vmem>>, vector<16x1xf32>
    %4 = vector.broadcast %3 : vector<16x1xf32> to vector<16x6272xf32>
    %5 = arith.addf %2, %4 : vector<16x6272xf32>
    %cst_5 = arith.constant dense<0.000000e+00> : vector<16xf32>
    %6 = vector.multi_reduction <add>, %5, %cst_5 [1] : vector<16x6272xf32> to vector<16xf32>
    %7 = vector.shape_cast %6 : vector<16xf32> to vector<16x1xf32>
    %cst_6 = arith.constant 1.59438772E-4 : f32
    %8 = vector.broadcast %cst_6 : f32 to vector<16x1xf32>
    %9 = arith.mulf %7, %8 : vector<16x1xf32>
    %10 = vector.broadcast %9 : vector<16x1xf32> to vector<16x6272xf32>
    %11 = arith.subf %5, %10 : vector<16x6272xf32>
    %12 = arith.mulf %11, %11 : vector<16x6272xf32>
    %cst_7 = arith.constant dense<0.000000e+00> : vector<16xf32>
    %13 = vector.multi_reduction <add>, %12, %cst_7 [1] : vector<16x6272xf32> to vector<16xf32>
    %14 = vector.shape_cast %13 : vector<16xf32> to vector<16x1xf32>
    %cst_8 = arith.constant 1.59438772E-4 : f32
    %15 = vector.broadcast %cst_8 : f32 to vector<16x1xf32>
    %16 = arith.mulf %14, %15 : vector<16x1xf32>
    %cst_9 = arith.constant 9.99999974E-6 : f32
    %17 = vector.broadcast %cst_9 : f32 to vector<16x1xf32>
    %18 = arith.addf %16, %17 : vector<16x1xf32>
    %19 = math.rsqrt %18 : vector<16x1xf32>
    %20 = vector.broadcast %19 : vector<16x1xf32> to vector<16x6272xf32>
    %21 = arith.mulf %11, %20 : vector<16x6272xf32>
    %c0_10 = arith.constant 0 : index
    %c0_11 = arith.constant 0 : index
    %22 = vector.load %arg4[%c0_10, %c0_11] : memref<16x1xf32, #tpu.memory_space<vmem>>, vector<16x1xf32>
    %23 = vector.broadcast %22 : vector<16x1xf32> to vector<16x6272xf32>
    %24 = arith.mulf %21, %23 : vector<16x6272xf32>
    %c0_12 = arith.constant 0 : index
    %c0_13 = arith.constant 0 : index
    %25 = vector.load %arg5[%c0_12, %c0_13] : memref<16x1xf32, #tpu.memory_space<vmem>>, vector<16x1xf32>
    %26 = vector.broadcast %25 : vector<16x1xf32> to vector<16x6272xf32>
    %27 = arith.addf %24, %26 : vector<16x6272xf32>
    %cst_14 = arith.constant 0.000000e+00 : f32
    %28 = vector.broadcast %cst_14 : f32 to vector<16x6272xf32>
    %29 = arith.maximumf %27, %28 : vector<16x6272xf32>
    %30 = arith.truncf %29 : vector<16x6272xf32> to vector<16x6272xbf16>
    %c0_15 = arith.constant 0 : index
    %c0_16 = arith.constant 0 : index
    %31 = vector.load %arg6[%c0_15, %c0_16] : memref<16x6272xbf16, #tpu.memory_space<vmem>>, vector<16x6272xbf16>
    tpu.vector_store %arg6[%c0_15, %c0_16], %30 {strides = array<i32>} : memref<16x6272xbf16, #tpu.memory_space<vmem>>, vector<16x6272xbf16>,
    return
  }
  func.func @transform_0(%arg0: i32) -> (i32, i32) {
    %c0_i32 = arith.constant 0 : i32
    %c0_i32_0 = arith.constant 0 : i32
    %c0_i32_1 = arith.constant 0 : i32
    return %c0_i32, %c0_i32_0 : i32, i32
  }
  func.func @transform_1(%arg0: i32) -> (i32, i32) {
    %c0_i32 = arith.constant 0 : i32
    %c0_i32_0 = arith.constant 0 : i32
    %c0_i32_1 = arith.constant 0 : i32
    return %c0_i32, %c0_i32_0 : i32, i32
  }
  func.func @transform_2(%arg0: i32) -> (i32, i32) {
    %c0_i32 = arith.constant 0 : i32
    %c0_i32_0 = arith.constant 0 : i32
    %c0_i32_1 = arith.constant 0 : i32
    return %c0_i32, %c0_i32_0 : i32, i32
  }
  func.func @transform_3(%arg0: i32) -> (i32, i32) {
    %c0_i32 = arith.constant 0 : i32
    %c0_i32_0 = arith.constant 0 : i32
    %c0_i32_1 = arith.constant 0 : i32
    return %c0_i32, %c0_i32_0 : i32, i32
  }
  func.func @transform_4(%arg0: i32) -> (i32, i32) {
    %c0_i32 = arith.constant 0 : i32
    %c0_i32_0 = arith.constant 0 : i32
    %c0_i32_1 = arith.constant 0 : i32
    return %c0_i32, %c0_i32_0 : i32, i32
  }
  func.func @transform_5(%arg0: i32) -> (i32, i32) {
    %c0_i32 = arith.constant 0 : i32
    %c0_i32_0 = arith.constant 0 : i32
    %c0_i32_1 = arith.constant 0 : i32
    return %c0_i32, %c0_i32_0 : i32, i32
  }
}

module attributes {stable_mosaic.version = 11 : i64} {
  func.func @_conv_relu_kernel(%arg0: i32, %arg1: memref<144x1458xbf16, #tpu.memory_space<vmem>>, %arg2: memref<32x144xbf16, #tpu.memory_space<vmem>>, %arg3: memref<32x1xf32, #tpu.memory_space<vmem>>, %arg4: memref<32x1458xbf16, #tpu.memory_space<vmem>>) attributes {dimension_semantics = [#tpu.dimension_semantics<parallel>], iteration_bounds = array<i64: 1>, scalar_prefetch = 0 : i64, scratch_operands = 0 : i64, tpu.core_type = #tpu.core_type<tc>, window_params = [{transform_indices = @transform_0, window_bounds = array<i64: 144, 1458>}, {pipeline_mode = #tpu.pipeline_mode<synchronous>, transform_indices = @transform_1, window_bounds = array<i64: 32, 144>}, {pipeline_mode = #tpu.pipeline_mode<synchronous>, transform_indices = @transform_2, window_bounds = array<i64: 32, 1>}, {transform_indices = @transform_3, window_bounds = array<i64: 32, 1458>}]} {
    %c0 = arith.constant 0 : index
    %c0_0 = arith.constant 0 : index
    %0 = vector.load %arg2[%c0, %c0_0] : memref<32x144xbf16, #tpu.memory_space<vmem>>, vector<32x144xbf16>
    %c0_1 = arith.constant 0 : index
    %c0_2 = arith.constant 0 : index
    %1 = vector.load %arg1[%c0_1, %c0_2] : memref<144x1458xbf16, #tpu.memory_space<vmem>>, vector<144x1458xbf16>
    %cst = arith.constant dense<0.000000e+00> : vector<32x1458xf32>
    %2 = tpu.matmul %0, %1, %cst {dimension_numbers = #tpu.dot_dimension_numbers<[1], [0], [0], [1], [0, 0, 1, 1], [], []>} : vector<32x144xbf16>, vector<144x1458xbf16>, vector<32x1458xf32> -> vector<32x1458xf32>
    %c0_3 = arith.constant 0 : index
    %c0_4 = arith.constant 0 : index
    %3 = vector.load %arg3[%c0_3, %c0_4] : memref<32x1xf32, #tpu.memory_space<vmem>>, vector<32x1xf32>
    %4 = vector.broadcast %3 : vector<32x1xf32> to vector<32x1458xf32>
    %5 = arith.addf %2, %4 : vector<32x1458xf32>
    %cst_5 = arith.constant 0.000000e+00 : f32
    %6 = vector.broadcast %cst_5 : f32 to vector<32x1458xf32>
    %7 = arith.maximumf %5, %6 : vector<32x1458xf32>
    %8 = arith.truncf %7 : vector<32x1458xf32> to vector<32x1458xbf16>
    %c0_6 = arith.constant 0 : index
    %c0_7 = arith.constant 0 : index
    %9 = vector.load %arg4[%c0_6, %c0_7] : memref<32x1458xbf16, #tpu.memory_space<vmem>>, vector<32x1458xbf16>
    tpu.vector_store %arg4[%c0_6, %c0_7], %8 {strides = array<i32>} : memref<32x1458xbf16, #tpu.memory_space<vmem>>, vector<32x1458xbf16>,
    return
  }
  func.func @transform_0(%arg0: i32) -> (i32, i32) {
    %c0_i32 = arith.constant 0 : i32
    %c0_i32_0 = arith.constant 0 : i32
    return %c0_i32, %arg0 : i32, i32
  }
  func.func @transform_1(%arg0: i32) -> (i32, i32) {
    %c0_i32 = arith.constant 0 : i32
    %c0_i32_0 = arith.constant 0 : i32
    %c0_i32_1 = arith.constant 0 : i32
    return %c0_i32, %c0_i32_0 : i32, i32
  }
  func.func @transform_2(%arg0: i32) -> (i32, i32) {
    %c0_i32 = arith.constant 0 : i32
    %c0_i32_0 = arith.constant 0 : i32
    %c0_i32_1 = arith.constant 0 : i32
    return %c0_i32, %c0_i32_0 : i32, i32
  }
  func.func @transform_3(%arg0: i32) -> (i32, i32) {
    %c0_i32 = arith.constant 0 : i32
    %c0_i32_0 = arith.constant 0 : i32
    return %c0_i32, %arg0 : i32, i32
  }
}

module attributes {stable_mosaic.version = 11 : i64} {
  func.func @_tail_kernel(%arg0: i32, %arg1: memref<2x7808xbf16, #tpu.memory_space<vmem>>, %arg2: memref<7808x128xbf16, #tpu.memory_space<vmem>>, %arg3: memref<1x128xf32, #tpu.memory_space<vmem>>, %arg4: memref<128x4xf32, #tpu.memory_space<vmem>>, %arg5: memref<1x4xf32, #tpu.memory_space<vmem>>, %arg6: memref<128x4xf32, #tpu.memory_space<vmem>>, %arg7: memref<1x4xf32, #tpu.memory_space<vmem>>, %arg8: memref<2x4xf32, #tpu.memory_space<vmem>>, %arg9: memref<2x4xf32, #tpu.memory_space<vmem>>, %arg10: memref<1x1xf32, #tpu.memory_space<vmem>>, %arg11: memref<2x128xf32, #tpu.memory_space<vmem>>) attributes {dimension_semantics = [#tpu.dimension_semantics<arbitrary>], iteration_bounds = array<i64: 3>, scalar_prefetch = 0 : i64, scratch_operands = 1 : i64, tpu.core_type = #tpu.core_type<tc>, window_params = [{transform_indices = @transform_0, window_bounds = array<i64: 2, 7808>}, {transform_indices = @transform_1, window_bounds = array<i64: 7808, 128>}, {pipeline_mode = #tpu.pipeline_mode<synchronous>, transform_indices = @transform_2, window_bounds = array<i64: 1, 128>}, {pipeline_mode = #tpu.pipeline_mode<synchronous>, transform_indices = @transform_3, window_bounds = array<i64: 128, 4>}, {pipeline_mode = #tpu.pipeline_mode<synchronous>, transform_indices = @transform_4, window_bounds = array<i64: 1, 4>}, {pipeline_mode = #tpu.pipeline_mode<synchronous>, transform_indices = @transform_5, window_bounds = array<i64: 128, 4>}, {pipeline_mode = #tpu.pipeline_mode<synchronous>, transform_indices = @transform_6, window_bounds = array<i64: 1, 4>}, {pipeline_mode = #tpu.pipeline_mode<synchronous>, transform_indices = @transform_7, window_bounds = array<i64: 2, 4>}, {pipeline_mode = #tpu.pipeline_mode<synchronous>, transform_indices = @transform_8, window_bounds = array<i64: 2, 4>}, {pipeline_mode = #tpu.pipeline_mode<synchronous>, transform_indices = @transform_9, window_bounds = array<i64: 1, 1>}]} {
    %c0_i32 = arith.constant 0 : i32
    %0 = arith.cmpi eq, %arg0, %c0_i32 : i32
    %1 = arith.extui %0 : i1 to i32
    %c0_i32_0 = arith.constant 0 : i32
    %2 = arith.cmpi ne, %1, %c0_i32_0 : i32
    scf.if %2 {
      %cst_9 = arith.constant 0.000000e+00 : f32
      %12 = vector.broadcast %cst_9 : f32 to vector<2x128xf32>
      %c0_10 = arith.constant 0 : index
      %c0_11 = arith.constant 0 : index
      %13 = vector.load %arg11[%c0_10, %c0_11] : memref<2x128xf32, #tpu.memory_space<vmem>>, vector<2x128xf32>
      tpu.vector_store %arg11[%c0_10, %c0_11], %12 {strides = array<i32>} : memref<2x128xf32, #tpu.memory_space<vmem>>, vector<2x128xf32>,
    } else {
    }
    %c0 = arith.constant 0 : index
    %c0_1 = arith.constant 0 : index
    %3 = vector.load %arg11[%c0, %c0_1] : memref<2x128xf32, #tpu.memory_space<vmem>>, vector<2x128xf32>
    %c0_2 = arith.constant 0 : index
    %c0_3 = arith.constant 0 : index
    %4 = vector.load %arg1[%c0_2, %c0_3] : memref<2x7808xbf16, #tpu.memory_space<vmem>>, vector<2x7808xbf16>
    %c0_4 = arith.constant 0 : index
    %c0_5 = arith.constant 0 : index
    %5 = vector.load %arg2[%c0_4, %c0_5] : memref<7808x128xbf16, #tpu.memory_space<vmem>>, vector<7808x128xbf16>
    %cst = arith.constant dense<0.000000e+00> : vector<2x128xf32>
    %6 = tpu.matmul %4, %5, %cst {dimension_numbers = #tpu.dot_dimension_numbers<[1], [0], [0], [1], [0, 0, 1, 1], [], []>} : vector<2x7808xbf16>, vector<7808x128xbf16>, vector<2x128xf32> -> vector<2x128xf32>
    %7 = arith.addf %3, %6 : vector<2x128xf32>
    %c0_6 = arith.constant 0 : index
    %c0_7 = arith.constant 0 : index
    %8 = vector.load %arg11[%c0_6, %c0_7] : memref<2x128xf32, #tpu.memory_space<vmem>>, vector<2x128xf32>
    tpu.vector_store %arg11[%c0_6, %c0_7], %7 {strides = array<i32>} : memref<2x128xf32, #tpu.memory_space<vmem>>, vector<2x128xf32>,
    %c2_i32 = arith.constant 2 : i32
    %9 = arith.cmpi eq, %arg0, %c2_i32 : i32
    %10 = arith.extui %9 : i1 to i32
    %c0_i32_8 = arith.constant 0 : i32
    %11 = arith.cmpi ne, %10, %c0_i32_8 : i32
    scf.if %11 {
      %c0_9 = arith.constant 0 : index
      %c0_10 = arith.constant 0 : index
      %12 = vector.load %arg11[%c0_9, %c0_10] : memref<2x128xf32, #tpu.memory_space<vmem>>, vector<2x128xf32>
      %c0_11 = arith.constant 0 : index
      %c0_12 = arith.constant 0 : index
      %13 = vector.load %arg3[%c0_11, %c0_12] : memref<1x128xf32, #tpu.memory_space<vmem>>, vector<1x128xf32>
      %14 = vector.broadcast %13 : vector<1x128xf32> to vector<2x128xf32>
      %15 = arith.addf %12, %14 : vector<2x128xf32>
      %cst_13 = arith.constant 0.000000e+00 : f32
      %16 = vector.broadcast %cst_13 : f32 to vector<2x128xf32>
      %17 = arith.maximumf %15, %16 : vector<2x128xf32>
      %c0_14 = arith.constant 0 : index
      %c0_15 = arith.constant 0 : index
      %18 = vector.load %arg4[%c0_14, %c0_15] : memref<128x4xf32, #tpu.memory_space<vmem>>, vector<128x4xf32>
      %cst_16 = arith.constant dense<0.000000e+00> : vector<2x4xf32>
      %19 = tpu.matmul %17, %18, %cst_16 {dimension_numbers = #tpu.dot_dimension_numbers<[1], [0], [0], [1], [0, 0, 1, 1], [], []>} : vector<2x128xf32>, vector<128x4xf32>, vector<2x4xf32> -> vector<2x4xf32>
      %c0_17 = arith.constant 0 : index
      %c0_18 = arith.constant 0 : index
      %20 = vector.load %arg5[%c0_17, %c0_18] : memref<1x4xf32, #tpu.memory_space<vmem>>, vector<1x4xf32>
      %21 = vector.broadcast %20 : vector<1x4xf32> to vector<2x4xf32>
      %22 = arith.addf %19, %21 : vector<2x4xf32>
      %c0_19 = arith.constant 0 : index
      %c0_20 = arith.constant 0 : index
      %23 = vector.load %arg6[%c0_19, %c0_20] : memref<128x4xf32, #tpu.memory_space<vmem>>, vector<128x4xf32>
      %cst_21 = arith.constant dense<0.000000e+00> : vector<2x4xf32>
      %24 = tpu.matmul %17, %23, %cst_21 {dimension_numbers = #tpu.dot_dimension_numbers<[1], [0], [0], [1], [0, 0, 1, 1], [], []>} : vector<2x128xf32>, vector<128x4xf32>, vector<2x4xf32> -> vector<2x4xf32>
      %c0_22 = arith.constant 0 : index
      %c0_23 = arith.constant 0 : index
      %25 = vector.load %arg7[%c0_22, %c0_23] : memref<1x4xf32, #tpu.memory_space<vmem>>, vector<1x4xf32>
      %26 = vector.broadcast %25 : vector<1x4xf32> to vector<2x4xf32>
      %27 = arith.addf %24, %26 : vector<2x4xf32>
      %28 = math.exp %27 : vector<2x4xf32>
      %c0_24 = arith.constant 0 : index
      %c0_25 = arith.constant 0 : index
      %29 = vector.load %arg8[%c0_24, %c0_25] : memref<2x4xf32, #tpu.memory_space<vmem>>, vector<2x4xf32>
      %30 = arith.mulf %28, %29 : vector<2x4xf32>
      %31 = arith.addf %22, %30 : vector<2x4xf32>
      %c0_26 = arith.constant 0 : index
      %c0_27 = arith.constant 0 : index
      %32 = vector.load %arg9[%c0_26, %c0_27] : memref<2x4xf32, #tpu.memory_space<vmem>>, vector<2x4xf32>
      tpu.vector_store %arg9[%c0_26, %c0_27], %31 {strides = array<i32>} : memref<2x4xf32, #tpu.memory_space<vmem>>, vector<2x4xf32>,
      %33 = arith.mulf %28, %28 : vector<2x4xf32>
      %34 = arith.mulf %22, %22 : vector<2x4xf32>
      %35 = arith.addf %33, %34 : vector<2x4xf32>
      %36 = arith.subf %35, %27 : vector<2x4xf32>
      %cst_28 = arith.constant 5.000000e-01 : f32
      %37 = vector.broadcast %cst_28 : f32 to vector<2x4xf32>
      %38 = arith.subf %36, %37 : vector<2x4xf32>
      %39 = vector.shape_cast %38 : vector<2x4xf32> to vector<1x2x4xf32>
      %cst_29 = arith.constant dense<0.000000e+00> : vector<1xf32>
      %40 = vector.multi_reduction <add>, %39, %cst_29 [1, 2] : vector<1x2x4xf32> to vector<1xf32>
      %41 = vector.shape_cast %40 : vector<1xf32> to vector<1x1x1xf32>
      %42 = vector.extract %41[0, 0, 0] : f32 from vector<1x1x1xf32>
      %43 = vector.broadcast %42 : f32 to vector<1x1xf32>
      %c0_30 = arith.constant 0 : index
      %c0_31 = arith.constant 0 : index
      %44 = vector.load %arg10[%c0_30, %c0_31] : memref<1x1xf32, #tpu.memory_space<vmem>>, vector<1x1xf32>
      tpu.vector_store %arg10[%c0_30, %c0_31], %43 {strides = array<i32>} : memref<1x1xf32, #tpu.memory_space<vmem>>, vector<1x1xf32>,
    } else {
    }
    return
  }
  func.func @transform_0(%arg0: i32) -> (i32, i32) {
    %c0_i32 = arith.constant 0 : i32
    %c0_i32_0 = arith.constant 0 : i32
    return %c0_i32, %arg0 : i32, i32
  }
  func.func @transform_1(%arg0: i32) -> (i32, i32) {
    %c0_i32 = arith.constant 0 : i32
    %c0_i32_0 = arith.constant 0 : i32
    return %arg0, %c0_i32 : i32, i32
  }
  func.func @transform_2(%arg0: i32) -> (i32, i32) {
    %c0_i32 = arith.constant 0 : i32
    %c0_i32_0 = arith.constant 0 : i32
    %c0_i32_1 = arith.constant 0 : i32
    return %c0_i32, %c0_i32_0 : i32, i32
  }
  func.func @transform_3(%arg0: i32) -> (i32, i32) {
    %c0_i32 = arith.constant 0 : i32
    %c0_i32_0 = arith.constant 0 : i32
    %c0_i32_1 = arith.constant 0 : i32
    return %c0_i32, %c0_i32_0 : i32, i32
  }
  func.func @transform_4(%arg0: i32) -> (i32, i32) {
    %c0_i32 = arith.constant 0 : i32
    %c0_i32_0 = arith.constant 0 : i32
    %c0_i32_1 = arith.constant 0 : i32
    return %c0_i32, %c0_i32_0 : i32, i32
  }
  func.func @transform_5(%arg0: i32) -> (i32, i32) {
    %c0_i32 = arith.constant 0 : i32
    %c0_i32_0 = arith.constant 0 : i32
    %c0_i32_1 = arith.constant 0 : i32
    return %c0_i32, %c0_i32_0 : i32, i32
  }
  func.func @transform_6(%arg0: i32) -> (i32, i32) {
    %c0_i32 = arith.constant 0 : i32
    %c0_i32_0 = arith.constant 0 : i32
    %c0_i32_1 = arith.constant 0 : i32
    return %c0_i32, %c0_i32_0 : i32, i32
  }
  func.func @transform_7(%arg0: i32) -> (i32, i32) {
    %c0_i32 = arith.constant 0 : i32
    %c0_i32_0 = arith.constant 0 : i32
    %c0_i32_1 = arith.constant 0 : i32
    return %c0_i32, %c0_i32_0 : i32, i32
  }
  func.func @transform_8(%arg0: i32) -> (i32, i32) {
    %c0_i32 = arith.constant 0 : i32
    %c0_i32_0 = arith.constant 0 : i32
    %c0_i32_1 = arith.constant 0 : i32
    return %c0_i32, %c0_i32_0 : i32, i32
  }
  func.func @transform_9(%arg0: i32) -> (i32, i32) {
    %c0_i32 = arith.constant 0 : i32
    %c0_i32_0 = arith.constant 0 : i32
    %c0_i32_1 = arith.constant 0 : i32
    return %c0_i32, %c0_i32_0 : i32, i32
  }
}

</mosaic_0001>

<bundles_post_ra>
// kernel: encoder_forward.4
= control target key start
LH: loop header
LB: loop body
LE: loop exit
PB: predicated region body
PF: predicated region fallthrough
CT: control target
= control target key end

     0   :  { %s2894_s12 = smov 0   ;;  %s2896_s13 = smov 0   ;;  %s3462_s0 = inlined_call_operand.vmem [shape: bf16[27,25088], index: 0, kind: input, shape index: {}]   ;;  %s3463_s1 = inlined_call_operand.vmem [shape: bf16[8,27], index: 1, kind: input, shape index: {}]   ;;  %s3464_s2 = inlined_call_operand.vmem [shape: f32[8,1], index: 2, kind: input, shape index: {}]   ;;  %s3465_s3 = inlined_call_operand.vmem [shape: bf16[8,25088], index: 3, kind: output, shape index: {}]  }
   0x1   :  { %s2898_s14 = smov 0  }
   0x2 LB: > { %s2467_s15 = sadd.s32 4294967295, %s2868_s14   ;;  %s2911_s16 = sadd.s32 1, %s2868_s14   ;;  %s2868_s14 = sphi %s2898_s14, %s3468_s14   ;;  %s2864_s13 = sphi %s2896_s13, %s3467_s13   ;;  %s2860_s12 = sphi %s2894_s12, %s3466_s12  }
   0x3   : > { %s17_s17 = ssub.s32 %s2868_s14, %s2911_s16  ;;  %s20_s18 = sadd.s32 1, %s2864_s13 }
   0x4   : > { %p18_p0 = scmp.eq.s32.totalorder %s17_s17, 0  ;;  %p27_p1 = scmp.ne.s32.totalorder %s2864_s13, %s2860_s12 }
   0x5   : > { %p28_p2 = scmp.eq.s32.totalorder %s2868_s14, 0  ;;  %p2470_p4 = scmp.ge.s32.totalorder %s2868_s14, 4 }
   0x6   : > { %s2920_s19 = scalar_select %p18_p0, %s2864_s13, %s20_s18  }
   0x7   : > { %p29_p3 = por %p28_p2, %p27_p1  ;;  %127 = sbr.rel (%p2470_p4) target bundleno = 69 (0x45), region = 24 }
   0xe   : > { %130 = sbr.rel (!%p29_p3) target bundleno = 69 (0x45), region = 28  ;;  %s132_s20 = sand.u32 (%p29_p3), 1, %s2864_s13  }
   0xf   : > { %s2632_s21 = smul.u32 (%p29_p3), 196, %s2868_s14 }
  0x10   : > { %s2669_s22 = smul.u32 (%p29_p3), 784, %s132_s20 }
  0x11   : > { %s2928_s25 = scalar_lea.vmem (%p29_p3), %s3462_s0, %s2632_s21 }
  0x12   : > { %v152_v0 = vld [vmem:[%s2928_s25] sm:$0xff] (%p29_p3)  ;;  %v154_v1 = vld [vmem:[%s2928_s25 + $0x8] sm:$0xff] (%p29_p3)  ;;  %v156_v2 = vld [vmem:[%s2928_s25 + $0x10] sm:$0xff] (%p29_p3)  ;;  %s2933_s26 = scalar_lea.vmem (%p29_p3), [#allocation2], %s2669_s22 }
  0x13   : > { %153 = vst [vmem:[%s2933_s26] sm:$0xff] (%p29_p3), %v152_v0  ;;  %155 = vst [vmem:[%s2933_s26 + $0x8] sm:$0xff] (%p29_p3), %v154_v1  ;;  %v158_v3 = vld [vmem:[%s2928_s25 + $0x18] sm:$0xff] (%p29_p3)  ;;  %v160_v4 = vld [vmem:[%s2928_s25 + $0x20] sm:$0xff] (%p29_p3) }
  0x14   : > { %157 = vst [vmem:[%s2933_s26 + $0x10] sm:$0xff] (%p29_p3), %v156_v2  ;;  %v162_v5 = vld [vmem:[%s2928_s25 + $0x28] sm:$0xff] (%p29_p3)  ;;  %159 = vst [vmem:[%s2933_s26 + $0x18] sm:$0xff] (%p29_p3), %v158_v3  ;;  %v164_v6 = vld [vmem:[%s2928_s25 + $0x30] sm:$0xff] (%p29_p3) }
  0x15   : > { %161 = vst [vmem:[%s2933_s26 + $0x20] sm:$0xff] %v160_v4  ;;  %163 = vst [vmem:[%s2933_s26 + $0x28] sm:$0xff] %v162_v5  ;;  %v166_v7 = vld [vmem:[%s2928_s25 + $0x38] sm:$0xff]  ;;  %v168_v8 = vld [vmem:[%s2928_s25 + $0x40] sm:$0xff] }
  0x16   : > { %165 = vst [vmem:[%s2933_s26 + $0x30] sm:$0xff] %v164_v6  ;;  %167 = vst [vmem:[%s2933_s26 + $0x38] sm:$0xff] %v166_v7  ;;  %v170_v9 = vld [vmem:[%s2928_s25 + $0x48] sm:$0xff]  ;;  %v172_v10 = vld [vmem:[%s2928_s25 + $0x50] sm:$0xff] }
  0x17   : > { %169 = vst [vmem:[%s2933_s26 + $0x40] sm:$0xff] %v168_v8  ;;  %v174_v11 = vld [vmem:[%s2928_s25 + $0x58] sm:$0xff]  ;;  %171 = vst [vmem:[%s2933_s26 + $0x48] sm:$0xff] %v170_v9  ;;  %v176_v12 = vld [vmem:[%s2928_s25 + $0x60] sm:$0xff] }
  0x18   : > { %173 = vst [vmem:[%s2933_s26 + $0x50] sm:$0xff] %v172_v10  ;;  %175 = vst [vmem:[%s2933_s26 + $0x58] sm:$0xff] %v174_v11  ;;  %v178_v13 = vld [vmem:[%s2928_s25 + $0x68] sm:$0xff]  ;;  %v180_v14 = vld [vmem:[%s2928_s25 + $0x70] sm:$0xff] }
  0x19   : > { %177 = vst [vmem:[%s2933_s26 + $0x60] sm:$0xff] %v176_v12  ;;  %179 = vst [vmem:[%s2933_s26 + $0x68] sm:$0xff] %v178_v13  ;;  %v182_v15 = vld [vmem:[%s2928_s25 + $0x78] sm:$0xff]  ;;  %v184_v16 = vld [vmem:[%s2928_s25 + $0x80] sm:$0xff] }
  0x1a   : > { %181 = vst [vmem:[%s2933_s26 + $0x70] sm:$0xff] %v180_v14  ;;  %v186_v17 = vld [vmem:[%s2928_s25 + $0x88] sm:$0xff]  ;;  %183 = vst [vmem:[%s2933_s26 + $0x78] sm:$0xff] %v182_v15  ;;  %v188_v18 = vld [vmem:[%s2928_s25 + $0x90] sm:$0xff] }
  0x1b   : > { %185 = vst [vmem:[%s2933_s26 + $0x80] sm:$0xff] %v184_v16  ;;  %187 = vst [vmem:[%s2933_s26 + $0x88] sm:$0xff] %v186_v17  ;;  %v190_v19 = vld [vmem:[%s2928_s25 + $0x98] sm:$0xff]  ;;  %v192_v20 = vld [vmem:[%s2928_s25 + $0xa0] sm:$0xff] }
  0x1c   : > { %189 = vst [vmem:[%s2933_s26 + $0x90] sm:$0xff] %v188_v18  ;;  %191 = vst [vmem:[%s2933_s26 + $0x98] sm:$0xff] %v190_v19  ;;  %v194_v21 = vld [vmem:[%s2928_s25 + $0xa8] sm:$0xff]  ;;  %v196_v22 = vld [vmem:[%s2928_s25 + $0xb0] sm:$0xff] }
  0x1d   : > { %193 = vst [vmem:[%s2933_s26 + $0xa0] sm:$0xff] %v192_v20  ;;  %v198_v23 = vld [vmem:[%s2928_s25 + $0xb8] sm:$0xff]  ;;  %195 = vst [vmem:[%s2933_s26 + $0xa8] sm:$0xff] %v194_v21  ;;  %v200_v24 = vld [vmem:[%s2928_s25 + $0x310] sm:$0xff] }
  0x1e   : > { %197 = vst [vmem:[%s2933_s26 + $0xb0] sm:$0xff] %v196_v22  ;;  %199 = vst [vmem:[%s2933_s26 + $0xb8] sm:$0xff] %v198_v23  ;;  %v202_v25 = vld [vmem:[%s2928_s25 + $0x318] sm:$0xff]  ;;  %v204_v26 = vld [vmem:[%s2928_s25 + $0x320] sm:$0xff] }
  0x1f   : > { %201 = vst [vmem:[%s2933_s26 + $0xc4] sm:$0xff] %v200_v24  ;;  %203 = vst [vmem:[%s2933_s26 + $0xcc] sm:$0xff] %v202_v25  ;;  %v206_v27 = vld [vmem:[%s2928_s25 + $0x328] sm:$0xff]  ;;  %v208_v28 = vld [vmem:[%s2928_s25 + $0x330] sm:$0xff] }
  0x20   : > { %205 = vst [vmem:[%s2933_s26 + $0xd4] sm:$0xff] %v204_v26  ;;  %v210_v29 = vld [vmem:[%s2928_s25 + $0x338] sm:$0xff]  ;;  %207 = vst [vmem:[%s2933_s26 + $0xdc] sm:$0xff] %v206_v27  ;;  %v212_v30 = vld [vmem:[%s2928_s25 + $0x340] sm:$0xff] }
  0x21   : > { %209 = vst [vmem:[%s2933_s26 + $0xe4] sm:$0xff] %v208_v28  ;;  %211 = vst [vmem:[%s2933_s26 + $0xec] sm:$0xff] %v210_v29  ;;  %v214_v31 = vld [vmem:[%s2928_s25 + $0x348] sm:$0xff]  ;;  %v216_v32 = vld [vmem:[%s2928_s25 + $0x350] sm:$0xff] }
  0x22   : > { %213 = vst [vmem:[%s2933_s26 + $0xf4] sm:$0xff] %v212_v30  ;;  %215 = vst [vmem:[%s2933_s26 + $0xfc] sm:$0xff] %v214_v31  ;;  %v218_v33 = vld [vmem:[%s2928_s25 + $0x358] sm:$0xff]  ;;  %v220_v34 = vld [vmem:[%s2928_s25 + $0x360] sm:$0xff] }
  0x23   : > { %217 = vst [vmem:[%s2933_s26 + $0x104] sm:$0xff] %v216_v32  ;;  %v222_v35 = vld [vmem:[%s2928_s25 + $0x368] sm:$0xff]  ;;  %219 = vst [vmem:[%s2933_s26 + $0x10c] sm:$0xff] %v218_v33  ;;  %v224_v36 = vld [vmem:[%s2928_s25 + $0x370] sm:$0xff] }
  0x24   : > { %221 = vst [vmem:[%s2933_s26 + $0x114] sm:$0xff] %v220_v34  ;;  %223 = vst [vmem:[%s2933_s26 + $0x11c] sm:$0xff] %v222_v35  ;;  %v226_v37 = vld [vmem:[%s2928_s25 + $0x378] sm:$0xff]  ;;  %v228_v38 = vld [vmem:[%s2928_s25 + $0x380] sm:$0xff] }
  0x25   : > { %225 = vst [vmem:[%s2933_s26 + $0x124] sm:$0xff] %v224_v36  ;;  %227 = vst [vmem:[%s2933_s26 + $0x12c] sm:$0xff] %v226_v37  ;;  %v230_v39 = vld [vmem:[%s2928_s25 + $0x388] sm:$0xff]  ;;  %v232_v40 = vld [vmem:[%s2928_s25 + $0x390] sm:$0xff] }
  0x26   : > { %229 = vst [vmem:[%s2933_s26 + $0x134] sm:$0xff] %v228_v38  ;;  %v234_v41 = vld [vmem:[%s2928_s25 + $0x398] sm:$0xff]  ;;  %231 = vst [vmem:[%s2933_s26 + $0x13c] sm:$0xff] %v230_v39  ;;  %v236_v42 = vld [vmem:[%s2928_s25 + $0x3a0] sm:$0xff] }
  0x27   : > { %233 = vst [vmem:[%s2933_s26 + $0x144] sm:$0xff] %v232_v40  ;;  %235 = vst [vmem:[%s2933_s26 + $0x14c] sm:$0xff] %v234_v41  ;;  %v238_v43 = vld [vmem:[%s2928_s25 + $0x3a8] sm:$0xff]  ;;  %v240_v44 = vld [vmem:[%s2928_s25 + $0x3b0] sm:$0xff] }
  0x28   : > { %237 = vst [vmem:[%s2933_s26 + $0x154] sm:$0xff] %v236_v42  ;;  %239 = vst [vmem:[%s2933_s26 + $0x15c] sm:$0xff] %v238_v43  ;;  %v242_v45 = vld [vmem:[%s2928_s25 + $0x3b8] sm:$0xff]  ;;  %v244_v46 = vld [vmem:[%s2928_s25 + $0x3c0] sm:$0xff] }
  0x29   : > { %241 = vst [vmem:[%s2933_s26 + $0x164] sm:$0xff] %v240_v44  ;;  %v246_v47 = vld [vmem:[%s2928_s25 + $0x3c8] sm:$0xff]  ;;  %243 = vst [vmem:[%s2933_s26 + $0x16c] sm:$0xff] %v242_v45  ;;  %v248_v48 = vld [vmem:[%s2928_s25 + $0x620] sm:$0xff] }
  0x2a   : > { %245 = vst [vmem:[%s2933_s26 + $0x174] sm:$0xff] %v244_v46  ;;  %247 = vst [vmem:[%s2933_s26 + $0x17c] sm:$0xff] %v246_v47  ;;  %v250_v49 = vld [vmem:[%s2928_s25 + $0x628] sm:$0xff]  ;;  %v252_v50 = vld [vmem:[%s2928_s25 + $0x630] sm:$0xff] }
  0x2b   : > { %249 = vst [vmem:[%s2933_s26 + $0x188] sm:$0xff] %v248_v48  ;;  %251 = vst [vmem:[%s2933_s26 + $0x190] sm:$0xff] %v250_v49  ;;  %v254_v51 = vld [vmem:[%s2928_s25 + $0x638] sm:$0xff]  ;;  %v256_v52 = vld [vmem:[%s2928_s25 + $0x640] sm:$0xff] }
  0x2c   : > { %253 = vst [vmem:[%s2933_s26 + $0x198] sm:$0xff] %v252_v50  ;;  %v258_v53 = vld [vmem:[%s2928_s25 + $0x648] sm:$0xff]  ;;  %255 = vst [vmem:[%s2933_s26 + $0x1a0] sm:$0xff] %v254_v51  ;;  %v260_v54 = vld [vmem:[%s2928_s25 + $0x650] sm:$0xff] }
  0x2d   : > { %257 = vst [vmem:[%s2933_s26 + $0x1a8] sm:$0xff] %v256_v52  ;;  %259 = vst [vmem:[%s2933_s26 + $0x1b0] sm:$0xff] %v258_v53  ;;  %v262_v55 = vld [vmem:[%s2928_s25 + $0x658] sm:$0xff]  ;;  %v264_v56 = vld [vmem:[%s2928_s25 + $0x660] sm:$0xff] }
  0x2e   : > { %261 = vst [vmem:[%s2933_s26 + $0x1b8] sm:$0xff] %v260_v54  ;;  %263 = vst [vmem:[%s2933_s26 + $0x1c0] sm:$0xff] %v262_v55  ;;  %v266_v57 = vld [vmem:[%s2928_s25 + $0x668] sm:$0xff]  ;;  %v268_v58 = vld [vmem:[%s2928_s25 + $0x670] sm:$0xff] }
  0x2f   : > { %265 = vst [vmem:[%s2933_s26 + $0x1c8] sm:$0xff] %v264_v56  ;;  %v270_v59 = vld [vmem:[%s2928_s25 + $0x678] sm:$0xff]  ;;  %267 = vst [vmem:[%s2933_s26 + $0x1d0] sm:$0xff] %v266_v57  ;;  %v272_v60 = vld [vmem:[%s2928_s25 + $0x680] sm:$0xff] }
  0x30   : > { %269 = vst [vmem:[%s2933_s26 + $0x1d8] sm:$0xff] %v268_v58  ;;  %271 = vst [vmem:[%s2933_s26 + $0x1e0] sm:$0xff] %v270_v59  ;;  %v274_v61 = vld [vmem:[%s2928_s25 + $0x688] sm:$0xff]  ;;  %v276_v62 = vld [vmem:[%s2928_s25 + $0x690] sm:$0xff] }
  0x31   : > { %273 = vst [vmem:[%s2933_s26 + $0x1e8] sm:$0xff] %v272_v60  ;;  %275 = vst [vmem:[%s2933_s26 + $0x1f0] sm:$0xff] %v274_v61  ;;  %v278_v63 = vld [vmem:[%s2928_s25 + $0x698] sm:$0xff]  ;;  %v280_v0 = vld [vmem:[%s2928_s25 + $0x6a0] sm:$0xff] }
  0x32   : > { %277 = vst [vmem:[%s2933_s26 + $0x1f8] sm:$0xff] %v276_v62  ;;  %v282_v1 = vld [vmem:[%s2928_s25 + $0x6a8] sm:$0xff]  ;;  %279 = vst [vmem:[%s2933_s26 + $0x200] sm:$0xff] %v278_v63  ;;  %v284_v2 = vld [vmem:[%s2928_s25 + $0x6b0] sm:$0xff] }
  0x33   : > { %281 = vst [vmem:[%s2933_s26 + $0x208] sm:$0xff] %v280_v0  ;;  %283 = vst [vmem:[%s2933_s26 + $0x210] sm:$0xff] %v282_v1  ;;  %v286_v3 = vld [vmem:[%s2928_s25 + $0x6b8] sm:$0xff]  ;;  %v288_v4 = vld [vmem:[%s2928_s25 + $0x6c0] sm:$0xff] }
  0x34   : > { %285 = vst [vmem:[%s2933_s26 + $0x218] sm:$0xff] %v284_v2  ;;  %287 = vst [vmem:[%s2933_s26 + $0x220] sm:$0xff] %v286_v3  ;;  %v290_v5 = vld [vmem:[%s2928_s25 + $0x6c8] sm:$0xff]  ;;  %v292_v6 = vld [vmem:[%s2928_s25 + $0x6d0] sm:$0xff] }
  0x35   : > { %289 = vst [vmem:[%s2933_s26 + $0x228] sm:$0xff] %v288_v4  ;;  %v294_v7 = vld [vmem:[%s2928_s25 + $0x6d8] sm:$0xff]  ;;  %291 = vst [vmem:[%s2933_s26 + $0x230] sm:$0xff] %v290_v5  ;;  %v296_v8 = vld [vmem:[%s2928_s25 + $0x930] sm:$0xff] }
  0x36   : > { %293 = vst [vmem:[%s2933_s26 + $0x238] sm:$0xff] %v292_v6  ;;  %295 = vst [vmem:[%s2933_s26 + $0x240] sm:$0xff] %v294_v7  ;;  %v298_v9 = vld [vmem:[%s2928_s25 + $0x938] sm:$0xff]  ;;  %v300_v10 = vld [vmem:[%s2928_s25 + $0x940] sm:$0xff] }
  0x37   : > { %297 = vst [vmem:[%s2933_s26 + $0x24c] sm:$0xff] %v296_v8  ;;  %299 = vst [vmem:[%s2933_s26 + $0x254] sm:$0xff] %v298_v9  ;;  %v302_v11 = vld [vmem:[%s2928_s25 + $0x948] sm:$0xff]  ;;  %v304_v12 = vld [vmem:[%s2928_s25 + $0x950] sm:$0xff] }
  0x38   : > { %301 = vst [vmem:[%s2933_s26 + $0x25c] sm:$0xff] %v300_v10  ;;  %v306_v13 = vld [vmem:[%s2928_s25 + $0x958] sm:$0xff]  ;;  %303 = vst [vmem:[%s2933_s26 + $0x264] sm:$0xff] %v302_v11  ;;  %v308_v14 = vld [vmem:[%s2928_s25 + $0x960] sm:$0xff] }
  0x39   : > { %305 = vst [vmem:[%s2933_s26 + $0x26c] sm:$0xff] %v304_v12  ;;  %307 = vst [vmem:[%s2933_s26 + $0x274] sm:$0xff] %v306_v13  ;;  %v310_v15 = vld [vmem:[%s2928_s25 + $0x968] sm:$0xff]  ;;  %v312_v16 = vld [vmem:[%s2928_s25 + $0x970] sm:$0xff] }
  0x3a   : > { %309 = vst [vmem:[%s2933_s26 + $0x27c] sm:$0xff] %v308_v14  ;;  %311 = vst [vmem:[%s2933_s26 + $0x284] sm:$0xff] %v310_v15  ;;  %v314_v17 = vld [vmem:[%s2928_s25 + $0x978] sm:$0xff]  ;;  %v316_v18 = vld [vmem:[%s2928_s25 + $0x980] sm:$0xff] }
  0x3b   : > { %313 = vst [vmem:[%s2933_s26 + $0x28c] sm:$0xff] %v312_v16  ;;  %v318_v19 = vld [vmem:[%s2928_s25 + $0x988] sm:$0xff]  ;;  %315 = vst [vmem:[%s2933_s26 + $0x294] sm:$0xff] %v314_v17  ;;  %v320_v20 = vld [vmem:[%s2928_s25 + $0x990] sm:$0xff] }
  0x3c   : > { %317 = vst [vmem:[%s2933_s26 + $0x29c] sm:$0xff] %v316_v18  ;;  %319 = vst [vmem:[%s2933_s26 + $0x2a4] sm:$0xff] %v318_v19  ;;  %v322_v21 = vld [vmem:[%s2928_s25 + $0x998] sm:$0xff]  ;;  %v324_v22 = vld [vmem:[%s2928_s25 + $0x9a0] sm:$0xff] }
  0x3d   : > { %321 = vst [vmem:[%s2933_s26 + $0x2ac] sm:$0xff] %v320_v20  ;;  %323 = vst [vmem:[%s2933_s26 + $0x2b4] sm:$0xff] %v322_v21  ;;  %v326_v23 = vld [vmem:[%s2928_s25 + $0x9a8] sm:$0xff]  ;;  %v328_v24 = vld [vmem:[%s2928_s25 + $0x9b0] sm:$0xff] }
  0x3e   : > { %325 = vst [vmem:[%s2933_s26 + $0x2bc] sm:$0xff] %v324_v22  ;;  %v330_v25 = vld [vmem:[%s2928_s25 + $0x9b8] sm:$0xff]  ;;  %327 = vst [vmem:[%s2933_s26 + $0x2c4] sm:$0xff] %v326_v23  ;;  %v332_v26 = vld [vmem:[%s2928_s25 + $0x9c0] sm:$0xff] }
  0x3f   : > { %329 = vst [vmem:[%s2933_s26 + $0x2cc] sm:$0xff] %v328_v24  ;;  %331 = vst [vmem:[%s2933_s26 + $0x2d4] sm:$0xff] %v330_v25  ;;  %v334_v27 = vld [vmem:[%s2928_s25 + $0x9c8] sm:$0xff]  ;;  %v336_v28 = vld [vmem:[%s2928_s25 + $0x9d0] sm:$0xff] }
  0x40   : > { %333 = vst [vmem:[%s2933_s26 + $0x2dc] sm:$0xff] %v332_v26  ;;  %335 = vst [vmem:[%s2933_s26 + $0x2e4] sm:$0xff] %v334_v27  ;;  %v338_v29 = vld [vmem:[%s2928_s25 + $0x9d8] sm:$0xff]  ;;  %v340_v30 = vld [vmem:[%s2928_s25 + $0x9e0] sm:$0xff] }
  0x41   : > { %337 = vst [vmem:[%s2933_s26 + $0x2ec] sm:$0xff] %v336_v28  ;;  %v342_v31 = vld [vmem:[%s2928_s25 + $0x9e8] sm:$0xff]  ;;  %339 = vst [vmem:[%s2933_s26 + $0x2f4] sm:$0xff] %v338_v29  ;;  %v2472_v32 = vld [vmem:[%s2928_s25 + $0xc0] sm:$0xf] }
  0x42   : > { %341 = vst [vmem:[%s2933_s26 + $0x2fc] sm:$0xff] %v340_v30  ;;  %343 = vst [vmem:[%s2933_s26 + $0x304] sm:$0xff] %v342_v31  ;;  %v2474_v33 = vld [vmem:[%s2928_s25 + $0x3d0] sm:$0xf]  ;;  %v2476_v34 = vld [vmem:[%s2928_s25 + $0x6e0] sm:$0xf] }
  0x43   : > { %2473 = vst [vmem:[%s2933_s26 + $0xc0] sm:$0xf] %v2472_v32  ;;  %2475 = vst [vmem:[%s2933_s26 + $0x184] sm:$0xf] %v2474_v33  ;;  %v2478_v35 = vld [vmem:[%s2928_s25 + $0x9f0] sm:$0xf] }
  0x44   : > { %2477 = vst [vmem:[%s2933_s26 + $0x248] sm:$0xf] %v2476_v34  ;;  %2479 = vst [vmem:[%s2933_s26 + $0x30c] sm:$0xf] %v2478_v35 }
  0x45 PF: > { %p2480_p5 = scmp.ge.s32.totalorder %s2868_s14, 1  ;;  %p363_p6 = scmp.lt.s32.totalorder %s2868_s14, 5 }
  0x47   : > { %p364_p7 = pnand %p2480_p5, %p363_p6 }
  0x48   : > { %s370_s27 = sand.u32 (!%p364_p7), 1, %s2860_s12   ;;  %vm955_vm0 = vcmask (!%p364_p7), 1044480   ;;  %v502_v36 = vld [vmem:[%s3464_s2] sm:$0xff] (!%p364_p7)  ;;  %v2870_v37 = vmov (!%p364_p7), 0   ;;  %vm956_vm1 = vcmask (!%p364_p7), 1045504   ;;  %v2871_v38 = vmov (!%p364_p7), 65535  }
  0x49   : > { %367 = sbr.rel (%p364_p7) target bundleno = 401 (0x191), region = 54  ;;  %1138 = vmatprep.mubr.bf16.mxu0 (!%p364_p7), %v2870_v37  ;;  %1179 = vmatprep.mubr.bf16.mxu1 (!%p364_p7), %v2870_v37  ;;  %v957_v39 = vsel (!%p364_p7), %vm955_vm0, 4294967295, %v2871_v38  ;;  %v3156_v49 = vld [vmem:[%s3463_s1] sm:$0xf] (!%p364_p7)  ;;  %vm951_vm2 = vcmask (!%p364_p7), 220160   ;;  %vm2873_vm3 = vmmov (!%p364_p7), 0  }
  0x4a   : > { %s2670_s30 = smul.u32 (!%p364_p7), 784, %s370_s27  ;;  %2699 = vset.pattern.permute.xlu0 (!%p364_p7), %v2870_v37  ;;  %v3145_v42 = vsel (!%p364_p7), %vm956_vm1, %v957_v39, 0 }
  0x4b   : > { %505 = vperm.xlu0 (!%p364_p7), %2699, %v502_v36   ;;  %s394_s7 = smul.u32 (!%p364_p7), 49, %s2467_s15 }
  0x4c   : > { %s3141_s4 = scalar_lea.vmem (!%p364_p7), [#allocation2], %s2670_s30 }
  0x4d   : > { %v2700_v40 = vld [vmem:[%s3141_s4 + $0x4] ss:$196 sps:$4 sm:$0xff] (!%p364_p7)   ;;  %v2703_v43 = vld [vmem:[%s3141_s4 + $0x18c] ss:$196 sps:$4 sm:$0x3f] (!%p364_p7)   ;;  %p395_p8 = scmp.lt.s32.totalorder (!%p364_p7), %s394_s7, 195 }
  0x4e   : > { %v2702_v41 = vld [vmem:[%s3141_s4] ss:$196 sps:$4 sm:$0xff] (!%p364_p7)   ;;  %1106 = vmatprep.subr.bf16.mxu0 (!%p364_p7), %v2700_v40  ;;  %v2705_v44 = vld [vmem:[%s3141_s4 + $0x188] ss:$196 sps:$4 sm:$0x3f] (!%p364_p7)   ;;  %v963_v46 = vand.u32 (!%p364_p7), %v2703_v43, %v3145_v42 }
  0x4f   : > { %1107 = vmatpush1.bf16.msra.mxu0 (!%p364_p7), %v2702_v41  ;;  %v2706_v45 = vld [vmem:[%s3141_s4 + $0xc] ss:$196 sps:$4 sm:$0xff] (!%p364_p7)   ;;  %v960_v47 = vand.u32 (!%p364_p7), %v2705_v44, %v3145_v42  ;;  %v2711_v51 = vld [vmem:[%s3141_s4 + $0x14] ss:$196 sps:$4 sm:$0xff] (!%p364_p7)   ;;  %v2720_v58 = vld [vmem:[%s3141_s4 + $0x1c] ss:$196 sps:$4 sm:$0xff] (!%p364_p7)  }
  0x50   : > { %v2708_v48 = vld [vmem:[%s3141_s4 + $0x8] ss:$196 sps:$4 sm:$0xff]   ;;  %1147 = vmatprep.subr.bf16.mxu1 %v2706_v45  ;;  %v2709_v50 = vld [vmem:[%s3141_s4 + $0x10] ss:$196 sps:$4 sm:$0xff]   ;;  %1108 = vmatprep.subr.bf16.mxu0 %v963_v46  ;;  %v2718_v60 = vld [vmem:[%s3141_s4 + $0x18] ss:$196 sps:$4 sm:$0xff]  }
  0x51   : > { %1148 = vmatpush1.bf16.msra.mxu1 %v2708_v48  ;;  %v2712_v52 = vld [vmem:[%s3141_s4 + $0x194] ss:$196 sps:$4 sm:$0x3f]   ;;  %v2717_v56 = vld [vmem:[%s3141_s4 + $0x19c] ss:$196 sps:$4 sm:$0x3f]  }
  0x52   : > { %v2714_v53 = vld [vmem:[%s3141_s4 + $0x190] ss:$196 sps:$4 sm:$0x3f]   ;;  %v969_v54 = vand.u32 %v2712_v52, %v3145_v42  ;;  %v2715_v55 = vld [vmem:[%s3141_s4 + $0x198] ss:$196 sps:$4 sm:$0x3f]   ;;  %v975_v59 = vand.u32 %v2717_v56, %v3145_v42 }
  0x53   : > { %1109 = vmatpush1.bf16.msra.mxu0 %v960_v47  ;;  %v966_v57 = vand.u32 %v2714_v53, %v3145_v42  ;;  %v972_v61 = vand.u32 %v2715_v55, %v3145_v42  ;;  %v2723_v62 = vld [vmem:[%s3141_s4 + $0x24] ss:$196 sps:$4 sm:$0xff]   ;;  %v2729_v2 = vld [vmem:[%s3141_s4 + $0x1ac] ss:$196 sps:$4 sm:$0x3f]   ;;  %s3470_s7 = smov (!%p395_p8, %s394_s7), 195 }
  0x54   : > { %1188 = vmatprep.subr.bf16.mxu0 %v2711_v51  ;;  %1149 = vmatprep.subr.bf16.mxu1 %v969_v54  ;;  %v2724_v63 = vld [vmem:[%s3141_s4 + $0x1a0] ss:$196 sps:$4 sm:$0x3f]   ;;  %v2727_v5 = vld [vmem:[%s3141_s4 + $0x1a8] ss:$196 sps:$4 sm:$0x3f]   ;;  %v987_v6 = vand.u32 %v2729_v2, %v3145_v42 }
  0x55   : > { %1150 = vmatpush1.bf16.msra.mxu1 %v966_v57  ;;  %v2726_v0 = vld [vmem:[%s3141_s4 + $0x1a4] ss:$196 sps:$4 sm:$0x3f]   ;;  %v978_v4 = vand.u32 %v2724_v63, %v3145_v42  ;;  %v2732_v7 = vld [vmem:[%s3141_s4 + $0x2c] ss:$196 sps:$4 sm:$0xff]   ;;  %v984_v10 = vand.u32 %v2727_v5, %v3145_v42  ;;  %s2481_s8 = sshll.u32 %s3470_s7, 2 }
  0x56   : > { %2580 = vmatmul.mubr.msk.bf16.vlgmr.msra.gmra.mrb[0].mxu0 %vm951_vm2, %v3156_v49  ;;  %1229 = vmatprep.subr.bf16.mxu1 %v2720_v58  ;;  %v981_v1 = vand.u32 %v2726_v0, %v3145_v42  ;;  %v2721_v3 = vld [vmem:[%s3141_s4 + $0x20] ss:$196 sps:$4 sm:$0xff]   ;;  %v2730_v8 = vld [vmem:[%s3141_s4 + $0x28] ss:$196 sps:$4 sm:$0xff]   ;;  %v2735_v11 = vld [vmem:[%s3141_s4 + $0x34] ss:$196 sps:$4 sm:$0xff]   ;;  %s3378_s11 = scalar_lea.vmem %s3465_s3, %s2481_s8 }
  0x57   : > { %1189 = vmatpush1.bf16.msra.mxu0 %v2709_v50  ;;  %1220 = vmatprep.mubr.bf16.mxu0 %v2870_v37  ;;  %v2738_v9 = vld [vmem:[%s3141_s4 + $0x1b4] ss:$196 sps:$4 sm:$0x3f]   ;;  %v2741_v14 = vld [vmem:[%s3141_s4 + $0x1bc] ss:$196 sps:$4 sm:$0x3f]  }
  0x58   : > { %1190 = vmatprep.subr.bf16.mxu0 %v975_v59  ;;  %2581 = vmatmul.mubr.msk.bf16.vlgmr.msra.gmra.mrb[0].mxu1 %vm951_vm2, %v3156_v49  ;;  %v2736_v12 = vld [vmem:[%s3141_s4 + $0x1b0] ss:$196 sps:$4 sm:$0x3f]   ;;  %v993_v13 = vand.u32 %v2738_v9, %v3145_v42  ;;  %v2739_v16 = vld [vmem:[%s3141_s4 + $0x1b8] ss:$196 sps:$4 sm:$0x3f]   ;;  %v999_v19 = vand.u32 %v2741_v14, %v3145_v42 }
  0x59   : > { %1230 = vmatpush1.bf16.msra.mxu1 %v2718_v60  ;;  %1261 = vmatprep.mubr.bf16.mxu1 %v2870_v37  ;;  %v2733_v15 = vld [vmem:[%s3141_s4 + $0x30] ss:$196 sps:$4 sm:$0xff]   ;;  %v990_v17 = vand.u32 %v2736_v12, %v3145_v42  ;;  %v2744_v18 = vld [vmem:[%s3141_s4 + $0x3c] ss:$196 sps:$4 sm:$0xff]   ;;  %v2747_v22 = vld [vmem:[%s3141_s4 + $0x44] ss:$196 sps:$4 sm:$0xff]   ;;  %v996_v23 = vand.u32 %v2739_v16, %v3145_v42 }
  0x5a   : > { %1231 = vmatprep.subr.bf16.mxu1 %v981_v1  ;;  %v2750_v20 = vld [vmem:[%s3141_s4 + $0x1c4] ss:$196 sps:$4 sm:$0x3f]   ;;  %v2742_v21 = vld [vmem:[%s3141_s4 + $0x38] ss:$196 sps:$4 sm:$0xff]  }
  0x5b   : > { %1191 = vmatpush1.bf16.msra.mxu0 %v972_v61  ;;  %v2748_v24 = vld [vmem:[%s3141_s4 + $0x1c0] ss:$196 sps:$4 sm:$0x3f]   ;;  %v1005_v25 = vand.u32 %v2750_v20, %v3145_v42  ;;  %v2753_v26 = vld [vmem:[%s3141_s4 + $0x1cc] ss:$196 sps:$4 sm:$0x3f]  }
  0x5c   : > { %1270 = vmatprep.subr.bf16.mxu0 %v2723_v62  ;;  %v2745_v27 = vld [vmem:[%s3141_s4 + $0x40] ss:$196 sps:$4 sm:$0xff]   ;;  %v1002_v28 = vand.u32 %v2748_v24, %v3145_v42  ;;  %v2751_v29 = vld [vmem:[%s3141_s4 + $0x1c8] ss:$196 sps:$4 sm:$0x3f]   ;;  %v1011_v30 = vand.u32 %v2753_v26, %v3145_v42 }
  0x5d   : > { %1232 = vmatpush1.bf16.msra.mxu1 %v978_v4  ;;  %v2756_v31 = vld [vmem:[%s3141_s4 + $0x4c] ss:$196 sps:$4 sm:$0xff]   ;;  %v2762_v32 = vld [vmem:[%s3141_s4 + $0x1d4] ss:$196 sps:$4 sm:$0x3f]   ;;  %v1008_v34 = vand.u32 %v2751_v29, %v3145_v42 }
  0x5e   : > { %2582 = vmatmul.mubr.msk.bf16.vlgmr.msra.gmra.mrb[4].mxu0 %vm951_vm2, %v3156_v49  ;;  %1311 = vmatprep.subr.bf16.mxu1 %v2732_v7  ;;  %v2754_v33 = vld [vmem:[%s3141_s4 + $0x48] ss:$196 sps:$4 sm:$0xff]   ;;  %v2760_v35 = vld [vmem:[%s3141_s4 + $0x1d0] ss:$196 sps:$4 sm:$0x3f]   ;;  %v1017_v38 = vand.u32 %v2762_v32, %v3145_v42 }
  0x5f   : > { %1271 = vmatpush1.bf16.msra.mxu0 %v2721_v3  ;;  %1302 = vmatprep.mubr.bf16.mxu0 %v2870_v37  ;;  %v2759_v36 = vld [vmem:[%s3141_s4 + $0x54] ss:$196 sps:$4 sm:$0xff]   ;;  %v2765_v39 = vld [vmem:[%s3141_s4 + $0x1dc] ss:$196 sps:$4 sm:$0x3f]   ;;  %v1014_v41 = vand.u32 %v2760_v35, %v3145_v42 }
  0x60   : > { %1272 = vmatprep.subr.bf16.mxu0 %v987_v6  ;;  %2583 = vmatmul.mubr.msk.bf16.vlgmr.msra.gmra.mrb[4].mxu1 %vm951_vm2, %v3156_v49  ;;  %v2757_v40 = vld [vmem:[%s3141_s4 + $0x50] ss:$196 sps:$4 sm:$0xff]   ;;  %v2763_v43 = vld [vmem:[%s3141_s4 + $0x1d8] ss:$196 sps:$4 sm:$0x3f]   ;;  %v1023_v45 = vand.u32 %v2765_v39, %v3145_v42 }
  0x61   : > { %1312 = vmatpush1.bf16.msra.mxu1 %v2730_v8  ;;  %1343 = vmatprep.mubr.bf16.mxu1 %v2870_v37  ;;  %v2768_v44 = vld [vmem:[%s3141_s4 + $0x5c] ss:$196 sps:$4 sm:$0xff]   ;;  %v2774_v46 = vld [vmem:[%s3141_s4 + $0x1e4] ss:$196 sps:$4 sm:$0x3f]   ;;  %v1020_v48 = vand.u32 %v2763_v43, %v3145_v42 }
  0x62   : > { %1313 = vmatprep.subr.bf16.mxu1 %v993_v13  ;;  %v2766_v47 = vld [vmem:[%s3141_s4 + $0x58] ss:$196 sps:$4 sm:$0xff]   ;;  %v2771_v50 = vld [vmem:[%s3141_s4 + $0x64] ss:$196 sps:$4 sm:$0xff]   ;;  %v1029_v52 = vand.u32 %v2774_v46, %v3145_v42  ;;  %v2780_v57 = vld [vmem:[%s3141_s4 + $0x6c] ss:$196 sps:$4 sm:$0xff]  }
  0x63   : > { %1273 = vmatpush1.bf16.msra.mxu0 %v984_v10  ;;  %v2772_v51 = vld [vmem:[%s3141_s4 + $0x1e0] ss:$196 sps:$4 sm:$0x3f]   ;;  %v2777_v53 = vld [vmem:[%s3141_s4 + $0x1ec] ss:$196 sps:$4 sm:$0x3f]  }
  0x64   : > { %1352 = vmatprep.subr.bf16.mxu0 %v2735_v11  ;;  %v2769_v54 = vld [vmem:[%s3141_s4 + $0x60] ss:$196 sps:$4 sm:$0xff]   ;;  %v2775_v55 = vld [vmem:[%s3141_s4 + $0x1e8] ss:$196 sps:$4 sm:$0x3f]   ;;  %v1026_v56 = vand.u32 %v2772_v51, %v3145_v42  ;;  %v1035_v58 = vand.u32 %v2777_v53, %v3145_v42 }
  0x65   : > { %1314 = vmatpush1.bf16.msra.mxu1 %v990_v17  ;;  %v2786_v59 = vld [vmem:[%s3141_s4 + $0x1f4] ss:$196 sps:$4 sm:$0x3f]   ;;  %v2778_v60 = vld [vmem:[%s3141_s4 + $0x68] ss:$196 sps:$4 sm:$0xff]   ;;  %v1032_v62 = vand.u32 %v2775_v55, %v3145_v42 }
  0x66   : > { %2584 = vmatmul.mubr.msk.bf16.vlgmr.msra.gmra.mrb[8].mxu0 %vm951_vm2, %v3156_v49  ;;  %1393 = vmatprep.subr.bf16.mxu1 %v2744_v18  ;;  %v2783_v61 = vld [vmem:[%s3141_s4 + $0x74] ss:$196 sps:$4 sm:$0xff]   ;;  %v1041_v0 = vand.u32 %v2786_v59, %v3145_v42  ;;  %v2789_v1 = vld [vmem:[%s3141_s4 + $0x1fc] ss:$196 sps:$4 sm:$0x3f]  }
  0x67   : > { %1353 = vmatpush1.bf16.msra.mxu0 %v2733_v15  ;;  %1384 = vmatprep.mubr.bf16.mxu0 %v2870_v37  ;;  %v2784_v63 = vld [vmem:[%s3141_s4 + $0x1f0] ss:$196 sps:$4 sm:$0x3f]   ;;  %v2787_v4 = vld [vmem:[%s3141_s4 + $0x1f8] ss:$196 sps:$4 sm:$0x3f]   ;;  %v1047_v5 = vand.u32 %v2789_v1, %v3145_v42 }
  0x68   : > { %1354 = vmatprep.subr.bf16.mxu0 %v999_v19  ;;  %2585 = vmatmul.mubr.msk.bf16.vlgmr.msra.gmra.mrb[8].mxu1 %vm951_vm2, %v3156_v49  ;;  %v2781_v2 = vld [vmem:[%s3141_s4 + $0x70] ss:$196 sps:$4 sm:$0xff]   ;;  %v1038_v3 = vand.u32 %v2784_v63, %v3145_v42  ;;  %v2792_v6 = vld [vmem:[%s3141_s4 + $0x7c] ss:$196 sps:$4 sm:$0xff]   ;;  %v1044_v8 = vand.u32 %v2787_v4, %v3145_v42  ;;  %v2795_v11 = vld [vmem:[%s3141_s4 + $0x84] ss:$196 sps:$4 sm:$0xff]  }
  0x69   : > { %1394 = vmatpush1.bf16.msra.mxu1 %v2742_v21  ;;  %1425 = vmatprep.mubr.bf16.mxu1 %v2870_v37  ;;  %v2798_v7 = vld [vmem:[%s3141_s4 + $0x204] ss:$196 sps:$4 sm:$0x3f]   ;;  %v2790_v9 = vld [vmem:[%s3141_s4 + $0x78] ss:$196 sps:$4 sm:$0xff]  }
  0x6a   : > { %1395 = vmatprep.subr.bf16.mxu1 %v1005_v25  ;;  %v2796_v10 = vld [vmem:[%s3141_s4 + $0x200] ss:$196 sps:$4 sm:$0x3f]   ;;  %v1053_v12 = vand.u32 %v2798_v7, %v3145_v42  ;;  %v2801_v13 = vld [vmem:[%s3141_s4 + $0x20c] ss:$196 sps:$4 sm:$0x3f]  }
  0x6b   : > { %1355 = vmatpush1.bf16.msra.mxu0 %v996_v23  ;;  %v2793_v14 = vld [vmem:[%s3141_s4 + $0x80] ss:$196 sps:$4 sm:$0xff]   ;;  %v1050_v15 = vand.u32 %v2796_v10, %v3145_v42  ;;  %v2799_v16 = vld [vmem:[%s3141_s4 + $0x208] ss:$196 sps:$4 sm:$0x3f]   ;;  %v1059_v18 = vand.u32 %v2801_v13, %v3145_v42 }
  0x6c   : > { %1434 = vmatprep.subr.bf16.mxu0 %v2747_v22  ;;  %v2804_v17 = vld [vmem:[%s3141_s4 + $0x8c] ss:$196 sps:$4 sm:$0xff]   ;;  %v2810_v19 = vld [vmem:[%s3141_s4 + $0x214] ss:$196 sps:$4 sm:$0x3f]   ;;  %v1056_v22 = vand.u32 %v2799_v16, %v3145_v42 }
  0x6d   : > { %1396 = vmatpush1.bf16.msra.mxu1 %v1002_v28  ;;  %v2802_v20 = vld [vmem:[%s3141_s4 + $0x88] ss:$196 sps:$4 sm:$0xff]   ;;  %v2807_v21 = vld [vmem:[%s3141_s4 + $0x94] ss:$196 sps:$4 sm:$0xff]   ;;  %v1065_v24 = vand.u32 %v2810_v19, %v3145_v42  ;;  %v2817_v39 = vld [vmem:[%s3141_s4 + $0xa0] ss:$196 sps:$4 sm:$0xff]  }
  0x6e   : > { %2586 = vmatmul.mubr.msk.bf16.vlgmr.msra.gmra.mrb[12].mxu0 %vm951_vm2, %v3156_v49  ;;  %1475 = vmatprep.subr.bf16.mxu1 %v2756_v31  ;;  %v2808_v23 = vld [vmem:[%s3141_s4 + $0x210] ss:$196 sps:$4 sm:$0x3f]   ;;  %v2813_v25 = vld [vmem:[%s3141_s4 + $0x21c] ss:$196 sps:$4 sm:$0x3f]  }
  0x6f   : > { %1435 = vmatpush1.bf16.msra.mxu0 %v2745_v27  ;;  %1466 = vmatprep.mubr.bf16.mxu0 %v2870_v37  ;;  %v2805_v26 = vld [vmem:[%s3141_s4 + $0x90] ss:$196 sps:$4 sm:$0xff]   ;;  %v1062_v27 = vand.u32 %v2808_v23, %v3145_v42  ;;  %v2811_v28 = vld [vmem:[%s3141_s4 + $0x218] ss:$196 sps:$4 sm:$0x3f]   ;;  %v1071_v29 = vand.u32 %v2813_v25, %v3145_v42 }
  0x70   : > { %1436 = vmatprep.subr.bf16.mxu0 %v1011_v30  ;;  %2587 = vmatmul.mubr.msk.bf16.vlgmr.msra.gmra.mrb[12].mxu1 %vm951_vm2, %v3156_v49  ;;  %v2816_v30 = vld [vmem:[%s3141_s4 + $0x9c] ss:$196 sps:$4 sm:$0xff]   ;;  %v2822_v31 = vld [vmem:[%s3141_s4 + $0x224] ss:$196 sps:$4 sm:$0x3f]   ;;  %v1068_v32 = vand.u32 %v2811_v28, %v3145_v42 }
  0x71   : > { %1476 = vmatpush1.bf16.msra.mxu1 %v2754_v33  ;;  %1507 = vmatprep.mubr.bf16.mxu1 %v2870_v37  ;;  %v2814_v33 = vld [vmem:[%s3141_s4 + $0x98] ss:$196 sps:$4 sm:$0xff]   ;;  %v2819_v35 = vld [vmem:[%s3141_s4 + $0xa4] ss:$196 sps:$4 sm:$0xff]   ;;  %v2829_v53 = vld [vmem:[%s3141_s4 + $0xb0] ss:$196 sps:$4 sm:$0xff]  }
  0x72   : > { %1477 = vmatprep.subr.bf16.mxu1 %v1017_v38  ;;  %v2825_v38 = vld [vmem:[%s3141_s4 + $0x22c] ss:$196 sps:$4 sm:$0x3f]   ;;  %v2835_v55 = vld [vmem:[%s3141_s4 + $0x238] ss:$196 sps:$4 sm:$0x3f]  }
  0x73   : > { %1437 = vmatpush1.bf16.msra.mxu0 %v1008_v34  ;;  %v2820_v34 = vld [vmem:[%s3141_s4 + $0x220] ss:$196 sps:$4 sm:$0x3f]   ;;  %v1083_v43 = vand.u32 %v2825_v38, %v3145_v42  ;;  %v1092_v59 = vand.u32 %v2835_v55, %v3145_v42  ;;  %v2845_v1 = vld [vmem:[%s3141_s4 + $0x248] ss:$196 sps:$4 sm:$0x3f]  }
  0x74   : > { %1516 = vmatprep.subr.bf16.mxu0 %v2759_v36  ;;  %v1077_v36 = vand.u32 %v2822_v31, %v3145_v42  ;;  %v2844_v63 = vld [vmem:[%s3141_s4 + $0xc0] ss:$196 sps:$4 sm:$0xff]  }
  0x75   : > { %1478 = vmatpush1.bf16.msra.mxu1 %v1014_v41  ;;  %v2823_v41 = vld [vmem:[%s3141_s4 + $0x228] ss:$196 sps:$4 sm:$0x3f]  }
  0x76   : > { %2588 = vmatmul.mubr.msk.bf16.vlgmr.msra.gmra.mrb[16].mxu0 %vm951_vm2, %v3156_v49  ;;  %1557 = vmatprep.subr.bf16.mxu1 %v2768_v44  ;;  %v2828_v44 = vld [vmem:[%s3141_s4 + $0xac] ss:$196 sps:$4 sm:$0xff]   ;;  %v1080_v46 = vand.u32 %v2823_v41, %v3145_v42 }
  0x77   : > { %1517 = vmatpush1.bf16.msra.mxu0 %v2757_v40  ;;  %1548 = vmatprep.mubr.bf16.mxu0 %v2870_v37  ;;  %v1074_v40 = vand.u32 %v2820_v34, %v3145_v42 }
  0x78   : > { %1518 = vmatprep.subr.bf16.mxu0 %v1023_v45  ;;  %2589 = vmatmul.mubr.msk.bf16.vlgmr.msra.gmra.mrb[16].mxu1 %vm951_vm2, %v3156_v49  ;;  %v2834_v45 = vld [vmem:[%s3141_s4 + $0x234] ss:$196 sps:$4 sm:$0x3f]  }
  0x79   : > { %1558 = vmatpush1.bf16.msra.mxu1 %v2766_v47  ;;  %1589 = vmatprep.mubr.bf16.mxu1 %v2870_v37  ;;  %v2826_v47 = vld [vmem:[%s3141_s4 + $0xa8] ss:$196 sps:$4 sm:$0xff]   ;;  %v1089_v51 = vand.u32 %v2834_v45, %v3145_v42 }
  0x7a   : > { %1559 = vmatprep.subr.bf16.mxu1 %v1029_v52  ;;  %v2837_v52 = vld [vmem:[%s3141_s4 + $0x23c] ss:$196 sps:$4 sm:$0x3f]  }
  0x7b   : > { %1519 = vmatpush1.bf16.msra.mxu0 %v1020_v48  ;;  %v2832_v48 = vld [vmem:[%s3141_s4 + $0x230] ss:$196 sps:$4 sm:$0x3f]  }
  0x7c   : > { %1598 = vmatprep.subr.bf16.mxu0 %v2771_v50  ;;  %v2831_v50 = vld [vmem:[%s3141_s4 + $0xb4] ss:$196 sps:$4 sm:$0xff]  }
  0x7d   : > { %1560 = vmatpush1.bf16.msra.mxu1 %v1026_v56  ;;  %v1095_v56 = vand.u32 %v2837_v52, %v3145_v42 }
  0x7e   : > { %2590 = vmatmul.mubr.msk.bf16.vlgmr.msra.gmra.mrb[20].mxu0 %vm951_vm2, %v3156_v49  ;;  %1639 = vmatprep.subr.bf16.mxu1 %v2780_v57  ;;  %v2840_v57 = vld [vmem:[%s3141_s4 + $0xbc] ss:$196 sps:$4 sm:$0xff]  }
  0x7f   : > { %1599 = vmatpush1.bf16.msra.mxu0 %v2769_v54  ;;  %1630 = vmatprep.mubr.bf16.mxu0 %v2870_v37  ;;  %v1086_v54 = vand.u32 %v2832_v48, %v3145_v42 }
  0x80   : > { %1600 = vmatprep.subr.bf16.mxu0 %v1035_v58  ;;  %2591 = vmatmul.mubr.msk.bf16.vlgmr.msra.gmra.mrb[20].mxu1 %vm951_vm2, %v3156_v49  ;;  %v2843_v58 = vld [vmem:[%s3141_s4 + $0x244] ss:$196 sps:$4 sm:$0x3f]  }
  0x81   : > { %1640 = vmatpush1.bf16.msra.mxu1 %v2778_v60  ;;  %1671 = vmatprep.mubr.bf16.mxu1 %v2870_v37  ;;  %v2838_v60 = vld [vmem:[%s3141_s4 + $0xb8] ss:$196 sps:$4 sm:$0xff]  }
  0x82   : > { %1641 = vmatprep.subr.bf16.mxu1 %v1041_v0 }
  0x83   : > { %1601 = vmatpush1.bf16.msra.mxu0 %v1032_v62  ;;  %v1101_v62 = vand.u32 %v2843_v58, %v3145_v42 }
  0x84   : > { %1680 = vmatprep.subr.bf16.mxu0 %v2783_v61  ;;  %v2841_v61 = vld [vmem:[%s3141_s4 + $0x240] ss:$196 sps:$4 sm:$0x3f]  }
  0x85   : > { %1642 = vmatpush1.bf16.msra.mxu1 %v1038_v3  ;;  %v1098_v0 = vand.u32 %v2841_v61, %v3145_v42  ;;  %v1104_v3 = vand.u32 %v2845_v1, %v3145_v42 }
  0x86   : > { %2592 = vmatmul.mubr.msk.bf16.vlgmr.msra.gmra.mrb[24].mxu0 %vm951_vm2, %v3156_v49  ;;  %1721 = vmatprep.subr.bf16.mxu1 %v2792_v6 }
  0x87   : > { %1681 = vmatpush1.bf16.msra.mxu0 %v2781_v2  ;;  %1712 = vmatprep.mubr.bf16.mxu0 %v2870_v37  ;;  %v2872_v2 = vmov 0.0  }
  0x88   : > { %1682 = vmatprep.subr.bf16.mxu0 %v1047_v5  ;;  %2593 = vmatmul.mubr.msk.bf16.vlgmr.msra.gmra.mrb[24].mxu1 %vm951_vm2, %v3156_v49 }
  0x89   : > { %1722 = vmatpush1.bf16.msra.mxu1 %v2790_v9  ;;  %1753 = vmatprep.mubr.bf16.mxu1 %v2870_v37 }
  0x8a   : > { %1723 = vmatprep.subr.bf16.mxu1 %v1053_v12 }
  0x8b   : > { %1683 = vmatpush1.bf16.msra.mxu0 %v1044_v8 }
  0x8c   : > { %1762 = vmatprep.subr.bf16.mxu0 %v2795_v11 }
  0x8d   : > { %1724 = vmatpush1.bf16.msra.mxu1 %v1050_v15 }
  0x8e   : > { %2594 = vmatmul.mubr.msk.bf16.vlgmr.msra.gmra.mrb[28].mxu0 %vm951_vm2, %v3156_v49  ;;  %1803 = vmatprep.subr.bf16.mxu1 %v2804_v17 }
  0x8f   : > { %1763 = vmatpush1.bf16.msra.mxu0 %v2793_v14  ;;  %1794 = vmatprep.mubr.bf16.mxu0 %v2870_v37 }
  0x90   : > { %1764 = vmatprep.subr.bf16.mxu0 %v1059_v18  ;;  %2595 = vmatmul.mubr.msk.bf16.vlgmr.msra.gmra.mrb[28].mxu1 %vm951_vm2, %v3156_v49 }
  0x91   : > { %1804 = vmatpush1.bf16.msra.mxu1 %v2802_v20  ;;  %1835 = vmatprep.mubr.bf16.mxu1 %v2870_v37 }
  0x92   : > { %1805 = vmatprep.subr.bf16.mxu1 %v1065_v24 }
  0x93   : > { %1765 = vmatpush1.bf16.msra.mxu0 %v1056_v22 }
  0x94   : > { %1844 = vmatprep.subr.bf16.mxu0 %v2807_v21 }
  0x95   : > { %1806 = vmatpush1.bf16.msra.mxu1 %v1062_v27 }
  0x96   : > { %2596 = vmatmul.mubr.msk.bf16.vlgmr.msra.gmra.mrb[32].mxu0 %vm951_vm2, %v3156_v49  ;;  %1885 = vmatprep.subr.bf16.mxu1 %v2816_v30 }
  0x97   : > { %1845 = vmatpush1.bf16.msra.mxu0 %v2805_v26  ;;  %1876 = vmatprep.mubr.bf16.mxu0 %v2870_v37 }
  0x98   : > { %1846 = vmatprep.subr.bf16.mxu0 %v1071_v29  ;;  %2597 = vmatmul.mubr.msk.bf16.vlgmr.msra.gmra.mrb[32].mxu1 %vm951_vm2, %v3156_v49 }
  0x99   : > { %1886 = vmatpush1.bf16.msra.mxu1 %v2814_v33  ;;  %1917 = vmatprep.mubr.bf16.mxu1 %v2870_v37 }
  0x9a   : > { %1887 = vmatprep.subr.bf16.mxu1 %v1077_v36 }
  0x9b   : > { %1847 = vmatpush1.bf16.msra.mxu0 %v1068_v32 }
  0x9c   : > { %1926 = vmatprep.subr.bf16.mxu0 %v2819_v35 }
  0x9d   : > { %1888 = vmatpush1.bf16.msra.mxu1 %v1074_v40 }
  0x9e   : > { %2598 = vmatmul.mubr.msk.bf16.vlgmr.msra.gmra.mrb[36].mxu0 %vm951_vm2, %v3156_v49  ;;  %1967 = vmatprep.subr.bf16.mxu1 %v2828_v44 }
  0x9f   : > { %1927 = vmatpush1.bf16.msra.mxu0 %v2817_v39  ;;  %1958 = vmatprep.mubr.bf16.mxu0 %v2870_v37 }
  0xa0   : > { %1928 = vmatprep.subr.bf16.mxu0 %v1083_v43  ;;  %2599 = vmatmul.mubr.msk.bf16.vlgmr.msra.gmra.mrb[36].mxu1 %vm951_vm2, %v3156_v49 }
  0xa1   : > { %1968 = vmatpush1.bf16.msra.mxu1 %v2826_v47  ;;  %1999 = vmatprep.mubr.bf16.mxu1 %v2870_v37 }
  0xa2   : > { %1969 = vmatprep.subr.bf16.mxu1 %v1089_v51 }
  0xa3   : > { %1929 = vmatpush1.bf16.msra.mxu0 %v1080_v46 }
  0xa4   : > { %2008 = vmatprep.subr.bf16.mxu0 %v2831_v50 }
  0xa5   : > { %1970 = vmatpush1.bf16.msra.mxu1 %v1086_v54 }
  0xa6   : > { %2600 = vmatmul.mubr.msk.bf16.vlgmr.msra.gmra.mrb[40].mxu0 %vm951_vm2, %v3156_v49  ;;  %2049 = vmatprep.subr.bf16.mxu1 %v2840_v57 }
  0xa7   : > { %2009 = vmatpush1.bf16.msra.mxu0 %v2829_v53  ;;  %2040 = vmatprep.mubr.bf16.mxu0 %v2870_v37 }
  0xa8   : > { %2010 = vmatprep.subr.bf16.mxu0 %v1095_v56  ;;  %2601 = vmatmul.mubr.msk.bf16.vlgmr.msra.gmra.mrb[40].mxu1 %vm951_vm2, %v3156_v49 }
  0xa9   : > { %2050 = vmatpush1.bf16.msra.mxu1 %v2838_v60  ;;  %2081 = vmatprep.mubr.bf16.mxu1 %v2870_v37 }
  0xaa   : > { %2051 = vmatprep.subr.bf16.mxu1 %v1101_v62 }
  0xab   : > { %2011 = vmatpush1.bf16.msra.mxu0 %v1092_v59 }
  0xac   : > { %2661 = vmatprep.subr.bf16.mxu0 %v2872_v2 }
  0xad   : > { %2052 = vmatpush1.bf16.msra.mxu1 %v1098_v0 }
  0xae   : > { %2602 = vmatmul.mubr.msk.bf16.vlgmr.msra.gmra.mrb[44].mxu0 %vm951_vm2, %v3156_v49 }
  0xaf   : > { %2662 = vmatpush3.bf16.msra.mxu0 %v2844_v63  ;;  %2665 = vmatprep.mubr.msk.bf16.mxu0 %vm2873_vm3, %v2872_v2 }
  0xb0   : > { %2663 = vmatprep.subr.bf16.mxu0 %v2872_v2  ;;  %2603 = vmatmul.mubr.msk.bf16.vlgmr.msra.gmra.mrb[44].mxu1 %vm951_vm2, %v3156_v49 }
  0xb3   : > { %2664 = vmatpush3.bf16.msra.mxu0 %v1104_v3 }
  0xb6   : > { %2666 = vmatmul.mubr.msk.bf16.vlgmr.msra.gmra.mrb[48].mxu0 %vm951_vm2, %v3156_v49 }
  0xca   : > { %v3371_v37 = vpop.permute.xlu0 %505 }
 0x129   : > { %v1140_v4 = vpop.f32.mrb[0].mxu0 }
 0x12a   : > { %v1141_v5 = vadd.f32 %v1140_v4, %v3371_v37  ;;  %v1142_v42 = vpop.f32.mrb[1].mxu0 }
 0x12b   : > { %v1143_v6 = vadd.f32 %v1142_v42, %v3371_v37  ;;  %v1144_v7 = vpop.f32.mrb[2].mxu0  ;;  %v1181_v11 = vpop.f32.mrb[0].mxu1 }
 0x12c   : > { %v2130_v8 = vmax.f32 %v1141_v5, 0.0  ;;  %v1145_v9 = vpop.f32.mrb[3].mxu0  ;;  %v1182_v49 = vadd.f32 %v1181_v11, %v3371_v37  ;;  %v1183_v12 = vpop.f32.mrb[1].mxu1 }
 0x12d   : > { %v2131_v10 = vmax.f32 %v1143_v6, 0.0  ;;  %v1184_v14 = vadd.f32 %v1183_v12, %v3371_v37  ;;  %v1185_v15 = vpop.f32.mrb[2].mxu1 }
 0x12e   : > { %v2132_v16 = vmax.f32 %v1182_v49, 0.0  ;;  %v1186_v17 = vpop.f32.mrb[3].mxu1 }
 0x12f   : > { %v2633_v13 = vpack.c.bf16 %v2131_v10, %v2130_v8  ;;  %v2133_v18 = vmax.f32 %v1184_v14, 0.0 }
 0x131   : > { %2376 = vst [vmem:[%s3378_s11] sm:$0xff] %v2633_v13  ;;  %v1222_v19 = vpop.f32.mrb[4].mxu0  ;;  %v2634_v22 = vpack.c.bf16 %v2133_v18, %v2132_v16 }
 0x132   : > { %v1223_v20 = vadd.f32 %v1222_v19, %v3371_v37  ;;  %v1224_v21 = vpop.f32.mrb[5].mxu0 }
 0x133   : > { %v1225_v23 = vadd.f32 %v1224_v21, %v3371_v37  ;;  %v1226_v24 = vpop.f32.mrb[6].mxu0  ;;  %2377 = vst [vmem:[%s3378_s11 + $0x8] sm:$0xff] %v2634_v22  ;;  %v1263_v28 = vpop.f32.mrb[4].mxu1 }
 0x134   : > { %v2134_v25 = vmax.f32 %v1223_v20, 0.0  ;;  %v1227_v26 = vpop.f32.mrb[7].mxu0  ;;  %v1264_v29 = vadd.f32 %v1263_v28, %v3371_v37  ;;  %v1265_v30 = vpop.f32.mrb[5].mxu1 }
 0x135   : > { %v2135_v27 = vmax.f32 %v1225_v23, 0.0  ;;  %v1266_v32 = vadd.f32 %v1265_v30, %v3371_v37  ;;  %v1267_v33 = vpop.f32.mrb[6].mxu1 }
 0x136   : > { %v2136_v34 = vmax.f32 %v1264_v29, 0.0  ;;  %v1268_v35 = vpop.f32.mrb[7].mxu1 }
 0x137   : > { %v2635_v31 = vpack.c.bf16 %v2135_v27, %v2134_v25  ;;  %v2137_v36 = vmax.f32 %v1266_v32, 0.0 }
 0x139   : > { %2378 = vst [vmem:[%s3378_s11 + $0x10] sm:$0xff] %v2635_v31  ;;  %v1304_v38 = vpop.f32.mrb[8].mxu0  ;;  %v2636_v41 = vpack.c.bf16 %v2137_v36, %v2136_v34 }
 0x13a   : > { %v1305_v39 = vadd.f32 %v1304_v38, %v3371_v37  ;;  %v1306_v40 = vpop.f32.mrb[9].mxu0 }
 0x13b   : > { %v1307_v43 = vadd.f32 %v1306_v40, %v3371_v37  ;;  %v1308_v44 = vpop.f32.mrb[10].mxu0  ;;  %2379 = vst [vmem:[%s3378_s11 + $0x18] sm:$0xff] %v2636_v41  ;;  %v1345_v48 = vpop.f32.mrb[8].mxu1 }
 0x13c   : > { %v2138_v45 = vmax.f32 %v1305_v39, 0.0  ;;  %v1309_v46 = vpop.f32.mrb[11].mxu0  ;;  %v1346_v50 = vadd.f32 %v1345_v48, %v3371_v37  ;;  %v1347_v51 = vpop.f32.mrb[9].mxu1 }
 0x13d   : > { %v2139_v47 = vmax.f32 %v1307_v43, 0.0  ;;  %v1348_v53 = vadd.f32 %v1347_v51, %v3371_v37  ;;  %v1349_v54 = vpop.f32.mrb[10].mxu1 }
 0x13e   : > { %v2140_v55 = vmax.f32 %v1346_v50, 0.0  ;;  %v1350_v56 = vpop.f32.mrb[11].mxu1 }
 0x13f   : > { %v2637_v52 = vpack.c.bf16 %v2139_v47, %v2138_v45  ;;  %v2141_v57 = vmax.f32 %v1348_v53, 0.0 }
 0x141   : > { %2380 = vst [vmem:[%s3378_s11 + $0x20] sm:$0xff] %v2637_v52  ;;  %v1386_v58 = vpop.f32.mrb[12].mxu0  ;;  %v2638_v61 = vpack.c.bf16 %v2141_v57, %v2140_v55 }
 0x142   : > { %v1387_v59 = vadd.f32 %v1386_v58, %v3371_v37  ;;  %v1388_v60 = vpop.f32.mrb[13].mxu0 }
 0x143   : > { %v1389_v62 = vadd.f32 %v1388_v60, %v3371_v37  ;;  %v1390_v63 = vpop.f32.mrb[14].mxu0  ;;  %2381 = vst [vmem:[%s3378_s11 + $0x28] sm:$0xff] %v2638_v61  ;;  %v1427_v3 = vpop.f32.mrb[12].mxu1 }
 0x144   : > { %v2142_v0 = vmax.f32 %v1387_v59, 0.0  ;;  %v1391_v1 = vpop.f32.mrb[15].mxu0  ;;  %v1428_v4 = vadd.f32 %v1427_v3, %v3371_v37  ;;  %v1429_v5 = vpop.f32.mrb[13].mxu1 }
 0x145   : > { %v2143_v2 = vmax.f32 %v1389_v62, 0.0  ;;  %v1430_v6 = vadd.f32 %v1429_v5, %v3371_v37  ;;  %v1431_v7 = vpop.f32.mrb[14].mxu1 }
 0x146   : > { %v2144_v8 = vmax.f32 %v1428_v4, 0.0  ;;  %v1432_v9 = vpop.f32.mrb[15].mxu1 }
 0x147   : > { %v2639_v42 = vpack.c.bf16 %v2143_v2, %v2142_v0  ;;  %v2145_v10 = vmax.f32 %v1430_v6, 0.0 }
 0x149   : > { %2382 = vst [vmem:[%s3378_s11 + $0x30] sm:$0xff] %v2639_v42  ;;  %v1468_v11 = vpop.f32.mrb[16].mxu0  ;;  %v2640_v13 = vpack.c.bf16 %v2145_v10, %v2144_v8 }
 0x14a   : > { %v1469_v49 = vadd.f32 %v1468_v11, %v3371_v37  ;;  %v1470_v12 = vpop.f32.mrb[17].mxu0 }
 0x14b   : > { %v1471_v14 = vadd.f32 %v1470_v12, %v3371_v37  ;;  %v1472_v15 = vpop.f32.mrb[18].mxu0  ;;  %2383 = vst [vmem:[%s3378_s11 + $0x38] sm:$0xff] %v2640_v13  ;;  %v1509_v19 = vpop.f32.mrb[16].mxu1 }
 0x14c   : > { %v2146_v16 = vmax.f32 %v1469_v49, 0.0  ;;  %v1473_v17 = vpop.f32.mrb[19].mxu0  ;;  %v1510_v20 = vadd.f32 %v1509_v19, %v3371_v37  ;;  %v1511_v21 = vpop.f32.mrb[17].mxu1 }
 0x14d   : > { %v2147_v18 = vmax.f32 %v1471_v14, 0.0  ;;  %v1512_v23 = vadd.f32 %v1511_v21, %v3371_v37  ;;  %v1513_v24 = vpop.f32.mrb[18].mxu1 }
 0x14e   : > { %v2148_v25 = vmax.f32 %v1510_v20, 0.0  ;;  %v1514_v26 = vpop.f32.mrb[19].mxu1 }
 0x14f   : > { %v2641_v22 = vpack.c.bf16 %v2147_v18, %v2146_v16  ;;  %v2149_v27 = vmax.f32 %v1512_v23, 0.0 }
 0x151   : > { %2384 = vst [vmem:[%s3378_s11 + $0x40] sm:$0xff] %v2641_v22  ;;  %v1550_v28 = vpop.f32.mrb[20].mxu0  ;;  %v2642_v31 = vpack.c.bf16 %v2149_v27, %v2148_v25 }
 0x152   : > { %v1551_v29 = vadd.f32 %v1550_v28, %v3371_v37  ;;  %v1552_v30 = vpop.f32.mrb[21].mxu0 }
 0x153   : > { %v1553_v32 = vadd.f32 %v1552_v30, %v3371_v37  ;;  %v1554_v33 = vpop.f32.mrb[22].mxu0  ;;  %2385 = vst [vmem:[%s3378_s11 + $0x48] sm:$0xff] %v2642_v31  ;;  %v1591_v38 = vpop.f32.mrb[20].mxu1 }
 0x154   : > { %v2150_v34 = vmax.f32 %v1551_v29, 0.0  ;;  %v1555_v35 = vpop.f32.mrb[23].mxu0  ;;  %v1592_v39 = vadd.f32 %v1591_v38, %v3371_v37  ;;  %v1593_v40 = vpop.f32.mrb[21].mxu1 }
 0x155   : > { %v2151_v36 = vmax.f32 %v1553_v32, 0.0  ;;  %v1594_v43 = vadd.f32 %v1593_v40, %v3371_v37  ;;  %v1595_v44 = vpop.f32.mrb[22].mxu1 }
 0x156   : > { %v2152_v45 = vmax.f32 %v1592_v39, 0.0  ;;  %v1596_v46 = vpop.f32.mrb[23].mxu1 }
 0x157   : > { %v2643_v41 = vpack.c.bf16 %v2151_v36, %v2150_v34  ;;  %v2153_v47 = vmax.f32 %v1594_v43, 0.0 }
 0x159   : > { %2386 = vst [vmem:[%s3378_s11 + $0x50] sm:$0xff] %v2643_v41  ;;  %v1632_v48 = vpop.f32.mrb[24].mxu0  ;;  %v2644_v52 = vpack.c.bf16 %v2153_v47, %v2152_v45 }
 0x15a   : > { %v1633_v50 = vadd.f32 %v1632_v48, %v3371_v37  ;;  %v1634_v51 = vpop.f32.mrb[25].mxu0 }
 0x15b   : > { %v1635_v53 = vadd.f32 %v1634_v51, %v3371_v37  ;;  %v1636_v54 = vpop.f32.mrb[26].mxu0  ;;  %2387 = vst [vmem:[%s3378_s11 + $0x58] sm:$0xff] %v2644_v52  ;;  %v1673_v58 = vpop.f32.mrb[24].mxu1 }
 0x15c   : > { %v2154_v55 = vmax.f32 %v1633_v50, 0.0  ;;  %v1637_v56 = vpop.f32.mrb[27].mxu0  ;;  %v1674_v59 = vadd.f32 %v1673_v58, %v3371_v37  ;;  %v1675_v60 = vpop.f32.mrb[25].mxu1 }
 0x15d   : > { %v2155_v57 = vmax.f32 %v1635_v53, 0.0  ;;  %v1676_v62 = vadd.f32 %v1675_v60, %v3371_v37  ;;  %v1677_v63 = vpop.f32.mrb[26].mxu1 }
 0x15e   : > { %v2156_v0 = vmax.f32 %v1674_v59, 0.0  ;;  %v1678_v1 = vpop.f32.mrb[27].mxu1 }
 0x15f   : > { %v2645_v61 = vpack.c.bf16 %v2155_v57, %v2154_v55  ;;  %v2157_v2 = vmax.f32 %v1676_v62, 0.0 }
 0x161   : > { %2388 = vst [vmem:[%s3378_s11 + $0x60] sm:$0xff] %v2645_v61  ;;  %v1714_v3 = vpop.f32.mrb[28].mxu0  ;;  %v2646_v42 = vpack.c.bf16 %v2157_v2, %v2156_v0 }
 0x162   : > { %v1715_v4 = vadd.f32 %v1714_v3, %v3371_v37  ;;  %v1716_v5 = vpop.f32.mrb[29].mxu0 }
 0x163   : > { %v1717_v6 = vadd.f32 %v1716_v5, %v3371_v37  ;;  %v1718_v7 = vpop.f32.mrb[30].mxu0  ;;  %2389 = vst [vmem:[%s3378_s11 + $0x68] sm:$0xff] %v2646_v42  ;;  %v1755_v11 = vpop.f32.mrb[28].mxu1 }
 0x164   : > { %v2158_v8 = vmax.f32 %v1715_v4, 0.0  ;;  %v1719_v9 = vpop.f32.mrb[31].mxu0  ;;  %v1756_v49 = vadd.f32 %v1755_v11, %v3371_v37  ;;  %v1757_v12 = vpop.f32.mrb[29].mxu1 }
 0x165   : > { %v2159_v10 = vmax.f32 %v1717_v6, 0.0  ;;  %v1758_v14 = vadd.f32 %v1757_v12, %v3371_v37  ;;  %v1759_v15 = vpop.f32.mrb[30].mxu1 }
 0x166   : > { %v2160_v16 = vmax.f32 %v1756_v49, 0.0  ;;  %v1760_v17 = vpop.f32.mrb[31].mxu1 }
 0x167   : > { %v2647_v13 = vpack.c.bf16 %v2159_v10, %v2158_v8  ;;  %v2161_v18 = vmax.f32 %v1758_v14, 0.0 }
 0x169   : > { %2390 = vst [vmem:[%s3378_s11 + $0x70] sm:$0xff] %v2647_v13  ;;  %v1796_v19 = vpop.f32.mrb[32].mxu0  ;;  %v2648_v22 = vpack.c.bf16 %v2161_v18, %v2160_v16 }
 0x16a   : > { %v1797_v20 = vadd.f32 %v1796_v19, %v3371_v37  ;;  %v1798_v21 = vpop.f32.mrb[33].mxu0 }
 0x16b   : > { %v1799_v23 = vadd.f32 %v1798_v21, %v3371_v37  ;;  %v1800_v24 = vpop.f32.mrb[34].mxu0  ;;  %2391 = vst [vmem:[%s3378_s11 + $0x78] sm:$0xff] %v2648_v22  ;;  %v1837_v28 = vpop.f32.mrb[32].mxu1 }
 0x16c   : > { %v2162_v25 = vmax.f32 %v1797_v20, 0.0  ;;  %v1801_v26 = vpop.f32.mrb[35].mxu0  ;;  %v1838_v29 = vadd.f32 %v1837_v28, %v3371_v37  ;;  %v1839_v30 = vpop.f32.mrb[33].mxu1 }
 0x16d   : > { %v2163_v27 = vmax.f32 %v1799_v23, 0.0  ;;  %v1840_v32 = vadd.f32 %v1839_v30, %v3371_v37  ;;  %v1841_v33 = vpop.f32.mrb[34].mxu1 }
 0x16e   : > { %v2164_v34 = vmax.f32 %v1838_v29, 0.0  ;;  %v1842_v35 = vpop.f32.mrb[35].mxu1 }
 0x16f   : > { %v2649_v31 = vpack.c.bf16 %v2163_v27, %v2162_v25  ;;  %v2165_v36 = vmax.f32 %v1840_v32, 0.0 }
 0x171   : > { %2392 = vst [vmem:[%s3378_s11 + $0x80] sm:$0xff] %v2649_v31  ;;  %v1878_v38 = vpop.f32.mrb[36].mxu0  ;;  %v2650_v41 = vpack.c.bf16 %v2165_v36, %v2164_v34 }
 0x172   : > { %v1879_v39 = vadd.f32 %v1878_v38, %v3371_v37  ;;  %v1880_v40 = vpop.f32.mrb[37].mxu0 }
 0x173   : > { %v1881_v43 = vadd.f32 %v1880_v40, %v3371_v37  ;;  %v1882_v44 = vpop.f32.mrb[38].mxu0  ;;  %2393 = vst [vmem:[%s3378_s11 + $0x88] sm:$0xff] %v2650_v41  ;;  %v1919_v48 = vpop.f32.mrb[36].mxu1 }
 0x174   : > { %v2166_v45 = vmax.f32 %v1879_v39, 0.0  ;;  %v1883_v46 = vpop.f32.mrb[39].mxu0  ;;  %v1920_v50 = vadd.f32 %v1919_v48, %v3371_v37  ;;  %v1921_v51 = vpop.f32.mrb[37].mxu1 }
 0x175   : > { %v2167_v47 = vmax.f32 %v1881_v43, 0.0  ;;  %v1922_v53 = vadd.f32 %v1921_v51, %v3371_v37  ;;  %v1923_v54 = vpop.f32.mrb[38].mxu1 }
 0x176   : > { %v2168_v55 = vmax.f32 %v1920_v50, 0.0  ;;  %v1924_v56 = vpop.f32.mrb[39].mxu1 }
 0x177   : > { %v2651_v52 = vpack.c.bf16 %v2167_v47, %v2166_v45  ;;  %v2169_v57 = vmax.f32 %v1922_v53, 0.0 }
 0x179   : > { %2394 = vst [vmem:[%s3378_s11 + $0x90] sm:$0xff] %v2651_v52  ;;  %v1960_v58 = vpop.f32.mrb[40].mxu0  ;;  %v2652_v61 = vpack.c.bf16 %v2169_v57, %v2168_v55 }
 0x17a   : > { %v1961_v59 = vadd.f32 %v1960_v58, %v3371_v37  ;;  %v1962_v60 = vpop.f32.mrb[41].mxu0 }
 0x17b   : > { %v1963_v62 = vadd.f32 %v1962_v60, %v3371_v37  ;;  %v1964_v63 = vpop.f32.mrb[42].mxu0  ;;  %2395 = vst [vmem:[%s3378_s11 + $0x98] sm:$0xff] %v2652_v61  ;;  %v2001_v3 = vpop.f32.mrb[40].mxu1 }
 0x17c   : > { %v2170_v0 = vmax.f32 %v1961_v59, 0.0  ;;  %v1965_v1 = vpop.f32.mrb[43].mxu0  ;;  %v2002_v4 = vadd.f32 %v2001_v3, %v3371_v37  ;;  %v2003_v5 = vpop.f32.mrb[41].mxu1 }
 0x17d   : > { %v2171_v2 = vmax.f32 %v1963_v62, 0.0  ;;  %v2004_v6 = vadd.f32 %v2003_v5, %v3371_v37  ;;  %v2005_v7 = vpop.f32.mrb[42].mxu1 }
 0x17e   : > { %v2172_v8 = vmax.f32 %v2002_v4, 0.0  ;;  %v2006_v9 = vpop.f32.mrb[43].mxu1 }
 0x17f   : > { %v2653_v42 = vpack.c.bf16 %v2171_v2, %v2170_v0  ;;  %v2173_v10 = vmax.f32 %v2004_v6, 0.0 }
 0x181   : > { %2396 = vst [vmem:[%s3378_s11 + $0xa0] sm:$0xff] %v2653_v42  ;;  %v2042_v11 = vpop.f32.mrb[44].mxu0  ;;  %v2654_v13 = vpack.c.bf16 %v2173_v10, %v2172_v8 }
 0x182   : > { %v2043_v49 = vadd.f32 %v2042_v11, %v3371_v37  ;;  %v2044_v12 = vpop.f32.mrb[45].mxu0 }
 0x183   : > { %v2045_v14 = vadd.f32 %v2044_v12, %v3371_v37  ;;  %v2046_v15 = vpop.f32.mrb[46].mxu0  ;;  %2397 = vst [vmem:[%s3378_s11 + $0xa8] sm:$0xff] %v2654_v13  ;;  %v2083_v19 = vpop.f32.mrb[44].mxu1 }
 0x184   : > { %v2174_v16 = vmax.f32 %v2043_v49, 0.0  ;;  %v2047_v17 = vpop.f32.mrb[47].mxu0  ;;  %v2084_v20 = vadd.f32 %v2083_v19, %v3371_v37  ;;  %v2085_v21 = vpop.f32.mrb[45].mxu1 }
 0x185   : > { %v2175_v18 = vmax.f32 %v2045_v14, 0.0  ;;  %v2086_v23 = vadd.f32 %v2085_v21, %v3371_v37  ;;  %v2087_v24 = vpop.f32.mrb[46].mxu1 }
 0x186   : > { %v2176_v25 = vmax.f32 %v2084_v20, 0.0  ;;  %v2088_v26 = vpop.f32.mrb[47].mxu1 }
 0x187   : > { %v2655_v22 = vpack.c.bf16 %v2175_v18, %v2174_v16  ;;  %v2177_v27 = vmax.f32 %v2086_v23, 0.0 }
 0x189   : > { %2398 = vst [vmem:[%s3378_s11 + $0xb0] sm:$0xff] %v2655_v22  ;;  %v2124_v28 = vpop.f32.mrb[48].mxu0  ;;  %v2656_v31 = vpack.c.bf16 %v2177_v27, %v2176_v25 }
 0x18a   : > { %v2125_v29 = vadd.f32 %v2124_v28, %v3371_v37  ;;  %v2667_v30 = vpop.f32.mrb[49].mxu0 }
 0x18b   : > { %v2127_v32 = vpop.f32.mrb[50].mxu0  ;;  %2399 = vst [vmem:[%s3378_s11 + $0xb8] sm:$0xff] %v2656_v31 }
 0x18c   : > { %v2178_v33 = vmax.f32 %v2125_v29, 0.0  ;;  %v2668_v34 = vpop.f32.mrb[51].mxu0 }
 0x18e   : > { %v2657_v35 = vpack.c.bf16 %v2178_v33, %v2178_v33 }
 0x190   : > { %2400 = vst [vmem:[%s3378_s11 + $0xc0] sm:$0xf] %v2657_v35 }
 0x191 PF: > { %p10_p9 = scmp.ge.s32.totalorder %s2911_s16, 6   ;;  %s3466_s12 = smov %s2864_s13 }
 0x192   : > { %s3467_s13 = smov %s2920_s19  ;;  %s3468_s14 = smov %s2911_s16 }
 0x193   :  { %12 = sbr.rel (!%p10_p9) target bundleno = 2 (0x2), region = 99 }

// kernel: encoder_forward.5
= control target key start
LH: loop header
LB: loop body
LE: loop exit
PB: predicated region body
PF: predicated region fallthrough
CT: control target
= control target key end

     0   :  { %v4534_v1 = vmov 0   ;;  %vm1376_vm0 = vcmask 1043456   ;;  %vm1372_vm1 = vcmask 588800   ;;  %vm4536_vm2 = vmmov 0   ;;  %s7825_s0 = inlined_call_operand.vmem [shape: bf16[72,6272], index: 0, kind: input, shape index: {}]   ;;  %s7826_s1 = inlined_call_operand.vmem [shape: bf16[16,72], index: 1, kind: input, shape index: {}]   ;;  %s7827_s2 = inlined_call_operand.vmem [shape: f32[16,1], index: 2, kind: input, shape index: {}]   ;;  %s7828_s3 = inlined_call_operand.vmem [shape: f32[16,1], index: 3, kind: input, shape index: {}]   ;;  %s7829_s4 = inlined_call_operand.vmem [shape: f32[16,1], index: 4, kind: input, shape index: {}]   ;;  %s7830_s5 = inlined_call_operand.vmem [shape: bf16[16,6272], index: 5, kind: output, shape index: {}]  }
   0x1   :  { %v4187_v0 = vld [vmem:[%s7825_s0 + $0x4] ss:$196 sps:$4 sm:$0xff]   ;;  %1556 = vmatprep.mubr.bf16.mxu0 %v4534_v1  ;;  %1599 = vmatprep.mubr.bf16.mxu1 %v4534_v1  ;;  %v4189_v2 = vld [vmem:[%s7825_s0 + $0xc] ss:$196 sps:$4 sm:$0xff]   ;;  %v4195_v6 = vld [vmem:[%s7825_s0 + $0x194] ss:$196 sps:$4 sm:$0xff]  }
   0x2   :  { %4185 = vset.pattern.permute.xlu0 %v4534_v1  ;;  %4186 = vset.pattern.permute.xlu1 %v4534_v1  ;;  %v4191_v3 = vld [vmem:[%s7825_s0] ss:$196 sps:$4 sm:$0xff]   ;;  %v4192_v4 = vld [vmem:[%s7825_s0 + $0x8] ss:$196 sps:$4 sm:$0xff]   ;;  %v4198_v8 = vld [vmem:[%s7825_s0 + $0x190] ss:$196 sps:$4 sm:$0xff]  }
   0x3   :  { %1524 = vmatprep.subr.bf16.mxu0 %v4187_v0  ;;  %1567 = vmatprep.subr.bf16.mxu1 %v4189_v2  ;;  %v4193_v5 = vld [vmem:[%s7825_s0 + $0x18c] ss:$196 sps:$4 sm:$0xff]   ;;  %v4199_v9 = vld [vmem:[%s7825_s0 + $0x314] ss:$196 sps:$4 sm:$0xff]   ;;  %v4201_v10 = vld [vmem:[%s7825_s0 + $0x31c] ss:$196 sps:$4 sm:$0xff]  }
   0x4   :  { %1525 = vmatpush1.bf16.msra.mxu0 %v4191_v3  ;;  %1568 = vmatpush1.bf16.msra.mxu1 %v4192_v4  ;;  %v4197_v7 = vld [vmem:[%s7825_s0 + $0x188] ss:$196 sps:$4 sm:$0xff]   ;;  %v4203_v11 = vld [vmem:[%s7825_s0 + $0x310] ss:$196 sps:$4 sm:$0xff]   ;;  %v4204_v12 = vld [vmem:[%s7825_s0 + $0x318] ss:$196 sps:$4 sm:$0xff]  }
   0x5   :  { %1526 = vmatprep.subr.bf16.mxu0 %v4193_v5  ;;  %1569 = vmatprep.subr.bf16.mxu1 %v4195_v6  ;;  %v4205_v13 = vld [vmem:[%s7825_s0 + $0x49c] ss:$196 sps:$4 sm:$0xff]   ;;  %v4207_v14 = vld [vmem:[%s7825_s0 + $0x4a4] ss:$196 sps:$4 sm:$0xff]   ;;  %v4218_v25 = vld [vmem:[%s7825_s0 + $0x14] ss:$196 sps:$4 sm:$0xff]  }
   0x6   :  { %v4209_v15 = vld [vmem:[%s7825_s0 + $0x498] ss:$196 sps:$4 sm:$0xff]   ;;  %v223_v16 = vld [vmem:[%s7825_s0 + $0x620] sm:$0xff]  ;;  %v224_v17 = vld [vmem:[%s7825_s0 + $0x628] sm:$0xff] }
   0x7   :  { %v4210_v18 = vld [vmem:[%s7825_s0 + $0x4a0] ss:$196 sps:$4 sm:$0xff]   ;;  %v3964_v19 = vcombine.low %v223_v16, %v223_v16  ;;  %v3965_v20 = vcombine.high %v223_v16, %v223_v16  ;;  %v3967_v21 = vcombine.high %v224_v17, %v224_v17  ;;  %v3966_v22 = vcombine.low %v224_v17, %v224_v17  ;;  %v4216_v28 = vld [vmem:[%s7825_s0 + $0x10] ss:$196 sps:$4 sm:$0xff]   ;;  %v4219_v29 = vld [vmem:[%s7825_s0 + $0x18] ss:$196 sps:$4 sm:$0xff]  }
   0x8   :  { %1527 = vmatpush1.bf16.msra.mxu0 %v4197_v7  ;;  %1570 = vmatpush1.bf16.msra.mxu1 %v4198_v8  ;;  %v4221_v26 = vld [vmem:[%s7825_s0 + $0x1c] ss:$196 sps:$4 sm:$0xff]   ;;  %v4227_v31 = vld [vmem:[%s7825_s0 + $0x1a4] ss:$196 sps:$4 sm:$0xff]   ;;  %v4233_v35 = vld [vmem:[%s7825_s0 + $0x32c] ss:$196 sps:$4 sm:$0xff]  }
   0x9   :  { %1528 = vmatprep.subr.bf16.mxu0 %v4199_v9  ;;  %1571 = vmatprep.subr.bf16.mxu1 %v4201_v10  ;;  %v1378_v23 = vsel %vm1376_vm0, %v3964_v19, 0  ;;  %v1384_v24 = vsel %vm1376_vm0, %v3966_v22, 0  ;;  %v4638_v27 = vld [vmem:[%s7826_s1] sm:$0xff]   ;;  %v4222_v32 = vld [vmem:[%s7825_s0 + $0x198] ss:$196 sps:$4 sm:$0xff]   ;;  %v225_v40 = vld [vmem:[%s7825_s0 + $0x630] sm:$0xff] }
   0xa   :  { %v4224_v30 = vld [vmem:[%s7825_s0 + $0x19c] ss:$196 sps:$4 sm:$0xff]   ;;  %v4230_v34 = vld [vmem:[%s7825_s0 + $0x324] ss:$196 sps:$4 sm:$0xff]   ;;  %v4236_v38 = vld [vmem:[%s7825_s0 + $0x4ac] ss:$196 sps:$4 sm:$0xff]   ;;  %v3969_v44 = vcombine.high %v225_v40, %v225_v40  ;;  %v3968_v46 = vcombine.low %v225_v40, %v225_v40 }
   0xb   :  { %v4225_v33 = vld [vmem:[%s7825_s0 + $0x1a0] ss:$196 sps:$4 sm:$0xff]   ;;  %v4231_v37 = vld [vmem:[%s7825_s0 + $0x328] ss:$196 sps:$4 sm:$0xff]   ;;  %v4239_v39 = vld [vmem:[%s7825_s0 + $0x4b4] ss:$196 sps:$4 sm:$0xff]  }
   0xc   :  { %1529 = vmatpush1.bf16.msra.mxu0 %v4203_v11  ;;  %1572 = vmatpush1.bf16.msra.mxu1 %v4204_v12  ;;  %v4228_v36 = vld [vmem:[%s7825_s0 + $0x320] ss:$196 sps:$4 sm:$0xff]   ;;  %v226_v41 = vld [vmem:[%s7825_s0 + $0x638] sm:$0xff]  ;;  %v4234_v42 = vld [vmem:[%s7825_s0 + $0x4a8] ss:$196 sps:$4 sm:$0xff]   ;;  %v1390_v48 = vsel %vm1376_vm0, %v3968_v46, 0 }
   0xd   :  { %1530 = vmatprep.subr.bf16.mxu0 %v4205_v13  ;;  %1573 = vmatprep.subr.bf16.mxu1 %v4207_v14  ;;  %v4237_v43 = vld [vmem:[%s7825_s0 + $0x4b0] ss:$196 sps:$4 sm:$0xff]   ;;  %v3971_v45 = vcombine.high %v226_v41, %v226_v41  ;;  %v3970_v47 = vcombine.low %v226_v41, %v226_v41  ;;  %v4246_v50 = vld [vmem:[%s7825_s0 + $0x24] ss:$196 sps:$4 sm:$0xff]   ;;  %v4261_v59 = vld [vmem:[%s7825_s0 + $0x33c] ss:$196 sps:$4 sm:$0xff]  }
   0xe   :  { %v4249_v51 = vld [vmem:[%s7825_s0 + $0x2c] ss:$196 sps:$4 sm:$0xff]   ;;  %v4244_v52 = vld [vmem:[%s7825_s0 + $0x20] ss:$196 sps:$4 sm:$0xff]   ;;  %v4255_v55 = vld [vmem:[%s7825_s0 + $0x1b4] ss:$196 sps:$4 sm:$0xff]  }
   0xf   :  { %v1396_v49 = vsel %vm1376_vm0, %v3970_v47, 0  ;;  %v4247_v53 = vld [vmem:[%s7825_s0 + $0x28] ss:$196 sps:$4 sm:$0xff]   ;;  %v4253_v57 = vld [vmem:[%s7825_s0 + $0x1b0] ss:$196 sps:$4 sm:$0xff]   ;;  %v227_v0 = vld [vmem:[%s7825_s0 + $0x640] sm:$0xff] }
  0x10   :  { %1531 = vmatpush1.bf16.msra.mxu0 %v4209_v15  ;;  %1574 = vmatpush1.bf16.msra.mxu1 %v4210_v18  ;;  %v4252_v54 = vld [vmem:[%s7825_s0 + $0x1ac] ss:$196 sps:$4 sm:$0xff]   ;;  %v4258_v58 = vld [vmem:[%s7825_s0 + $0x334] ss:$196 sps:$4 sm:$0xff]   ;;  %v4264_v62 = vld [vmem:[%s7825_s0 + $0x4bc] ss:$196 sps:$4 sm:$0xff]   ;;  %v3973_v5 = vcombine.high %v227_v0, %v227_v0  ;;  %v3972_v7 = vcombine.low %v227_v0, %v227_v0 }
  0x11   :  { %4013 = vmatprep.subr.msk.bf16.mxu0 %vm1376_vm0, %v3965_v20  ;;  %4015 = vmatprep.subr.msk.bf16.mxu1 %vm1376_vm0, %v3967_v21  ;;  %v4250_v56 = vld [vmem:[%s7825_s0 + $0x1a8] ss:$196 sps:$4 sm:$0xff]   ;;  %v4256_v60 = vld [vmem:[%s7825_s0 + $0x330] ss:$196 sps:$4 sm:$0xff]   ;;  %v4259_v61 = vld [vmem:[%s7825_s0 + $0x338] ss:$196 sps:$4 sm:$0xff]  }
  0x12   :  { %v4267_v63 = vld [vmem:[%s7825_s0 + $0x4c4] ss:$196 sps:$4 sm:$0xff]   ;;  %v4262_v3 = vld [vmem:[%s7825_s0 + $0x4b8] ss:$196 sps:$4 sm:$0xff]   ;;  %v1402_v9 = vsel %vm1376_vm0, %v3972_v7, 0 }
  0x13   :  { %v228_v2 = vld [vmem:[%s7825_s0 + $0x648] sm:$0xff]  ;;  %v4265_v4 = vld [vmem:[%s7825_s0 + $0x4c0] ss:$196 sps:$4 sm:$0xff]   ;;  %v4274_v11 = vld [vmem:[%s7825_s0 + $0x34] ss:$196 sps:$4 sm:$0xff]  }
  0x14   :  { %1533 = vmatpush1.bf16.msra.mxu0 %v1378_v23  ;;  %1576 = vmatpush1.bf16.msra.mxu1 %v1384_v24  ;;  %v3975_v6 = vcombine.high %v228_v2, %v228_v2  ;;  %v3974_v8 = vcombine.low %v228_v2, %v228_v2  ;;  %v4277_v12 = vld [vmem:[%s7825_s0 + $0x3c] ss:$196 sps:$4 sm:$0xff]   ;;  %v4272_v13 = vld [vmem:[%s7825_s0 + $0x30] ss:$196 sps:$4 sm:$0xff]   ;;  %v4283_v16 = vld [vmem:[%s7825_s0 + $0x1c4] ss:$196 sps:$4 sm:$0xff]  }
  0x15   :  { %1610 = vmatprep.subr.bf16.mxu0 %v4218_v25  ;;  %1653 = vmatprep.subr.bf16.mxu1 %v4221_v26  ;;  %v4275_v14 = vld [vmem:[%s7825_s0 + $0x38] ss:$196 sps:$4 sm:$0xff]   ;;  %v248_v17 = vld [vmem:[%s7827_s2] sm:$0xff]  ;;  %v249_v20 = vld [vmem:[%s7827_s2 + $0x8] sm:$0xff] }
  0x16   :  { %v1408_v10 = vsel %vm1376_vm0, %v3974_v8, 0  ;;  %v4280_v15 = vld [vmem:[%s7825_s0 + $0x1bc] ss:$196 sps:$4 sm:$0xff]   ;;  %252 = vperm.xlu0 %4185, %v248_v17   ;;  %v4286_v21 = vld [vmem:[%s7825_s0 + $0x344] ss:$196 sps:$4 sm:$0xff]  }
  0x17   :  { %4014 = vmatmul.mubr.msk.bf16.vlgmr.msra.gmra.mrb[0].mxu0 %vm1372_vm1, %v4638_v27  ;;  %4016 = vmatmul.mubr.msk.bf16.vlgmr.msra.gmra.mrb[0].mxu1 %vm1372_vm1, %v4638_v27  ;;  %v4278_v18 = vld [vmem:[%s7825_s0 + $0x1b8] ss:$196 sps:$4 sm:$0xff]   ;;  %v4281_v19 = vld [vmem:[%s7825_s0 + $0x1c0] ss:$196 sps:$4 sm:$0xff]   ;;  %v4289_v22 = vld [vmem:[%s7825_s0 + $0x34c] ss:$196 sps:$4 sm:$0xff]  }
  0x18   :  { %1611 = vmatpush1.bf16.msra.mxu0 %v4216_v28  ;;  %1654 = vmatpush1.bf16.msra.mxu1 %v4219_v29  ;;  %v4284_v23 = vld [vmem:[%s7825_s0 + $0x340] ss:$196 sps:$4 sm:$0xff]   ;;  %v4287_v24 = vld [vmem:[%s7825_s0 + $0x348] ss:$196 sps:$4 sm:$0xff]   ;;  %v4295_v26 = vld [vmem:[%s7825_s0 + $0x4d4] ss:$196 sps:$4 sm:$0xff]  }
  0x19   :  { %1612 = vmatprep.subr.bf16.mxu0 %v4224_v30  ;;  %1655 = vmatprep.subr.bf16.mxu1 %v4227_v31  ;;  %v4292_v25 = vld [vmem:[%s7825_s0 + $0x4cc] ss:$196 sps:$4 sm:$0xff]   ;;  %v230_v29 = vld [vmem:[%s7825_s0 + $0x658] sm:$0xff]  ;;  %v4300_v40 = vld [vmem:[%s7825_s0 + $0x40] ss:$196 sps:$4 sm:$0xff]  }
  0x1a   :  { %1642 = vmatprep.mubr.bf16.mxu0 %v4534_v1  ;;  %1685 = vmatprep.mubr.bf16.mxu1 %v4534_v1  ;;  %v229_v28 = vld [vmem:[%s7825_s0 + $0x650] sm:$0xff]  ;;  %v4290_v30 = vld [vmem:[%s7825_s0 + $0x4c8] ss:$196 sps:$4 sm:$0xff]   ;;  %v4317_v47 = vld [vmem:[%s7825_s0 + $0x35c] ss:$196 sps:$4 sm:$0xff]  }
  0x1b   :  { %257 = vperm.xlu0 %4185, %v249_v20   ;;  %v4293_v31 = vld [vmem:[%s7825_s0 + $0x4d0] ss:$196 sps:$4 sm:$0xff]   ;;  %v4303_v41 = vld [vmem:[%s7825_s0 + $0x48] ss:$196 sps:$4 sm:$0xff]   ;;  %v4331_v2 = vld [vmem:[%s7825_s0 + $0x58] ss:$196 sps:$4 sm:$0xff]  }
  0x1c   :  { %1613 = vmatpush1.bf16.msra.mxu0 %v4222_v32  ;;  %1656 = vmatpush1.bf16.msra.mxu1 %v4225_v33  ;;  %v3977_v32 = vcombine.high %v229_v28, %v229_v28  ;;  %v3979_v33 = vcombine.high %v230_v29, %v230_v29  ;;  %v4314_v46 = vld [vmem:[%s7825_s0 + $0x354] ss:$196 sps:$4 sm:$0xff]   ;;  %v4342_v7 = vld [vmem:[%s7825_s0 + $0x364] ss:$196 sps:$4 sm:$0xff]   ;;  %v4345_v8 = vld [vmem:[%s7825_s0 + $0x36c] ss:$196 sps:$4 sm:$0xff]  }
  0x1d   :  { %1614 = vmatprep.subr.bf16.mxu0 %v4230_v34  ;;  %1657 = vmatprep.subr.bf16.mxu1 %v4233_v35  ;;  %v3976_v34 = vcombine.low %v229_v28, %v229_v28  ;;  %v3978_v35 = vcombine.low %v230_v29, %v230_v29  ;;  %v4328_v0 = vld [vmem:[%s7825_s0 + $0x50] ss:$196 sps:$4 sm:$0xff]  }
  0x1e   :  { %v4364_v28 = vld [vmem:[%s7825_s0 + $0x1ec] ss:$196 sps:$4 sm:$0xff]   ;;  %v4367_v29 = vld [vmem:[%s7825_s0 + $0x1f4] ss:$196 sps:$4 sm:$0xff]  }
  0x20   :  { %1615 = vmatpush1.bf16.msra.mxu0 %v4228_v36  ;;  %1658 = vmatpush1.bf16.msra.mxu1 %v4231_v37  ;;  %v4302_v36 = vld [vmem:[%s7825_s0 + $0x44] ss:$196 sps:$4 sm:$0xff]   ;;  %v1414_v37 = vsel %vm1376_vm0, %v3976_v34, 0  ;;  %v4368_v34 = vld [vmem:[%s7825_s0 + $0x370] ss:$196 sps:$4 sm:$0xff]  }
  0x21   :  { %1616 = vmatprep.subr.bf16.mxu0 %v4236_v38  ;;  %1659 = vmatprep.subr.bf16.mxu1 %v4239_v39  ;;  %v1420_v38 = vsel %vm1376_vm0, %v3978_v35, 0  ;;  %v4305_v39 = vld [vmem:[%s7825_s0 + $0x4c] ss:$196 sps:$4 sm:$0xff]   ;;  %v4371_v35 = vld [vmem:[%s7825_s0 + $0x378] ss:$196 sps:$4 sm:$0xff]  }
  0x24   :  { %1617 = vmatpush1.bf16.msra.mxu0 %v4234_v42  ;;  %1660 = vmatpush1.bf16.msra.mxu1 %v4237_v43  ;;  %v4308_v42 = vld [vmem:[%s7825_s0 + $0x1cc] ss:$196 sps:$4 sm:$0xff]   ;;  %v4311_v43 = vld [vmem:[%s7825_s0 + $0x1d4] ss:$196 sps:$4 sm:$0xff]  }
  0x25   :  { %4017 = vmatprep.subr.msk.bf16.mxu0 %vm1376_vm0, %v3969_v44  ;;  %4019 = vmatprep.subr.msk.bf16.mxu1 %vm1376_vm0, %v3971_v45  ;;  %v4306_v44 = vld [vmem:[%s7825_s0 + $0x1c8] ss:$196 sps:$4 sm:$0xff]   ;;  %v4309_v45 = vld [vmem:[%s7825_s0 + $0x1d0] ss:$196 sps:$4 sm:$0xff]  }
  0x28   :  { %1619 = vmatpush1.bf16.msra.mxu0 %v1390_v48  ;;  %1662 = vmatpush1.bf16.msra.mxu1 %v1396_v49  ;;  %v4312_v48 = vld [vmem:[%s7825_s0 + $0x350] ss:$196 sps:$4 sm:$0xff]   ;;  %v4315_v49 = vld [vmem:[%s7825_s0 + $0x358] ss:$196 sps:$4 sm:$0xff]  }
  0x29   :  { %1696 = vmatprep.subr.bf16.mxu0 %v4246_v50  ;;  %1739 = vmatprep.subr.bf16.mxu1 %v4249_v51  ;;  %v4320_v50 = vld [vmem:[%s7825_s0 + $0x4dc] ss:$196 sps:$4 sm:$0xff]   ;;  %v4323_v51 = vld [vmem:[%s7825_s0 + $0x4e4] ss:$196 sps:$4 sm:$0xff]  }
  0x2b   :  { %4018 = vmatmul.mubr.msk.bf16.vlgmr.msra.gmra.mrb[4].mxu0 %vm1372_vm1, %v4638_v27  ;;  %4020 = vmatmul.mubr.msk.bf16.vlgmr.msra.gmra.mrb[4].mxu1 %vm1372_vm1, %v4638_v27 }
  0x2c   :  { %1697 = vmatpush1.bf16.msra.mxu0 %v4244_v52  ;;  %1740 = vmatpush1.bf16.msra.mxu1 %v4247_v53  ;;  %v231_v52 = vld [vmem:[%s7825_s0 + $0x660] sm:$0xff]  ;;  %v232_v53 = vld [vmem:[%s7825_s0 + $0x668] sm:$0xff] }
  0x2d   :  { %1698 = vmatprep.subr.bf16.mxu0 %v4252_v54  ;;  %1741 = vmatprep.subr.bf16.mxu1 %v4255_v55  ;;  %v4318_v54 = vld [vmem:[%s7825_s0 + $0x4d8] ss:$196 sps:$4 sm:$0xff]   ;;  %v4321_v55 = vld [vmem:[%s7825_s0 + $0x4e0] ss:$196 sps:$4 sm:$0xff]  }
  0x2e   :  { %1728 = vmatprep.mubr.bf16.mxu0 %v4534_v1  ;;  %1771 = vmatprep.mubr.bf16.mxu1 %v4534_v1 }
  0x30   :  { %1699 = vmatpush1.bf16.msra.mxu0 %v4250_v56  ;;  %1742 = vmatpush1.bf16.msra.mxu1 %v4253_v57  ;;  %v3981_v56 = vcombine.high %v231_v52, %v231_v52  ;;  %v3983_v57 = vcombine.high %v232_v53, %v232_v53 }
  0x31   :  { %1700 = vmatprep.subr.bf16.mxu0 %v4258_v58  ;;  %1743 = vmatprep.subr.bf16.mxu1 %v4261_v59  ;;  %v3980_v58 = vcombine.low %v231_v52, %v231_v52  ;;  %v3982_v59 = vcombine.low %v232_v53, %v232_v53  ;;  %v4392_v52 = vld [vmem:[%s7825_s0 + $0x1fc] ss:$196 sps:$4 sm:$0xff]   ;;  %v4395_v53 = vld [vmem:[%s7825_s0 + $0x204] ss:$196 sps:$4 sm:$0xff]  }
  0x34   :  { %1701 = vmatpush1.bf16.msra.mxu0 %v4256_v60  ;;  %1744 = vmatpush1.bf16.msra.mxu1 %v4259_v61  ;;  %v4330_v60 = vld [vmem:[%s7825_s0 + $0x54] ss:$196 sps:$4 sm:$0xff]   ;;  %v1426_v61 = vsel %vm1376_vm0, %v3980_v58, 0  ;;  %v4399_v58 = vld [vmem:[%s7825_s0 + $0x388] ss:$196 sps:$4 sm:$0xff]  }
  0x35   :  { %1702 = vmatprep.subr.bf16.mxu0 %v4264_v62  ;;  %1745 = vmatprep.subr.bf16.mxu1 %v4267_v63  ;;  %v1432_v62 = vsel %vm1376_vm0, %v3982_v59, 0  ;;  %v4333_v63 = vld [vmem:[%s7825_s0 + $0x5c] ss:$196 sps:$4 sm:$0xff]   ;;  %v4404_v59 = vld [vmem:[%s7825_s0 + $0x50c] ss:$196 sps:$4 sm:$0xff]  }
  0x38   :  { %1703 = vmatpush1.bf16.msra.mxu0 %v4262_v3  ;;  %1746 = vmatpush1.bf16.msra.mxu1 %v4265_v4  ;;  %v4336_v3 = vld [vmem:[%s7825_s0 + $0x1dc] ss:$196 sps:$4 sm:$0xff]   ;;  %v4339_v4 = vld [vmem:[%s7825_s0 + $0x1e4] ss:$196 sps:$4 sm:$0xff]  }
  0x39   :  { %4021 = vmatprep.subr.msk.bf16.mxu0 %vm1376_vm0, %v3973_v5  ;;  %4023 = vmatprep.subr.msk.bf16.mxu1 %vm1376_vm0, %v3975_v6  ;;  %v4334_v5 = vld [vmem:[%s7825_s0 + $0x1d8] ss:$196 sps:$4 sm:$0xff]   ;;  %v4337_v6 = vld [vmem:[%s7825_s0 + $0x1e0] ss:$196 sps:$4 sm:$0xff]  }
  0x3c   :  { %1705 = vmatpush1.bf16.msra.mxu0 %v1402_v9  ;;  %1748 = vmatpush1.bf16.msra.mxu1 %v1408_v10  ;;  %v4340_v9 = vld [vmem:[%s7825_s0 + $0x360] ss:$196 sps:$4 sm:$0xff]   ;;  %v4343_v10 = vld [vmem:[%s7825_s0 + $0x368] ss:$196 sps:$4 sm:$0xff]  }
  0x3d   :  { %1782 = vmatprep.subr.bf16.mxu0 %v4274_v11  ;;  %1825 = vmatprep.subr.bf16.mxu1 %v4277_v12  ;;  %v4348_v11 = vld [vmem:[%s7825_s0 + $0x4ec] ss:$196 sps:$4 sm:$0xff]   ;;  %v4351_v12 = vld [vmem:[%s7825_s0 + $0x4f4] ss:$196 sps:$4 sm:$0xff]  }
  0x3f   :  { %4022 = vmatmul.mubr.msk.bf16.vlgmr.msra.gmra.mrb[8].mxu0 %vm1372_vm1, %v4638_v27  ;;  %4024 = vmatmul.mubr.msk.bf16.vlgmr.msra.gmra.mrb[8].mxu1 %vm1372_vm1, %v4638_v27 }
  0x40   :  { %1783 = vmatpush1.bf16.msra.mxu0 %v4272_v13  ;;  %1826 = vmatpush1.bf16.msra.mxu1 %v4275_v14  ;;  %v233_v13 = vld [vmem:[%s7825_s0 + $0x670] sm:$0xff]  ;;  %v234_v14 = vld [vmem:[%s7825_s0 + $0x678] sm:$0xff] }
  0x41   :  { %1784 = vmatprep.subr.bf16.mxu0 %v4280_v15  ;;  %1827 = vmatprep.subr.bf16.mxu1 %v4283_v16  ;;  %v4346_v15 = vld [vmem:[%s7825_s0 + $0x4e8] ss:$196 sps:$4 sm:$0xff]   ;;  %v4349_v16 = vld [vmem:[%s7825_s0 + $0x4f0] ss:$196 sps:$4 sm:$0xff]   ;;  %v3985_v17 = vcombine.high %v233_v13, %v233_v13  ;;  %v3986_v20 = vcombine.low %v234_v14, %v234_v14 }
  0x42   :  { %1814 = vmatprep.mubr.bf16.mxu0 %v4534_v1  ;;  %1857 = vmatprep.mubr.bf16.mxu1 %v4534_v1 }
  0x44   :  { %1785 = vmatpush1.bf16.msra.mxu0 %v4278_v18  ;;  %1828 = vmatpush1.bf16.msra.mxu1 %v4281_v19  ;;  %v3987_v18 = vcombine.high %v234_v14, %v234_v14  ;;  %v3984_v19 = vcombine.low %v233_v13, %v233_v13  ;;  %v4423_v13 = vld [vmem:[%s7825_s0 + $0x214] ss:$196 sps:$4 sm:$0xff]   ;;  %v5109_v14 = vld [vmem:[%s7826_s1] sm:$0xff]  }
  0x45   :  { %1786 = vmatprep.subr.bf16.mxu0 %v4286_v21  ;;  %1829 = vmatprep.subr.bf16.mxu1 %v4289_v22  ;;  %v4358_v21 = vld [vmem:[%s7825_s0 + $0x64] ss:$196 sps:$4 sm:$0xff]  }
  0x46   :  { %v1438_v22 = vsel %vm1376_vm0, %v3984_v19, 0  ;;  %v4424_v19 = vld [vmem:[%s7825_s0 + $0x390] ss:$196 sps:$4 sm:$0xff]  }
  0x48   :  { %1787 = vmatpush1.bf16.msra.mxu0 %v4284_v23  ;;  %1830 = vmatpush1.bf16.msra.mxu1 %v4287_v24  ;;  %v1444_v23 = vsel %vm1376_vm0, %v3986_v20, 0  ;;  %v4361_v24 = vld [vmem:[%s7825_s0 + $0x6c] ss:$196 sps:$4 sm:$0xff]   ;;  %v4427_v20 = vld [vmem:[%s7825_s0 + $0x398] ss:$196 sps:$4 sm:$0xff]  }
  0x49   :  { %1788 = vmatprep.subr.bf16.mxu0 %v4292_v25  ;;  %1831 = vmatprep.subr.bf16.mxu1 %v4295_v26  ;;  %v4356_v25 = vld [vmem:[%s7825_s0 + $0x60] ss:$196 sps:$4 sm:$0xff]   ;;  %v4359_v26 = vld [vmem:[%s7825_s0 + $0x68] ss:$196 sps:$4 sm:$0xff]  }
  0x4c   :  { %1789 = vmatpush1.bf16.msra.mxu0 %v4290_v30  ;;  %1832 = vmatpush1.bf16.msra.mxu1 %v4293_v31  ;;  %v4362_v30 = vld [vmem:[%s7825_s0 + $0x1e8] ss:$196 sps:$4 sm:$0xff]   ;;  %v4365_v31 = vld [vmem:[%s7825_s0 + $0x1f0] ss:$196 sps:$4 sm:$0xff]  }
  0x4d   :  { %4025 = vmatprep.subr.msk.bf16.mxu0 %vm1376_vm0, %v3977_v32  ;;  %4027 = vmatprep.subr.msk.bf16.mxu1 %vm1376_vm0, %v3979_v33  ;;  %v4370_v32 = vld [vmem:[%s7825_s0 + $0x374] ss:$196 sps:$4 sm:$0xff]   ;;  %v4373_v33 = vld [vmem:[%s7825_s0 + $0x37c] ss:$196 sps:$4 sm:$0xff]  }
  0x50   :  { %1791 = vmatpush1.bf16.msra.mxu0 %v1414_v37  ;;  %1834 = vmatpush1.bf16.msra.mxu1 %v1420_v38  ;;  %v4379_v37 = vld [vmem:[%s7825_s0 + $0x504] ss:$196 sps:$4 sm:$0xff]  }
  0x51   :  { %1868 = vmatprep.subr.bf16.mxu0 %v4302_v36  ;;  %1911 = vmatprep.subr.bf16.mxu1 %v4305_v39  ;;  %v4376_v36 = vld [vmem:[%s7825_s0 + $0x4fc] ss:$196 sps:$4 sm:$0xff]   ;;  %v236_v39 = vld [vmem:[%s7825_s0 + $0x688] sm:$0xff] }
  0x52   :  { %v235_v38 = vld [vmem:[%s7825_s0 + $0x680] sm:$0xff] }
  0x53   :  { %4026 = vmatmul.mubr.msk.bf16.vlgmr.msra.gmra.mrb[12].mxu0 %vm1372_vm1, %v4638_v27  ;;  %4028 = vmatmul.mubr.msk.bf16.vlgmr.msra.gmra.mrb[12].mxu1 %vm1372_vm1, %v4638_v27 }
  0x54   :  { %1869 = vmatpush1.bf16.msra.mxu0 %v4300_v40  ;;  %1912 = vmatpush1.bf16.msra.mxu1 %v4303_v41  ;;  %v4374_v40 = vld [vmem:[%s7825_s0 + $0x4f8] ss:$196 sps:$4 sm:$0xff]   ;;  %v4377_v41 = vld [vmem:[%s7825_s0 + $0x500] ss:$196 sps:$4 sm:$0xff]  }
  0x55   :  { %1870 = vmatprep.subr.bf16.mxu0 %v4308_v42  ;;  %1913 = vmatprep.subr.bf16.mxu1 %v4311_v43  ;;  %v3989_v42 = vcombine.high %v235_v38, %v235_v38  ;;  %v3991_v43 = vcombine.high %v236_v39, %v236_v39 }
  0x56   :  { %1900 = vmatprep.mubr.bf16.mxu0 %v4534_v1  ;;  %1943 = vmatprep.mubr.bf16.mxu1 %v4534_v1 }
  0x58   :  { %1871 = vmatpush1.bf16.msra.mxu0 %v4306_v44  ;;  %1914 = vmatpush1.bf16.msra.mxu1 %v4309_v45  ;;  %v3988_v44 = vcombine.low %v235_v38, %v235_v38  ;;  %v3990_v45 = vcombine.low %v236_v39, %v236_v39  ;;  %v4448_v38 = vld [vmem:[%s7825_s0 + $0x21c] ss:$196 sps:$4 sm:$0xff]   ;;  %v4451_v39 = vld [vmem:[%s7825_s0 + $0x224] ss:$196 sps:$4 sm:$0xff]  }
  0x59   :  { %1872 = vmatprep.subr.bf16.mxu0 %v4314_v46  ;;  %1915 = vmatprep.subr.bf16.mxu1 %v4317_v47  ;;  %v4386_v46 = vld [vmem:[%s7825_s0 + $0x74] ss:$196 sps:$4 sm:$0xff]  }
  0x5a   :  { %v1450_v47 = vsel %vm1376_vm0, %v3988_v44, 0  ;;  %v4452_v44 = vld [vmem:[%s7825_s0 + $0x3a0] ss:$196 sps:$4 sm:$0xff]  }
  0x5c   :  { %1873 = vmatpush1.bf16.msra.mxu0 %v4312_v48  ;;  %1916 = vmatpush1.bf16.msra.mxu1 %v4315_v49  ;;  %v1456_v48 = vsel %vm1376_vm0, %v3990_v45, 0  ;;  %v4389_v49 = vld [vmem:[%s7825_s0 + $0x7c] ss:$196 sps:$4 sm:$0xff]   ;;  %v4455_v45 = vld [vmem:[%s7825_s0 + $0x3a8] ss:$196 sps:$4 sm:$0xff]  }
  0x5d   :  { %1874 = vmatprep.subr.bf16.mxu0 %v4320_v50  ;;  %1917 = vmatprep.subr.bf16.mxu1 %v4323_v51  ;;  %v4384_v50 = vld [vmem:[%s7825_s0 + $0x70] ss:$196 sps:$4 sm:$0xff]   ;;  %v4387_v51 = vld [vmem:[%s7825_s0 + $0x78] ss:$196 sps:$4 sm:$0xff]  }
  0x60   :  { %1875 = vmatpush1.bf16.msra.mxu0 %v4318_v54  ;;  %1918 = vmatpush1.bf16.msra.mxu1 %v4321_v55  ;;  %v4390_v54 = vld [vmem:[%s7825_s0 + $0x1f8] ss:$196 sps:$4 sm:$0xff]   ;;  %v4393_v55 = vld [vmem:[%s7825_s0 + $0x200] ss:$196 sps:$4 sm:$0xff]  }
  0x61   :  { %4029 = vmatprep.subr.msk.bf16.mxu0 %vm1376_vm0, %v3981_v56  ;;  %4031 = vmatprep.subr.msk.bf16.mxu1 %vm1376_vm0, %v3983_v57  ;;  %v4398_v56 = vld [vmem:[%s7825_s0 + $0x384] ss:$196 sps:$4 sm:$0xff]  }
  0x62   :  { %v4396_v57 = vld [vmem:[%s7825_s0 + $0x380] ss:$196 sps:$4 sm:$0xff]  }
  0x64   :  { %1877 = vmatpush1.bf16.msra.mxu0 %v1426_v61  ;;  %1920 = vmatpush1.bf16.msra.mxu1 %v1432_v62  ;;  %v237_v61 = vld [vmem:[%s7825_s0 + $0x690] sm:$0xff]  ;;  %v238_v62 = vld [vmem:[%s7825_s0 + $0x698] sm:$0xff] }
  0x65   :  { %1954 = vmatprep.subr.bf16.mxu0 %v4330_v60  ;;  %1997 = vmatprep.subr.bf16.mxu1 %v4333_v63  ;;  %v4407_v60 = vld [vmem:[%s7825_s0 + $0x514] ss:$196 sps:$4 sm:$0xff]   ;;  %v4402_v63 = vld [vmem:[%s7825_s0 + $0x508] ss:$196 sps:$4 sm:$0xff]  }
  0x67   :  { %4030 = vmatmul.mubr.msk.bf16.vlgmr.msra.gmra.mrb[16].mxu0 %vm1372_vm1, %v4638_v27  ;;  %4032 = vmatmul.mubr.msk.bf16.vlgmr.msra.gmra.mrb[16].mxu1 %vm1372_vm1, %v4638_v27 }
  0x68   :  { %1955 = vmatpush1.bf16.msra.mxu0 %v4328_v0  ;;  %1998 = vmatpush1.bf16.msra.mxu1 %v4331_v2  ;;  %v4405_v0 = vld [vmem:[%s7825_s0 + $0x510] ss:$196 sps:$4 sm:$0xff]   ;;  %v3993_v2 = vcombine.high %v237_v61, %v237_v61 }
  0x69   :  { %1956 = vmatprep.subr.bf16.mxu0 %v4336_v3  ;;  %1999 = vmatprep.subr.bf16.mxu1 %v4339_v4  ;;  %v3995_v3 = vcombine.high %v238_v62, %v238_v62  ;;  %v3992_v4 = vcombine.low %v237_v61, %v237_v61  ;;  %v4476_v61 = vld [vmem:[%s7825_s0 + $0x22c] ss:$196 sps:$4 sm:$0xff]  }
  0x6a   :  { %1986 = vmatprep.mubr.bf16.mxu0 %v4534_v1  ;;  %2029 = vmatprep.mubr.bf16.mxu1 %v4534_v1 }
  0x6c   :  { %1957 = vmatpush1.bf16.msra.mxu0 %v4334_v5  ;;  %2000 = vmatpush1.bf16.msra.mxu1 %v4337_v6  ;;  %v3994_v5 = vcombine.low %v238_v62, %v238_v62  ;;  %v1462_v6 = vsel %vm1376_vm0, %v3992_v4, 0  ;;  %v4479_v62 = vld [vmem:[%s7825_s0 + $0x234] ss:$196 sps:$4 sm:$0xff]  }
  0x6d   :  { %1958 = vmatprep.subr.bf16.mxu0 %v4342_v7  ;;  %2001 = vmatprep.subr.bf16.mxu1 %v4345_v8  ;;  %v4414_v8 = vld [vmem:[%s7825_s0 + $0x84] ss:$196 sps:$4 sm:$0xff]   ;;  %v4480_v4 = vld [vmem:[%s7825_s0 + $0x3b0] ss:$196 sps:$4 sm:$0xff]  }
  0x6e   :  { %v1468_v7 = vsel %vm1376_vm0, %v3994_v5, 0  ;;  %v4483_v5 = vld [vmem:[%s7825_s0 + $0x3b8] ss:$196 sps:$4 sm:$0xff]  }
  0x70   :  { %1959 = vmatpush1.bf16.msra.mxu0 %v4340_v9  ;;  %2002 = vmatpush1.bf16.msra.mxu1 %v4343_v10  ;;  %v4417_v9 = vld [vmem:[%s7825_s0 + $0x8c] ss:$196 sps:$4 sm:$0xff]   ;;  %v4412_v10 = vld [vmem:[%s7825_s0 + $0x80] ss:$196 sps:$4 sm:$0xff]  }
  0x71   :  { %1960 = vmatprep.subr.bf16.mxu0 %v4348_v11  ;;  %2003 = vmatprep.subr.bf16.mxu1 %v4351_v12  ;;  %v4415_v11 = vld [vmem:[%s7825_s0 + $0x88] ss:$196 sps:$4 sm:$0xff]  }
  0x72   :  { %v4420_v12 = vld [vmem:[%s7825_s0 + $0x20c] ss:$196 sps:$4 sm:$0xff]  }
  0x74   :  { %1961 = vmatpush1.bf16.msra.mxu0 %v4346_v15  ;;  %2004 = vmatpush1.bf16.msra.mxu1 %v4349_v16  ;;  %v4418_v15 = vld [vmem:[%s7825_s0 + $0x208] ss:$196 sps:$4 sm:$0xff]   ;;  %v4421_v16 = vld [vmem:[%s7825_s0 + $0x210] ss:$196 sps:$4 sm:$0xff]  }
  0x75   :  { %4033 = vmatprep.subr.msk.bf16.mxu0 %vm1376_vm0, %v3985_v17  ;;  %4035 = vmatprep.subr.msk.bf16.mxu1 %vm1376_vm0, %v3987_v18  ;;  %v4426_v17 = vld [vmem:[%s7825_s0 + $0x394] ss:$196 sps:$4 sm:$0xff]   ;;  %v4429_v18 = vld [vmem:[%s7825_s0 + $0x39c] ss:$196 sps:$4 sm:$0xff]  }
  0x78   :  { %1963 = vmatpush1.bf16.msra.mxu0 %v1438_v22  ;;  %2006 = vmatpush1.bf16.msra.mxu1 %v1444_v23  ;;  %v4435_v22 = vld [vmem:[%s7825_s0 + $0x524] ss:$196 sps:$4 sm:$0xff]  }
  0x79   :  { %2040 = vmatprep.subr.bf16.mxu0 %v4358_v21  ;;  %2083 = vmatprep.subr.bf16.mxu1 %v4361_v24  ;;  %v4432_v21 = vld [vmem:[%s7825_s0 + $0x51c] ss:$196 sps:$4 sm:$0xff]   ;;  %v240_v24 = vld [vmem:[%s7825_s0 + $0x6a8] sm:$0xff] }
  0x7a   :  { %v239_v23 = vld [vmem:[%s7825_s0 + $0x6a0] sm:$0xff] }
  0x7b   :  { %4034 = vmatmul.mubr.msk.bf16.vlgmr.msra.gmra.mrb[20].mxu0 %vm1372_vm1, %v4638_v27  ;;  %4036 = vmatmul.mubr.msk.bf16.vlgmr.msra.gmra.mrb[20].mxu1 %vm1372_vm1, %v4638_v27 }
  0x7c   :  { %2041 = vmatpush1.bf16.msra.mxu0 %v4356_v25  ;;  %2084 = vmatpush1.bf16.msra.mxu1 %v4359_v26  ;;  %v4430_v25 = vld [vmem:[%s7825_s0 + $0x518] ss:$196 sps:$4 sm:$0xff]   ;;  %v4433_v26 = vld [vmem:[%s7825_s0 + $0x520] ss:$196 sps:$4 sm:$0xff]  }
  0x7d   :  { %2042 = vmatprep.subr.bf16.mxu0 %v4364_v28  ;;  %2085 = vmatprep.subr.bf16.mxu1 %v4367_v29  ;;  %v3997_v28 = vcombine.high %v239_v23, %v239_v23  ;;  %v3999_v29 = vcombine.high %v240_v24, %v240_v24 }
  0x7e   :  { %2072 = vmatprep.mubr.bf16.mxu0 %v4534_v1  ;;  %2115 = vmatprep.mubr.bf16.mxu1 %v4534_v1 }
  0x80   :  { %2043 = vmatpush1.bf16.msra.mxu0 %v4362_v30  ;;  %2086 = vmatpush1.bf16.msra.mxu1 %v4365_v31  ;;  %v3996_v30 = vcombine.low %v239_v23, %v239_v23  ;;  %v3998_v31 = vcombine.low %v240_v24, %v240_v24  ;;  %v4504_v23 = vld [vmem:[%s7825_s0 + $0x23c] ss:$196 sps:$4 sm:$0xff]   ;;  %v4507_v24 = vld [vmem:[%s7825_s0 + $0x244] ss:$196 sps:$4 sm:$0xff]  }
  0x81   :  { %2044 = vmatprep.subr.bf16.mxu0 %v4370_v32  ;;  %2087 = vmatprep.subr.bf16.mxu1 %v4373_v33 }
  0x82   :  { %v1474_v32 = vsel %vm1376_vm0, %v3996_v30, 0  ;;  %v1480_v33 = vsel %vm1376_vm0, %v3998_v31, 0  ;;  %v4508_v30 = vld [vmem:[%s7825_s0 + $0x3c0] ss:$196 sps:$4 sm:$0xff]   ;;  %v4511_v31 = vld [vmem:[%s7825_s0 + $0x3c8] ss:$196 sps:$4 sm:$0xff]  }
  0x84   :  { %2045 = vmatpush1.bf16.msra.mxu0 %v4368_v34  ;;  %2088 = vmatpush1.bf16.msra.mxu1 %v4371_v35  ;;  %v4442_v34 = vld [vmem:[%s7825_s0 + $0x94] ss:$196 sps:$4 sm:$0xff]   ;;  %v4445_v35 = vld [vmem:[%s7825_s0 + $0x9c] ss:$196 sps:$4 sm:$0xff]  }
  0x85   :  { %2046 = vmatprep.subr.bf16.mxu0 %v4376_v36  ;;  %2089 = vmatprep.subr.bf16.mxu1 %v4379_v37  ;;  %v4440_v36 = vld [vmem:[%s7825_s0 + $0x90] ss:$196 sps:$4 sm:$0xff]   ;;  %v4443_v37 = vld [vmem:[%s7825_s0 + $0x98] ss:$196 sps:$4 sm:$0xff]  }
  0x88   :  { %2047 = vmatpush1.bf16.msra.mxu0 %v4374_v40  ;;  %2090 = vmatpush1.bf16.msra.mxu1 %v4377_v41  ;;  %v4446_v40 = vld [vmem:[%s7825_s0 + $0x218] ss:$196 sps:$4 sm:$0xff]   ;;  %v4449_v41 = vld [vmem:[%s7825_s0 + $0x220] ss:$196 sps:$4 sm:$0xff]  }
  0x89   :  { %4037 = vmatprep.subr.msk.bf16.mxu0 %vm1376_vm0, %v3989_v42  ;;  %4039 = vmatprep.subr.msk.bf16.mxu1 %vm1376_vm0, %v3991_v43  ;;  %v4454_v42 = vld [vmem:[%s7825_s0 + $0x3a4] ss:$196 sps:$4 sm:$0xff]   ;;  %v4457_v43 = vld [vmem:[%s7825_s0 + $0x3ac] ss:$196 sps:$4 sm:$0xff]  }
  0x8c   :  { %2049 = vmatpush1.bf16.msra.mxu0 %v1450_v47  ;;  %2092 = vmatpush1.bf16.msra.mxu1 %v1456_v48  ;;  %v4463_v47 = vld [vmem:[%s7825_s0 + $0x534] ss:$196 sps:$4 sm:$0xff]  }
  0x8d   :  { %2126 = vmatprep.subr.bf16.mxu0 %v4386_v46  ;;  %2169 = vmatprep.subr.bf16.mxu1 %v4389_v49  ;;  %v4460_v46 = vld [vmem:[%s7825_s0 + $0x52c] ss:$196 sps:$4 sm:$0xff]   ;;  %v242_v49 = vld [vmem:[%s7825_s0 + $0x6b8] sm:$0xff] }
  0x8e   :  { %v241_v48 = vld [vmem:[%s7825_s0 + $0x6b0] sm:$0xff] }
  0x8f   :  { %4038 = vmatmul.mubr.msk.bf16.vlgmr.msra.gmra.mrb[24].mxu0 %vm1372_vm1, %v4638_v27  ;;  %4040 = vmatmul.mubr.msk.bf16.vlgmr.msra.gmra.mrb[24].mxu1 %vm1372_vm1, %v4638_v27  ;;  %v4401_v27 = vld [vmem:[%s7825_s0 + $0x38c] ss:$196 sps:$4 sm:$0xff]  }
  0x90   :  { %2127 = vmatpush1.bf16.msra.mxu0 %v4384_v50  ;;  %2170 = vmatpush1.bf16.msra.mxu1 %v4387_v51  ;;  %v4458_v50 = vld [vmem:[%s7825_s0 + $0x528] ss:$196 sps:$4 sm:$0xff]   ;;  %v4461_v51 = vld [vmem:[%s7825_s0 + $0x530] ss:$196 sps:$4 sm:$0xff]  }
  0x91   :  { %2128 = vmatprep.subr.bf16.mxu0 %v4392_v52  ;;  %2171 = vmatprep.subr.bf16.mxu1 %v4395_v53  ;;  %v4001_v52 = vcombine.high %v241_v48, %v241_v48  ;;  %v4003_v53 = vcombine.high %v242_v49, %v242_v49 }
  0x92   :  { %2158 = vmatprep.mubr.bf16.mxu0 %v4534_v1  ;;  %2201 = vmatprep.mubr.bf16.mxu1 %v4534_v1 }
  0x94   :  { %2129 = vmatpush1.bf16.msra.mxu0 %v4390_v54  ;;  %2172 = vmatpush1.bf16.msra.mxu1 %v4393_v55  ;;  %v4000_v54 = vcombine.low %v241_v48, %v241_v48  ;;  %v4002_v55 = vcombine.low %v242_v49, %v242_v49 }
  0x95   :  { %2130 = vmatprep.subr.bf16.mxu0 %v4398_v56  ;;  %2173 = vmatprep.subr.bf16.mxu1 %v4401_v27 }
  0x96   :  { %v1486_v56 = vsel %vm1376_vm0, %v4000_v54, 0  ;;  %v1492_v27 = vsel %vm1376_vm0, %v4002_v55, 0  ;;  %v4526_v54 = vld [vmem:[%s7825_s0 + $0x3d0] ss:$196 sps:$4 sm:$0xff]   ;;  %v4527_v55 = vld [vmem:[%s7825_s0 + $0x558] ss:$196 sps:$4 sm:$0xff]  }
  0x98   :  { %2131 = vmatpush1.bf16.msra.mxu0 %v4396_v57  ;;  %2174 = vmatpush1.bf16.msra.mxu1 %v4399_v58  ;;  %v4470_v57 = vld [vmem:[%s7825_s0 + $0xa4] ss:$196 sps:$4 sm:$0xff]   ;;  %v4473_v58 = vld [vmem:[%s7825_s0 + $0xac] ss:$196 sps:$4 sm:$0xff]  }
  0x99   :  { %2132 = vmatprep.subr.bf16.mxu0 %v4404_v59  ;;  %2175 = vmatprep.subr.bf16.mxu1 %v4407_v60  ;;  %v4468_v59 = vld [vmem:[%s7825_s0 + $0xa0] ss:$196 sps:$4 sm:$0xff]   ;;  %v4471_v60 = vld [vmem:[%s7825_s0 + $0xa8] ss:$196 sps:$4 sm:$0xff]  }
  0x9c   :  { %2133 = vmatpush1.bf16.msra.mxu0 %v4402_v63  ;;  %2176 = vmatpush1.bf16.msra.mxu1 %v4405_v0  ;;  %v4474_v63 = vld [vmem:[%s7825_s0 + $0x228] ss:$196 sps:$4 sm:$0xff]   ;;  %v4477_v0 = vld [vmem:[%s7825_s0 + $0x230] ss:$196 sps:$4 sm:$0xff]  }
  0x9d   :  { %4041 = vmatprep.subr.msk.bf16.mxu0 %vm1376_vm0, %v3993_v2  ;;  %4043 = vmatprep.subr.msk.bf16.mxu1 %vm1376_vm0, %v3995_v3  ;;  %v4482_v2 = vld [vmem:[%s7825_s0 + $0x3b4] ss:$196 sps:$4 sm:$0xff]   ;;  %v4485_v3 = vld [vmem:[%s7825_s0 + $0x3bc] ss:$196 sps:$4 sm:$0xff]  }
  0xa0   :  { %2135 = vmatpush1.bf16.msra.mxu0 %v1462_v6  ;;  %2178 = vmatpush1.bf16.msra.mxu1 %v1468_v7  ;;  %v4488_v6 = vld [vmem:[%s7825_s0 + $0x53c] ss:$196 sps:$4 sm:$0xff]   ;;  %v4491_v7 = vld [vmem:[%s7825_s0 + $0x544] ss:$196 sps:$4 sm:$0xff]  }
  0xa1   :  { %2212 = vmatprep.subr.bf16.mxu0 %v4414_v8  ;;  %2255 = vmatprep.subr.bf16.mxu1 %v4417_v9  ;;  %v243_v8 = vld [vmem:[%s7825_s0 + $0x6c0] sm:$0xff]  ;;  %v244_v9 = vld [vmem:[%s7825_s0 + $0x6c8] sm:$0xff] }
  0xa3   :  { %4042 = vmatmul.mubr.msk.bf16.vlgmr.msra.gmra.mrb[28].mxu0 %vm1372_vm1, %v5109_v14  ;;  %4044 = vmatmul.mubr.msk.bf16.vlgmr.msra.gmra.mrb[28].mxu1 %vm1372_vm1, %v5109_v14 }
  0xa4   :  { %2213 = vmatpush1.bf16.msra.mxu0 %v4412_v10  ;;  %2256 = vmatpush1.bf16.msra.mxu1 %v4415_v11  ;;  %v4486_v10 = vld [vmem:[%s7825_s0 + $0x538] ss:$196 sps:$4 sm:$0xff]   ;;  %v4489_v11 = vld [vmem:[%s7825_s0 + $0x540] ss:$196 sps:$4 sm:$0xff]  }
  0xa5   :  { %2214 = vmatprep.subr.bf16.mxu0 %v4420_v12  ;;  %2257 = vmatprep.subr.bf16.mxu1 %v4423_v13  ;;  %v4005_v12 = vcombine.high %v243_v8, %v243_v8  ;;  %v4007_v13 = vcombine.high %v244_v9, %v244_v9 }
  0xa6   :  { %2244 = vmatprep.mubr.bf16.mxu0 %v4534_v1  ;;  %2287 = vmatprep.mubr.bf16.mxu1 %v4534_v1 }
  0xa8   :  { %2215 = vmatpush1.bf16.msra.mxu0 %v4418_v15  ;;  %2258 = vmatpush1.bf16.msra.mxu1 %v4421_v16  ;;  %v4004_v15 = vcombine.low %v243_v8, %v243_v8  ;;  %v4006_v16 = vcombine.low %v244_v9, %v244_v9 }
  0xa9   :  { %2216 = vmatprep.subr.bf16.mxu0 %v4426_v17  ;;  %2259 = vmatprep.subr.bf16.mxu1 %v4429_v18 }
  0xaa   :  { %v1498_v17 = vsel %vm1376_vm0, %v4004_v15, 0  ;;  %v1504_v18 = vsel %vm1376_vm0, %v4006_v16, 0 }
  0xac   :  { %2217 = vmatpush1.bf16.msra.mxu0 %v4424_v19  ;;  %2260 = vmatpush1.bf16.msra.mxu1 %v4427_v20  ;;  %v4498_v19 = vld [vmem:[%s7825_s0 + $0xb4] ss:$196 sps:$4 sm:$0xff]   ;;  %v4501_v20 = vld [vmem:[%s7825_s0 + $0xbc] ss:$196 sps:$4 sm:$0xff]  }
  0xad   :  { %2218 = vmatprep.subr.bf16.mxu0 %v4432_v21  ;;  %2261 = vmatprep.subr.bf16.mxu1 %v4435_v22  ;;  %v4496_v21 = vld [vmem:[%s7825_s0 + $0xb0] ss:$196 sps:$4 sm:$0xff]   ;;  %v4499_v22 = vld [vmem:[%s7825_s0 + $0xb8] ss:$196 sps:$4 sm:$0xff]  }
  0xb0   :  { %2219 = vmatpush1.bf16.msra.mxu0 %v4430_v25  ;;  %2262 = vmatpush1.bf16.msra.mxu1 %v4433_v26  ;;  %v4502_v25 = vld [vmem:[%s7825_s0 + $0x238] ss:$196 sps:$4 sm:$0xff]   ;;  %v4505_v26 = vld [vmem:[%s7825_s0 + $0x240] ss:$196 sps:$4 sm:$0xff]  }
  0xb1   :  { %4045 = vmatprep.subr.msk.bf16.mxu0 %vm1376_vm0, %v3997_v28  ;;  %4047 = vmatprep.subr.msk.bf16.mxu1 %vm1376_vm0, %v3999_v29  ;;  %v4510_v28 = vld [vmem:[%s7825_s0 + $0x3c4] ss:$196 sps:$4 sm:$0xff]   ;;  %v4513_v29 = vld [vmem:[%s7825_s0 + $0x3cc] ss:$196 sps:$4 sm:$0xff]  }
  0xb4   :  { %2221 = vmatpush1.bf16.msra.mxu0 %v1474_v32  ;;  %2264 = vmatpush1.bf16.msra.mxu1 %v1480_v33  ;;  %v4516_v32 = vld [vmem:[%s7825_s0 + $0x54c] ss:$196 sps:$4 sm:$0xff]  }
  0xb5   :  { %2298 = vmatprep.subr.bf16.mxu0 %v4442_v34  ;;  %2341 = vmatprep.subr.bf16.mxu1 %v4445_v35  ;;  %v245_v33 = vld [vmem:[%s7825_s0 + $0x6d0] sm:$0xff]  ;;  %v246_v34 = vld [vmem:[%s7825_s0 + $0x6d8] sm:$0xff]  ;;  %v4514_v35 = vld [vmem:[%s7825_s0 + $0x548] ss:$196 sps:$4 sm:$0xff]  }
  0xb7   :  { %4046 = vmatmul.mubr.msk.bf16.vlgmr.msra.gmra.mrb[32].mxu0 %vm1372_vm1, %v5109_v14  ;;  %4048 = vmatmul.mubr.msk.bf16.vlgmr.msra.gmra.mrb[32].mxu1 %vm1372_vm1, %v5109_v14 }
  0xb8   :  { %2299 = vmatpush1.bf16.msra.mxu0 %v4440_v36  ;;  %2342 = vmatpush1.bf16.msra.mxu1 %v4443_v37  ;;  %v4517_v36 = vld [vmem:[%s7825_s0 + $0x550] ss:$196 sps:$4 sm:$0xff]   ;;  %v4009_v37 = vcombine.high %v245_v33, %v245_v33 }
  0xb9   :  { %2300 = vmatprep.subr.bf16.mxu0 %v4448_v38  ;;  %2343 = vmatprep.subr.bf16.mxu1 %v4451_v39  ;;  %v4011_v38 = vcombine.high %v246_v34, %v246_v34  ;;  %v4008_v39 = vcombine.low %v245_v33, %v245_v33 }
  0xba   :  { %2330 = vmatprep.mubr.bf16.mxu0 %v4534_v1  ;;  %2373 = vmatprep.mubr.bf16.mxu1 %v4534_v1 }
  0xbb   :  { %v1510_v48 = vsel %vm1376_vm0, %v4008_v39, 0 }
  0xbc   :  { %2301 = vmatpush1.bf16.msra.mxu0 %v4446_v40  ;;  %2344 = vmatpush1.bf16.msra.mxu1 %v4449_v41  ;;  %v4010_v40 = vcombine.low %v246_v34, %v246_v34 }
  0xbd   :  { %2302 = vmatprep.subr.bf16.mxu0 %v4454_v42  ;;  %2345 = vmatprep.subr.bf16.mxu1 %v4457_v43 }
  0xbe   :  { %v1516_v49 = vsel %vm1376_vm0, %v4010_v40, 0 }
  0xc0   :  { %2303 = vmatpush1.bf16.msra.mxu0 %v4452_v44  ;;  %2346 = vmatpush1.bf16.msra.mxu1 %v4455_v45 }
  0xc1   :  { %2304 = vmatprep.subr.bf16.mxu0 %v4460_v46  ;;  %2347 = vmatprep.subr.bf16.mxu1 %v4463_v47 }
  0xc4   :  { %2305 = vmatpush1.bf16.msra.mxu0 %v4458_v50  ;;  %2348 = vmatpush1.bf16.msra.mxu1 %v4461_v51  ;;  %v4524_v51 = vld [vmem:[%s7825_s0 + $0xc0] ss:$196 sps:$4 sm:$0xff]  }
  0xc5   :  { %4049 = vmatprep.subr.msk.bf16.mxu0 %vm1376_vm0, %v4001_v52  ;;  %4051 = vmatprep.subr.msk.bf16.mxu1 %vm1376_vm0, %v4003_v53  ;;  %v4535_v52 = vmov 0.0   ;;  %v4525_v53 = vld [vmem:[%s7825_s0 + $0x248] ss:$196 sps:$4 sm:$0xff]  }
  0xc8   :  { %2307 = vmatpush1.bf16.msra.mxu0 %v1486_v56  ;;  %2350 = vmatpush1.bf16.msra.mxu1 %v1492_v27  ;;  %v4528_v56 = vld [vmem:[%s7825_s0 + $0x6e0] ss:$0 sps:$4 sm:$0xff]  }
  0xc9   :  { %2384 = vmatprep.subr.bf16.mxu0 %v4470_v57  ;;  %2427 = vmatprep.subr.bf16.mxu1 %v4473_v58 }
  0xcb   :  { %4050 = vmatmul.mubr.msk.bf16.vlgmr.msra.gmra.mrb[36].mxu0 %vm1372_vm1, %v5109_v14  ;;  %4052 = vmatmul.mubr.msk.bf16.vlgmr.msra.gmra.mrb[36].mxu1 %vm1372_vm1, %v5109_v14 }
  0xcc   :  { %2385 = vmatpush1.bf16.msra.mxu0 %v4468_v59  ;;  %2428 = vmatpush1.bf16.msra.mxu1 %v4471_v60 }
  0xcd   :  { %2386 = vmatprep.subr.bf16.mxu0 %v4476_v61  ;;  %2429 = vmatprep.subr.bf16.mxu1 %v4479_v62 }
  0xce   :  { %2416 = vmatprep.mubr.bf16.mxu0 %v4534_v1  ;;  %2459 = vmatprep.mubr.bf16.mxu1 %v4534_v1 }
  0xd0   :  { %2387 = vmatpush1.bf16.msra.mxu0 %v4474_v63  ;;  %2430 = vmatpush1.bf16.msra.mxu1 %v4477_v0  ;;  %v1522_v63 = vsel %vm1376_vm0, %v4528_v56, 0 }
  0xd1   :  { %2388 = vmatprep.subr.bf16.mxu0 %v4482_v2  ;;  %2431 = vmatprep.subr.bf16.mxu1 %v4485_v3 }
  0xd4   :  { %2389 = vmatpush1.bf16.msra.mxu0 %v4480_v4  ;;  %2432 = vmatpush1.bf16.msra.mxu1 %v4483_v5 }
  0xd5   :  { %2390 = vmatprep.subr.bf16.mxu0 %v4488_v6  ;;  %2433 = vmatprep.subr.bf16.mxu1 %v4491_v7 }
  0xd8   :  { %2391 = vmatpush1.bf16.msra.mxu0 %v4486_v10  ;;  %2434 = vmatpush1.bf16.msra.mxu1 %v4489_v11 }
  0xd9   :  { %4053 = vmatprep.subr.msk.bf16.mxu0 %vm1376_vm0, %v4005_v12  ;;  %4055 = vmatprep.subr.msk.bf16.mxu1 %vm1376_vm0, %v4007_v13 }
  0xdc   :  { %2393 = vmatpush1.bf16.msra.mxu0 %v1498_v17  ;;  %2436 = vmatpush1.bf16.msra.mxu1 %v1504_v18  ;;  %v5409_v18 = vpop.permute.xlu0 %252 }
  0xdd   :  { %2470 = vmatprep.subr.bf16.mxu0 %v4498_v19  ;;  %2513 = vmatprep.subr.bf16.mxu1 %v4501_v20 }
  0xdf   :  { %4054 = vmatmul.mubr.msk.bf16.vlgmr.msra.gmra.mrb[40].mxu0 %vm1372_vm1, %v5109_v14  ;;  %4056 = vmatmul.mubr.msk.bf16.vlgmr.msra.gmra.mrb[40].mxu1 %vm1372_vm1, %v5109_v14 }
  0xe0   :  { %2471 = vmatpush1.bf16.msra.mxu0 %v4496_v21  ;;  %2514 = vmatpush1.bf16.msra.mxu1 %v4499_v22  ;;  %v5418_v21 = vpop.permute.xlu0 %257 }
  0xe1   :  { %2472 = vmatprep.subr.bf16.mxu0 %v4504_v23  ;;  %2515 = vmatprep.subr.bf16.mxu1 %v4507_v24 }
  0xe2   :  { %2502 = vmatprep.mubr.bf16.mxu0 %v4534_v1  ;;  %2545 = vmatprep.mubr.bf16.mxu1 %v4534_v1  ;;  %v4519_v1 = vld [vmem:[%s7825_s0 + $0x554] ss:$196 sps:$4 sm:$0xff]  }
  0xe4   :  { %2473 = vmatpush1.bf16.msra.mxu0 %v4502_v25  ;;  %2516 = vmatpush1.bf16.msra.mxu1 %v4505_v26 }
  0xe5   :  { %2474 = vmatprep.subr.bf16.mxu0 %v4510_v28  ;;  %2517 = vmatprep.subr.bf16.mxu1 %v4513_v29 }
  0xe8   :  { %2475 = vmatpush1.bf16.msra.mxu0 %v4508_v30  ;;  %2518 = vmatpush1.bf16.msra.mxu1 %v4511_v31 }
  0xe9   :  { %2476 = vmatprep.subr.bf16.mxu0 %v4516_v32  ;;  %2519 = vmatprep.subr.bf16.mxu1 %v4519_v1 }
  0xea   :  { %v5345_v41 = vpop.f32.mrb[0].mxu0  ;;  %v5347_v42 = vpop.f32.mrb[0].mxu1 }
  0xeb   :  { %v1560_v43 = vpop.f32.mrb[1].mxu0  ;;  %v5349_v44 = vpop.f32.mrb[1].mxu1  ;;  %v5413_v19 = vadd.f32 %v5345_v41, %v5409_v18  ;;  %v5431_v25 = vadd.f32 %v5347_v42, %v5409_v18 }
  0xec   :  { %v5351_v45 = vpop.f32.mrb[2].mxu0  ;;  %2477 = vmatpush1.bf16.msra.mxu0 %v4514_v35  ;;  %2520 = vmatpush1.bf16.msra.mxu1 %v4517_v36  ;;  %v5353_v46 = vpop.f32.mrb[2].mxu1  ;;  %v5416_v20 = vadd.f32 %v1560_v43, %v5409_v18  ;;  %v5450_v34 = vadd.f32 %v5349_v44, %v5409_v18 }
  0xed   :  { %v1564_v47 = vpop.f32.mrb[3].mxu0  ;;  %4057 = vmatprep.subr.msk.bf16.mxu0 %vm1376_vm0, %v4009_v37  ;;  %4059 = vmatprep.subr.msk.bf16.mxu1 %vm1376_vm0, %v4011_v38  ;;  %v5359_v50 = vpop.f32.mrb[3].mxu1  ;;  %v5424_v23 = vadd.f32 %v5351_v45, %v5418_v21  ;;  %v5454_v35 = vadd.f32 %v5353_v46, %v5418_v21 }
  0xee   :  { %v2597_v22 = vadd.f32 %v5416_v20, %v5413_v19  ;;  %v5427_v24 = vadd.f32 %v1564_v47, %v5418_v21  ;;  %v5467_v41 = vadd.f32 %v5359_v50, %v5418_v21 }
  0xf0   :  { %2479 = vmatpush1.bf16.msra.mxu0 %v1510_v48  ;;  %2522 = vmatpush1.bf16.msra.mxu1 %v1516_v49  ;;  %v2647_v1 = vadd.f32 %v5427_v24, %v5424_v23  ;;  %v2598_v33 = vadd.f32 %v2597_v22, %v5431_v25 }
  0xf1   :  { %4168 = vmatprep.subr.bf16.mxu0 %v4535_v52 }
  0xf2   :  { %v2599_v39 = vadd.f32 %v2598_v33, %v5450_v34  ;;  %v2648_v40 = vadd.f32 %v2647_v1, %v5454_v35 }
  0xf3   :  { %4058 = vmatmul.mubr.msk.bf16.vlgmr.msra.gmra.mrb[44].mxu0 %vm1372_vm1, %v5109_v14  ;;  %4060 = vmatmul.mubr.msk.bf16.vlgmr.msra.gmra.mrb[44].mxu1 %vm1372_vm1, %v5109_v14 }
  0xf4   :  { %4169 = vmatpush3.bf16.msra.mxu0 %v4524_v51  ;;  %4178 = vmatprep.mubr.msk.bf16.mxu0 %vm4536_vm2, %v4535_v52  ;;  %v2649_v45 = vadd.f32 %v2648_v40, %v5467_v41 }
  0xf5   :  { %4170 = vmatprep.subr.bf16.mxu0 %v4535_v52 }
  0xf8   :  { %4171 = vmatpush3.bf16.msra.mxu0 %v4525_v53 }
  0xf9   :  { %4172 = vmatprep.subr.bf16.mxu0 %v4535_v52 }
  0xfc   :  { %4173 = vmatpush3.bf16.msra.mxu0 %v4526_v54 }
  0xfd   :  { %4174 = vmatprep.subr.bf16.mxu0 %v4535_v52 }
  0xfe   :  { %v1644_v27 = vpop.f32.mrb[4].mxu0  ;;  %v1687_v57 = vpop.f32.mrb[4].mxu1 }
  0xff   :  { %v1646_v58 = vpop.f32.mrb[5].mxu0  ;;  %v1689_v59 = vpop.f32.mrb[5].mxu1  ;;  %v5461_v38 = vadd.f32 %v1644_v27, %v5409_v18  ;;  %v5483_v49 = vadd.f32 %v1687_v57, %v5409_v18 }
 0x100   :  { %v1648_v60 = vpop.f32.mrb[6].mxu0  ;;  %4175 = vmatpush3.bf16.msra.mxu0 %v4527_v55  ;;  %v1691_v61 = vpop.f32.mrb[6].mxu1  ;;  %v5471_v43 = vadd.f32 %v1646_v58, %v5409_v18 }
 0x101   :  { %v1650_v62 = vpop.f32.mrb[7].mxu0  ;;  %4176 = vmatprep.subr.bf16.mxu0 %v4535_v52  ;;  %v1693_v0 = vpop.f32.mrb[7].mxu1  ;;  %v2600_v42 = vadd.f32 %v2599_v39, %v5461_v38  ;;  %v5474_v44 = vadd.f32 %v1648_v60, %v5418_v21  ;;  %v5488_v52 = vadd.f32 %v1689_v59, %v5409_v18  ;;  %v5491_v53 = vadd.f32 %v1691_v61, %v5418_v21 }
 0x102   :  { %v5480_v48 = vadd.f32 %v1650_v62, %v5418_v21  ;;  %v5503_v58 = vadd.f32 %v1693_v0, %v5418_v21 }
 0x103   :  { %v2601_v46 = vadd.f32 %v2600_v42, %v5471_v43  ;;  %v2650_v47 = vadd.f32 %v2649_v45, %v5474_v44 }
 0x104   :  { %4177 = vmatpush3.bf16.msra.mxu0 %v1522_v63 }
 0x105   :  { %v2651_v50 = vadd.f32 %v2650_v47, %v5480_v48  ;;  %v2602_v51 = vadd.f32 %v2601_v46, %v5483_v49 }
 0x107   :  { %4179 = vmatmul.mubr.msk.bf16.vlgmr.msra.gmra.mrb[48].mxu0 %vm1372_vm1, %v5109_v14  ;;  %v2603_v27 = vadd.f32 %v2602_v51, %v5488_v52  ;;  %v2652_v57 = vadd.f32 %v2651_v50, %v5491_v53 }
 0x109   :  { %v2653_v33 = vadd.f32 %v2652_v57, %v5503_v58 }
 0x112   :  { %v1730_v2 = vpop.f32.mrb[8].mxu0  ;;  %v5383_v3 = vpop.f32.mrb[8].mxu1 }
 0x113   :  { %v1732_v4 = vpop.f32.mrb[9].mxu0  ;;  %v5385_v5 = vpop.f32.mrb[9].mxu1  ;;  %v5494_v54 = vadd.f32 %v1730_v2, %v5409_v18 }
 0x114   :  { %v1734_v6 = vpop.f32.mrb[10].mxu0  ;;  %v5387_v7 = vpop.f32.mrb[10].mxu1  ;;  %v5515_v2 = vadd.f32 %v1732_v4, %v5409_v18  ;;  %v5533_v4 = vadd.f32 %v5383_v3, %v5409_v18  ;;  %v5539_v46 = vadd.f32 %v5385_v5, %v5409_v18 }
 0x115   :  { %v5389_v8 = vpop.f32.mrb[11].mxu0  ;;  %v5391_v9 = vpop.f32.mrb[11].mxu1  ;;  %v2604_v63 = vadd.f32 %v2603_v27, %v5494_v54  ;;  %v5518_v22 = vadd.f32 %v1734_v6, %v5418_v21  ;;  %v5543_v47 = vadd.f32 %v5387_v7, %v5418_v21 }
 0x116   :  { %v5529_v42 = vadd.f32 %v5389_v8, %v5418_v21  ;;  %v5553_v51 = vadd.f32 %v5391_v9, %v5418_v21 }
 0x117   :  { %v2605_v39 = vadd.f32 %v2604_v63, %v5515_v2  ;;  %v2654_v40 = vadd.f32 %v2653_v33, %v5518_v22 }
 0x119   :  { %v2655_v6 = vadd.f32 %v2654_v40, %v5529_v42  ;;  %v2606_v45 = vadd.f32 %v2605_v39, %v5533_v4 }
 0x11b   :  { %v2607_v50 = vadd.f32 %v2606_v45, %v5539_v46  ;;  %v2656_v3 = vadd.f32 %v2655_v6, %v5543_v47 }
 0x126   :  { %v5393_v10 = vpop.f32.mrb[12].mxu0  ;;  %v5395_v11 = vpop.f32.mrb[12].mxu1 }
 0x127   :  { %v5397_v12 = vpop.f32.mrb[13].mxu0  ;;  %v5399_v14 = vpop.f32.mrb[13].mxu1  ;;  %v5547_v8 = vadd.f32 %v5393_v10, %v5409_v18  ;;  %v2657_v10 = vadd.f32 %v2656_v3, %v5553_v51 }
 0x128   :  { %v5401_v13 = vpop.f32.mrb[14].mxu0  ;;  %v5403_v15 = vpop.f32.mrb[14].mxu1  ;;  %v5558_v5 = vadd.f32 %v5397_v12, %v5409_v18  ;;  %v5575_v12 = vadd.f32 %v5395_v11, %v5409_v18 }
 0x129   :  { %v5405_v16 = vpop.f32.mrb[15].mxu0  ;;  %v5407_v17 = vpop.f32.mrb[15].mxu1  ;;  %7930 = vst [vmem:[#allocation2_spill] sm:$0xff] %v5547_v8  ;;  %v2608_v27 = vadd.f32 %v2607_v50, %v5547_v8  ;;  %v5562_v7 = vadd.f32 %v5401_v13, %v5418_v21  ;;  %v5591_v11 = vadd.f32 %v5403_v15, %v5418_v21 }
 0x12a   :  { %7931 = vst [vmem:[#allocation3_spill] sm:$0xff] %v5558_v5  ;;  %v5571_v39 = vadd.f32 %v5405_v16, %v5418_v21  ;;  %v5587_v16 = vadd.f32 %v5399_v14, %v5409_v18 }
 0x12b   :  { %7932 = vst [vmem:[#allocation4_spill] sm:$0xff] %v5562_v7  ;;  %v2609_v33 = vadd.f32 %v2608_v27, %v5558_v5  ;;  %v2658_v9 = vadd.f32 %v2657_v10, %v5562_v7 }
 0x12c   :  { %7933 = vst [vmem:[#allocation5_spill] sm:$0xff] %v5587_v16 }
 0x12d   :  { %v2659_v27 = vadd.f32 %v2658_v9, %v5571_v39  ;;  %v2610_v10 = vadd.f32 %v2609_v33, %v5575_v12  ;;  %v5601_v9 = vadd.f32 %v5407_v17, %v5418_v21 }
 0x12f   :  { %v2611_v7 = vadd.f32 %v2610_v10, %v5587_v16  ;;  %v2660_v8 = vadd.f32 %v2659_v27, %v5591_v11  ;;  %7935 = vst [vmem:[#allocation7_spill] sm:$0xff] %v5601_v9 }
 0x13a   :  { %v5433_v26 = vpop.f32.mrb[16].mxu0  ;;  %v5435_v28 = vpop.f32.mrb[16].mxu1 }
 0x13b   :  { %v5437_v29 = vpop.f32.mrb[17].mxu0  ;;  %v5439_v30 = vpop.f32.mrb[17].mxu1  ;;  %v5595_v5 = vadd.f32 %v5433_v26, %v5409_v18  ;;  %v2661_v26 = vadd.f32 %v2660_v8, %v5601_v9 }
 0x13c   :  { %v5441_v31 = vpop.f32.mrb[18].mxu0  ;;  %v5443_v32 = vpop.f32.mrb[18].mxu1  ;;  %v5606_v14 = vadd.f32 %v5437_v29, %v5409_v18 }
 0x13d   :  { %v5456_v36 = vpop.f32.mrb[19].mxu0  ;;  %v5458_v37 = vpop.f32.mrb[19].mxu1  ;;  %7934 = vst [vmem:[#allocation6_spill] sm:$0xff] %v5595_v5  ;;  %v2612_v33 = vadd.f32 %v2611_v7, %v5595_v5  ;;  %v5610_v15 = vadd.f32 %v5441_v31, %v5418_v21  ;;  %v5621_v7 = vadd.f32 %v5435_v28, %v5409_v18  ;;  %v5627_v31 = vadd.f32 %v5439_v30, %v5409_v18 }
 0x13e   :  { %7936 = vst [vmem:[#allocation8_spill] sm:$0xff] %v5606_v14  ;;  %v5617_v17 = vadd.f32 %v5456_v36, %v5418_v21  ;;  %v5631_v8 = vadd.f32 %v5443_v32, %v5418_v21  ;;  %v5641_v30 = vadd.f32 %v5458_v37, %v5418_v21 }
 0x13f   :  { %7937 = vst [vmem:[#allocation9_spill] sm:$0xff] %v5610_v15  ;;  %v2613_v10 = vadd.f32 %v2612_v33, %v5606_v14  ;;  %v2662_v27 = vadd.f32 %v2661_v26, %v5610_v15  ;;  %7939 = vst [vmem:[#allocation11_spill] sm:$0xff] %v5621_v7 }
 0x140   :  { %7938 = vst [vmem:[#allocation10_spill] sm:$0xff] %v5617_v17  ;;  %7940 = vst [vmem:[#allocation12_spill] sm:$0xff] %v5627_v31 }
 0x141   :  { %v2663_v29 = vadd.f32 %v2662_v27, %v5617_v17  ;;  %v2614_v5 = vadd.f32 %v2613_v10, %v5621_v7 }
 0x143   :  { %v2615_v10 = vadd.f32 %v2614_v5, %v5627_v31  ;;  %v2664_v7 = vadd.f32 %v2663_v29, %v5631_v8 }
 0x145   :  { %v2665_v5 = vadd.f32 %v2664_v7, %v5641_v30 }
 0x14e   :  { %v5496_v55 = vpop.f32.mrb[20].mxu0  ;;  %v5498_v56 = vpop.f32.mrb[20].mxu1 }
 0x14f   :  { %v5505_v60 = vpop.f32.mrb[21].mxu0  ;;  %v5507_v59 = vpop.f32.mrb[21].mxu1  ;;  %v5635_v36 = vadd.f32 %v5496_v55, %v5409_v18 }
 0x150   :  { %v5509_v61 = vpop.f32.mrb[22].mxu0  ;;  %v5511_v62 = vpop.f32.mrb[22].mxu1  ;;  %v5648_v55 = vadd.f32 %v5505_v60, %v5409_v18 }
 0x151   :  { %v5520_v1 = vpop.f32.mrb[23].mxu0  ;;  %v5522_v0 = vpop.f32.mrb[23].mxu1  ;;  %7941 = vst [vmem:[#allocation13_spill] sm:$0xff] %v5635_v36  ;;  %v2616_v9 = vadd.f32 %v2615_v10, %v5635_v36  ;;  %v5652_v16 = vadd.f32 %v5509_v61, %v5418_v21  ;;  %v5663_v10 = vadd.f32 %v5498_v56, %v5409_v18  ;;  %v5669_v61 = vadd.f32 %v5507_v59, %v5409_v18 }
 0x152   :  { %7942 = vst [vmem:[#allocation14_spill] sm:$0xff] %v5648_v55  ;;  %v5659_v31 = vadd.f32 %v5520_v1, %v5418_v21 }
 0x153   :  { %v2617_v29 = vadd.f32 %v2616_v9, %v5648_v55  ;;  %v2666_v37 = vadd.f32 %v2665_v5, %v5652_v16  ;;  %7944 = vst [vmem:[#allocation16_spill] sm:$0xff] %v5663_v10  ;;  %7945 = vst [vmem:[#allocation17_spill] sm:$0xff] %v5669_v61  ;;  %v5673_v9 = vadd.f32 %v5511_v62, %v5418_v21 }
 0x154   :  { %7943 = vst [vmem:[#allocation15_spill] sm:$0xff] %v5659_v31  ;;  %v5682_v5 = vadd.f32 %v5522_v0, %v5418_v21 }
 0x155   :  { %v2667_v60 = vadd.f32 %v2666_v37, %v5659_v31  ;;  %v2618_v36 = vadd.f32 %v2617_v29, %v5663_v10  ;;  %7946 = vst [vmem:[#allocation18_spill] sm:$0xff] %v5673_v9 }
 0x156   :  { %7948 = vst [vmem:[#allocation20_spill] sm:$0xff] %v5682_v5 }
 0x157   :  { %v2619_v1 = vadd.f32 %v2618_v36, %v5669_v61  ;;  %v2668_v56 = vadd.f32 %v2667_v60, %v5673_v9 }
 0x162   :  { %v2074_v57 = vpop.f32.mrb[24].mxu0  ;;  %v5565_v63 = vpop.f32.mrb[24].mxu1 }
 0x163   :  { %v2076_v40 = vpop.f32.mrb[25].mxu0  ;;  %v5577_v13 = vpop.f32.mrb[25].mxu1  ;;  %v5676_v7 = vadd.f32 %v2074_v57, %v5409_v18  ;;  %v2669_v57 = vadd.f32 %v2668_v56, %v5682_v5 }
 0x164   :  { %v2078_v6 = vpop.f32.mrb[26].mxu0  ;;  %v5579_v45 = vpop.f32.mrb[26].mxu1  ;;  %v5686_v59 = vadd.f32 %v2076_v40, %v5409_v18  ;;  %v5699_v40 = vadd.f32 %v5565_v63, %v5409_v18  ;;  %v5705_v5 = vadd.f32 %v5577_v13, %v5409_v18 }
 0x165   :  { %v2080_v50 = vpop.f32.mrb[27].mxu0  ;;  %v5581_v3 = vpop.f32.mrb[27].mxu1  ;;  %7947 = vst [vmem:[#allocation19_spill] sm:$0xff] %v5676_v7  ;;  %v2620_v29 = vadd.f32 %v2619_v1, %v5676_v7  ;;  %v5689_v37 = vadd.f32 %v2078_v6, %v5418_v21 }
 0x166   :  { %v5695_v1 = vadd.f32 %v2080_v50, %v5418_v21  ;;  %7949 = vst [vmem:[#allocation21_spill] sm:$0xff] %v5699_v40  ;;  %7950 = vst [vmem:[#allocation22_spill] sm:$0xff] %v5705_v5 }
 0x167   :  { %v2621_v9 = vadd.f32 %v2620_v29, %v5686_v59  ;;  %v2670_v0 = vadd.f32 %v2669_v57, %v5689_v37  ;;  %v5709_v29 = vadd.f32 %v5579_v45, %v5418_v21 }
 0x169   :  { %v2671_v55 = vadd.f32 %v2670_v0, %v5695_v1  ;;  %v2622_v56 = vadd.f32 %v2621_v9, %v5699_v40  ;;  %7951 = vst [vmem:[#allocation23_spill] sm:$0xff] %v5709_v29  ;;  %v5718_v0 = vadd.f32 %v5581_v3, %v5418_v21 }
 0x16b   :  { %v2623_v63 = vadd.f32 %v2622_v56, %v5705_v5  ;;  %v2672_v57 = vadd.f32 %v2671_v55, %v5709_v29  ;;  %7953 = vst [vmem:[#allocation25_spill] sm:$0xff] %v5718_v0 }
 0x16d   :  { %v2673_v45 = vadd.f32 %v2672_v57, %v5718_v0 }
 0x176   :  { %v2160_v33 = vpop.f32.mrb[28].mxu0  ;;  %v2203_v26 = vpop.f32.mrb[28].mxu1 }
 0x177   :  { %v2162_v28 = vpop.f32.mrb[29].mxu0  ;;  %v2205_v14 = vpop.f32.mrb[29].mxu1  ;;  %v5712_v50 = vadd.f32 %v2160_v33, %v5409_v18  ;;  %v5734_v3 = vadd.f32 %v2203_v26, %v5409_v18 }
 0x178   :  { %v2164_v15 = vpop.f32.mrb[30].mxu0  ;;  %v2207_v27 = vpop.f32.mrb[30].mxu1  ;;  %v5722_v13 = vadd.f32 %v2162_v28, %v5409_v18 }
 0x179   :  { %v2166_v32 = vpop.f32.mrb[31].mxu0  ;;  %v5643_v17 = vpop.f32.mrb[31].mxu1  ;;  %7952 = vst [vmem:[#allocation24_spill] sm:$0xff] %v5712_v50  ;;  %v2624_v9 = vadd.f32 %v2623_v63, %v5712_v50  ;;  %v5725_v40 = vadd.f32 %v2164_v15, %v5418_v21  ;;  %7957 = vst [vmem:[#allocation29_spill] sm:$0xff] %v5734_v3  ;;  %v5739_v15 = vadd.f32 %v2205_v14, %v5409_v18 }
 0x17a   :  { %7954 = vst [vmem:[#allocation26_spill] sm:$0xff] %v5722_v13  ;;  %v5731_v55 = vadd.f32 %v2166_v32, %v5418_v21  ;;  %v5742_v57 = vadd.f32 %v2207_v27, %v5418_v21  ;;  %v5751_v14 = vadd.f32 %v5643_v17, %v5418_v21 }
 0x17b   :  { %7955 = vst [vmem:[#allocation27_spill] sm:$0xff] %v5725_v40  ;;  %v2625_v33 = vadd.f32 %v2624_v9, %v5722_v13  ;;  %v2674_v56 = vadd.f32 %v2673_v45, %v5725_v40 }
 0x17c   :  { %7956 = vst [vmem:[#allocation28_spill] sm:$0xff] %v5731_v55 }
 0x17d   :  { %v2675_v28 = vadd.f32 %v2674_v56, %v5731_v55  ;;  %v2626_v50 = vadd.f32 %v2625_v33, %v5734_v3 }
 0x17f   :  { %v2627_v29 = vadd.f32 %v2626_v50, %v5739_v15  ;;  %v2676_v56 = vadd.f32 %v2675_v28, %v5742_v57 }
 0x18a   :  { %v2246_v62 = vpop.f32.mrb[32].mxu0  ;;  %v2289_v10 = vpop.f32.mrb[32].mxu1 }
 0x18b   :  { %v2248_v31 = vpop.f32.mrb[33].mxu0  ;;  %v2291_v36 = vpop.f32.mrb[33].mxu1  ;;  %v5745_v40 = vadd.f32 %v2246_v62, %v5409_v18  ;;  %v2677_v62 = vadd.f32 %v2676_v56, %v5751_v14  ;;  %v5767_v17 = vadd.f32 %v2289_v10, %v5409_v18 }
 0x18c   :  { %v2250_v61 = vpop.f32.mrb[34].mxu0  ;;  %v2293_v60 = vpop.f32.mrb[34].mxu1  ;;  %v5755_v33 = vadd.f32 %v2248_v31, %v5409_v18 }
 0x18d   :  { %v2252_v6 = vpop.f32.mrb[35].mxu0  ;;  %v2295_v7 = vpop.f32.mrb[35].mxu1  ;;  %7958 = vst [vmem:[#allocation30_spill] sm:$0xff] %v5745_v40  ;;  %v2628_v27 = vadd.f32 %v2627_v29, %v5745_v40  ;;  %v5758_v3 = vadd.f32 %v2250_v61, %v5418_v21  ;;  %7962 = vst [vmem:[#allocation34_spill] sm:$0xff] %v5767_v17  ;;  %v5772_v40 = vadd.f32 %v2291_v36, %v5409_v18 }
 0x18e   :  { %7959 = vst [vmem:[#allocation31_spill] sm:$0xff] %v5755_v33  ;;  %v5764_v28 = vadd.f32 %v2252_v6, %v5418_v21  ;;  %v5775_v61 = vadd.f32 %v2293_v60, %v5418_v21 }
 0x18f   :  { %7960 = vst [vmem:[#allocation32_spill] sm:$0xff] %v5758_v3  ;;  %v2629_v55 = vadd.f32 %v2628_v27, %v5755_v33  ;;  %v2678_v50 = vadd.f32 %v2677_v62, %v5758_v3  ;;  %7963 = vst [vmem:[#allocation35_spill] sm:$0xff] %v5772_v40  ;;  %v5783_v33 = vadd.f32 %v2295_v7, %v5418_v21 }
 0x190   :  { %7961 = vst [vmem:[#allocation33_spill] sm:$0xff] %v5764_v28  ;;  %7964 = vst [vmem:[#allocation36_spill] sm:$0xff] %v5775_v61 }
 0x191   :  { %v2630_v29 = vadd.f32 %v2629_v55, %v5767_v17  ;;  %v2679_v31 = vadd.f32 %v2678_v50, %v5764_v28 }
 0x193   :  { %v2631_v27 = vadd.f32 %v2630_v29, %v5772_v40  ;;  %v2680_v6 = vadd.f32 %v2679_v31, %v5775_v61 }
 0x195   :  { %v2681_v29 = vadd.f32 %v2680_v6, %v5783_v33 }
 0x19e   :  { %v2332_v5 = vpop.f32.mrb[36].mxu0  ;;  %v2375_v63 = vpop.f32.mrb[36].mxu1 }
 0x19f   :  { %v2334_v9 = vpop.f32.mrb[37].mxu0  ;;  %v2377_v45 = vpop.f32.mrb[37].mxu1  ;;  %v5778_v56 = vadd.f32 %v2332_v5, %v5409_v18 }
 0x1a0   :  { %v2336_v13 = vpop.f32.mrb[38].mxu0  ;;  %v2379_v32 = vpop.f32.mrb[38].mxu1  ;;  %v5787_v36 = vadd.f32 %v2334_v9, %v5409_v18  ;;  %v5799_v9 = vadd.f32 %v2375_v63, %v5409_v18  ;;  %v5804_v3 = vadd.f32 %v2377_v45, %v5409_v18 }
 0x1a1   :  { %v2338_v26 = vpop.f32.mrb[39].mxu0  ;;  %v2381_v0 = vpop.f32.mrb[39].mxu1  ;;  %7965 = vst [vmem:[#allocation37_spill] sm:$0xff] %v5778_v56  ;;  %v2632_v55 = vadd.f32 %v2631_v27, %v5778_v56  ;;  %v5790_v60 = vadd.f32 %v2336_v13, %v5418_v21  ;;  %v5807_v6 = vadd.f32 %v2379_v32, %v5418_v21 }
 0x1a2   :  { %v5796_v27 = vadd.f32 %v2338_v26, %v5418_v21  ;;  %7967 = vst [vmem:[#allocation39_spill] sm:$0xff] %v5799_v9  ;;  %7968 = vst [vmem:[#allocation40_spill] sm:$0xff] %v5804_v3  ;;  %v5815_v63 = vadd.f32 %v2381_v0, %v5418_v21 }
 0x1a3   :  { %v2633_v61 = vadd.f32 %v2632_v55, %v5787_v36  ;;  %v2682_v7 = vadd.f32 %v2681_v29, %v5790_v60  ;;  %7969 = vst [vmem:[#allocation41_spill] sm:$0xff] %v5807_v6 }
 0x1a4   :  { %7966 = vst [vmem:[#allocation38_spill] sm:$0xff] %v5796_v27  ;;  %7971 = vst [vmem:[#allocation43_spill] sm:$0xff] %v5815_v63 }
 0x1a5   :  { %v2634_v13 = vadd.f32 %v2633_v61, %v5799_v9  ;;  %v2683_v56 = vadd.f32 %v2682_v7, %v5796_v27 }
 0x1a7   :  { %v2635_v29 = vadd.f32 %v2634_v13, %v5804_v3  ;;  %v2684_v26 = vadd.f32 %v2683_v56, %v5807_v6 }
 0x1a9   :  { %v2685_v32 = vadd.f32 %v2684_v26, %v5815_v63 }
 0x1b2   :  { %v2418_v62 = vpop.f32.mrb[40].mxu0  ;;  %v2461_v10 = vpop.f32.mrb[40].mxu1 }
 0x1b3   :  { %v2420_v50 = vpop.f32.mrb[41].mxu0  ;;  %v2463_v5 = vpop.f32.mrb[41].mxu1  ;;  %v5810_v55 = vadd.f32 %v2418_v62, %v5409_v18  ;;  %v5831_v3 = vadd.f32 %v2461_v10, %v5409_v18 }
 0x1b4   :  { %v2422_v17 = vpop.f32.mrb[42].mxu0  ;;  %v2465_v28 = vpop.f32.mrb[42].mxu1  ;;  %v5819_v7 = vadd.f32 %v2420_v50, %v5409_v18 }
 0x1b5   :  { %v2424_v31 = vpop.f32.mrb[43].mxu0  ;;  %v2467_v40 = vpop.f32.mrb[43].mxu1  ;;  %7970 = vst [vmem:[#allocation42_spill] sm:$0xff] %v5810_v55  ;;  %v2636_v61 = vadd.f32 %v2635_v29, %v5810_v55  ;;  %v5822_v45 = vadd.f32 %v2422_v17, %v5418_v21  ;;  %7974 = vst [vmem:[#allocation46_spill] sm:$0xff] %v5831_v3 }
 0x1b6   :  { %7972 = vst [vmem:[#allocation44_spill] sm:$0xff] %v5819_v7  ;;  %v5828_v13 = vadd.f32 %v2424_v31, %v5418_v21  ;;  %v5839_v31 = vadd.f32 %v2465_v28, %v5418_v21  ;;  %v5847_v27 = vadd.f32 %v2467_v40, %v5418_v21 }
 0x1b7   :  { %7973 = vst [vmem:[#allocation45_spill] sm:$0xff] %v5822_v45  ;;  %v2637_v62 = vadd.f32 %v2636_v61, %v5819_v7  ;;  %v2686_v9 = vadd.f32 %v2685_v32, %v5822_v45  ;;  %v5836_v32 = vadd.f32 %v2463_v5, %v5409_v18 }
 0x1b9   :  { %v2638_v17 = vadd.f32 %v2637_v62, %v5831_v3  ;;  %v2687_v26 = vadd.f32 %v2686_v9, %v5828_v13 }
 0x1bb   :  { %v2639_v10 = vadd.f32 %v2638_v17, %v5836_v32  ;;  %v2688_v45 = vadd.f32 %v2687_v26, %v5839_v31 }
 0x1bd   :  { %v2689_v28 = vadd.f32 %v2688_v45, %v5847_v27 }
 0x1c6   :  { %v2504_v56 = vpop.f32.mrb[44].mxu0  ;;  %v2547_v0 = vpop.f32.mrb[44].mxu1 }
 0x1c7   :  { %v2506_v29 = vpop.f32.mrb[45].mxu0  ;;  %v2549_v50 = vpop.f32.mrb[45].mxu1  ;;  %v5842_v7 = vadd.f32 %v2504_v56, %v5409_v18  ;;  %v5863_v40 = vadd.f32 %v2547_v0, %v5409_v18 }
 0x1c8   :  { %v2508_v55 = vpop.f32.mrb[46].mxu0  ;;  %v2551_v6 = vpop.f32.mrb[46].mxu1  ;;  %v5851_v62 = vadd.f32 %v2506_v29, %v5409_v18 }
 0x1c9   :  { %v2510_v63 = vpop.f32.mrb[47].mxu0  ;;  %v2553_v61 = vpop.f32.mrb[47].mxu1  ;;  %v2640_v9 = vadd.f32 %v2639_v10, %v5842_v7  ;;  %v5854_v5 = vadd.f32 %v2508_v55, %v5418_v21  ;;  %7976 = vst [vmem:[#allocation48_spill] sm:$0xff] %v5863_v40  ;;  %v5868_v10 = vadd.f32 %v2549_v50, %v5409_v18  ;;  %v5871_v55 = vadd.f32 %v2551_v6, %v5418_v21 }
 0x1ca   :  { %7975 = vst [vmem:[#allocation47_spill] sm:$0xff] %v5851_v62  ;;  %v5860_v17 = vadd.f32 %v2510_v63, %v5418_v21 }
 0x1cb   :  { %v2641_v56 = vadd.f32 %v2640_v9, %v5851_v62  ;;  %v2690_v3 = vadd.f32 %v2689_v28, %v5854_v5 }
 0x1cd   :  { %v2691_v26 = vadd.f32 %v2690_v3, %v5860_v17  ;;  %v2642_v29 = vadd.f32 %v2641_v56, %v5863_v40  ;;  %v5879_v3 = vadd.f32 %v2553_v61, %v5418_v21  ;;  %v3100_v61 = vld [vmem:[%s7828_s3 + $0x8] sm:$0xff] }
 0x1cf   :  { %v2692_v9 = vadd.f32 %v2691_v26, %v5871_v55  ;;  %v2643_v0 = vadd.f32 %v2642_v29, %v5868_v10 }
 0x1d1   :  { %v2693_v40 = vadd.f32 %v2692_v9, %v5879_v3 }
 0x1da   :  { %v2590_v45 = vpop.f32.mrb[48].mxu0 }
 0x1db   :  { %v5875_v28 = vadd.f32 %v2590_v45, %v5409_v18  ;;  %v4180_v63 = vpop.f32.mrb[49].mxu0  ;;  %v3099_v18 = vld [vmem:[%s7828_s3] sm:$0xff] }
 0x1dc   :  { %v2593_v62 = vpop.f32.mrb[50].mxu0 }
 0x1dd   :  { %v5882_v56 = vadd.f32 %v2593_v62, %v5418_v21  ;;  %v4181_v50 = vpop.f32.mrb[51].mxu0  ;;  %v2644_v6 = vadd.f32 %v2643_v0, %v5875_v28  ;;  %v3209_v21 = vld [vmem:[%s7829_s4] sm:$0xff] }
 0x1df   :  { %2645 = vadd.xlane.f32.xlu1 %v2644_v6  ;;  %v2694_v26 = vadd.f32 %v2693_v40, %v5882_v56 }
 0x1e3   :  { %2695 = vadd.xlane.f32.xlu1 %v2694_v26 }
 0x1f4   :  { %3103 = vperm.xlu1 %4186, %v3099_v18  }
 0x1f8   :  { %3108 = vperm.xlu1 %4186, %v3100_v61  }
 0x1fc   :  { %3213 = vperm.xlu1 %4186, %v3209_v21  }
 0x26c   :  { %v2646_v62 = vpop.xlane.xlu1 %2645 }
 0x26d   :  { %v5896_v45 = vmul.f32 0.00015943877, %v2646_v62 }
 0x26f   :  { %v5902_v9 = vsub.f32 %v5413_v19, %v5896_v45  ;;  %v5906_v63 = vsub.f32 %v5416_v20, %v5896_v45  ;;  %v5918_v6 = vsub.f32 %v5431_v25, %v5896_v45  ;;  %v5934_v25 = vsub.f32 %v5450_v34, %v5896_v45 }
 0x270   :  { %v2696_v29 = vpop.xlane.xlu1 %2695  ;;  %v5942_v61 = vsub.f32 %v5461_v38, %v5896_v45 }
 0x271   :  { %v5898_v40 = vmul.f32 0.00015943877, %v2696_v29  ;;  %v2797_v19 = vmul.f32 %v5902_v9, %v5902_v9  ;;  %v2798_v26 = vmul.f32 %v5906_v63, %v5906_v63  ;;  %v2800_v38 = vmul.f32 %v5934_v25, %v5934_v25 }
 0x273   :  { %v5910_v0 = vsub.f32 %v5424_v23, %v5898_v40  ;;  %v5914_v50 = vsub.f32 %v5427_v24, %v5898_v40  ;;  %v5926_v20 = vsub.f32 %v5454_v35, %v5898_v40  ;;  %v5938_v18 = vsub.f32 %v5467_v41, %v5898_v40 }
 0x274   :  { %v2799_v35 = vmul.f32 %v5918_v6, %v5918_v6  ;;  %v2895_v21 = vadd.f32 %v2798_v26, %v2797_v19  ;;  %v5948_v62 = vsub.f32 %v5474_v44, %v5898_v40  ;;  %v5954_v41 = vsub.f32 %v5471_v43, %v5896_v45 }
 0x275   :  { %7977 = vst [vmem:[#allocation49_spill] sm:$0xff] %v5910_v0  ;;  %7978 = vst [vmem:[#allocation50_spill] sm:$0xff] %v5914_v50  ;;  %v2846_v23 = vmul.f32 %v5910_v0, %v5910_v0  ;;  %v2847_v24 = vmul.f32 %v5914_v50, %v5914_v50  ;;  %v2848_v34 = vmul.f32 %v5926_v20, %v5926_v20 }
 0x276   :  { %7979 = vst [vmem:[#allocation51_spill] sm:$0xff] %v5926_v20  ;;  %7980 = vst [vmem:[#allocation52_spill] sm:$0xff] %v5938_v18  ;;  %v2896_v50 = vadd.f32 %v2895_v21, %v2799_v35  ;;  %v5960_v0 = vsub.f32 %v5480_v48, %v5898_v40  ;;  %v2849_v44 = vmul.f32 %v5938_v18, %v5938_v18 }
 0x277   :  { %7981 = vst [vmem:[#allocation53_spill] sm:$0xff] %v5948_v62  ;;  %v2945_v29 = vadd.f32 %v2847_v24, %v2846_v23  ;;  %v5966_v26 = vsub.f32 %v5483_v49, %v5896_v45  ;;  %v2801_v43 = vmul.f32 %v5942_v61, %v5942_v61  ;;  %v5972_v24 = vsub.f32 %v5491_v53, %v5898_v40 }
 0x278   :  { %7982 = vst [vmem:[#allocation54_spill] sm:$0xff] %v5960_v0  ;;  %v2897_v23 = vadd.f32 %v2896_v50, %v2800_v38  ;;  %v2850_v48 = vmul.f32 %v5948_v62, %v5948_v62  ;;  %v5978_v21 = vsub.f32 %v5488_v52, %v5896_v45  ;;  %v2802_v49 = vmul.f32 %v5954_v41, %v5954_v41 }
 0x279   :  { %v2946_v19 = vadd.f32 %v2945_v29, %v2848_v34  ;;  %7983 = vst [vmem:[#allocation55_spill] sm:$0xff] %v5972_v24  ;;  %v5984_v29 = vsub.f32 %v5503_v58, %v5898_v40  ;;  %v2851_v53 = vmul.f32 %v5960_v0, %v5960_v0  ;;  %v5990_v38 = vsub.f32 %v5494_v54, %v5896_v45 }
 0x27a   :  { %v2898_v34 = vadd.f32 %v2897_v23, %v2801_v43  ;;  %v2803_v52 = vmul.f32 %v5966_v26, %v5966_v26  ;;  %v2852_v58 = vmul.f32 %v5972_v24, %v5972_v24  ;;  %v6002_v23 = vsub.f32 %v5515_v2, %v5896_v45 }
 0x27b   :  { %v2947_v35 = vadd.f32 %v2946_v19, %v2849_v44  ;;  %7984 = vst [vmem:[#allocation56_spill] sm:$0xff] %v5984_v29  ;;  %v5996_v19 = vsub.f32 %v5518_v22, %v5898_v40  ;;  %v2804_v54 = vmul.f32 %v5978_v21, %v5978_v21  ;;  %v2853_v22 = vmul.f32 %v5984_v29, %v5984_v29 }
 0x27c   :  { %v2899_v44 = vadd.f32 %v2898_v34, %v2802_v49  ;;  %v6014_v34 = vsub.f32 %v5533_v4, %v5896_v45  ;;  %v2805_v2 = vmul.f32 %v5990_v38, %v5990_v38  ;;  %v2806_v4 = vmul.f32 %v6002_v23, %v6002_v23 }
 0x27d   :  { %v2948_v50 = vadd.f32 %v2947_v35, %v2850_v48  ;;  %7985 = vst [vmem:[#allocation57_spill] sm:$0xff] %v5996_v19  ;;  %v6008_v35 = vsub.f32 %v5529_v42, %v5898_v40  ;;  %v2854_v42 = vmul.f32 %v5996_v19, %v5996_v19 }
 0x27e   :  { %v2900_v48 = vadd.f32 %v2899_v44, %v2803_v52  ;;  %v6026_v44 = vsub.f32 %v5539_v46, %v5896_v45  ;;  %v2807_v46 = vmul.f32 %v6014_v34, %v6014_v34 }
 0x27f   :  { %v2949_v43 = vadd.f32 %v2948_v50, %v2851_v53  ;;  %7986 = vst [vmem:[#allocation58_spill] sm:$0xff] %v6008_v35  ;;  %v6020_v50 = vsub.f32 %v5543_v47, %v5898_v40  ;;  %v2855_v47 = vmul.f32 %v6008_v35, %v6008_v35 }
 0x280   :  { %v2901_v53 = vadd.f32 %v2900_v48, %v2804_v54  ;;  %v7989_v48 = vld [vmem:[#allocation2_spill] sm:$0xff] }
 0x281   :  { %v2950_v49 = vadd.f32 %v2949_v43, %v2852_v58  ;;  %7987 = vst [vmem:[#allocation59_spill] sm:$0xff] %v6020_v50  ;;  %v6032_v43 = vsub.f32 %v5553_v51, %v5898_v40  ;;  %v6038_v19 = vsub.f32 %v7989_v48, %v5896_v45  ;;  %v2856_v51 = vmul.f32 %v6020_v50, %v6020_v50 }
 0x282   :  { %v2902_v58 = vadd.f32 %v2901_v53, %v2805_v2  ;;  %v7992_v53 = vld [vmem:[#allocation3_spill] sm:$0xff]  ;;  %v6056_v48 = vsub.f32 %v5571_v39, %v5898_v40 }
 0x283   :  { %v2951_v52 = vadd.f32 %v2950_v49, %v2853_v22  ;;  %7988 = vst [vmem:[#allocation60_spill] sm:$0xff] %v6032_v43  ;;  %v7990_v49 = vld [vmem:[#allocation4_spill] sm:$0xff]  ;;  %v6050_v35 = vsub.f32 %v7992_v53, %v5896_v45  ;;  %v6068_v53 = vsub.f32 %v5591_v11, %v5898_v40 }
 0x284   :  { %v2903_v22 = vadd.f32 %v2902_v58, %v2806_v4  ;;  %v6044_v29 = vsub.f32 %v7990_v49, %v5898_v40  ;;  %7993 = vst [vmem:[#allocation4_spill] sm:$0xff] %v6056_v48  ;;  %v2857_v4 = vmul.f32 %v6032_v43, %v6032_v43  ;;  %v6062_v49 = vsub.f32 %v5575_v12, %v5896_v45 }
 0x285   :  { %v2952_v54 = vadd.f32 %v2951_v52, %v2854_v42  ;;  %v2808_v42 = vmul.f32 %v6026_v44, %v6026_v44  ;;  %7994 = vst [vmem:[#allocation3_spill] sm:$0xff] %v6068_v53  ;;  %v2810_v12 = vmul.f32 %v6050_v35, %v6050_v35  ;;  %v2859_v11 = vmul.f32 %v6056_v48, %v6056_v48 }
 0x286   :  { %7991 = vst [vmem:[#allocation2_spill] sm:$0xff] %v6044_v29  ;;  %v2904_v52 = vadd.f32 %v2903_v22, %v2807_v46  ;;  %v2858_v39 = vmul.f32 %v6044_v29, %v6044_v29  ;;  %v7995_v22 = vld [vmem:[#allocation5_spill] sm:$0xff] }
 0x287   :  { %v2953_v2 = vadd.f32 %v2952_v54, %v2855_v47  ;;  %v2809_v47 = vmul.f32 %v6038_v19, %v6038_v19  ;;  %v6074_v43 = vsub.f32 %v7995_v22, %v5896_v45  ;;  %v7999_v22 = vld [vmem:[#allocation9_spill] sm:$0xff] }
 0x288   :  { %v2905_v54 = vadd.f32 %v2904_v52, %v2808_v42  ;;  %v7998_v52 = vld [vmem:[#allocation6_spill] sm:$0xff]  ;;  %v6092_v24 = vsub.f32 %v7999_v22, %v5898_v40  ;;  %v8004_v22 = vld [vmem:[#allocation11_spill] sm:$0xff] }
 0x289   :  { %v2954_v58 = vadd.f32 %v2953_v2, %v2856_v51  ;;  %v7996_v2 = vld [vmem:[#allocation7_spill] sm:$0xff]  ;;  %v6086_v29 = vsub.f32 %v7998_v52, %v5896_v45  ;;  %v8002_v52 = vld [vmem:[#allocation10_spill] sm:$0xff] }
 0x28a   :  { %v2906_v51 = vadd.f32 %v2905_v54, %v2809_v47  ;;  %v6080_v50 = vsub.f32 %v7996_v2, %v5898_v40  ;;  %8000 = vst [vmem:[#allocation7_spill] sm:$0xff] %v6092_v24  ;;  %v2860_v47 = vmul.f32 %v6068_v53, %v6068_v53  ;;  %v8001_v2 = vld [vmem:[#allocation8_spill] sm:$0xff]  ;;  %v6104_v0 = vsub.f32 %v8002_v52, %v5898_v40 }
 0x28b   :  { %v2955_v46 = vadd.f32 %v2954_v58, %v2857_v4  ;;  %v2811_v4 = vmul.f32 %v6062_v49, %v6062_v49  ;;  %v6098_v48 = vsub.f32 %v8001_v2, %v5896_v45  ;;  %v6110_v53 = vsub.f32 %v8004_v22, %v5896_v45  ;;  %v8006_v52 = vld [vmem:[#allocation12_spill] sm:$0xff] }
 0x28c   :  { %7997 = vst [vmem:[#allocation5_spill] sm:$0xff] %v6080_v50  ;;  %v2907_v58 = vadd.f32 %v2906_v51, %v2810_v12  ;;  %8003 = vst [vmem:[#allocation6_spill] sm:$0xff] %v6104_v0  ;;  %v2861_v12 = vmul.f32 %v6080_v50, %v6080_v50  ;;  %v6116_v2 = vsub.f32 %v5631_v8, %v5898_v40 }
 0x28d   :  { %v2956_v42 = vadd.f32 %v2955_v46, %v2858_v39  ;;  %v2812_v39 = vmul.f32 %v6074_v43, %v6074_v43  ;;  %v6122_v50 = vsub.f32 %v8006_v52, %v5896_v45  ;;  %v6128_v22 = vsub.f32 %v5641_v30, %v5898_v40 }
 0x28e   :  { %v2908_v46 = vadd.f32 %v2907_v58, %v2811_v4  ;;  %8005 = vst [vmem:[#allocation9_spill] sm:$0xff] %v6116_v2  ;;  %v2862_v4 = vmul.f32 %v6092_v24, %v6092_v24  ;;  %v2863_v8 = vmul.f32 %v6104_v0, %v6104_v0  ;;  %v6140_v52 = vsub.f32 %v5652_v16, %v5898_v40 }
 0x28f   :  { %v2957_v54 = vadd.f32 %v2956_v42, %v2859_v11  ;;  %v2813_v11 = vmul.f32 %v6086_v29, %v6086_v29  ;;  %8007 = vst [vmem:[#allocation8_spill] sm:$0xff] %v6128_v22  ;;  %v2864_v30 = vmul.f32 %v6116_v2, %v6116_v2  ;;  %v2865_v16 = vmul.f32 %v6128_v22, %v6128_v22 }
 0x290   :  { %v2909_v42 = vadd.f32 %v2908_v46, %v2812_v39  ;;  %v8008_v46 = vld [vmem:[#allocation13_spill] sm:$0xff]  ;;  %8009 = vst [vmem:[#allocation10_spill] sm:$0xff] %v6140_v52 }
 0x291   :  { %v2958_v51 = vadd.f32 %v2957_v54, %v2860_v47  ;;  %v2814_v47 = vmul.f32 %v6098_v48, %v6098_v48  ;;  %v6134_v24 = vsub.f32 %v8008_v46, %v5896_v45  ;;  %v8011_v46 = vld [vmem:[#allocation15_spill] sm:$0xff] }
 0x292   :  { %v2910_v54 = vadd.f32 %v2909_v42, %v2813_v11  ;;  %v8010_v42 = vld [vmem:[#allocation14_spill] sm:$0xff]  ;;  %v6152_v62 = vsub.f32 %v8011_v46, %v5898_v40  ;;  %v8016_v46 = vld [vmem:[#allocation17_spill] sm:$0xff] }
 0x293   :  { %v2959_v58 = vadd.f32 %v2958_v51, %v2861_v12  ;;  %v2815_v12 = vmul.f32 %v6110_v53, %v6110_v53  ;;  %v6146_v0 = vsub.f32 %v8010_v42, %v5896_v45  ;;  %v8014_v42 = vld [vmem:[#allocation18_spill] sm:$0xff]  ;;  %v6170_v22 = vsub.f32 %v8016_v46, %v5896_v45 }
 0x294   :  { %v2911_v51 = vadd.f32 %v2910_v54, %v2814_v47  ;;  %8012 = vst [vmem:[#allocation11_spill] sm:$0xff] %v6152_v62  ;;  %v8013_v54 = vld [vmem:[#allocation16_spill] sm:$0xff]  ;;  %v6164_v18 = vsub.f32 %v8014_v42, %v5898_v40  ;;  %v8019_v42 = vld [vmem:[#allocation19_spill] sm:$0xff]  ;;  %v6188_v46 = vsub.f32 %v5689_v37, %v5898_v40 }
 0x295   :  { %v2960_v39 = vadd.f32 %v2959_v58, %v2862_v4  ;;  %v2816_v4 = vmul.f32 %v6122_v50, %v6122_v50  ;;  %v6158_v2 = vsub.f32 %v8013_v54, %v5896_v45  ;;  %v8017_v54 = vld [vmem:[#allocation20_spill] sm:$0xff] }
 0x296   :  { %v2912_v58 = vadd.f32 %v2911_v51, %v2815_v12  ;;  %8015 = vst [vmem:[#allocation12_spill] sm:$0xff] %v6164_v18  ;;  %v2866_v12 = vmul.f32 %v6140_v52, %v6140_v52  ;;  %v6176_v20 = vsub.f32 %v8017_v54, %v5898_v40  ;;  %v6182_v52 = vsub.f32 %v8019_v42, %v5896_v45 }
 0x297   :  { %v2961_v11 = vadd.f32 %v2960_v39, %v2863_v8  ;;  %v2817_v8 = vmul.f32 %v6134_v24, %v6134_v24  ;;  %8021 = vst [vmem:[#allocation15_spill] sm:$0xff] %v6188_v46  ;;  %v6194_v54 = vsub.f32 %v5686_v59, %v5896_v45  ;;  %v6200_v42 = vsub.f32 %v5695_v1, %v5898_v40 }
 0x298   :  { %v2913_v39 = vadd.f32 %v2912_v58, %v2816_v4  ;;  %8018 = vst [vmem:[#allocation13_spill] sm:$0xff] %v6176_v20  ;;  %v2867_v4 = vmul.f32 %v6152_v62, %v6152_v62  ;;  %8020 = vst [vmem:[#allocation14_spill] sm:$0xff] %v6182_v52  ;;  %v2869_v37 = vmul.f32 %v6176_v20, %v6176_v20 }
 0x299   :  { %v2962_v47 = vadd.f32 %v2961_v11, %v2864_v30  ;;  %v2818_v30 = vmul.f32 %v6146_v0, %v6146_v0  ;;  %8022 = vst [vmem:[#allocation16_spill] sm:$0xff] %v6194_v54  ;;  %8023 = vst [vmem:[#allocation18_spill] sm:$0xff] %v6200_v42  ;;  %v2821_v59 = vmul.f32 %v6182_v52, %v6182_v52 }
 0x29a   :  { %v2914_v11 = vadd.f32 %v2913_v39, %v2817_v8  ;;  %v2868_v8 = vmul.f32 %v6164_v18, %v6164_v18  ;;  %v2870_v1 = vmul.f32 %v6188_v46, %v6188_v46 }
 0x29b   :  { %v2963_v51 = vadd.f32 %v2962_v47, %v2865_v16  ;;  %v2819_v16 = vmul.f32 %v6158_v2, %v6158_v2 }
 0x29c   :  { %v2915_v47 = vadd.f32 %v2914_v11, %v2818_v30  ;;  %v8024_v11 = vld [vmem:[#allocation21_spill] sm:$0xff] }
 0x29d   :  { %v2964_v58 = vadd.f32 %v2963_v51, %v2866_v12  ;;  %v2820_v12 = vmul.f32 %v6170_v22, %v6170_v22  ;;  %v6206_v18 = vsub.f32 %v8024_v11, %v5896_v45  ;;  %v8029_v11 = vld [vmem:[#allocation25_spill] sm:$0xff] }
 0x29e   :  { %v2916_v51 = vadd.f32 %v2915_v47, %v2819_v16  ;;  %v8028_v47 = vld [vmem:[#allocation22_spill] sm:$0xff]  ;;  %v6224_v52 = vsub.f32 %v8029_v11, %v5898_v40 }
 0x29f   :  { %v2965_v39 = vadd.f32 %v2964_v58, %v2867_v4  ;;  %8025 = vst [vmem:[#allocation17_spill] sm:$0xff] %v6206_v18  ;;  %v8026_v58 = vld [vmem:[#allocation23_spill] sm:$0xff]  ;;  %v6218_v20 = vsub.f32 %v8028_v47, %v5896_v45  ;;  %v8034_v11 = vld [vmem:[#allocation26_spill] sm:$0xff] }
 0x2a0   :  { %v2917_v4 = vadd.f32 %v2916_v51, %v2820_v12  ;;  %v6212_v62 = vsub.f32 %v8026_v58, %v5898_v40  ;;  %8030 = vst [vmem:[#allocation19_spill] sm:$0xff] %v6224_v52  ;;  %v2871_v12 = vmul.f32 %v6200_v42, %v6200_v42  ;;  %v8031_v58 = vld [vmem:[#allocation24_spill] sm:$0xff]  ;;  %v8032_v47 = vld [vmem:[#allocation27_spill] sm:$0xff]  ;;  %v6242_v42 = vsub.f32 %v8034_v11, %v5896_v45 }
 0x2a1   :  { %v2966_v30 = vadd.f32 %v2965_v39, %v2868_v8  ;;  %v2822_v8 = vmul.f32 %v6194_v54, %v6194_v54  ;;  %v6230_v46 = vsub.f32 %v8031_v58, %v5896_v45  ;;  %v6236_v54 = vsub.f32 %v8032_v47, %v5898_v40  ;;  %v8035_v58 = vld [vmem:[#allocation28_spill] sm:$0xff]  ;;  %v8037_v47 = vld [vmem:[#allocation29_spill] sm:$0xff] }
 0x2a2   :  { %8027 = vst [vmem:[#allocation20_spill] sm:$0xff] %v6212_v62  ;;  %v2918_v39 = vadd.f32 %v2917_v4, %v2821_v59  ;;  %v2872_v59 = vmul.f32 %v6212_v62, %v6212_v62  ;;  %v6254_v62 = vsub.f32 %v8037_v47, %v5896_v45  ;;  %v6260_v11 = vsub.f32 %v5742_v57, %v5898_v40 }
 0x2a3   :  { %v2967_v16 = vadd.f32 %v2966_v30, %v2869_v37  ;;  %v2823_v37 = vmul.f32 %v6206_v18, %v6206_v18  ;;  %8033 = vst [vmem:[#allocation21_spill] sm:$0xff] %v6236_v54  ;;  %v6248_v18 = vsub.f32 %v8035_v58, %v5898_v40  ;;  %v6266_v58 = vsub.f32 %v5739_v15, %v5896_v45 }
 0x2a4   :  { %v2919_v30 = vadd.f32 %v2918_v39, %v2822_v8  ;;  %v2873_v8 = vmul.f32 %v6224_v52, %v6224_v52  ;;  %8038 = vst [vmem:[#allocation22_spill] sm:$0xff] %v6254_v62  ;;  %8039 = vst [vmem:[#allocation25_spill] sm:$0xff] %v6260_v11  ;;  %v6272_v47 = vsub.f32 %v5751_v14, %v5898_v40 }
 0x2a5   :  { %v2968_v51 = vadd.f32 %v2967_v16, %v2870_v1  ;;  %v2824_v1 = vmul.f32 %v6218_v20, %v6218_v20  ;;  %8036 = vst [vmem:[#allocation23_spill] sm:$0xff] %v6248_v18  ;;  %8040 = vst [vmem:[#allocation24_spill] sm:$0xff] %v6266_v58  ;;  %v2875_v57 = vmul.f32 %v6248_v18, %v6248_v18 }
 0x2a6   :  { %v2920_v16 = vadd.f32 %v2919_v30, %v2823_v37  ;;  %v2874_v37 = vmul.f32 %v6236_v54, %v6236_v54  ;;  %8041 = vst [vmem:[#allocation27_spill] sm:$0xff] %v6272_v47  ;;  %v2827_v15 = vmul.f32 %v6254_v62, %v6254_v62  ;;  %v2876_v14 = vmul.f32 %v6260_v11, %v6260_v11 }
 0x2a7   :  { %v2969_v4 = vadd.f32 %v2968_v51, %v2871_v12  ;;  %v2825_v12 = vmul.f32 %v6230_v46, %v6230_v46 }
 0x2a8   :  { %v2921_v51 = vadd.f32 %v2920_v16, %v2824_v1  ;;  %v8042_v16 = vld [vmem:[#allocation30_spill] sm:$0xff] }
 0x2a9   :  { %v2970_v39 = vadd.f32 %v2969_v4, %v2872_v59  ;;  %v2826_v59 = vmul.f32 %v6242_v42, %v6242_v42  ;;  %v6278_v54 = vsub.f32 %v8042_v16, %v5896_v45  ;;  %v8046_v16 = vld [vmem:[#allocation33_spill] sm:$0xff] }
 0x2aa   :  { %v2922_v4 = vadd.f32 %v2921_v51, %v2825_v12  ;;  %v8045_v51 = vld [vmem:[#allocation31_spill] sm:$0xff]  ;;  %v6296_v62 = vsub.f32 %v8046_v16, %v5898_v40 }
 0x2ab   :  { %v2971_v30 = vadd.f32 %v2970_v39, %v2873_v8  ;;  %v8043_v39 = vld [vmem:[#allocation32_spill] sm:$0xff]  ;;  %v6290_v18 = vsub.f32 %v8045_v51, %v5896_v45  ;;  %v8051_v16 = vld [vmem:[#allocation35_spill] sm:$0xff] }
 0x2ac   :  { %v2923_v8 = vadd.f32 %v2922_v4, %v2826_v59  ;;  %v6284_v52 = vsub.f32 %v8043_v39, %v5898_v40  ;;  %8047 = vst [vmem:[#allocation28_spill] sm:$0xff] %v6296_v62  ;;  %v2877_v59 = vmul.f32 %v6272_v47, %v6272_v47  ;;  %v8048_v39 = vld [vmem:[#allocation34_spill] sm:$0xff]  ;;  %v8049_v51 = vld [vmem:[#allocation36_spill] sm:$0xff]  ;;  %v6314_v47 = vsub.f32 %v8051_v16, %v5896_v45 }
 0x2ad   :  { %v2972_v1 = vadd.f32 %v2971_v30, %v2874_v37  ;;  %v2828_v37 = vmul.f32 %v6266_v58, %v6266_v58  ;;  %v6302_v11 = vsub.f32 %v8048_v39, %v5896_v45  ;;  %v6308_v58 = vsub.f32 %v8049_v51, %v5898_v40  ;;  %v8054_v51 = vld [vmem:[#allocation37_spill] sm:$0xff] }
 0x2ae   :  { %8044 = vst [vmem:[#allocation26_spill] sm:$0xff] %v6284_v52  ;;  %v2924_v30 = vadd.f32 %v2923_v8, %v2827_v15  ;;  %v2878_v15 = vmul.f32 %v6284_v52, %v6284_v52  ;;  %8052 = vst [vmem:[#allocation30_spill] sm:$0xff] %v6314_v47  ;;  %v6320_v39 = vsub.f32 %v5783_v33, %v5898_v40 }
 0x2af   :  { %v2973_v12 = vadd.f32 %v2972_v1, %v2875_v57  ;;  %v2829_v57 = vmul.f32 %v6278_v54, %v6278_v54  ;;  %8050 = vst [vmem:[#allocation29_spill] sm:$0xff] %v6308_v58  ;;  %v6326_v52 = vsub.f32 %v8054_v51, %v5896_v45  ;;  %v6332_v16 = vsub.f32 %v5790_v60, %v5898_v40  ;;  %v8058_v51 = vld [vmem:[#allocation38_spill] sm:$0xff] }
 0x2b0   :  { %v2925_v1 = vadd.f32 %v2924_v30, %v2828_v37  ;;  %8053 = vst [vmem:[#allocation32_spill] sm:$0xff] %v6320_v39  ;;  %v2879_v37 = vmul.f32 %v6296_v62, %v6296_v62  ;;  %v2880_v33 = vmul.f32 %v6308_v58, %v6308_v58  ;;  %v6344_v62 = vsub.f32 %v8058_v51, %v5898_v40  ;;  %v8063_v51 = vld [vmem:[#allocation40_spill] sm:$0xff] }
 0x2b1   :  { %v2974_v4 = vadd.f32 %v2973_v12, %v2876_v14  ;;  %v2830_v14 = vmul.f32 %v6290_v18, %v6290_v18  ;;  %8055 = vst [vmem:[#allocation31_spill] sm:$0xff] %v6326_v52  ;;  %8056 = vst [vmem:[#allocation33_spill] sm:$0xff] %v6332_v16  ;;  %v2881_v60 = vmul.f32 %v6320_v39, %v6320_v39 }
 0x2b2   :  { %v2926_v12 = vadd.f32 %v2925_v1, %v2829_v57  ;;  %v6338_v1 = vsub.f32 %v5787_v36, %v5896_v45  ;;  %8059 = vst [vmem:[#allocation36_spill] sm:$0xff] %v6344_v62  ;;  %v2833_v36 = vmul.f32 %v6326_v52, %v6326_v52  ;;  %v6362_v39 = vsub.f32 %v8063_v51, %v5896_v45  ;;  %v8066_v51 = vld [vmem:[#allocation45_spill] sm:$0xff] }
 0x2b3   :  { %v2975_v8 = vadd.f32 %v2974_v4, %v2877_v59  ;;  %v2831_v59 = vmul.f32 %v6302_v11, %v6302_v11 }
 0x2b4   :  { %v2927_v4 = vadd.f32 %v2926_v12, %v2830_v14  ;;  %8057 = vst [vmem:[#allocation34_spill] sm:$0xff] %v6338_v1  ;;  %v8060_v12 = vld [vmem:[#allocation39_spill] sm:$0xff] }
 0x2b5   :  { %v2976_v30 = vadd.f32 %v2975_v8, %v2878_v15  ;;  %v2832_v15 = vmul.f32 %v6314_v47, %v6314_v47  ;;  %v6350_v58 = vsub.f32 %v8060_v12, %v5896_v45  ;;  %v8064_v12 = vld [vmem:[#allocation43_spill] sm:$0xff] }
 0x2b6   :  { %v2928_v8 = vadd.f32 %v2927_v4, %v2831_v59  ;;  %v2882_v59 = vmul.f32 %v6332_v16, %v6332_v16  ;;  %v6368_v52 = vsub.f32 %v8064_v12, %v5898_v40  ;;  %v8067_v12 = vld [vmem:[#allocation44_spill] sm:$0xff] }
 0x2b7   :  { %v2977_v57 = vadd.f32 %v2976_v30, %v2879_v37  ;;  %v8061_v30 = vld [vmem:[#allocation41_spill] sm:$0xff] }
 0x2b8   :  { %v2929_v37 = vadd.f32 %v2928_v8, %v2832_v15  ;;  %v6356_v47 = vsub.f32 %v8061_v30, %v5898_v40  ;;  %v2883_v15 = vmul.f32 %v6344_v62, %v6344_v62  ;;  %v8065_v30 = vld [vmem:[#allocation42_spill] sm:$0xff]  ;;  %v6386_v62 = vsub.f32 %v8067_v12, %v5896_v45 }
 0x2b9   :  { %v2978_v14 = vadd.f32 %v2977_v57, %v2880_v33  ;;  %v2834_v33 = vmul.f32 %v6338_v1, %v6338_v1  ;;  %v6374_v16 = vsub.f32 %v8065_v30, %v5896_v45  ;;  %v6380_v1 = vsub.f32 %v8066_v51, %v5898_v40  ;;  %v8069_v51 = vld [vmem:[#allocation46_spill] sm:$0xff] }
 0x2ba   :  { %8062 = vst [vmem:[#allocation35_spill] sm:$0xff] %v6356_v47  ;;  %v2930_v57 = vadd.f32 %v2929_v37, %v2833_v36  ;;  %v2884_v36 = vmul.f32 %v6356_v47, %v6356_v47  ;;  %v6392_v30 = vsub.f32 %v5828_v13, %v5898_v40  ;;  %v6398_v47 = vsub.f32 %v8069_v51, %v5896_v45 }
 0x2bb   :  { %v2979_v4 = vadd.f32 %v2978_v14, %v2881_v60  ;;  %v2835_v60 = vmul.f32 %v6350_v58, %v6350_v58  ;;  %v6404_v12 = vsub.f32 %v5839_v31, %v5898_v40  ;;  %v2886_v13 = vmul.f32 %v6380_v1, %v6380_v1 }
 0x2bc   :  { %v2931_v14 = vadd.f32 %v2930_v57, %v2834_v33  ;;  %8068 = vst [vmem:[#allocation37_spill] sm:$0xff] %v6392_v30  ;;  %v2885_v33 = vmul.f32 %v6368_v52, %v6368_v52  ;;  %v6416_v51 = vsub.f32 %v5847_v27, %v5898_v40  ;;  %v2887_v31 = vmul.f32 %v6392_v30, %v6392_v30 }
 0x2bd   :  { %v2980_v8 = vadd.f32 %v2979_v4, %v2882_v59  ;;  %v2836_v59 = vmul.f32 %v6362_v39, %v6362_v39  ;;  %8070 = vst [vmem:[#allocation38_spill] sm:$0xff] %v6404_v12  ;;  %v2888_v27 = vmul.f32 %v6404_v12, %v6404_v12 }
 0x2be   :  { %v2932_v4 = vadd.f32 %v2931_v14, %v2835_v60  ;;  %v6410_v14 = vsub.f32 %v5836_v32, %v5896_v45  ;;  %v2839_v32 = vmul.f32 %v6398_v47, %v6398_v47 }
 0x2bf   :  { %v2981_v37 = vadd.f32 %v2980_v8, %v2883_v15  ;;  %v2837_v15 = vmul.f32 %v6374_v16, %v6374_v16 }
 0x2c0   :  { %v2933_v8 = vadd.f32 %v2932_v4, %v2836_v59  ;;  %v6422_v4 = vsub.f32 %v5842_v7, %v5896_v45  ;;  %v2840_v7 = vmul.f32 %v6410_v14, %v6410_v14 }
 0x2c1   :  { %v2982_v57 = vadd.f32 %v2981_v37, %v2884_v36  ;;  %v2838_v36 = vmul.f32 %v6386_v62, %v6386_v62 }
 0x2c2   :  { %v2934_v37 = vadd.f32 %v2933_v8, %v2837_v15  ;;  %v8071_v8 = vld [vmem:[#allocation47_spill] sm:$0xff] }
 0x2c3   :  { %v2983_v60 = vadd.f32 %v2982_v57, %v2885_v33  ;;  %v6428_v57 = vsub.f32 %v5854_v5, %v5898_v40  ;;  %v6434_v30 = vsub.f32 %v8071_v8, %v5896_v45  ;;  %v2889_v5 = vmul.f32 %v6416_v51, %v6416_v51 }
 0x2c4   :  { %v2935_v33 = vadd.f32 %v2934_v37, %v2838_v36  ;;  %v8073_v37 = vld [vmem:[#allocation48_spill] sm:$0xff]  ;;  %v6452_v8 = vsub.f32 %v5871_v55, %v5898_v40 }
 0x2c5   :  { %v2984_v59 = vadd.f32 %v2983_v60, %v2886_v13  ;;  %v6440_v60 = vsub.f32 %v5860_v17, %v5898_v40  ;;  %v6446_v12 = vsub.f32 %v8073_v37, %v5896_v45  ;;  %v2890_v17 = vmul.f32 %v6428_v57, %v6428_v57 }
 0x2c6   :  { %v2936_v13 = vadd.f32 %v2935_v33, %v2839_v32  ;;  %v6458_v33 = vsub.f32 %v5868_v10, %v5896_v45  ;;  %v6464_v37 = vsub.f32 %v5879_v3, %v5898_v40  ;;  %v2892_v3 = vmul.f32 %v6452_v8, %v6452_v8 }
 0x2c7   :  { %v2985_v15 = vadd.f32 %v2984_v59, %v2887_v31  ;;  %8072 = vst [vmem:[#allocation39_spill] sm:$0xff] %v6440_v60  ;;  %v2841_v31 = vmul.f32 %v6422_v4, %v6422_v4  ;;  %v2891_v55 = vmul.f32 %v6440_v60, %v6440_v60  ;;  %v2843_v10 = vmul.f32 %v6446_v12, %v6446_v12 }
 0x2c8   :  { %v2937_v59 = vadd.f32 %v2936_v13, %v2840_v7  ;;  %v6470_v13 = vsub.f32 %v5875_v28, %v5896_v45  ;;  %v2893_v28 = vmul.f32 %v6464_v37, %v6464_v37 }
 0x2c9   :  { %v2986_v36 = vadd.f32 %v2985_v15, %v2888_v27  ;;  %v2842_v27 = vmul.f32 %v6434_v30, %v6434_v30 }
 0x2ca   :  { %v2938_v15 = vadd.f32 %v2937_v59, %v2841_v31  ;;  %v2844_v59 = vmul.f32 %v6458_v33, %v6458_v33 }
 0x2cb   :  { %v2987_v32 = vadd.f32 %v2986_v36, %v2889_v5  ;;  %v6476_v36 = vsub.f32 %v5882_v56, %v5898_v40 }
 0x2cc   :  { %v2939_v5 = vadd.f32 %v2938_v15, %v2842_v27 }
 0x2cd   :  { %v2988_v7 = vadd.f32 %v2987_v32, %v2890_v17  ;;  %v2845_v32 = vmul.f32 %v6470_v13, %v6470_v13  ;;  %v2894_v56 = vmul.f32 %v6476_v36, %v6476_v36 }
 0x2ce   :  { %v2940_v17 = vadd.f32 %v2939_v5, %v2843_v10 }
 0x2cf   :  { %v2989_v31 = vadd.f32 %v2988_v7, %v2891_v55  ;;  %v3210_v55 = vld [vmem:[%s7829_s4 + $0x8] sm:$0xff]  ;;  %v6491_v7 = vpop.permute.xlu1 %3103 }
 0x2d0   :  { %v2941_v27 = vadd.f32 %v2940_v17, %v2844_v59 }
 0x2d1   :  { %v2990_v45 = vadd.f32 %v2989_v31, %v2892_v3 }
 0x2d2   :  { %v2942_v15 = vadd.f32 %v2941_v27, %v2845_v32 }
 0x2d3   :  { %v2991_v40 = vadd.f32 %v2990_v45, %v2893_v28  ;;  %v6493_v10 = vpop.permute.xlu1 %3108 }
 0x2d4   :  { %2943 = vadd.xlane.f32.xlu0 %v2942_v15  ;;  %8074 = vst [vmem:[#allocation41_spill] sm:$0xff] %v6493_v10  ;;  %v8084_v10 = vld [vmem:[#allocation31_spill] sm:$0xff] }
 0x2d5   :  { %v2992_v60 = vadd.f32 %v2991_v40, %v2894_v56 }
 0x2d7   :  { %2993 = vadd.xlane.f32.xlu1 %v2992_v60  ;;  %v6495_v5 = vpop.permute.xlu1 %3213 }
 0x2d8   :  { %8075 = vst [vmem:[#allocation40_spill] sm:$0xff] %v6495_v5 }
 0x2e8   :  { %3218 = vperm.xlu1 %4186, %v3210_v55  }
 0x361   :  { %v2944_v3 = vpop.xlane.xlu0 %2943 }
 0x362   :  { %v2995_v31 = vmul.f32 0.00015943877, %v2944_v3 }
 0x364   :  { %v2997_v59 = vadd.f32 1e-05, %v2995_v31  ;;  %v2994_v17 = vpop.xlane.xlu1 %2993 }
 0x365   :  { %v2996_v28 = vmul.f32 0.00015943877, %v2994_v17 }
 0x366   :  { %4529 = vrsqrt.f32 %v2997_v59 }
 0x367   :  { %v2998_v45 = vadd.f32 1e-05, %v2996_v28 }
 0x369   :  { %4531 = vrsqrt.f32 %v2998_v45  ;;  %v8082_v45 = vld [vmem:[#allocation24_spill] sm:$0xff] }
 0x370   :  { %v4530_v32 = vpop.eup %4529 }
 0x371   :  { %v6498_v60 = vmul.f32 %v4530_v32, %v5902_v9  ;;  %v6501_v27 = vmul.f32 %v4530_v32, %v5906_v63  ;;  %v6504_v56 = vmul.f32 %v4530_v32, %v5918_v6  ;;  %v6507_v40 = vmul.f32 %v4530_v32, %v5934_v25 }
 0x372   :  { %v6510_v15 = vmul.f32 %v4530_v32, %v5942_v61  ;;  %v6513_v55 = vmul.f32 %v4530_v32, %v5954_v41  ;;  %v6516_v3 = vmul.f32 %v4530_v32, %v5966_v26  ;;  %v6519_v9 = vmul.f32 %v4530_v32, %v5978_v21 }
 0x373   :  { %v6522_v63 = vmul.f32 %v4530_v32, %v5990_v38  ;;  %v6525_v6 = vmul.f32 %v4530_v32, %v6002_v23  ;;  %v6528_v25 = vmul.f32 %v4530_v32, %v6014_v34  ;;  %v6531_v61 = vmul.f32 %v4530_v32, %v6026_v44 }
 0x374   :  { %v6534_v41 = vmul.f32 %v4530_v32, %v6038_v19  ;;  %v6537_v26 = vmul.f32 %v4530_v32, %v6050_v35  ;;  %v6540_v21 = vmul.f32 %v4530_v32, %v6062_v49  ;;  %v6543_v38 = vmul.f32 %v4530_v32, %v6074_v43 }
 0x375   :  { %v6546_v23 = vmul.f32 %v4530_v32, %v6086_v29  ;;  %v6549_v34 = vmul.f32 %v4530_v32, %v6098_v48  ;;  %v6552_v44 = vmul.f32 %v4530_v32, %v6110_v53  ;;  %v6555_v19 = vmul.f32 %v4530_v32, %v6122_v50  ;;  %v8076_v48 = vld [vmem:[#allocation14_spill] sm:$0xff]  ;;  %v8077_v53 = vld [vmem:[#allocation16_spill] sm:$0xff]  ;;  %v8078_v50 = vld [vmem:[#allocation17_spill] sm:$0xff] }
 0x376   :  { %v6558_v35 = vmul.f32 %v4530_v32, %v6134_v24  ;;  %v6561_v49 = vmul.f32 %v4530_v32, %v6146_v0  ;;  %v6564_v43 = vmul.f32 %v4530_v32, %v6158_v2  ;;  %v6567_v29 = vmul.f32 %v4530_v32, %v6170_v22  ;;  %v8080_v22 = vld [vmem:[#allocation22_spill] sm:$0xff] }
 0x377   :  { %v6570_v31 = vmul.f32 %v4530_v32, %v8076_v48  ;;  %v6573_v59 = vmul.f32 %v4530_v32, %v8077_v53  ;;  %v6576_v17 = vmul.f32 %v4530_v32, %v8078_v50  ;;  %v6579_v24 = vmul.f32 %v4530_v32, %v6218_v20 }
 0x378   :  { %v6582_v0 = vmul.f32 %v4530_v32, %v6230_v46  ;;  %v6585_v2 = vmul.f32 %v4530_v32, %v6242_v42  ;;  %v6588_v28 = vmul.f32 %v4530_v32, %v8080_v22  ;;  %v6591_v48 = vmul.f32 %v4530_v32, %v8082_v45  ;;  %v8083_v46 = vld [vmem:[#allocation30_spill] sm:$0xff]  ;;  %v4532_v42 = vpop.eup %4531 }
 0x379   :  { %v6594_v53 = vmul.f32 %v4530_v32, %v6278_v54  ;;  %v6597_v50 = vmul.f32 %v4530_v32, %v6290_v18  ;;  %v6600_v20 = vmul.f32 %v4530_v32, %v6302_v11  ;;  %v6603_v5 = vmul.f32 %v4530_v32, %v8083_v46  ;;  %v8085_v22 = vld [vmem:[#allocation34_spill] sm:$0xff] }
 0x37a   :  { %8079 = vst [vmem:[#allocation43_spill] sm:$0xff] %v6585_v2  ;;  %8081 = vst [vmem:[#allocation42_spill] sm:$0xff] %v6588_v28  ;;  %v6606_v2 = vmul.f32 %v4530_v32, %v8084_v10  ;;  %v6609_v28 = vmul.f32 %v4530_v32, %v8085_v22  ;;  %v6612_v45 = vmul.f32 %v4530_v32, %v6350_v58 }
 0x37b   :  { %v6615_v54 = vmul.f32 %v4530_v32, %v6362_v39  ;;  %v6618_v18 = vmul.f32 %v4530_v32, %v6374_v16  ;;  %v6621_v11 = vmul.f32 %v4530_v32, %v6386_v62  ;;  %v6624_v46 = vmul.f32 %v4530_v32, %v6398_v47  ;;  %v8092_v47 = vld [vmem:[#allocation49_spill] sm:$0xff] }
 0x37c   :  { %v6627_v10 = vmul.f32 %v4530_v32, %v6410_v14  ;;  %v6630_v22 = vmul.f32 %v4530_v32, %v6422_v4  ;;  %v6633_v58 = vmul.f32 %v4530_v32, %v6434_v30  ;;  %v6636_v39 = vmul.f32 %v4530_v32, %v6446_v12  ;;  %v8094_v14 = vld [vmem:[#allocation50_spill] sm:$0xff]  ;;  %v8096_v4 = vld [vmem:[#allocation51_spill] sm:$0xff]  ;;  %v8098_v30 = vld [vmem:[#allocation52_spill] sm:$0xff] }
 0x37d   :  { %8086 = vst [vmem:[#allocation45_spill] sm:$0xff] %v6624_v46  ;;  %v6639_v16 = vmul.f32 %v4530_v32, %v6458_v33  ;;  %v6642_v62 = vmul.f32 %v4530_v32, %v6470_v13  ;;  %v6645_v46 = vmul.f32 %v4532_v42, %v8092_v47  ;;  %v8100_v12 = vld [vmem:[#allocation53_spill] sm:$0xff]  ;;  %v8102_v33 = vld [vmem:[#allocation54_spill] sm:$0xff]  ;;  %v8104_v13 = vld [vmem:[#allocation55_spill] sm:$0xff] }
 0x37e   :  { %8087 = vst [vmem:[#allocation44_spill] sm:$0xff] %v6627_v10  ;;  %8088 = vst [vmem:[#allocation46_spill] sm:$0xff] %v6630_v22  ;;  %v6648_v10 = vmul.f32 %v4532_v42, %v8094_v14  ;;  %v6651_v22 = vmul.f32 %v4532_v42, %v8096_v4  ;;  %v6663_v32 = vmul.f32 %v4532_v42, %v8104_v13  ;;  %v8106_v47 = vld [vmem:[#allocation56_spill] sm:$0xff]  ;;  %v8108_v14 = vld [vmem:[#allocation57_spill] sm:$0xff] }
 0x37f   :  { %8089 = vst [vmem:[#allocation47_spill] sm:$0xff] %v6633_v58  ;;  %8090 = vst [vmem:[#allocation48_spill] sm:$0xff] %v6636_v39  ;;  %v6654_v58 = vmul.f32 %v4532_v42, %v8098_v30  ;;  %v6657_v39 = vmul.f32 %v4532_v42, %v8100_v12  ;;  %v8110_v4 = vld [vmem:[#allocation58_spill] sm:$0xff]  ;;  %v8112_v30 = vld [vmem:[#allocation59_spill] sm:$0xff] }
 0x380   :  { %8091 = vst [vmem:[#allocation14_spill] sm:$0xff] %v6639_v16  ;;  %8093 = vst [vmem:[#allocation16_spill] sm:$0xff] %v6645_v46  ;;  %v6660_v16 = vmul.f32 %v4532_v42, %v8102_v33  ;;  %v6666_v46 = vmul.f32 %v4532_v42, %v8106_v47  ;;  %v8114_v12 = vld [vmem:[#allocation60_spill] sm:$0xff]  ;;  %v8116_v33 = vld [vmem:[#allocation2_spill] sm:$0xff] }
 0x381   :  { %8095 = vst [vmem:[#allocation17_spill] sm:$0xff] %v6648_v10  ;;  %8097 = vst [vmem:[#allocation22_spill] sm:$0xff] %v6651_v22  ;;  %v6669_v10 = vmul.f32 %v4532_v42, %v8108_v14  ;;  %v6672_v22 = vmul.f32 %v4532_v42, %v8110_v4  ;;  %v8118_v13 = vld [vmem:[#allocation4_spill] sm:$0xff]  ;;  %v8120_v47 = vld [vmem:[#allocation3_spill] sm:$0xff] }
 0x382   :  { %8099 = vst [vmem:[#allocation24_spill] sm:$0xff] %v6654_v58  ;;  %8101 = vst [vmem:[#allocation30_spill] sm:$0xff] %v6657_v39  ;;  %v6675_v58 = vmul.f32 %v4532_v42, %v8112_v30  ;;  %v6678_v39 = vmul.f32 %v4532_v42, %v8114_v12  ;;  %v8122_v14 = vld [vmem:[#allocation5_spill] sm:$0xff]  ;;  %v8124_v4 = vld [vmem:[#allocation7_spill] sm:$0xff] }
 0x383   :  { %8103 = vst [vmem:[#allocation31_spill] sm:$0xff] %v6660_v16  ;;  %8105 = vst [vmem:[#allocation34_spill] sm:$0xff] %v6663_v32  ;;  %v6681_v16 = vmul.f32 %v4532_v42, %v8116_v33  ;;  %v6684_v32 = vmul.f32 %v4532_v42, %v8118_v13  ;;  %v8126_v30 = vld [vmem:[#allocation6_spill] sm:$0xff]  ;;  %v8128_v12 = vld [vmem:[#allocation9_spill] sm:$0xff] }
 0x384   :  { %8107 = vst [vmem:[#allocation49_spill] sm:$0xff] %v6666_v46  ;;  %8109 = vst [vmem:[#allocation50_spill] sm:$0xff] %v6669_v10  ;;  %v6687_v46 = vmul.f32 %v4532_v42, %v8120_v47  ;;  %v6690_v10 = vmul.f32 %v4532_v42, %v8122_v14  ;;  %v8130_v33 = vld [vmem:[#allocation8_spill] sm:$0xff]  ;;  %v8132_v13 = vld [vmem:[#allocation10_spill] sm:$0xff] }
 0x385   :  { %8111 = vst [vmem:[#allocation51_spill] sm:$0xff] %v6672_v22  ;;  %8113 = vst [vmem:[#allocation52_spill] sm:$0xff] %v6675_v58  ;;  %v6693_v22 = vmul.f32 %v4532_v42, %v8124_v4  ;;  %v6696_v58 = vmul.f32 %v4532_v42, %v8126_v30  ;;  %v8134_v47 = vld [vmem:[#allocation11_spill] sm:$0xff]  ;;  %v8136_v14 = vld [vmem:[#allocation12_spill] sm:$0xff] }
 0x386   :  { %8115 = vst [vmem:[#allocation53_spill] sm:$0xff] %v6678_v39  ;;  %8117 = vst [vmem:[#allocation54_spill] sm:$0xff] %v6681_v16  ;;  %v6699_v39 = vmul.f32 %v4532_v42, %v8128_v12  ;;  %v6702_v16 = vmul.f32 %v4532_v42, %v8130_v33  ;;  %v8138_v4 = vld [vmem:[#allocation13_spill] sm:$0xff]  ;;  %v8140_v30 = vld [vmem:[#allocation15_spill] sm:$0xff] }
 0x387   :  { %8119 = vst [vmem:[#allocation55_spill] sm:$0xff] %v6684_v32  ;;  %8121 = vst [vmem:[#allocation56_spill] sm:$0xff] %v6687_v46  ;;  %v6705_v32 = vmul.f32 %v4532_v42, %v8132_v13  ;;  %v6708_v46 = vmul.f32 %v4532_v42, %v8134_v47  ;;  %v8142_v12 = vld [vmem:[#allocation18_spill] sm:$0xff]  ;;  %v8144_v33 = vld [vmem:[#allocation20_spill] sm:$0xff] }
 0x388   :  { %8123 = vst [vmem:[#allocation57_spill] sm:$0xff] %v6690_v10  ;;  %8125 = vst [vmem:[#allocation58_spill] sm:$0xff] %v6693_v22  ;;  %v6711_v10 = vmul.f32 %v4532_v42, %v8136_v14  ;;  %v6714_v22 = vmul.f32 %v4532_v42, %v8138_v4  ;;  %v8146_v13 = vld [vmem:[#allocation19_spill] sm:$0xff]  ;;  %v8148_v47 = vld [vmem:[#allocation21_spill] sm:$0xff] }
 0x389   :  { %8127 = vst [vmem:[#allocation59_spill] sm:$0xff] %v6696_v58  ;;  %8129 = vst [vmem:[#allocation60_spill] sm:$0xff] %v6699_v39  ;;  %v6717_v58 = vmul.f32 %v4532_v42, %v8140_v30  ;;  %v6720_v39 = vmul.f32 %v4532_v42, %v8142_v12  ;;  %v8150_v14 = vld [vmem:[#allocation23_spill] sm:$0xff]  ;;  %v8152_v4 = vld [vmem:[#allocation25_spill] sm:$0xff] }
 0x38a   :  { %8131 = vst [vmem:[#allocation2_spill] sm:$0xff] %v6702_v16  ;;  %8133 = vst [vmem:[#allocation4_spill] sm:$0xff] %v6705_v32  ;;  %v6723_v16 = vmul.f32 %v4532_v42, %v8144_v33  ;;  %v6726_v32 = vmul.f32 %v4532_v42, %v8146_v13  ;;  %v8154_v30 = vld [vmem:[#allocation27_spill] sm:$0xff]  ;;  %v8156_v12 = vld [vmem:[#allocation26_spill] sm:$0xff] }
 0x38b   :  { %8135 = vst [vmem:[#allocation3_spill] sm:$0xff] %v6708_v46  ;;  %8137 = vst [vmem:[#allocation5_spill] sm:$0xff] %v6711_v10  ;;  %v6729_v46 = vmul.f32 %v4532_v42, %v8148_v47  ;;  %v6732_v10 = vmul.f32 %v4532_v42, %v8150_v14  ;;  %v8157_v33 = vld [vmem:[#allocation28_spill] sm:$0xff]  ;;  %v8158_v13 = vld [vmem:[#allocation29_spill] sm:$0xff] }
 0x38c   :  { %8139 = vst [vmem:[#allocation7_spill] sm:$0xff] %v6714_v22  ;;  %8141 = vst [vmem:[#allocation6_spill] sm:$0xff] %v6717_v58  ;;  %v6735_v22 = vmul.f32 %v4532_v42, %v8152_v4  ;;  %v6738_v58 = vmul.f32 %v4532_v42, %v8154_v30  ;;  %v8160_v47 = vld [vmem:[#allocation32_spill] sm:$0xff]  ;;  %v8162_v14 = vld [vmem:[#allocation33_spill] sm:$0xff] }
 0x38d   :  { %8143 = vst [vmem:[#allocation9_spill] sm:$0xff] %v6720_v39  ;;  %8145 = vst [vmem:[#allocation8_spill] sm:$0xff] %v6723_v16  ;;  %v6741_v39 = vmul.f32 %v4532_v42, %v8156_v12  ;;  %v6744_v16 = vmul.f32 %v4532_v42, %v8157_v33  ;;  %v8163_v4 = vld [vmem:[#allocation36_spill] sm:$0xff]  ;;  %v8164_v30 = vld [vmem:[#allocation35_spill] sm:$0xff]  ;;  %v6762_v12 = vmul.f32 %v4532_v42, %v6368_v52 }
 0x38e   :  { %8147 = vst [vmem:[#allocation10_spill] sm:$0xff] %v6726_v32  ;;  %8149 = vst [vmem:[#allocation11_spill] sm:$0xff] %v6729_v46  ;;  %v6747_v32 = vmul.f32 %v4532_v42, %v8158_v13  ;;  %v6750_v46 = vmul.f32 %v4532_v42, %v8160_v47  ;;  %v6765_v33 = vmul.f32 %v4532_v42, %v6380_v1  ;;  %v8166_v13 = vld [vmem:[#allocation37_spill] sm:$0xff]  ;;  %v8167_v47 = vld [vmem:[#allocation38_spill] sm:$0xff] }
 0x38f   :  { %8151 = vst [vmem:[#allocation12_spill] sm:$0xff] %v6732_v10  ;;  %8153 = vst [vmem:[#allocation13_spill] sm:$0xff] %v6735_v22  ;;  %v6753_v10 = vmul.f32 %v4532_v42, %v8162_v14  ;;  %v6756_v22 = vmul.f32 %v4532_v42, %v8163_v4  ;;  %v6774_v14 = vmul.f32 %v4532_v42, %v6416_v51 }
 0x390   :  { %8155 = vst [vmem:[#allocation15_spill] sm:$0xff] %v6738_v58  ;;  %8159 = vst [vmem:[#allocation18_spill] sm:$0xff] %v6747_v32  ;;  %v6759_v58 = vmul.f32 %v4532_v42, %v8164_v30  ;;  %v6768_v32 = vmul.f32 %v4532_v42, %v8166_v13  ;;  %v6777_v4 = vmul.f32 %v4532_v42, %v6428_v57  ;;  %v8168_v30 = vld [vmem:[#allocation39_spill] sm:$0xff] }
 0x391   :  { %8161 = vst [vmem:[#allocation20_spill] sm:$0xff] %v6750_v46  ;;  %v6771_v46 = vmul.f32 %v4532_v42, %v8167_v47  ;;  %v6783_v52 = vmul.f32 %v4532_v42, %v6452_v8  ;;  %v6786_v1 = vmul.f32 %v4532_v42, %v6464_v37  ;;  %v6789_v13 = vmul.f32 %v4532_v42, %v6476_v36 }
 0x392   :  { %8165 = vst [vmem:[#allocation19_spill] sm:$0xff] %v6759_v58  ;;  %v6780_v58 = vmul.f32 %v4532_v42, %v8168_v30  ;;  %v6793_v47 = vmul.f32 %v6491_v7, %v6498_v60  ;;  %v6797_v51 = vmul.f32 %v6491_v7, %v6501_v27  ;;  %v6801_v57 = vmul.f32 %v6491_v7, %v6504_v56  ;;  %v8170_v42 = vld [vmem:[#allocation42_spill] sm:$0xff] }
 0x393   :  { %v6805_v8 = vmul.f32 %v6491_v7, %v6507_v40  ;;  %v6809_v37 = vmul.f32 %v6491_v7, %v6510_v15  ;;  %v6813_v36 = vmul.f32 %v6491_v7, %v6513_v55  ;;  %v6817_v60 = vmul.f32 %v6491_v7, %v6516_v3 }
 0x394   :  { %v6821_v27 = vmul.f32 %v6491_v7, %v6519_v9  ;;  %v6825_v56 = vmul.f32 %v6491_v7, %v6522_v63  ;;  %v6829_v40 = vmul.f32 %v6491_v7, %v6525_v6  ;;  %v6833_v15 = vmul.f32 %v6491_v7, %v6528_v25 }
 0x395   :  { %v6837_v55 = vmul.f32 %v6491_v7, %v6531_v61  ;;  %v6841_v3 = vmul.f32 %v6491_v7, %v6534_v41  ;;  %v6845_v9 = vmul.f32 %v6491_v7, %v6537_v26  ;;  %v6849_v63 = vmul.f32 %v6491_v7, %v6540_v21 }
 0x396   :  { %v6853_v6 = vmul.f32 %v6491_v7, %v6543_v38  ;;  %v6857_v25 = vmul.f32 %v6491_v7, %v6546_v23  ;;  %v6861_v61 = vmul.f32 %v6491_v7, %v6549_v34  ;;  %v6865_v41 = vmul.f32 %v6491_v7, %v6552_v44 }
 0x397   :  { %v6869_v26 = vmul.f32 %v6491_v7, %v6555_v19  ;;  %v6873_v21 = vmul.f32 %v6491_v7, %v6558_v35  ;;  %v6877_v38 = vmul.f32 %v6491_v7, %v6561_v49  ;;  %v6881_v23 = vmul.f32 %v6491_v7, %v6564_v43 }
 0x398   :  { %v6885_v34 = vmul.f32 %v6491_v7, %v6567_v29  ;;  %v6889_v44 = vmul.f32 %v6491_v7, %v6570_v31  ;;  %v6893_v19 = vmul.f32 %v6491_v7, %v6573_v59  ;;  %v6897_v35 = vmul.f32 %v6491_v7, %v6576_v17  ;;  %v8169_v29 = vld [vmem:[#allocation43_spill] sm:$0xff] }
 0x399   :  { %v6901_v49 = vmul.f32 %v6491_v7, %v6579_v24  ;;  %v6905_v43 = vmul.f32 %v6491_v7, %v6582_v0  ;;  %v6909_v31 = vmul.f32 %v6491_v7, %v8169_v29  ;;  %v6913_v59 = vmul.f32 %v6491_v7, %v8170_v42  ;;  %v8176_v42 = vld [vmem:[#allocation45_spill] sm:$0xff] }
 0x39a   :  { %v6917_v17 = vmul.f32 %v6491_v7, %v6591_v48  ;;  %v6921_v24 = vmul.f32 %v6491_v7, %v6594_v53  ;;  %v6925_v0 = vmul.f32 %v6491_v7, %v6597_v50  ;;  %v6929_v30 = vmul.f32 %v6491_v7, %v6600_v20 }
 0x39b   :  { %v6933_v29 = vmul.f32 %v6491_v7, %v6603_v5  ;;  %v6937_v48 = vmul.f32 %v6491_v7, %v6606_v2  ;;  %v6941_v53 = vmul.f32 %v6491_v7, %v6609_v28  ;;  %v6945_v50 = vmul.f32 %v6491_v7, %v6612_v45 }
 0x39c   :  { %v6949_v20 = vmul.f32 %v6491_v7, %v6615_v54  ;;  %v6953_v5 = vmul.f32 %v6491_v7, %v6618_v18  ;;  %v6957_v2 = vmul.f32 %v6491_v7, %v6621_v11  ;;  %v6961_v28 = vmul.f32 %v6491_v7, %v8176_v42 }
 0x39d   :  { %8171 = vst [vmem:[#allocation21_spill] sm:$0xff] %v6941_v53  ;;  %8172 = vst [vmem:[#allocation23_spill] sm:$0xff] %v6945_v50  ;;  %v8178_v53 = vld [vmem:[#allocation44_spill] sm:$0xff]  ;;  %v8180_v50 = vld [vmem:[#allocation46_spill] sm:$0xff] }
 0x39e   :  { %8173 = vst [vmem:[#allocation25_spill] sm:$0xff] %v6949_v20  ;;  %8174 = vst [vmem:[#allocation27_spill] sm:$0xff] %v6953_v5  ;;  %v6965_v45 = vmul.f32 %v6491_v7, %v8178_v53  ;;  %v6969_v54 = vmul.f32 %v6491_v7, %v8180_v50  ;;  %v8182_v20 = vld [vmem:[#allocation47_spill] sm:$0xff]  ;;  %v8184_v5 = vld [vmem:[#allocation48_spill] sm:$0xff]  ;;  %v6985_v53 = vmul.f32 %v6491_v7, %v6642_v62 }
 0x39f   :  { %8175 = vst [vmem:[#allocation26_spill] sm:$0xff] %v6957_v2  ;;  %8177 = vst [vmem:[#allocation28_spill] sm:$0xff] %v6961_v28  ;;  %v6973_v18 = vmul.f32 %v6491_v7, %v8182_v20  ;;  %v6977_v11 = vmul.f32 %v6491_v7, %v8184_v5  ;;  %v8186_v2 = vld [vmem:[#allocation14_spill] sm:$0xff]  ;;  %v8189_v28 = vld [vmem:[#allocation41_spill] sm:$0xff] }
 0x3a0   :  { %8179 = vst [vmem:[#allocation29_spill] sm:$0xff] %v6965_v45  ;;  %8181 = vst [vmem:[#allocation32_spill] sm:$0xff] %v6969_v54  ;;  %v6981_v42 = vmul.f32 %v6491_v7, %v8186_v2  ;;  %v8188_v45 = vld [vmem:[#allocation16_spill] sm:$0xff]  ;;  %v8191_v54 = vld [vmem:[#allocation17_spill] sm:$0xff] }
 0x3a1   :  { %8183 = vst [vmem:[#allocation33_spill] sm:$0xff] %v6973_v18  ;;  %8185 = vst [vmem:[#allocation36_spill] sm:$0xff] %v6977_v11  ;;  %v6989_v50 = vmul.f32 %v8189_v28, %v8188_v45  ;;  %v6993_v20 = vmul.f32 %v8189_v28, %v8191_v54  ;;  %v8193_v18 = vld [vmem:[#allocation22_spill] sm:$0xff]  ;;  %v8195_v11 = vld [vmem:[#allocation24_spill] sm:$0xff] }
 0x3a2   :  { %8187 = vst [vmem:[#allocation35_spill] sm:$0xff] %v6981_v42  ;;  %v6997_v5 = vmul.f32 %v8189_v28, %v8193_v18  ;;  %v7001_v2 = vmul.f32 %v8189_v28, %v8195_v11  ;;  %v8197_v42 = vld [vmem:[#allocation30_spill] sm:$0xff]  ;;  %v8199_v62 = vld [vmem:[#allocation31_spill] sm:$0xff] }
 0x3a3   :  { %8190 = vst [vmem:[#allocation37_spill] sm:$0xff] %v6989_v50  ;;  %8192 = vst [vmem:[#allocation38_spill] sm:$0xff] %v6993_v20  ;;  %v7005_v7 = vmul.f32 %v8189_v28, %v8197_v42  ;;  %v7009_v45 = vmul.f32 %v8189_v28, %v8199_v62  ;;  %v8201_v50 = vld [vmem:[#allocation34_spill] sm:$0xff]  ;;  %v8203_v20 = vld [vmem:[#allocation49_spill] sm:$0xff] }
 0x3a4   :  { %8194 = vst [vmem:[#allocation39_spill] sm:$0xff] %v6997_v5  ;;  %8196 = vst [vmem:[#allocation43_spill] sm:$0xff] %v7001_v2  ;;  %v7013_v54 = vmul.f32 %v8189_v28, %v8201_v50  ;;  %v7017_v18 = vmul.f32 %v8189_v28, %v8203_v20  ;;  %v8205_v5 = vld [vmem:[#allocation50_spill] sm:$0xff]  ;;  %v8207_v2 = vld [vmem:[#allocation51_spill] sm:$0xff] }
 0x3a5   :  { %8198 = vst [vmem:[#allocation42_spill] sm:$0xff] %v7005_v7  ;;  %8200 = vst [vmem:[#allocation45_spill] sm:$0xff] %v7009_v45  ;;  %v7021_v11 = vmul.f32 %v8189_v28, %v8205_v5  ;;  %v7025_v42 = vmul.f32 %v8189_v28, %v8207_v2  ;;  %v8209_v7 = vld [vmem:[#allocation52_spill] sm:$0xff]  ;;  %v8211_v45 = vld [vmem:[#allocation53_spill] sm:$0xff] }
 0x3a6   :  { %8202 = vst [vmem:[#allocation44_spill] sm:$0xff] %v7013_v54  ;;  %8204 = vst [vmem:[#allocation46_spill] sm:$0xff] %v7017_v18  ;;  %v7029_v62 = vmul.f32 %v8189_v28, %v8209_v7  ;;  %v7033_v50 = vmul.f32 %v8189_v28, %v8211_v45  ;;  %v8213_v54 = vld [vmem:[#allocation54_spill] sm:$0xff]  ;;  %v8215_v18 = vld [vmem:[#allocation55_spill] sm:$0xff] }
 0x3a7   :  { %8206 = vst [vmem:[#allocation47_spill] sm:$0xff] %v7021_v11  ;;  %8208 = vst [vmem:[#allocation48_spill] sm:$0xff] %v7025_v42  ;;  %v7037_v20 = vmul.f32 %v8189_v28, %v8213_v54  ;;  %v7041_v5 = vmul.f32 %v8189_v28, %v8215_v18  ;;  %v8217_v11 = vld [vmem:[#allocation56_spill] sm:$0xff]  ;;  %v8219_v42 = vld [vmem:[#allocation57_spill] sm:$0xff] }
 0x3a8   :  { %8210 = vst [vmem:[#allocation14_spill] sm:$0xff] %v7029_v62  ;;  %8212 = vst [vmem:[#allocation16_spill] sm:$0xff] %v7033_v50  ;;  %v7045_v2 = vmul.f32 %v8189_v28, %v8217_v11  ;;  %v7049_v7 = vmul.f32 %v8189_v28, %v8219_v42  ;;  %v8221_v62 = vld [vmem:[#allocation58_spill] sm:$0xff]  ;;  %v8223_v50 = vld [vmem:[#allocation59_spill] sm:$0xff] }
 0x3a9   :  { %8214 = vst [vmem:[#allocation41_spill] sm:$0xff] %v7037_v20  ;;  %8216 = vst [vmem:[#allocation17_spill] sm:$0xff] %v7041_v5  ;;  %v7053_v45 = vmul.f32 %v8189_v28, %v8221_v62  ;;  %v7057_v54 = vmul.f32 %v8189_v28, %v8223_v50  ;;  %v8225_v20 = vld [vmem:[#allocation60_spill] sm:$0xff]  ;;  %v8227_v5 = vld [vmem:[#allocation2_spill] sm:$0xff] }
 0x3aa   :  { %8218 = vst [vmem:[#allocation22_spill] sm:$0xff] %v7045_v2  ;;  %8220 = vst [vmem:[#allocation24_spill] sm:$0xff] %v7049_v7  ;;  %v7061_v18 = vmul.f32 %v8189_v28, %v8225_v20  ;;  %v7065_v11 = vmul.f32 %v8189_v28, %v8227_v5  ;;  %v8229_v2 = vld [vmem:[#allocation4_spill] sm:$0xff]  ;;  %v8231_v7 = vld [vmem:[#allocation3_spill] sm:$0xff] }
 0x3ab   :  { %8222 = vst [vmem:[#allocation30_spill] sm:$0xff] %v7053_v45  ;;  %8224 = vst [vmem:[#allocation31_spill] sm:$0xff] %v7057_v54  ;;  %v7069_v42 = vmul.f32 %v8189_v28, %v8229_v2  ;;  %v7073_v62 = vmul.f32 %v8189_v28, %v8231_v7  ;;  %v8233_v45 = vld [vmem:[#allocation5_spill] sm:$0xff]  ;;  %v8235_v54 = vld [vmem:[#allocation7_spill] sm:$0xff] }
 0x3ac   :  { %8226 = vst [vmem:[#allocation34_spill] sm:$0xff] %v7061_v18  ;;  %8228 = vst [vmem:[#allocation49_spill] sm:$0xff] %v7065_v11  ;;  %v7077_v50 = vmul.f32 %v8189_v28, %v8233_v45  ;;  %v7081_v20 = vmul.f32 %v8189_v28, %v8235_v54  ;;  %v8237_v18 = vld [vmem:[#allocation6_spill] sm:$0xff]  ;;  %v8239_v11 = vld [vmem:[#allocation9_spill] sm:$0xff] }
 0x3ad   :  { %8230 = vst [vmem:[#allocation50_spill] sm:$0xff] %v7069_v42  ;;  %8232 = vst [vmem:[#allocation51_spill] sm:$0xff] %v7073_v62  ;;  %v7085_v5 = vmul.f32 %v8189_v28, %v8237_v18  ;;  %v7089_v2 = vmul.f32 %v8189_v28, %v8239_v11  ;;  %v8241_v42 = vld [vmem:[#allocation8_spill] sm:$0xff]  ;;  %v8243_v62 = vld [vmem:[#allocation10_spill] sm:$0xff] }
 0x3ae   :  { %8234 = vst [vmem:[#allocation52_spill] sm:$0xff] %v7077_v50  ;;  %8236 = vst [vmem:[#allocation53_spill] sm:$0xff] %v7081_v20  ;;  %v7093_v7 = vmul.f32 %v8189_v28, %v8241_v42  ;;  %v7097_v45 = vmul.f32 %v8189_v28, %v8243_v62  ;;  %v8245_v50 = vld [vmem:[#allocation11_spill] sm:$0xff]  ;;  %v8247_v20 = vld [vmem:[#allocation12_spill] sm:$0xff]  ;;  %v7117_v62 = vmul.f32 %v8189_v28, %v6741_v39 }
 0x3af   :  { %8238 = vst [vmem:[#allocation54_spill] sm:$0xff] %v7085_v5  ;;  %8240 = vst [vmem:[#allocation55_spill] sm:$0xff] %v7089_v2  ;;  %v7101_v54 = vmul.f32 %v8189_v28, %v8245_v50  ;;  %v7105_v18 = vmul.f32 %v8189_v28, %v8247_v20  ;;  %v8249_v5 = vld [vmem:[#allocation13_spill] sm:$0xff]  ;;  %v8251_v2 = vld [vmem:[#allocation15_spill] sm:$0xff]  ;;  %v7121_v50 = vmul.f32 %v8189_v28, %v6744_v16 }
 0x3b0   :  { %8242 = vst [vmem:[#allocation56_spill] sm:$0xff] %v7093_v7  ;;  %8244 = vst [vmem:[#allocation57_spill] sm:$0xff] %v7097_v45  ;;  %v7109_v11 = vmul.f32 %v8189_v28, %v8249_v5  ;;  %v7113_v42 = vmul.f32 %v8189_v28, %v8251_v2  ;;  %v7133_v2 = vmul.f32 %v8189_v28, %v6753_v10 }
 0x3b1   :  { %8246 = vst [vmem:[#allocation58_spill] sm:$0xff] %v7101_v54  ;;  %8248 = vst [vmem:[#allocation59_spill] sm:$0xff] %v7105_v18  ;;  %v8255_v54 = vld [vmem:[#allocation18_spill] sm:$0xff]  ;;  %v8257_v18 = vld [vmem:[#allocation20_spill] sm:$0xff]  ;;  %v7137_v39 = vmul.f32 %v8189_v28, %v6756_v22  ;;  %v7153_v10 = vmul.f32 %v8189_v28, %v6768_v32  ;;  %v7157_v22 = vmul.f32 %v8189_v28, %v6771_v46 }
 0x3b2   :  { %8250 = vst [vmem:[#allocation60_spill] sm:$0xff] %v7109_v11  ;;  %8252 = vst [vmem:[#allocation2_spill] sm:$0xff] %v7113_v42  ;;  %v7125_v20 = vmul.f32 %v8189_v28, %v8255_v54  ;;  %v7129_v5 = vmul.f32 %v8189_v28, %v8257_v18  ;;  %v7145_v54 = vmul.f32 %v8189_v28, %v6762_v12 }
 0x3b3   :  { %8253 = vst [vmem:[#allocation4_spill] sm:$0xff] %v7117_v62  ;;  %8254 = vst [vmem:[#allocation3_spill] sm:$0xff] %v7121_v50  ;;  %v8261_v62 = vld [vmem:[#allocation19_spill] sm:$0xff]  ;;  %v7149_v18 = vmul.f32 %v8189_v28, %v6765_v33  ;;  %v7165_v12 = vmul.f32 %v8189_v28, %v6777_v4  ;;  %v7169_v33 = vmul.f32 %v8189_v28, %v6780_v58 }
 0x3b4   :  { %8256 = vst [vmem:[#allocation5_spill] sm:$0xff] %v7125_v20  ;;  %8258 = vst [vmem:[#allocation7_spill] sm:$0xff] %v7129_v5  ;;  %v7141_v16 = vmul.f32 %v8189_v28, %v8261_v62  ;;  %v7161_v62 = vmul.f32 %v8189_v28, %v6774_v14  ;;  %v7173_v32 = vmul.f32 %v8189_v28, %v6783_v52 }
 0x3b5   :  { %8259 = vst [vmem:[#allocation6_spill] sm:$0xff] %v7133_v2  ;;  %8260 = vst [vmem:[#allocation9_spill] sm:$0xff] %v7137_v39  ;;  %v7177_v46 = vmul.f32 %v8189_v28, %v6786_v1  ;;  %v7181_v14 = vmul.f32 %v8189_v28, %v6789_v13  ;;  %v8274_v28 = vld [vmem:[#allocation21_spill] sm:$0xff] }
 0x3b6   :  { %8262 = vst [vmem:[#allocation8_spill] sm:$0xff] %v7141_v16  ;;  %8263 = vst [vmem:[#allocation10_spill] sm:$0xff] %v7145_v54  ;;  %v8283_v54 = vld [vmem:[#allocation36_spill] sm:$0xff]  ;;  %v8284_v16 = vld [vmem:[#allocation35_spill] sm:$0xff] }
 0x3b7   :  { %8264 = vst [vmem:[#allocation11_spill] sm:$0xff] %v7149_v18  ;;  %8265 = vst [vmem:[#allocation12_spill] sm:$0xff] %v7153_v10  ;;  %v8281_v10 = vld [vmem:[#allocation32_spill] sm:$0xff]  ;;  %v8282_v18 = vld [vmem:[#allocation33_spill] sm:$0xff] }
 0x3b8   :  { %8266 = vst [vmem:[#allocation13_spill] sm:$0xff] %v7157_v22  ;;  %8267 = vst [vmem:[#allocation15_spill] sm:$0xff] %v7161_v62  ;;  %v8273_v62 = vld [vmem:[#allocation40_spill] sm:$0xff]  ;;  %v8280_v22 = vld [vmem:[#allocation29_spill] sm:$0xff] }
 0x3b9   :  { %8268 = vst [vmem:[#allocation18_spill] sm:$0xff] %v7165_v12  ;;  %8269 = vst [vmem:[#allocation20_spill] sm:$0xff] %v7169_v33  ;;  %v7185_v4 = vadd.f32 %v8273_v62, %v6793_v47  ;;  %v7189_v58 = vadd.f32 %v8273_v62, %v6797_v51  ;;  %v7193_v52 = vadd.f32 %v8273_v62, %v6801_v57  ;;  %v8278_v33 = vld [vmem:[#allocation26_spill] sm:$0xff]  ;;  %v8279_v12 = vld [vmem:[#allocation28_spill] sm:$0xff] }
 0x3ba   :  { %8270 = vst [vmem:[#allocation19_spill] sm:$0xff] %v7173_v32  ;;  %8271 = vst [vmem:[#allocation61_spill] sm:$0xff] %v7177_v46  ;;  %v7197_v1 = vadd.f32 %v8273_v62, %v6805_v8  ;;  %v7201_v13 = vadd.f32 %v8273_v62, %v6809_v37  ;;  %v7205_v47 = vadd.f32 %v8273_v62, %v6813_v36  ;;  %v8276_v46 = vld [vmem:[#allocation25_spill] sm:$0xff]  ;;  %v8277_v32 = vld [vmem:[#allocation27_spill] sm:$0xff] }
 0x3bb   :  { %8272 = vst [vmem:[#allocation62_spill] sm:$0xff] %v7181_v14  ;;  %v7209_v51 = vadd.f32 %v8273_v62, %v6817_v60  ;;  %v7213_v57 = vadd.f32 %v8273_v62, %v6821_v27  ;;  %v7217_v8 = vadd.f32 %v8273_v62, %v6825_v56  ;;  %v7221_v37 = vadd.f32 %v8273_v62, %v6829_v40  ;;  %v8275_v14 = vld [vmem:[#allocation23_spill] sm:$0xff] }
 0x3bc   :  { %v7225_v36 = vadd.f32 %v8273_v62, %v6833_v15  ;;  %v7229_v60 = vadd.f32 %v8273_v62, %v6837_v55  ;;  %v7233_v27 = vadd.f32 %v8273_v62, %v6841_v3  ;;  %v7237_v56 = vadd.f32 %v8273_v62, %v6845_v9 }
 0x3bd   :  { %v7241_v40 = vadd.f32 %v8273_v62, %v6849_v63  ;;  %v7245_v15 = vadd.f32 %v8273_v62, %v6853_v6  ;;  %v7249_v55 = vadd.f32 %v8273_v62, %v6857_v25  ;;  %v7253_v3 = vadd.f32 %v8273_v62, %v6861_v61 }
 0x3be   :  { %v7257_v9 = vadd.f32 %v8273_v62, %v6865_v41  ;;  %v7261_v63 = vadd.f32 %v8273_v62, %v6869_v26  ;;  %v7265_v6 = vadd.f32 %v8273_v62, %v6873_v21  ;;  %v7269_v25 = vadd.f32 %v8273_v62, %v6877_v38 }
 0x3bf   :  { %v7273_v61 = vadd.f32 %v8273_v62, %v6881_v23  ;;  %v7277_v41 = vadd.f32 %v8273_v62, %v6885_v34  ;;  %v7281_v26 = vadd.f32 %v8273_v62, %v6889_v44  ;;  %v7285_v21 = vadd.f32 %v8273_v62, %v6893_v19 }
 0x3c0   :  { %v7289_v38 = vadd.f32 %v8273_v62, %v6897_v35  ;;  %v7293_v23 = vadd.f32 %v8273_v62, %v6901_v49  ;;  %v7297_v34 = vadd.f32 %v8273_v62, %v6905_v43  ;;  %v7301_v44 = vadd.f32 %v8273_v62, %v6909_v31 }
 0x3c1   :  { %v7305_v19 = vadd.f32 %v8273_v62, %v6913_v59  ;;  %v7309_v35 = vadd.f32 %v8273_v62, %v6917_v17  ;;  %v7313_v49 = vadd.f32 %v8273_v62, %v6921_v24  ;;  %v7317_v43 = vadd.f32 %v8273_v62, %v6925_v0 }
 0x3c2   :  { %v7321_v31 = vadd.f32 %v8273_v62, %v6929_v30  ;;  %v7325_v59 = vadd.f32 %v8273_v62, %v6933_v29  ;;  %v7329_v17 = vadd.f32 %v8273_v62, %v6937_v48  ;;  %v7333_v24 = vadd.f32 %v8273_v62, %v8274_v28 }
 0x3c3   :  { %v7337_v0 = vadd.f32 %v8273_v62, %v8275_v14  ;;  %v7341_v30 = vadd.f32 %v8273_v62, %v8276_v46  ;;  %v7345_v29 = vadd.f32 %v8273_v62, %v8277_v32  ;;  %v7349_v48 = vadd.f32 %v8273_v62, %v8278_v33 }
 0x3c4   :  { %v7353_v28 = vadd.f32 %v8273_v62, %v8279_v12  ;;  %v7357_v14 = vadd.f32 %v8273_v62, %v8280_v22  ;;  %v7361_v46 = vadd.f32 %v8273_v62, %v8281_v10  ;;  %v7365_v32 = vadd.f32 %v8273_v62, %v8282_v18 }
 0x3c5   :  { %v7369_v33 = vadd.f32 %v8273_v62, %v8283_v54  ;;  %v7373_v12 = vadd.f32 %v8273_v62, %v8284_v16  ;;  %v7377_v22 = vadd.f32 %v8273_v62, %v6985_v53  ;;  %v3319_v39 = vmax.f32 %v7185_v4, 0.0 }
 0x3c6   :  { %v3320_v10 = vmax.f32 %v7189_v58, 0.0  ;;  %v3321_v2 = vmax.f32 %v7193_v52, 0.0  ;;  %v3322_v18 = vmax.f32 %v7197_v1, 0.0  ;;  %v3323_v5 = vmax.f32 %v7201_v13, 0.0 }
 0x3c7   :  { %v3324_v54 = vmax.f32 %v7205_v47, 0.0  ;;  %v3325_v20 = vmax.f32 %v7209_v51, 0.0  ;;  %v3326_v16 = vmax.f32 %v7213_v57, 0.0  ;;  %v3327_v50 = vmax.f32 %v7217_v8, 0.0 }
 0x3c8   :  { %v3328_v53 = vmax.f32 %v7221_v37, 0.0  ;;  %v3329_v62 = vmax.f32 %v7225_v36, 0.0  ;;  %v3330_v4 = vmax.f32 %v7229_v60, 0.0  ;;  %v3331_v58 = vmax.f32 %v7233_v27, 0.0 }
 0x3c9   :  { %v3332_v52 = vmax.f32 %v7237_v56, 0.0  ;;  %v3333_v1 = vmax.f32 %v7241_v40, 0.0  ;;  %v3334_v13 = vmax.f32 %v7245_v15, 0.0  ;;  %v3335_v47 = vmax.f32 %v7249_v55, 0.0 }
 0x3ca   :  { %v3336_v51 = vmax.f32 %v7253_v3, 0.0  ;;  %v3337_v57 = vmax.f32 %v7257_v9, 0.0  ;;  %v3338_v8 = vmax.f32 %v7261_v63, 0.0  ;;  %v3339_v37 = vmax.f32 %v7265_v6, 0.0 }
 0x3cb   :  { %v3340_v36 = vmax.f32 %v7269_v25, 0.0  ;;  %v3341_v60 = vmax.f32 %v7273_v61, 0.0  ;;  %v3342_v27 = vmax.f32 %v7277_v41, 0.0  ;;  %v3343_v56 = vmax.f32 %v7281_v26, 0.0 }
 0x3cc   :  { %v3344_v40 = vmax.f32 %v7285_v21, 0.0  ;;  %v3345_v15 = vmax.f32 %v7289_v38, 0.0  ;;  %v3346_v55 = vmax.f32 %v7293_v23, 0.0  ;;  %v3347_v3 = vmax.f32 %v7297_v34, 0.0 }
 0x3cd   :  { %v3348_v9 = vmax.f32 %v7301_v44, 0.0  ;;  %v3349_v63 = vmax.f32 %v7305_v19, 0.0  ;;  %v3350_v6 = vmax.f32 %v7309_v35, 0.0  ;;  %v3351_v25 = vmax.f32 %v7313_v49, 0.0 }
 0x3ce   :  { %v3352_v61 = vmax.f32 %v7317_v43, 0.0  ;;  %v3353_v41 = vmax.f32 %v7321_v31, 0.0  ;;  %v3354_v26 = vmax.f32 %v7325_v59, 0.0  ;;  %v3355_v21 = vmax.f32 %v7329_v17, 0.0 }
 0x3cf   :  { %v3356_v38 = vmax.f32 %v7333_v24, 0.0  ;;  %v3357_v23 = vmax.f32 %v7337_v0, 0.0  ;;  %v3358_v34 = vmax.f32 %v7341_v30, 0.0  ;;  %v3359_v44 = vmax.f32 %v7345_v29, 0.0 }
 0x3d0   :  { %v3360_v19 = vmax.f32 %v7349_v48, 0.0  ;;  %v3361_v35 = vmax.f32 %v7353_v28, 0.0  ;;  %v3362_v49 = vmax.f32 %v7357_v14, 0.0  ;;  %v3363_v43 = vmax.f32 %v7361_v46, 0.0 }
 0x3d1   :  { %v3364_v31 = vmax.f32 %v7365_v32, 0.0  ;;  %v3365_v59 = vmax.f32 %v7369_v33, 0.0  ;;  %v3366_v17 = vmax.f32 %v7373_v12, 0.0  ;;  %v3367_v24 = vmax.f32 %v7377_v22, 0.0 }
 0x3d2   :  { %v4112_v0 = vpack.c.bf16 %v3320_v10, %v3319_v39  ;;  %v4113_v30 = vpack.c.bf16 %v3322_v18, %v3321_v2  ;;  %v4114_v42 = vpack.c.bf16 %v3324_v54, %v3323_v5  ;;  %v4115_v29 = vpack.c.bf16 %v3326_v16, %v3325_v20  ;;  %v8285_v54 = vld [vmem:[#allocation37_spill] sm:$0xff] }
 0x3d3   :  { %v4116_v11 = vpack.c.bf16 %v3328_v53, %v3327_v50  ;;  %v4117_v48 = vpack.c.bf16 %v3330_v4, %v3329_v62  ;;  %v4118_v45 = vpack.c.bf16 %v3332_v52, %v3331_v58  ;;  %v4119_v28 = vpack.c.bf16 %v3334_v13, %v3333_v1  ;;  %v8286_v53 = vld [vmem:[#allocation38_spill] sm:$0xff]  ;;  %v8287_v4 = vld [vmem:[#allocation39_spill] sm:$0xff] }
 0x3d4   :  { %v4120_v7 = vpack.c.bf16 %v3336_v51, %v3335_v47  ;;  %v4121_v14 = vpack.c.bf16 %v3338_v8, %v3337_v57  ;;  %3713 = vst [vmem:[%s7830_s5] sm:$0xff] %v4112_v0  ;;  %3714 = vst [vmem:[%s7830_s5 + $0x8] sm:$0xff] %v4113_v30  ;;  %v4122_v46 = vpack.c.bf16 %v3340_v36, %v3339_v37  ;;  %v8288_v52 = vld [vmem:[#allocation43_spill] sm:$0xff]  ;;  %v8289_v13 = vld [vmem:[#allocation42_spill] sm:$0xff] }
 0x3d5   :  { %v4123_v32 = vpack.c.bf16 %v3342_v27, %v3341_v60  ;;  %v4124_v39 = vpack.c.bf16 %v3344_v40, %v3343_v56  ;;  %v4125_v2 = vpack.c.bf16 %v3346_v55, %v3345_v15  ;;  %3715 = vst [vmem:[%s7830_s5 + $0x10] sm:$0xff] %v4114_v42  ;;  %3716 = vst [vmem:[%s7830_s5 + $0x18] sm:$0xff] %v4115_v29  ;;  %v8290_v51 = vld [vmem:[#allocation45_spill] sm:$0xff]  ;;  %v8291_v8 = vld [vmem:[#allocation44_spill] sm:$0xff] }
 0x3d6   :  { %3717 = vst [vmem:[%s7830_s5 + $0x20] sm:$0xff] %v4116_v11  ;;  %3718 = vst [vmem:[%s7830_s5 + $0x28] sm:$0xff] %v4117_v48  ;;  %v4126_v50 = vpack.c.bf16 %v3348_v9, %v3347_v3  ;;  %v4127_v20 = vpack.c.bf16 %v3350_v6, %v3349_v63  ;;  %v4128_v5 = vpack.c.bf16 %v3352_v61, %v3351_v25  ;;  %v8292_v36 = vld [vmem:[#allocation46_spill] sm:$0xff]  ;;  %v8293_v27 = vld [vmem:[#allocation47_spill] sm:$0xff] }
 0x3d7   :  { %v4129_v33 = vpack.c.bf16 %v3354_v26, %v3353_v41  ;;  %3719 = vst [vmem:[%s7830_s5 + $0x30] sm:$0xff] %v4118_v45  ;;  %3720 = vst [vmem:[%s7830_s5 + $0x38] sm:$0xff] %v4119_v28  ;;  %v4130_v11 = vpack.c.bf16 %v3356_v38, %v3355_v21  ;;  %v4131_v42 = vpack.c.bf16 %v3358_v34, %v3357_v23  ;;  %v8294_v40 = vld [vmem:[#allocation48_spill] sm:$0xff]  ;;  %v8295_v55 = vld [vmem:[#allocation14_spill] sm:$0xff] }
 0x3d8   :  { %3721 = vst [vmem:[%s7830_s5 + $0x40] sm:$0xff] %v4120_v7  ;;  %3722 = vst [vmem:[%s7830_s5 + $0x48] sm:$0xff] %v4121_v14  ;;  %v4132_v12 = vpack.c.bf16 %v3360_v19, %v3359_v44  ;;  %v4133_v22 = vpack.c.bf16 %v3362_v49, %v3361_v35  ;;  %v7470_v7 = vpop.permute.xlu1 %3218  ;;  %v4134_v45 = vpack.c.bf16 %v3364_v31, %v3363_v43  ;;  %v8296_v9 = vld [vmem:[#allocation16_spill] sm:$0xff]  ;;  %v8297_v6 = vld [vmem:[#allocation41_spill] sm:$0xff] }
 0x3d9   :  { %3723 = vst [vmem:[%s7830_s5 + $0x50] sm:$0xff] %v4122_v46  ;;  %3724 = vst [vmem:[%s7830_s5 + $0x58] sm:$0xff] %v4123_v32  ;;  %v4135_v10 = vpack.c.bf16 %v3366_v17, %v3365_v59  ;;  %v4136_v18 = vpack.c.bf16 %v3367_v24, %v3367_v24  ;;  %v7486_v16 = vadd.f32 %v7470_v7, %v8285_v54  ;;  %v8298_v61 = vld [vmem:[#allocation17_spill] sm:$0xff]  ;;  %v8299_v26 = vld [vmem:[#allocation22_spill] sm:$0xff] }
 0x3da   :  { %3725 = vst [vmem:[%s7830_s5 + $0x60] sm:$0xff] %v4124_v39  ;;  %3726 = vst [vmem:[%s7830_s5 + $0x68] sm:$0xff] %v4125_v2  ;;  %v7502_v62 = vadd.f32 %v7470_v7, %v8286_v53  ;;  %v7506_v58 = vadd.f32 %v7470_v7, %v8287_v4  ;;  %v7510_v1 = vadd.f32 %v7470_v7, %v8288_v52  ;;  %v8300_v38 = vld [vmem:[#allocation24_spill] sm:$0xff]  ;;  %v8301_v34 = vld [vmem:[#allocation30_spill] sm:$0xff] }
 0x3db   :  { %3727 = vst [vmem:[%s7830_s5 + $0x70] sm:$0xff] %v4126_v50  ;;  %3728 = vst [vmem:[%s7830_s5 + $0x78] sm:$0xff] %v4127_v20  ;;  %v7514_v47 = vadd.f32 %v7470_v7, %v8289_v13  ;;  %v7527_v57 = vadd.f32 %v7470_v7, %v8290_v51  ;;  %v7531_v37 = vadd.f32 %v7470_v7, %v8291_v8  ;;  %v8302_v19 = vld [vmem:[#allocation31_spill] sm:$0xff]  ;;  %v8303_v49 = vld [vmem:[#allocation34_spill] sm:$0xff] }
 0x3dc   :  { %3729 = vst [vmem:[%s7830_s5 + $0x80] sm:$0xff] %v4128_v5  ;;  %3730 = vst [vmem:[%s7830_s5 + $0x88] sm:$0xff] %v4129_v33  ;;  %v7535_v60 = vadd.f32 %v7470_v7, %v8292_v36  ;;  %v7539_v56 = vadd.f32 %v7470_v7, %v8293_v27  ;;  %v7543_v15 = vadd.f32 %v7470_v7, %v8294_v40  ;;  %v8304_v31 = vld [vmem:[#allocation49_spill] sm:$0xff]  ;;  %v8305_v17 = vld [vmem:[#allocation50_spill] sm:$0xff] }
 0x3dd   :  { %3731 = vst [vmem:[%s7830_s5 + $0x90] sm:$0xff] %v4130_v11  ;;  %3732 = vst [vmem:[%s7830_s5 + $0x98] sm:$0xff] %v4131_v42  ;;  %v7547_v3 = vadd.f32 %v7470_v7, %v8295_v55  ;;  %v7551_v63 = vadd.f32 %v7470_v7, %v8296_v9  ;;  %v7555_v25 = vadd.f32 %v7470_v7, %v8297_v6  ;;  %v8306_v0 = vld [vmem:[#allocation51_spill] sm:$0xff]  ;;  %v8307_v29 = vld [vmem:[#allocation52_spill] sm:$0xff] }
 0x3de   :  { %3733 = vst [vmem:[%s7830_s5 + $0xa0] sm:$0xff] %v4132_v12  ;;  %3734 = vst [vmem:[%s7830_s5 + $0xa8] sm:$0xff] %v4133_v22  ;;  %v7559_v41 = vadd.f32 %v7470_v7, %v8298_v61  ;;  %v7563_v21 = vadd.f32 %v7470_v7, %v8299_v26  ;;  %v7567_v23 = vadd.f32 %v7470_v7, %v8300_v38  ;;  %v8308_v28 = vld [vmem:[#allocation53_spill] sm:$0xff]  ;;  %v8309_v46 = vld [vmem:[#allocation54_spill] sm:$0xff] }
 0x3df   :  { %3735 = vst [vmem:[%s7830_s5 + $0xb0] sm:$0xff] %v4134_v45  ;;  %3736 = vst [vmem:[%s7830_s5 + $0xb8] sm:$0xff] %v4135_v10  ;;  %v7571_v44 = vadd.f32 %v7470_v7, %v8301_v34  ;;  %v7575_v35 = vadd.f32 %v7470_v7, %v8302_v19  ;;  %v7579_v43 = vadd.f32 %v7470_v7, %v8303_v49  ;;  %v8310_v39 = vld [vmem:[#allocation55_spill] sm:$0xff]  ;;  %v8311_v50 = vld [vmem:[#allocation56_spill] sm:$0xff] }
 0x3e0   :  { %3737 = vst [vmem:[%s7830_s5 + $0xc0] sm:$0xf] %v4136_v18  ;;  %v7583_v59 = vadd.f32 %v7470_v7, %v8304_v31  ;;  %v7587_v24 = vadd.f32 %v7470_v7, %v8305_v17  ;;  %v7591_v30 = vadd.f32 %v7470_v7, %v8306_v0  ;;  %v7595_v48 = vadd.f32 %v7470_v7, %v8307_v29  ;;  %v8312_v5 = vld [vmem:[#allocation57_spill] sm:$0xff]  ;;  %v8313_v11 = vld [vmem:[#allocation58_spill] sm:$0xff]  ;;  %v8314_v12 = vld [vmem:[#allocation59_spill] sm:$0xff] }
 0x3e1   :  { %v7599_v14 = vadd.f32 %v7470_v7, %v8308_v28  ;;  %v7603_v32 = vadd.f32 %v7470_v7, %v8309_v46  ;;  %v7607_v2 = vadd.f32 %v7470_v7, %v8310_v39  ;;  %v7611_v20 = vadd.f32 %v7470_v7, %v8311_v50  ;;  %v8315_v45 = vld [vmem:[#allocation60_spill] sm:$0xff]  ;;  %v8316_v18 = vld [vmem:[#allocation2_spill] sm:$0xff]  ;;  %v8318_v52 = vld [vmem:[#allocation3_spill] sm:$0xff] }
 0x3e2   :  { %v7615_v33 = vadd.f32 %v7470_v7, %v8312_v5  ;;  %v7619_v42 = vadd.f32 %v7470_v7, %v8313_v11  ;;  %v7623_v22 = vadd.f32 %v7470_v7, %v8314_v12  ;;  %v7627_v10 = vadd.f32 %v7470_v7, %v8315_v45  ;;  %v8317_v53 = vld [vmem:[#allocation4_spill] sm:$0xff]  ;;  %v8319_v51 = vld [vmem:[#allocation5_spill] sm:$0xff]  ;;  %v8320_v36 = vld [vmem:[#allocation7_spill] sm:$0xff] }
 0x3e3   :  { %v7631_v54 = vadd.f32 %v7470_v7, %v8316_v18  ;;  %v7635_v4 = vadd.f32 %v7470_v7, %v8317_v53  ;;  %v7639_v13 = vadd.f32 %v7470_v7, %v8318_v52  ;;  %v7643_v8 = vadd.f32 %v7470_v7, %v8319_v51  ;;  %v8321_v40 = vld [vmem:[#allocation6_spill] sm:$0xff]  ;;  %v8322_v9 = vld [vmem:[#allocation9_spill] sm:$0xff]  ;;  %v8323_v61 = vld [vmem:[#allocation8_spill] sm:$0xff] }
 0x3e4   :  { %v7647_v27 = vadd.f32 %v7470_v7, %v8320_v36  ;;  %v7651_v55 = vadd.f32 %v7470_v7, %v8321_v40  ;;  %v7655_v6 = vadd.f32 %v7470_v7, %v8322_v9  ;;  %v7659_v26 = vadd.f32 %v7470_v7, %v8323_v61  ;;  %v8324_v38 = vld [vmem:[#allocation10_spill] sm:$0xff]  ;;  %v8325_v19 = vld [vmem:[#allocation11_spill] sm:$0xff]  ;;  %v8326_v31 = vld [vmem:[#allocation12_spill] sm:$0xff] }
 0x3e5   :  { %v7663_v34 = vadd.f32 %v7470_v7, %v8324_v38  ;;  %v7667_v49 = vadd.f32 %v7470_v7, %v8325_v19  ;;  %v7671_v17 = vadd.f32 %v7470_v7, %v8326_v31  ;;  %v8327_v0 = vld [vmem:[#allocation13_spill] sm:$0xff]  ;;  %v8328_v28 = vld [vmem:[#allocation15_spill] sm:$0xff]  ;;  %v8329_v39 = vld [vmem:[#allocation18_spill] sm:$0xff]  ;;  %v3368_v36 = vmax.f32 %v7486_v16, 0.0 }
 0x3e6   :  { %v7675_v29 = vadd.f32 %v7470_v7, %v8327_v0  ;;  %v7679_v46 = vadd.f32 %v7470_v7, %v8328_v28  ;;  %v7683_v50 = vadd.f32 %v7470_v7, %v8329_v39  ;;  %v8330_v5 = vld [vmem:[#allocation20_spill] sm:$0xff]  ;;  %v8331_v12 = vld [vmem:[#allocation19_spill] sm:$0xff]  ;;  %v8332_v18 = vld [vmem:[#allocation61_spill] sm:$0xff]  ;;  %v3369_v40 = vmax.f32 %v7502_v62, 0.0 }
 0x3e7   :  { %v7687_v11 = vadd.f32 %v7470_v7, %v8330_v5  ;;  %v7691_v45 = vadd.f32 %v7470_v7, %v8331_v12  ;;  %v7695_v53 = vadd.f32 %v7470_v7, %v8332_v18  ;;  %v8333_v52 = vld [vmem:[#allocation62_spill] sm:$0xff]  ;;  %v3370_v9 = vmax.f32 %v7506_v58, 0.0 }
 0x3e8   :  { %v7699_v51 = vadd.f32 %v7470_v7, %v8333_v52  ;;  %v3371_v61 = vmax.f32 %v7510_v1, 0.0  ;;  %v3372_v38 = vmax.f32 %v7514_v47, 0.0  ;;  %v3373_v19 = vmax.f32 %v7527_v57, 0.0 }
 0x3e9   :  { %v3374_v31 = vmax.f32 %v7531_v37, 0.0  ;;  %v3375_v0 = vmax.f32 %v7535_v60, 0.0  ;;  %v3376_v28 = vmax.f32 %v7539_v56, 0.0  ;;  %v3377_v7 = vmax.f32 %v7543_v15, 0.0 }
 0x3ea   :  { %v3378_v16 = vmax.f32 %v7547_v3, 0.0  ;;  %v3379_v62 = vmax.f32 %v7551_v63, 0.0  ;;  %v3380_v58 = vmax.f32 %v7555_v25, 0.0  ;;  %v3381_v1 = vmax.f32 %v7559_v41, 0.0 }
 0x3eb   :  { %v3382_v47 = vmax.f32 %v7563_v21, 0.0  ;;  %v3383_v57 = vmax.f32 %v7567_v23, 0.0  ;;  %v3384_v37 = vmax.f32 %v7571_v44, 0.0  ;;  %v3385_v60 = vmax.f32 %v7575_v35, 0.0 }
 0x3ec   :  { %v3386_v56 = vmax.f32 %v7579_v43, 0.0  ;;  %v3387_v15 = vmax.f32 %v7583_v59, 0.0  ;;  %v3388_v3 = vmax.f32 %v7587_v24, 0.0  ;;  %v3389_v63 = vmax.f32 %v7591_v30, 0.0 }
 0x3ed   :  { %v3390_v25 = vmax.f32 %v7595_v48, 0.0  ;;  %v3391_v41 = vmax.f32 %v7599_v14, 0.0  ;;  %v3392_v21 = vmax.f32 %v7603_v32, 0.0  ;;  %v3393_v23 = vmax.f32 %v7607_v2, 0.0 }
 0x3ee   :  { %v3394_v44 = vmax.f32 %v7611_v20, 0.0  ;;  %v3395_v35 = vmax.f32 %v7615_v33, 0.0  ;;  %v3396_v43 = vmax.f32 %v7619_v42, 0.0  ;;  %v3397_v59 = vmax.f32 %v7623_v22, 0.0 }
 0x3ef   :  { %v3398_v24 = vmax.f32 %v7627_v10, 0.0  ;;  %v3399_v30 = vmax.f32 %v7631_v54, 0.0  ;;  %v3400_v48 = vmax.f32 %v7635_v4, 0.0  ;;  %v3401_v14 = vmax.f32 %v7639_v13, 0.0 }
 0x3f0   :  { %v3402_v32 = vmax.f32 %v7643_v8, 0.0  ;;  %v3403_v2 = vmax.f32 %v7647_v27, 0.0  ;;  %v3404_v20 = vmax.f32 %v7651_v55, 0.0  ;;  %v3405_v33 = vmax.f32 %v7655_v6, 0.0 }
 0x3f1   :  { %v3406_v42 = vmax.f32 %v7659_v26, 0.0  ;;  %v3407_v22 = vmax.f32 %v7663_v34, 0.0  ;;  %v3408_v10 = vmax.f32 %v7667_v49, 0.0  ;;  %v3409_v54 = vmax.f32 %v7671_v17, 0.0 }
 0x3f2   :  { %v3410_v4 = vmax.f32 %v7675_v29, 0.0  ;;  %v3411_v13 = vmax.f32 %v7679_v46, 0.0  ;;  %v3412_v8 = vmax.f32 %v7683_v50, 0.0  ;;  %v3413_v27 = vmax.f32 %v7687_v11, 0.0 }
 0x3f3   :  { %v3414_v55 = vmax.f32 %v7691_v45, 0.0  ;;  %v3415_v6 = vmax.f32 %v7695_v53, 0.0  ;;  %v3416_v26 = vmax.f32 %v7699_v51, 0.0  ;;  %v4137_v39 = vpack.c.bf16 %v3369_v40, %v3368_v36 }
 0x3f4   :  { %v4138_v34 = vpack.c.bf16 %v3371_v61, %v3370_v9  ;;  %v4139_v5 = vpack.c.bf16 %v3373_v19, %v3372_v38  ;;  %v4140_v49 = vpack.c.bf16 %v3375_v0, %v3374_v31  ;;  %v4141_v12 = vpack.c.bf16 %v3377_v7, %v3376_v28 }
 0x3f5   :  { %v4142_v17 = vpack.c.bf16 %v3379_v62, %v3378_v16  ;;  %v4143_v18 = vpack.c.bf16 %v3381_v1, %v3380_v58  ;;  %v4144_v29 = vpack.c.bf16 %v3383_v57, %v3382_v47  ;;  %v4145_v52 = vpack.c.bf16 %v3385_v60, %v3384_v37  ;;  %3738 = vst [vmem:[%s7830_s5 + $0xc4] sm:$0xff] %v4137_v39 }
 0x3f6   :  { %v4146_v46 = vpack.c.bf16 %v3387_v15, %v3386_v56  ;;  %v4147_v50 = vpack.c.bf16 %v3389_v63, %v3388_v3  ;;  %3739 = vst [vmem:[%s7830_s5 + $0xcc] sm:$0xff] %v4138_v34  ;;  %3740 = vst [vmem:[%s7830_s5 + $0xd4] sm:$0xff] %v4139_v5  ;;  %v4148_v11 = vpack.c.bf16 %v3391_v41, %v3390_v25 }
 0x3f7   :  { %v4149_v45 = vpack.c.bf16 %v3393_v23, %v3392_v21  ;;  %v4150_v53 = vpack.c.bf16 %v3395_v35, %v3394_v44  ;;  %v4151_v51 = vpack.c.bf16 %v3397_v59, %v3396_v43  ;;  %3741 = vst [vmem:[%s7830_s5 + $0xdc] sm:$0xff] %v4140_v49  ;;  %3742 = vst [vmem:[%s7830_s5 + $0xe4] sm:$0xff] %v4141_v12 }
 0x3f8   :  { %3743 = vst [vmem:[%s7830_s5 + $0xec] sm:$0xff] %v4142_v17  ;;  %3744 = vst [vmem:[%s7830_s5 + $0xf4] sm:$0xff] %v4143_v18  ;;  %v4152_v36 = vpack.c.bf16 %v3399_v30, %v3398_v24  ;;  %v4153_v40 = vpack.c.bf16 %v3401_v14, %v3400_v48  ;;  %v4154_v9 = vpack.c.bf16 %v3403_v2, %v3402_v32 }
 0x3f9   :  { %v4155_v61 = vpack.c.bf16 %v3405_v33, %v3404_v20  ;;  %3745 = vst [vmem:[%s7830_s5 + $0xfc] sm:$0xff] %v4144_v29  ;;  %3746 = vst [vmem:[%s7830_s5 + $0x104] sm:$0xff] %v4145_v52  ;;  %v4156_v38 = vpack.c.bf16 %v3407_v22, %v3406_v42  ;;  %v4157_v19 = vpack.c.bf16 %v3409_v54, %v3408_v10 }
 0x3fa   :  { %3747 = vst [vmem:[%s7830_s5 + $0x10c] sm:$0xff] %v4146_v46  ;;  %3748 = vst [vmem:[%s7830_s5 + $0x114] sm:$0xff] %v4147_v50  ;;  %v4158_v31 = vpack.c.bf16 %v3411_v13, %v3410_v4  ;;  %v4159_v0 = vpack.c.bf16 %v3413_v27, %v3412_v8  ;;  %v4160_v28 = vpack.c.bf16 %v3415_v6, %v3414_v55 }
 0x3fb   :  { %3749 = vst [vmem:[%s7830_s5 + $0x11c] sm:$0xff] %v4148_v11  ;;  %3750 = vst [vmem:[%s7830_s5 + $0x124] sm:$0xff] %v4149_v45  ;;  %v4161_v7 = vpack.c.bf16 %v3416_v26, %v3416_v26 }
 0x3fc   :  { %3751 = vst [vmem:[%s7830_s5 + $0x12c] sm:$0xff] %v4150_v53  ;;  %3752 = vst [vmem:[%s7830_s5 + $0x134] sm:$0xff] %v4151_v51 }
 0x3fd   :  { %3753 = vst [vmem:[%s7830_s5 + $0x13c] sm:$0xff] %v4152_v36  ;;  %3754 = vst [vmem:[%s7830_s5 + $0x144] sm:$0xff] %v4153_v40 }
 0x3fe   :  { %3755 = vst [vmem:[%s7830_s5 + $0x14c] sm:$0xff] %v4154_v9  ;;  %3756 = vst [vmem:[%s7830_s5 + $0x154] sm:$0xff] %v4155_v61 }
 0x3ff   :  { %3757 = vst [vmem:[%s7830_s5 + $0x15c] sm:$0xff] %v4156_v38  ;;  %3758 = vst [vmem:[%s7830_s5 + $0x164] sm:$0xff] %v4157_v19 }
 0x400   :  { %3759 = vst [vmem:[%s7830_s5 + $0x16c] sm:$0xff] %v4158_v31  ;;  %3760 = vst [vmem:[%s7830_s5 + $0x174] sm:$0xff] %v4159_v0 }
 0x401   :  { %3761 = vst [vmem:[%s7830_s5 + $0x17c] sm:$0xff] %v4160_v28  ;;  %3762 = vst [vmem:[%s7830_s5 + $0x184] sm:$0xf] %v4161_v7 }

// kernel: encoder_forward.6
= control target key start
LH: loop header
LB: loop body
LE: loop exit
PB: predicated region body
PF: predicated region fallthrough
CT: control target
= control target key end

     0   :  { %v1600_v1 = vmov 0   ;;  %vm709_vm0 = vcmask 130048   ;;  %vm1231_vm1 = vcmask 1043456   ;;  %vm1232_vm2 = vcmask 408580   ;;  %s2153_s0 = inlined_call_operand.vmem [shape: bf16[144,1458], index: 0, kind: input, shape index: {}]   ;;  %s2154_s1 = inlined_call_operand.vmem [shape: bf16[32,144], index: 1, kind: input, shape index: {}]   ;;  %s2155_s2 = inlined_call_operand.vmem [shape: f32[32,1], index: 2, kind: input, shape index: {}]   ;;  %s2156_s3 = inlined_call_operand.vmem [shape: bf16[32,1458], index: 3, kind: output, shape index: {}]  }
   0x1   :  { %v1432_v0 = vld [vmem:[%s2153_s0 + $0x4] ss:$48 sps:$4 sm:$0xff]   ;;  %1430 = vset.pattern.permute.xlu0 %v1600_v1  ;;  %1431 = vset.pattern.permute.xlu1 %v1600_v1  ;;  %v1434_v2 = vld [vmem:[%s2153_s0 + $0xc] ss:$48 sps:$4 sm:$0xff]   ;;  %v1436_v3 = vld [vmem:[%s2153_s0] ss:$48 sps:$4 sm:$0xff]  }
   0x2   :  { %716 = vmatprep.subr.bf16.mxu0 %v1432_v0  ;;  %v1437_v4 = vld [vmem:[%s2153_s0 + $0x8] ss:$48 sps:$4 sm:$0xff]   ;;  %769 = vmatprep.subr.bf16.mxu1 %v1434_v2  ;;  %v1438_v5 = vld [vmem:[%s2153_s0 + $0x64] ss:$48 sps:$4 sm:$0xff]   ;;  %v1440_v6 = vld [vmem:[%s2153_s0 + $0x6c] ss:$48 sps:$4 sm:$0xff]  }
   0x3   :  { %717 = vmatpush1.bf16.msra.mxu0 %v1436_v3  ;;  %770 = vmatpush1.bf16.msra.mxu1 %v1437_v4  ;;  %v1442_v7 = vld [vmem:[%s2153_s0 + $0x60] ss:$48 sps:$4 sm:$0xff]   ;;  %v1443_v8 = vld [vmem:[%s2153_s0 + $0x68] ss:$48 sps:$4 sm:$0xff]   ;;  %v1444_v9 = vld [vmem:[%s2153_s0 + $0xc4] ss:$48 sps:$4 sm:$0xff]  }
   0x4   :  { %718 = vmatprep.subr.bf16.mxu0 %v1438_v5  ;;  %771 = vmatprep.subr.bf16.mxu1 %v1440_v6  ;;  %v1446_v10 = vld [vmem:[%s2153_s0 + $0xcc] ss:$48 sps:$4 sm:$0xff]   ;;  %v1448_v11 = vld [vmem:[%s2153_s0 + $0xc0] ss:$48 sps:$4 sm:$0xff]   ;;  %v1449_v12 = vld [vmem:[%s2153_s0 + $0xc8] ss:$48 sps:$4 sm:$0xff]  }
   0x5   :  { %v1450_v13 = vld [vmem:[%s2153_s0 + $0x124] ss:$48 sps:$4 sm:$0xff]   ;;  %v1452_v14 = vld [vmem:[%s2153_s0 + $0x12c] ss:$48 sps:$4 sm:$0xff]   ;;  %v1454_v15 = vld [vmem:[%s2153_s0 + $0x120] ss:$48 sps:$4 sm:$0xff]  }
   0x6   :  { %v1455_v16 = vld [vmem:[%s2153_s0 + $0x128] ss:$48 sps:$4 sm:$0xff]   ;;  %v1456_v17 = vld [vmem:[%s2153_s0 + $0x184] ss:$48 sps:$4 sm:$0xff]   ;;  %v1458_v18 = vld [vmem:[%s2153_s0 + $0x18c] ss:$48 sps:$4 sm:$0xff]  }
   0x7   :  { %719 = vmatpush1.bf16.msra.mxu0 %v1442_v7  ;;  %772 = vmatpush1.bf16.msra.mxu1 %v1443_v8  ;;  %v1460_v19 = vld [vmem:[%s2153_s0 + $0x180] ss:$48 sps:$4 sm:$0xff]   ;;  %v1461_v20 = vld [vmem:[%s2153_s0 + $0x188] ss:$48 sps:$4 sm:$0xff]   ;;  %v1462_v21 = vld [vmem:[%s2153_s0 + $0x1e4] ss:$48 sps:$4 sm:$0xff]  }
   0x8   :  { %720 = vmatprep.subr.bf16.mxu0 %v1444_v9  ;;  %773 = vmatprep.subr.bf16.mxu1 %v1446_v10  ;;  %v1464_v22 = vld [vmem:[%s2153_s0 + $0x1ec] ss:$48 sps:$4 sm:$0xff]   ;;  %v1466_v23 = vld [vmem:[%s2153_s0 + $0x1e0] ss:$48 sps:$4 sm:$0xff]   ;;  %v1467_v24 = vld [vmem:[%s2153_s0 + $0x1e8] ss:$48 sps:$4 sm:$0xff]  }
   0x9   :  { %v1468_v25 = vld [vmem:[%s2153_s0 + $0x244] ss:$48 sps:$4 sm:$0xff]   ;;  %v1470_v26 = vld [vmem:[%s2153_s0 + $0x24c] ss:$48 sps:$4 sm:$0xff]   ;;  %v1472_v27 = vld [vmem:[%s2153_s0 + $0x240] ss:$48 sps:$4 sm:$0xff]  }
   0xa   :  { %v1473_v28 = vld [vmem:[%s2153_s0 + $0x248] ss:$48 sps:$4 sm:$0xff]   ;;  %v1474_v29 = vld [vmem:[%s2153_s0 + $0x2a4] ss:$48 sps:$4 sm:$0xff]   ;;  %v1476_v31 = vld [vmem:[%s2153_s0 + $0x2ac] ss:$48 sps:$4 sm:$0xff]  }
   0xb   :  { %721 = vmatpush1.bf16.msra.mxu0 %v1448_v11  ;;  %774 = vmatpush1.bf16.msra.mxu1 %v1449_v12  ;;  %v1711_v30 = vld [vmem:[%s2154_s1 + $0x4] ss:$8 sps:$4 sm:$0xff]   ;;  %v1478_v32 = vld [vmem:[%s2153_s0 + $0x2a0] ss:$48 sps:$4 sm:$0xff]   ;;  %v1479_v33 = vld [vmem:[%s2153_s0 + $0x2a8] ss:$48 sps:$4 sm:$0xff]  }
   0xc   :  { %722 = vmatprep.subr.bf16.mxu0 %v1450_v13  ;;  %775 = vmatprep.subr.bf16.mxu1 %v1452_v14  ;;  %v1480_v34 = vld [vmem:[%s2153_s0 + $0x304] ss:$48 sps:$4 sm:$0xff]   ;;  %v1482_v35 = vld [vmem:[%s2153_s0 + $0x30c] ss:$48 sps:$4 sm:$0xff]   ;;  %v1484_v36 = vld [vmem:[%s2153_s0 + $0x300] ss:$48 sps:$4 sm:$0xff]  }
   0xd   :  { %1369 = vmatprep.mubr.msk.bf16.mxu0 %vm709_vm0, %v1711_v30  ;;  %1371 = vmatprep.mubr.msk.bf16.mxu1 %vm709_vm0, %v1711_v30  ;;  %v1485_v37 = vld [vmem:[%s2153_s0 + $0x308] ss:$48 sps:$4 sm:$0xff]   ;;  %v1491_v38 = vld [vmem:[%s2153_s0 + $0x14] ss:$48 sps:$4 sm:$0xff]   ;;  %v1494_v39 = vld [vmem:[%s2153_s0 + $0x1c] ss:$48 sps:$4 sm:$0xff]  }
   0xe   :  { %v1747_v40 = vld [vmem:[%s2154_s1] ss:$8 sps:$4 sm:$0xff]   ;;  %v1497_v43 = vld [vmem:[%s2153_s0 + $0x74] ss:$48 sps:$4 sm:$0xff]   ;;  %v1500_v44 = vld [vmem:[%s2153_s0 + $0x7c] ss:$48 sps:$4 sm:$0xff]  }
   0xf   :  { %723 = vmatpush1.bf16.msra.mxu0 %v1454_v15  ;;  %776 = vmatpush1.bf16.msra.mxu1 %v1455_v16  ;;  %v1489_v41 = vld [vmem:[%s2153_s0 + $0x10] ss:$48 sps:$4 sm:$0xff]   ;;  %v1492_v42 = vld [vmem:[%s2153_s0 + $0x18] ss:$48 sps:$4 sm:$0xff]   ;;  %v1503_v47 = vld [vmem:[%s2153_s0 + $0xd4] ss:$48 sps:$4 sm:$0xff]  }
  0x10   :  { %724 = vmatprep.subr.bf16.mxu0 %v1456_v17  ;;  %777 = vmatprep.subr.bf16.mxu1 %v1458_v18  ;;  %v1495_v45 = vld [vmem:[%s2153_s0 + $0x70] ss:$48 sps:$4 sm:$0xff]   ;;  %v1498_v46 = vld [vmem:[%s2153_s0 + $0x78] ss:$48 sps:$4 sm:$0xff]   ;;  %v1506_v48 = vld [vmem:[%s2153_s0 + $0xdc] ss:$48 sps:$4 sm:$0xff]  }
  0x11   :  { %v1501_v49 = vld [vmem:[%s2153_s0 + $0xd0] ss:$48 sps:$4 sm:$0xff]   ;;  %v1504_v50 = vld [vmem:[%s2153_s0 + $0xd8] ss:$48 sps:$4 sm:$0xff]   ;;  %v1509_v51 = vld [vmem:[%s2153_s0 + $0x134] ss:$48 sps:$4 sm:$0xff]  }
  0x12   :  { %v1512_v52 = vld [vmem:[%s2153_s0 + $0x13c] ss:$48 sps:$4 sm:$0xff]   ;;  %v1795_v54 = vld [vmem:[%s2154_s1 + $0x10] ss:$8 sps:$4 sm:$0xff]   ;;  %v1515_v57 = vld [vmem:[%s2153_s0 + $0x194] ss:$48 sps:$4 sm:$0xff]  }
  0x13   :  { %725 = vmatpush1.bf16.msra.mxu0 %v1460_v19  ;;  %778 = vmatpush1.bf16.msra.mxu1 %v1461_v20  ;;  %v1790_v53 = vld [vmem:[%s2154_s1 + $0x14] ss:$8 sps:$4 sm:$0xff]   ;;  %v1507_v55 = vld [vmem:[%s2153_s0 + $0x130] ss:$48 sps:$4 sm:$0xff]   ;;  %v1510_v56 = vld [vmem:[%s2153_s0 + $0x138] ss:$48 sps:$4 sm:$0xff]  }
  0x14   :  { %726 = vmatprep.subr.bf16.mxu0 %v1462_v21  ;;  %779 = vmatprep.subr.bf16.mxu1 %v1464_v22  ;;  %v1518_v58 = vld [vmem:[%s2153_s0 + $0x19c] ss:$48 sps:$4 sm:$0xff]   ;;  %v1513_v59 = vld [vmem:[%s2153_s0 + $0x190] ss:$48 sps:$4 sm:$0xff]   ;;  %v1516_v60 = vld [vmem:[%s2153_s0 + $0x198] ss:$48 sps:$4 sm:$0xff]  }
  0x15   :  { %v1521_v61 = vld [vmem:[%s2153_s0 + $0x1f4] ss:$48 sps:$4 sm:$0xff]   ;;  %v1524_v62 = vld [vmem:[%s2153_s0 + $0x1fc] ss:$48 sps:$4 sm:$0xff]   ;;  %v1519_v63 = vld [vmem:[%s2153_s0 + $0x1f0] ss:$48 sps:$4 sm:$0xff]  }
  0x16   :  { %v1522_v0 = vld [vmem:[%s2153_s0 + $0x1f8] ss:$48 sps:$4 sm:$0xff]   ;;  %v1527_v1 = vld [vmem:[%s2153_s0 + $0x254] ss:$48 sps:$4 sm:$0xff]   ;;  %v1530_v2 = vld [vmem:[%s2153_s0 + $0x25c] ss:$48 sps:$4 sm:$0xff]  }
  0x17   :  { %727 = vmatpush1.bf16.msra.mxu0 %v1466_v23  ;;  %780 = vmatpush1.bf16.msra.mxu1 %v1467_v24  ;;  %v1525_v3 = vld [vmem:[%s2153_s0 + $0x250] ss:$48 sps:$4 sm:$0xff]   ;;  %v1528_v4 = vld [vmem:[%s2153_s0 + $0x258] ss:$48 sps:$4 sm:$0xff]   ;;  %v1536_v5 = vld [vmem:[%s2153_s0 + $0x2b4] ss:$48 sps:$4 sm:$0xff]  }
  0x18   :  { %728 = vmatprep.subr.bf16.mxu0 %v1468_v25  ;;  %781 = vmatprep.subr.bf16.mxu1 %v1470_v26  ;;  %v1539_v6 = vld [vmem:[%s2153_s0 + $0x2bc] ss:$48 sps:$4 sm:$0xff]   ;;  %v1534_v7 = vld [vmem:[%s2153_s0 + $0x2b0] ss:$48 sps:$4 sm:$0xff]   ;;  %v1537_v8 = vld [vmem:[%s2153_s0 + $0x2b8] ss:$48 sps:$4 sm:$0xff]  }
  0x19   :  { %v1542_v9 = vld [vmem:[%s2153_s0 + $0x314] ss:$48 sps:$4 sm:$0xff]   ;;  %v1545_v10 = vld [vmem:[%s2153_s0 + $0x31c] ss:$48 sps:$4 sm:$0xff]   ;;  %v1540_v11 = vld [vmem:[%s2153_s0 + $0x310] ss:$48 sps:$4 sm:$0xff]  }
  0x1a   :  { %v1543_v12 = vld [vmem:[%s2153_s0 + $0x318] ss:$48 sps:$4 sm:$0xff]   ;;  %v1548_v13 = vld [vmem:[%s2153_s0 + $0x24] ss:$48 sps:$4 sm:$0xff]   ;;  %v1551_v14 = vld [vmem:[%s2153_s0 + $0x2c] ss:$48 sps:$4 sm:$0xff]  }
  0x1b   :  { %729 = vmatpush1.bf16.msra.mxu0 %v1472_v27  ;;  %782 = vmatpush1.bf16.msra.mxu1 %v1473_v28  ;;  %v1546_v15 = vld [vmem:[%s2153_s0 + $0x20] ss:$48 sps:$4 sm:$0xff]   ;;  %v1549_v16 = vld [vmem:[%s2153_s0 + $0x28] ss:$48 sps:$4 sm:$0xff]   ;;  %v1554_v17 = vld [vmem:[%s2153_s0 + $0x84] ss:$48 sps:$4 sm:$0xff]  }
  0x1c   :  { %730 = vmatprep.subr.bf16.mxu0 %v1474_v29  ;;  %783 = vmatprep.subr.bf16.mxu1 %v1476_v31  ;;  %v1557_v18 = vld [vmem:[%s2153_s0 + $0x8c] ss:$48 sps:$4 sm:$0xff]   ;;  %v1552_v19 = vld [vmem:[%s2153_s0 + $0x80] ss:$48 sps:$4 sm:$0xff]   ;;  %v1555_v20 = vld [vmem:[%s2153_s0 + $0x88] ss:$48 sps:$4 sm:$0xff]  }
  0x1d   :  { %v127_v21 = vld [vmem:[%s2155_s2] sm:$0xff]  ;;  %v129_v22 = vld [vmem:[%s2155_s2 + $0x10] sm:$0xff]  ;;  %v1563_v24 = vld [vmem:[%s2153_s0 + $0xec] ss:$48 sps:$4 sm:$0xff]  }
  0x1e   :  { %v1560_v23 = vld [vmem:[%s2153_s0 + $0xe4] ss:$48 sps:$4 sm:$0xff]   ;;  %133 = vperm.xlu0 %1430, %v127_v21   ;;  %143 = vperm.xlu1 %1431, %v129_v22   ;;  %v1558_v25 = vld [vmem:[%s2153_s0 + $0xe0] ss:$48 sps:$4 sm:$0xff]   ;;  %v1561_v26 = vld [vmem:[%s2153_s0 + $0xe8] ss:$48 sps:$4 sm:$0xff]  }
  0x1f   :  { %731 = vmatpush1.bf16.msra.mxu0 %v1478_v32  ;;  %784 = vmatpush1.bf16.msra.mxu1 %v1479_v33  ;;  %v1566_v27 = vld [vmem:[%s2153_s0 + $0x144] ss:$48 sps:$4 sm:$0xff]   ;;  %v1569_v28 = vld [vmem:[%s2153_s0 + $0x14c] ss:$48 sps:$4 sm:$0xff]   ;;  %v1564_v29 = vld [vmem:[%s2153_s0 + $0x140] ss:$48 sps:$4 sm:$0xff]  }
  0x20   :  { %732 = vmatprep.subr.bf16.mxu0 %v1480_v34  ;;  %785 = vmatprep.subr.bf16.mxu1 %v1482_v35  ;;  %v1567_v31 = vld [vmem:[%s2153_s0 + $0x148] ss:$48 sps:$4 sm:$0xff]   ;;  %v1572_v34 = vld [vmem:[%s2153_s0 + $0x1a4] ss:$48 sps:$4 sm:$0xff]   ;;  %v1575_v35 = vld [vmem:[%s2153_s0 + $0x1ac] ss:$48 sps:$4 sm:$0xff]  }
  0x21   :  { %v128_v32 = vld [vmem:[%s2155_s2 + $0x8] sm:$0xff]  ;;  %v130_v33 = vld [vmem:[%s2155_s2 + $0x18] sm:$0xff]  ;;  %vm2109_vm3 = vmor %vm1232_vm2, %vm1231_vm1 }
  0x22   :  { %138 = vperm.xlu0 %1430, %v128_v32   ;;  %148 = vperm.xlu1 %1431, %v130_v33  }
  0x23   :  { %733 = vmatpush1.bf16.msra.mxu0 %v1484_v36  ;;  %786 = vmatpush1.bf16.msra.mxu1 %v1485_v37  ;;  %v1570_v36 = vld [vmem:[%s2153_s0 + $0x1a0] ss:$48 sps:$4 sm:$0xff]   ;;  %v1573_v37 = vld [vmem:[%s2153_s0 + $0x1a8] ss:$48 sps:$4 sm:$0xff]  }
  0x24   :  { %822 = vmatprep.subr.bf16.mxu0 %v1491_v38  ;;  %875 = vmatprep.subr.bf16.mxu1 %v1494_v39  ;;  %v1578_v38 = vld [vmem:[%s2153_s0 + $0x204] ss:$48 sps:$4 sm:$0xff]   ;;  %v1576_v39 = vld [vmem:[%s2153_s0 + $0x200] ss:$48 sps:$4 sm:$0xff]  }
  0x26   :  { %749 = vmatmul.mubr.bf16.vlgmr.msra.gmra.mrb[0].mxu0 %v1747_v40  ;;  %802 = vmatmul.mubr.bf16.vlgmr.msra.gmra.mrb[0].mxu1 %v1747_v40 }
  0x27   :  { %823 = vmatpush1.bf16.msra.mxu0 %v1489_v41  ;;  %876 = vmatpush1.bf16.msra.mxu1 %v1492_v42  ;;  %v1579_v41 = vld [vmem:[%s2153_s0 + $0x208] ss:$48 sps:$4 sm:$0xff]   ;;  %v1584_v42 = vld [vmem:[%s2153_s0 + $0x264] ss:$48 sps:$4 sm:$0xff]  }
  0x28   :  { %824 = vmatprep.subr.bf16.mxu0 %v1497_v43  ;;  %877 = vmatprep.subr.bf16.mxu1 %v1500_v44  ;;  %v1587_v43 = vld [vmem:[%s2153_s0 + $0x26c] ss:$48 sps:$4 sm:$0xff]   ;;  %v1582_v44 = vld [vmem:[%s2153_s0 + $0x260] ss:$48 sps:$4 sm:$0xff]  }
  0x29   :  { %1370 = vmatprep.mubr.msk.bf16.mxu0 %vm709_vm0, %v1790_v53  ;;  %1372 = vmatprep.mubr.msk.bf16.mxu1 %vm709_vm0, %v1790_v53 }
  0x2b   :  { %825 = vmatpush1.bf16.msra.mxu0 %v1495_v45  ;;  %878 = vmatpush1.bf16.msra.mxu1 %v1498_v46  ;;  %v1585_v45 = vld [vmem:[%s2153_s0 + $0x268] ss:$48 sps:$4 sm:$0xff]   ;;  %v1590_v46 = vld [vmem:[%s2153_s0 + $0x2c4] ss:$48 sps:$4 sm:$0xff]  }
  0x2c   :  { %826 = vmatprep.subr.bf16.mxu0 %v1503_v47  ;;  %879 = vmatprep.subr.bf16.mxu1 %v1506_v48  ;;  %v1593_v47 = vld [vmem:[%s2153_s0 + $0x2cc] ss:$48 sps:$4 sm:$0xff]   ;;  %v1588_v48 = vld [vmem:[%s2153_s0 + $0x2c0] ss:$48 sps:$4 sm:$0xff]  }
  0x2e   :  { %759 = vmatmul.mubr.bf16.gmra.mrb[4].mxu0 %v1795_v54  ;;  %812 = vmatmul.mubr.bf16.gmra.mrb[4].mxu1 %v1795_v54 }
  0x2f   :  { %827 = vmatpush1.bf16.msra.mxu0 %v1501_v49  ;;  %880 = vmatpush1.bf16.msra.mxu1 %v1504_v50  ;;  %v1591_v49 = vld [vmem:[%s2153_s0 + $0x2c8] ss:$48 sps:$4 sm:$0xff]   ;;  %v1596_v50 = vld [vmem:[%s2153_s0 + $0x324] ss:$48 sps:$4 sm:$0xff]  }
  0x30   :  { %828 = vmatprep.subr.bf16.mxu0 %v1509_v51  ;;  %881 = vmatprep.subr.bf16.mxu1 %v1512_v52  ;;  %v1599_v51 = vld [vmem:[%s2153_s0 + $0x32c] ss:$48 sps:$4 sm:$0xff]   ;;  %v1594_v52 = vld [vmem:[%s2153_s0 + $0x320] ss:$48 sps:$4 sm:$0xff]  }
  0x31   :  { %1373 = vmatprep.mubr.msk.bf16.mxu0 %vm709_vm0, %v1711_v30  ;;  %1375 = vmatprep.mubr.msk.bf16.mxu1 %vm709_vm0, %v1711_v30 }
  0x33   :  { %829 = vmatpush1.bf16.msra.mxu0 %v1507_v55  ;;  %882 = vmatpush1.bf16.msra.mxu1 %v1510_v56  ;;  %v1597_v55 = vld [vmem:[%s2153_s0 + $0x328] ss:$48 sps:$4 sm:$0xff]  }
  0x34   :  { %830 = vmatprep.subr.bf16.mxu0 %v1515_v57  ;;  %883 = vmatprep.subr.bf16.mxu1 %v1518_v58 }
  0x37   :  { %831 = vmatpush1.bf16.msra.mxu0 %v1513_v59  ;;  %884 = vmatpush1.bf16.msra.mxu1 %v1516_v60 }
  0x38   :  { %832 = vmatprep.subr.bf16.mxu0 %v1521_v61  ;;  %885 = vmatprep.subr.bf16.mxu1 %v1524_v62 }
  0x3b   :  { %833 = vmatpush1.bf16.msra.mxu0 %v1519_v63  ;;  %886 = vmatpush1.bf16.msra.mxu1 %v1522_v0 }
  0x3c   :  { %834 = vmatprep.subr.bf16.mxu0 %v1527_v1  ;;  %887 = vmatprep.subr.bf16.mxu1 %v1530_v2 }
  0x3f   :  { %835 = vmatpush1.bf16.msra.mxu0 %v1525_v3  ;;  %888 = vmatpush1.bf16.msra.mxu1 %v1528_v4 }
  0x40   :  { %836 = vmatprep.subr.bf16.mxu0 %v1536_v5  ;;  %889 = vmatprep.subr.bf16.mxu1 %v1539_v6 }
  0x43   :  { %837 = vmatpush1.bf16.msra.mxu0 %v1534_v7  ;;  %890 = vmatpush1.bf16.msra.mxu1 %v1537_v8 }
  0x44   :  { %838 = vmatprep.subr.bf16.mxu0 %v1542_v9  ;;  %891 = vmatprep.subr.bf16.mxu1 %v1545_v10 }
  0x47   :  { %839 = vmatpush1.bf16.msra.mxu0 %v1540_v11  ;;  %892 = vmatpush1.bf16.msra.mxu1 %v1543_v12 }
  0x48   :  { %928 = vmatprep.subr.bf16.mxu0 %v1548_v13  ;;  %981 = vmatprep.subr.bf16.mxu1 %v1551_v14 }
  0x4a   :  { %855 = vmatmul.mubr.bf16.vlgmr.msra.gmra.mrb[8].mxu0 %v1747_v40  ;;  %908 = vmatmul.mubr.bf16.vlgmr.msra.gmra.mrb[8].mxu1 %v1747_v40 }
  0x4b   :  { %929 = vmatpush1.bf16.msra.mxu0 %v1546_v15  ;;  %982 = vmatpush1.bf16.msra.mxu1 %v1549_v16 }
  0x4c   :  { %930 = vmatprep.subr.bf16.mxu0 %v1554_v17  ;;  %983 = vmatprep.subr.bf16.mxu1 %v1557_v18 }
  0x4d   :  { %1374 = vmatprep.mubr.msk.bf16.mxu0 %vm709_vm0, %v1790_v53  ;;  %1376 = vmatprep.mubr.msk.bf16.mxu1 %vm709_vm0, %v1790_v53 }
  0x4f   :  { %931 = vmatpush1.bf16.msra.mxu0 %v1552_v19  ;;  %984 = vmatpush1.bf16.msra.mxu1 %v1555_v20 }
  0x50   :  { %932 = vmatprep.subr.bf16.mxu0 %v1560_v23  ;;  %985 = vmatprep.subr.bf16.mxu1 %v1563_v24 }
  0x52   :  { %865 = vmatmul.mubr.bf16.gmra.mrb[12].mxu0 %v1795_v54  ;;  %918 = vmatmul.mubr.bf16.gmra.mrb[12].mxu1 %v1795_v54 }
  0x53   :  { %933 = vmatpush1.bf16.msra.mxu0 %v1558_v25  ;;  %986 = vmatpush1.bf16.msra.mxu1 %v1561_v26 }
  0x54   :  { %934 = vmatprep.subr.bf16.mxu0 %v1566_v27  ;;  %987 = vmatprep.subr.bf16.mxu1 %v1569_v28 }
  0x55   :  { %1377 = vmatprep.mubr.msk.bf16.mxu0 %vm709_vm0, %v1711_v30  ;;  %1379 = vmatprep.mubr.msk.bf16.mxu1 %vm709_vm0, %v1711_v30  ;;  %v1581_v30 = vld [vmem:[%s2153_s0 + $0x20c] ss:$48 sps:$4 sm:$0xff]  }
  0x57   :  { %935 = vmatpush1.bf16.msra.mxu0 %v1564_v29  ;;  %988 = vmatpush1.bf16.msra.mxu1 %v1567_v31 }
  0x58   :  { %936 = vmatprep.subr.bf16.mxu0 %v1572_v34  ;;  %989 = vmatprep.subr.bf16.mxu1 %v1575_v35 }
  0x5b   :  { %937 = vmatpush1.bf16.msra.mxu0 %v1570_v36  ;;  %990 = vmatpush1.bf16.msra.mxu1 %v1573_v37 }
  0x5c   :  { %938 = vmatprep.subr.bf16.mxu0 %v1578_v38  ;;  %991 = vmatprep.subr.bf16.mxu1 %v1581_v30 }
  0x5f   :  { %939 = vmatpush1.bf16.msra.mxu0 %v1576_v39  ;;  %992 = vmatpush1.bf16.msra.mxu1 %v1579_v41 }
  0x60   :  { %940 = vmatprep.subr.bf16.mxu0 %v1584_v42  ;;  %993 = vmatprep.subr.bf16.mxu1 %v1587_v43 }
  0x63   :  { %941 = vmatpush1.bf16.msra.mxu0 %v1582_v44  ;;  %994 = vmatpush1.bf16.msra.mxu1 %v1585_v45 }
  0x64   :  { %942 = vmatprep.subr.bf16.mxu0 %v1590_v46  ;;  %995 = vmatprep.subr.bf16.mxu1 %v1593_v47 }
  0x67   :  { %943 = vmatpush1.bf16.msra.mxu0 %v1588_v48  ;;  %996 = vmatpush1.bf16.msra.mxu1 %v1591_v49 }
  0x68   :  { %944 = vmatprep.subr.bf16.mxu0 %v1596_v50  ;;  %997 = vmatprep.subr.bf16.mxu1 %v1599_v51 }
  0x6b   :  { %945 = vmatpush1.bf16.msra.mxu0 %v1594_v52  ;;  %998 = vmatpush1.bf16.msra.mxu1 %v1597_v55 }
  0x6e   :  { %961 = vmatmul.mubr.bf16.vlgmr.msra.gmra.mrb[16].mxu0 %v1747_v40  ;;  %1014 = vmatmul.mubr.bf16.vlgmr.msra.gmra.mrb[16].mxu1 %v1747_v40 }
  0x6f   :  { %1378 = vmatprep.mubr.msk.bf16.mxu0 %vm709_vm0, %v1790_v53  ;;  %1380 = vmatprep.mubr.msk.bf16.mxu1 %vm709_vm0, %v1790_v53 }
  0x76   :  { %971 = vmatmul.mubr.bf16.gmra.mrb[20].mxu0 %v1795_v54  ;;  %1024 = vmatmul.mubr.bf16.gmra.mrb[20].mxu1 %v1795_v54 }
  0x9d   :  { %v2013_v56 = vpop.permute.xlu0 %133  ;;  %v2017_v58 = vpop.permute.xlu1 %143 }
  0xa1   :  { %v2015_v57 = vpop.permute.xlu0 %138  ;;  %v2027_v18 = vpop.permute.xlu1 %148 }
  0xf9   :  { %v750_v59 = vpop.f32.mrb[0].mxu0  ;;  %v803_v60 = vpop.f32.mrb[0].mxu1 }
  0xfa   :  { %v751_v40 = vadd.f32 %v750_v59, %v2013_v56  ;;  %v804_v61 = vadd.f32 %v803_v60, %v2013_v56  ;;  %v752_v62 = vpop.f32.mrb[1].mxu0  ;;  %v805_v63 = vpop.f32.mrb[1].mxu1 }
  0xfb   :  { %v753_v53 = vadd.f32 %v752_v62, %v2013_v56  ;;  %v806_v0 = vadd.f32 %v805_v63, %v2013_v56  ;;  %v754_v1 = vpop.f32.mrb[2].mxu0  ;;  %v807_v54 = vpop.f32.mrb[2].mxu1 }
  0xfc   :  { %v1034_v2 = vmax.f32 %v751_v40, 0.0  ;;  %v1036_v3 = vmax.f32 %v804_v61, 0.0  ;;  %v755_v4 = vadd.f32 %v754_v1, %v2015_v57  ;;  %v808_v5 = vadd.f32 %v807_v54, %v2015_v57  ;;  %v756_v6 = vpop.f32.mrb[3].mxu0  ;;  %v809_v7 = vpop.f32.mrb[3].mxu1 }
  0xfd   :  { %v1035_v8 = vmax.f32 %v753_v53, 0.0  ;;  %v1037_v9 = vmax.f32 %v806_v0, 0.0  ;;  %v757_v10 = vadd.f32 %v756_v6, %v2015_v57  ;;  %v810_v11 = vadd.f32 %v809_v7, %v2015_v57 }
  0xfe   :  { %v1046_v12 = vmax.f32 %v755_v4, 0.0  ;;  %v1048_v13 = vmax.f32 %v808_v5, 0.0 }
  0xff   :  { %v1405_v14 = vpack.c.bf16 %v1035_v8, %v1034_v2  ;;  %v1406_v15 = vpack.c.bf16 %v1037_v9, %v1036_v3  ;;  %v1047_v16 = vmax.f32 %v757_v10, 0.0  ;;  %v1049_v17 = vmax.f32 %v810_v11, 0.0 }
 0x101   :  { %1226 = vst [vmem:[%s2156_s3] sm:$0xff] %v1405_v14  ;;  %1227 = vst [vmem:[%s2156_s3 + $0x8] sm:$0xff] %v1406_v15  ;;  %v1411_v19 = vpack.c.bf16 %v1047_v16, %v1046_v12  ;;  %v1412_v20 = vpack.c.bf16 %v1049_v17, %v1048_v13  ;;  %v760_v21 = vpop.f32.mrb[4].mxu0  ;;  %v813_v22 = vpop.f32.mrb[4].mxu1 }
 0x102   :  { %v761_v23 = vadd.f32 %v760_v21, %v2017_v58  ;;  %v814_v24 = vadd.f32 %v813_v22, %v2017_v58  ;;  %v762_v25 = vpop.f32.mrb[5].mxu0  ;;  %v815_v26 = vpop.f32.mrb[5].mxu1 }
 0x103   :  { %1235 = vst [vmem:[%s2156_s3 + $0x30] sm:$0xff] %v1411_v19  ;;  %1236 = vst [vmem:[%s2156_s3 + $0x38] sm:$0xff] %v1412_v20  ;;  %v763_v27 = vadd.f32 %v762_v25, %v2017_v58  ;;  %v816_v28 = vadd.f32 %v815_v26, %v2017_v58  ;;  %v764_v29 = vpop.f32.mrb[6].mxu0  ;;  %v817_v31 = vpop.f32.mrb[6].mxu1 }
 0x104   :  { %v1058_v32 = vmax.f32 %v761_v23, 0.0  ;;  %v1060_v33 = vmax.f32 %v814_v24, 0.0  ;;  %v765_v34 = vadd.f32 %v764_v29, %v2027_v18  ;;  %v766_v35 = vpop.f32.mrb[7].mxu0  ;;  %v818_v36 = vadd.f32 %v817_v31, %v2027_v18  ;;  %v819_v37 = vpop.f32.mrb[7].mxu1 }
 0x105   :  { %v1059_v38 = vmax.f32 %v763_v27, 0.0  ;;  %v1061_v30 = vmax.f32 %v816_v28, 0.0  ;;  %v767_v39 = vadd.f32 %v766_v35, %v2027_v18  ;;  %v820_v41 = vadd.f32 %v819_v37, %v2027_v18 }
 0x106   :  { %v1070_v42 = vmax.f32 %v765_v34, 0.0  ;;  %v1072_v43 = vmax.f32 %v818_v36, 0.0 }
 0x107   :  { %v1417_v44 = vpack.c.bf16 %v1059_v38, %v1058_v32  ;;  %v1418_v45 = vpack.c.bf16 %v1061_v30, %v1060_v33  ;;  %v1071_v46 = vmax.f32 %v767_v39, 0.0  ;;  %v1073_v47 = vmax.f32 %v820_v41, 0.0 }
 0x109   :  { %1241 = vst [vmem:[%s2156_s3 + $0x60] sm:$0xff] %v1417_v44  ;;  %1242 = vst [vmem:[%s2156_s3 + $0x68] sm:$0xff] %v1418_v45  ;;  %v1423_v48 = vpack.c.bf16 %v1071_v46, %v1070_v42  ;;  %v1424_v49 = vpack.c.bf16 %v1073_v47, %v1072_v43 }
 0x10b   :  { %1247 = vst [vmem:[%s2156_s3 + $0x90] sm:$0xff] %v1423_v48  ;;  %1248 = vst [vmem:[%s2156_s3 + $0x98] sm:$0xff] %v1424_v49 }
 0x11d   :  { %v856_v50 = vpop.f32.mrb[8].mxu0  ;;  %v909_v51 = vpop.f32.mrb[8].mxu1 }
 0x11e   :  { %v857_v52 = vadd.f32 %v856_v50, %v2013_v56  ;;  %v910_v55 = vadd.f32 %v909_v51, %v2013_v56  ;;  %v858_v59 = vpop.f32.mrb[9].mxu0  ;;  %v911_v60 = vpop.f32.mrb[9].mxu1 }
 0x11f   :  { %v859_v40 = vadd.f32 %v858_v59, %v2013_v56  ;;  %v912_v61 = vadd.f32 %v911_v60, %v2013_v56  ;;  %v860_v62 = vpop.f32.mrb[10].mxu0  ;;  %v913_v63 = vpop.f32.mrb[10].mxu1 }
 0x120   :  { %v1038_v53 = vmax.f32 %v857_v52, 0.0  ;;  %v1040_v0 = vmax.f32 %v910_v55, 0.0  ;;  %v861_v1 = vadd.f32 %v860_v62, %v2015_v57  ;;  %v914_v54 = vadd.f32 %v913_v63, %v2015_v57  ;;  %v862_v2 = vpop.f32.mrb[11].mxu0  ;;  %v915_v3 = vpop.f32.mrb[11].mxu1 }
 0x121   :  { %v1039_v4 = vmax.f32 %v859_v40, 0.0  ;;  %v1041_v5 = vmax.f32 %v912_v61, 0.0  ;;  %v863_v6 = vadd.f32 %v862_v2, %v2015_v57  ;;  %v916_v7 = vadd.f32 %v915_v3, %v2015_v57 }
 0x122   :  { %v1050_v8 = vmax.f32 %v861_v1, 0.0  ;;  %v1052_v9 = vmax.f32 %v914_v54, 0.0 }
 0x123   :  { %v1407_v10 = vpack.c.bf16 %v1039_v4, %v1038_v53  ;;  %v1408_v11 = vpack.c.bf16 %v1041_v5, %v1040_v0  ;;  %v1051_v12 = vmax.f32 %v863_v6, 0.0  ;;  %v1053_v13 = vmax.f32 %v916_v7, 0.0 }
 0x125   :  { %1228 = vst [vmem:[%s2156_s3 + $0x10] sm:$0xff] %v1407_v10  ;;  %1229 = vst [vmem:[%s2156_s3 + $0x18] sm:$0xff] %v1408_v11  ;;  %v1413_v14 = vpack.c.bf16 %v1051_v12, %v1050_v8  ;;  %v1414_v15 = vpack.c.bf16 %v1053_v13, %v1052_v9  ;;  %v866_v16 = vpop.f32.mrb[12].mxu0  ;;  %v919_v17 = vpop.f32.mrb[12].mxu1 }
 0x126   :  { %v867_v19 = vadd.f32 %v866_v16, %v2017_v58  ;;  %v920_v20 = vadd.f32 %v919_v17, %v2017_v58  ;;  %v868_v21 = vpop.f32.mrb[13].mxu0  ;;  %v921_v22 = vpop.f32.mrb[13].mxu1 }
 0x127   :  { %1237 = vst [vmem:[%s2156_s3 + $0x40] sm:$0xff] %v1413_v14  ;;  %1238 = vst [vmem:[%s2156_s3 + $0x48] sm:$0xff] %v1414_v15  ;;  %v869_v23 = vadd.f32 %v868_v21, %v2017_v58  ;;  %v922_v24 = vadd.f32 %v921_v22, %v2017_v58  ;;  %v870_v25 = vpop.f32.mrb[14].mxu0  ;;  %v923_v26 = vpop.f32.mrb[14].mxu1 }
 0x128   :  { %v1062_v27 = vmax.f32 %v867_v19, 0.0  ;;  %v1064_v28 = vmax.f32 %v920_v20, 0.0  ;;  %v871_v29 = vadd.f32 %v870_v25, %v2027_v18  ;;  %v924_v31 = vadd.f32 %v923_v26, %v2027_v18  ;;  %v872_v32 = vpop.f32.mrb[15].mxu0  ;;  %v925_v33 = vpop.f32.mrb[15].mxu1 }
 0x129   :  { %v1063_v34 = vmax.f32 %v869_v23, 0.0  ;;  %v1065_v35 = vmax.f32 %v922_v24, 0.0  ;;  %v873_v36 = vadd.f32 %v872_v32, %v2027_v18  ;;  %v926_v37 = vadd.f32 %v925_v33, %v2027_v18 }
 0x12a   :  { %v1074_v38 = vmax.f32 %v871_v29, 0.0  ;;  %v1076_v30 = vmax.f32 %v924_v31, 0.0 }
 0x12b   :  { %v1419_v39 = vpack.c.bf16 %v1063_v34, %v1062_v27  ;;  %v1420_v41 = vpack.c.bf16 %v1065_v35, %v1064_v28  ;;  %v1075_v42 = vmax.f32 %v873_v36, 0.0  ;;  %v1077_v43 = vmax.f32 %v926_v37, 0.0 }
 0x12d   :  { %1243 = vst [vmem:[%s2156_s3 + $0x70] sm:$0xff] %v1419_v39  ;;  %1244 = vst [vmem:[%s2156_s3 + $0x78] sm:$0xff] %v1420_v41  ;;  %v1425_v44 = vpack.c.bf16 %v1075_v42, %v1074_v38  ;;  %v1426_v45 = vpack.c.bf16 %v1077_v43, %v1076_v30 }
 0x12f   :  { %1249 = vst [vmem:[%s2156_s3 + $0xa0] sm:$0xff] %v1425_v44  ;;  %1250 = vst [vmem:[%s2156_s3 + $0xa8] sm:$0xff] %v1426_v45 }
 0x141   :  { %v962_v46 = vpop.f32.mrb[16].mxu0  ;;  %v1015_v47 = vpop.f32.mrb[16].mxu1 }
 0x142   :  { %v963_v48 = vadd.f32 %v962_v46, %v2013_v56  ;;  %v1016_v49 = vadd.f32 %v1015_v47, %v2013_v56  ;;  %v964_v50 = vpop.f32.mrb[17].mxu0  ;;  %v1017_v51 = vpop.f32.mrb[17].mxu1 }
 0x143   :  { %v965_v52 = vadd.f32 %v964_v50, %v2013_v56  ;;  %v1018_v55 = vadd.f32 %v1017_v51, %v2013_v56  ;;  %v966_v59 = vpop.f32.mrb[18].mxu0  ;;  %v1019_v60 = vpop.f32.mrb[18].mxu1 }
 0x144   :  { %v1042_v40 = vmax.f32 %v963_v48, 0.0  ;;  %v1044_v61 = vmax.f32 %v1016_v49, 0.0  ;;  %v967_v62 = vadd.f32 %v966_v59, %v2015_v57  ;;  %v1020_v63 = vadd.f32 %v1019_v60, %v2015_v57  ;;  %v968_v53 = vpop.f32.mrb[19].mxu0  ;;  %v1021_v0 = vpop.f32.mrb[19].mxu1 }
 0x145   :  { %v1043_v1 = vmax.f32 %v965_v52, 0.0  ;;  %v1045_v54 = vmax.f32 %v1018_v55, 0.0  ;;  %v969_v2 = vadd.f32 %v968_v53, %v2015_v57  ;;  %v1022_v3 = vadd.f32 %v1021_v0, %v2015_v57 }
 0x146   :  { %v1054_v4 = vmax.f32 %v967_v62, 0.0  ;;  %v1056_v5 = vmax.f32 %v1020_v63, 0.0 }
 0x147   :  { %v1409_v6 = vpack.c.bf16 %v1043_v1, %v1042_v40  ;;  %v1410_v7 = vpack.c.bf16 %v1045_v54, %v1044_v61  ;;  %v1055_v8 = vmax.f32 %v969_v2, 0.0  ;;  %v1057_v9 = vmax.f32 %v1022_v3, 0.0 }
 0x149   :  { %1230 = vst [vmem:[%s2156_s3 + $0x20] sm:$0xff] %v1409_v6  ;;  %1234 = vst.msk [vmem:[%s2156_s3 + $0x28] sm:$0xff] %vm2109_vm3, %v1410_v7  ;;  %v1415_v57 = vpack.c.bf16 %v1055_v8, %v1054_v4  ;;  %v1416_v10 = vpack.c.bf16 %v1057_v9, %v1056_v5  ;;  %v972_v11 = vpop.f32.mrb[20].mxu0  ;;  %v1025_v12 = vpop.f32.mrb[20].mxu1 }
 0x14a   :  { %v973_v13 = vadd.f32 %v972_v11, %v2017_v58  ;;  %v1026_v14 = vadd.f32 %v1025_v12, %v2017_v58  ;;  %v974_v15 = vpop.f32.mrb[21].mxu0  ;;  %v1027_v16 = vpop.f32.mrb[21].mxu1 }
 0x14b   :  { %1239 = vst [vmem:[%s2156_s3 + $0x50] sm:$0xff] %v1415_v57  ;;  %1240 = vst.msk [vmem:[%s2156_s3 + $0x58] sm:$0xff] %vm2109_vm3, %v1416_v10  ;;  %v975_v17 = vadd.f32 %v974_v15, %v2017_v58  ;;  %v1028_v19 = vadd.f32 %v1027_v16, %v2017_v58  ;;  %v976_v20 = vpop.f32.mrb[22].mxu0  ;;  %v1029_v21 = vpop.f32.mrb[22].mxu1 }
 0x14c   :  { %v1066_v22 = vmax.f32 %v973_v13, 0.0  ;;  %v1068_v23 = vmax.f32 %v1026_v14, 0.0  ;;  %v977_v24 = vadd.f32 %v976_v20, %v2027_v18  ;;  %v1030_v25 = vadd.f32 %v1029_v21, %v2027_v18  ;;  %v978_v26 = vpop.f32.mrb[23].mxu0  ;;  %v1031_v27 = vpop.f32.mrb[23].mxu1 }
 0x14d   :  { %v1067_v28 = vmax.f32 %v975_v17, 0.0  ;;  %v1069_v29 = vmax.f32 %v1028_v19, 0.0  ;;  %v979_v31 = vadd.f32 %v978_v26, %v2027_v18  ;;  %v1032_v32 = vadd.f32 %v1031_v27, %v2027_v18 }
 0x14e   :  { %v1078_v33 = vmax.f32 %v977_v24, 0.0  ;;  %v1080_v34 = vmax.f32 %v1030_v25, 0.0 }
 0x14f   :  { %v1421_v35 = vpack.c.bf16 %v1067_v28, %v1066_v22  ;;  %v1422_v58 = vpack.c.bf16 %v1069_v29, %v1068_v23  ;;  %v1079_v36 = vmax.f32 %v979_v31, 0.0  ;;  %v1081_v37 = vmax.f32 %v1032_v32, 0.0 }
 0x151   :  { %1245 = vst [vmem:[%s2156_s3 + $0x80] sm:$0xff] %v1421_v35  ;;  %1246 = vst.msk [vmem:[%s2156_s3 + $0x88] sm:$0xff] %vm2109_vm3, %v1422_v58  ;;  %v1427_v38 = vpack.c.bf16 %v1079_v36, %v1078_v33  ;;  %v1428_v30 = vpack.c.bf16 %v1081_v37, %v1080_v34 }
 0x153   :  { %1251 = vst [vmem:[%s2156_s3 + $0xb0] sm:$0xff] %v1427_v38  ;;  %1252 = vst.msk [vmem:[%s2156_s3 + $0xb8] sm:$0xff] %vm2109_vm3, %v1428_v30 }

// kernel: encoder_forward.7
= control target key start
LH: loop header
LB: loop body
LE: loop exit
PB: predicated region body
PF: predicated region fallthrough
CT: control target
= control target key end

     0   :  { %15 = vsyncpa [#allocation4], 0  ;;  %s9052_s0 = inlined_call_operand.vmem [shape: bf16[2,23424], index: 0, kind: input, shape index: {}]   ;;  %s9053_s1 = inlined_call_operand.vmem [shape: bf16[23424,128], index: 1, kind: input, shape index: {}]   ;;  %s9054_s2 = inlined_call_operand.vmem [shape: f32[1,128], index: 2, kind: input, shape index: {}]   ;;  %s9055_s3 = inlined_call_operand.vmem [shape: f32[128,4], index: 3, kind: input, shape index: {}]   ;;  %s9056_s4 = inlined_call_operand.vmem [shape: f32[1,4], index: 4, kind: input, shape index: {}]   ;;  %s9057_s5 = inlined_call_operand.vmem [shape: f32[128,4], index: 5, kind: input, shape index: {}]   ;;  %s9058_s6 = inlined_call_operand.vmem [shape: f32[1,4], index: 6, kind: input, shape index: {}]   ;;  %s9059_s7 = inlined_call_operand.vmem [shape: f32[2,4], index: 7, kind: input, shape index: {}]   ;;  %s9060_s8 = inlined_call_operand.hbm [shape: f32[2,4], index: 8, kind: output, shape index: {0}]   ;;  %s9061_s9 = inlined_call_operand.hbm [shape: f32[1,1], index: 9, kind: output, shape index: {1}]  }
   0x1   :  { %16 = vsyncpa [#allocation6], 0  ;;  %s8255_s30 = smov 0  }
   0x2 LB: > { %s8261_s10 = sadd.s32 4294967295, %s8194_s30   ;;  %p6256_p0 = scmp.ge.s32.totalorder %s8194_s30, 1  ;;  %s8194_s30 = sphi %s8255_s30, %s22_s30  }
   0x3   : > { %p293_p1 = scmp.lt.s32.totalorder %s8194_s30, 4 }
   0x5   : > { %p294_p2 = pnand %p6256_p0, %p293_p1 }
   0x6   : > { %s328_s11 = smul.u32 (!%p294_p2), 61, %s8261_s10  ;;  %p6258_p5 = scmp.ne.s32.totalorder (!%p294_p2), %s8261_s10, 0 }
   0x7   : > { %297 = sbr.rel (%p294_p2) target bundleno = 1255 (0x4e7), region = 52 }
   0x8   : > { %s333_s12 = smul.u32 (!%p294_p2), 976, %s8261_s10  ;;  %p329_p3 = scmp.lt.s32.totalorder (!%p294_p2), %s328_s11, 182 }
   0xa   : > { %p334_p4 = scmp.lt.s32.totalorder (!%p294_p2), %s333_s12, 2927 }
   0xe   : > { %s9063_s11 = smov (!%p329_p3, %s328_s11), 182  ;;  %s9065_s12 = smov (!%p334_p4, %s333_s12), 2927 }
   0xf   : > { %s8270_s15 = scalar_lea.vmem %s9052_s0, %s9063_s11  ;;  %s6257_s16 = sshll.u32 %s9065_s12, 2  ;;  %v8196_v0 = vmov (!%p6258_p5), 0.0  }
  0x10   : > { %s8275_s19 = scalar_lea.vmem %s9053_s1, %s6257_s16  ;;  %343 = sbr.rel (%p6258_p5) target bundleno = 23 (0x17), region = 56  ;;  %344 = vst [vmem:[#allocation2] sm:$0x3] (!%p6258_p5), %v8196_v0 }
  0x17 PF: > { %v7630_v1 = vld [vmem:[%s8275_s19 + $0x40] sm:$0xff]   ;;  %v7634_v5 = vld [vmem:[%s8275_s19 + $0x48] sm:$0xff]   ;;  %v7638_v9 = vld [vmem:[%s8275_s19 + $0x50] sm:$0xff]   ;;  %v1342_v30 = vlaneseq  ;;  %v8197_v36 = vmov 1966171168   ;;  %vm8199_vm0 = vmmov 0  }
  0x18   : > { %v7631_v2 = vld [vmem:[%s8275_s19 + $0xc0] sm:$0xff]   ;;  %6758 = vmatprep.subr.bf16.mxu0 %v7630_v1  ;;  %v7635_v6 = vld [vmem:[%s8275_s19 + $0xc8] sm:$0xff]   ;;  %v7639_v10 = vld [vmem:[%s8275_s19 + $0xd0] sm:$0xff]   ;;  %v1340_v37 = vunpack.c.l.s4 %v8197_v36  ;;  %p6747_p6 = scmp.ne.s32.totalorder %s8261_s10, 2 }
  0x19   : > { %v7632_v3 = vld [vmem:[%s8275_s19] sm:$0xff]   ;;  %6780 = vmatprep.subr.bf16.mxu1 %v7631_v2  ;;  %v7636_v7 = vld [vmem:[%s8275_s19 + $0x8] sm:$0xff]   ;;  %v7640_v11 = vld [vmem:[%s8275_s19 + $0x10] sm:$0xff]   ;;  %v1343_v34 = vshrl.u32 %v1342_v30, 7  ;;  %vm8201_vm1 = vmmov (!%p6747_p6), 0   ;;  %vm6156_vm2 = vcmask (!%p6747_p6), 25600  }
  0x1a   : > { %v7633_v4 = vld [vmem:[%s8275_s19 + $0x80] sm:$0xff]   ;;  %6759 = vmatpush3.bf16.msra.mxu0 %v7632_v3  ;;  %v7637_v8 = vld [vmem:[%s8275_s19 + $0x88] sm:$0xff]   ;;  %v7641_v12 = vld [vmem:[%s8275_s19 + $0x90] sm:$0xff]   ;;  %v1341_v40 = vunpack.c.0.s8 %v1340_v37  ;;  %vm6174_vm3 = vcmask (!%p6747_p6), 0  }
  0x1b   : > { %6781 = vmatpush3.bf16.msra.mxu1 %v7633_v4  ;;  %6760 = vmatprep.subr.bf16.mxu0 %v7634_v5  ;;  %v7642_v13 = vld [vmem:[%s8275_s19 + $0x58] sm:$0xff]   ;;  %v7646_v17 = vld [vmem:[%s8275_s19 + $0x60] sm:$0xff]   ;;  %v7650_v21 = vld [vmem:[%s8275_s19 + $0x68] sm:$0xff]  }
  0x1c   : > { %6782 = vmatprep.subr.bf16.mxu1 %v7635_v6  ;;  %v7643_v14 = vld [vmem:[%s8275_s19 + $0xd8] sm:$0xff]   ;;  %v7647_v18 = vld [vmem:[%s8275_s19 + $0xe0] sm:$0xff]   ;;  %v7651_v22 = vld [vmem:[%s8275_s19 + $0xe8] sm:$0xff]   ;;  %v8313_v42 = vsub.s32 %v1341_v40, %v1343_v34 }
  0x1d   : > { %v7644_v15 = vld [vmem:[%s8275_s19 + $0x18] sm:$0xff]   ;;  %v7648_v19 = vld [vmem:[%s8275_s19 + $0x20] sm:$0xff]   ;;  %v7652_v23 = vld [vmem:[%s8275_s19 + $0x28] sm:$0xff]  }
  0x1e   : > { %6761 = vmatpush3.bf16.msra.mxu0 %v7636_v7  ;;  %v7645_v16 = vld [vmem:[%s8275_s19 + $0x98] sm:$0xff]   ;;  %v7649_v20 = vld [vmem:[%s8275_s19 + $0xa0] sm:$0xff]   ;;  %v7653_v24 = vld [vmem:[%s8275_s19 + $0xa8] sm:$0xff]  }
  0x1f   : > { %6783 = vmatpush3.bf16.msra.mxu1 %v7637_v8  ;;  %6762 = vmatprep.subr.bf16.mxu0 %v7638_v9  ;;  %v7654_v25 = vld [vmem:[%s8275_s19 + $0x70] sm:$0xff]   ;;  %v7658_v29 = vld [vmem:[%s8275_s19 + $0x78] sm:$0xff]   ;;  %v7663_v35 = vld [vmem:[%s8275_s19 + $0x140] sm:$0xff]  }
  0x20   : > { %6784 = vmatprep.subr.bf16.mxu1 %v7639_v10  ;;  %v7655_v26 = vld [vmem:[%s8275_s19 + $0xf0] sm:$0xff]   ;;  %v7659_v31 = vld [vmem:[%s8275_s19 + $0xf8] sm:$0xff]   ;;  %v346_v38 = vld [vmem:[%s8270_s15] sm:$0xff] }
  0x21   : > { %v7656_v27 = vld [vmem:[%s8275_s19 + $0x30] sm:$0xff]   ;;  %v7660_v32 = vld [vmem:[%s8275_s19 + $0x38] sm:$0xff]   ;;  %v1338_v39 = vcombine.high %v346_v38, %v346_v38  ;;  %v7665_v41 = vld [vmem:[%s8275_s19 + $0x1c0] sm:$0xff]   ;;  %v1345_v43 = vrot.slane %v346_v38, %v8313_v42 }
  0x22   : > { %6763 = vmatpush3.bf16.msra.mxu0 %v7640_v11  ;;  %v7657_v28 = vld [vmem:[%s8275_s19 + $0xb0] sm:$0xff]   ;;  %v7661_v33 = vld [vmem:[%s8275_s19 + $0xb8] sm:$0xff]   ;;  %v7664_v48 = vld [vmem:[%s8275_s19 + $0x100] sm:$0xff]  }
  0x23   : > { %6785 = vmatpush3.bf16.msra.mxu1 %v7641_v12  ;;  %6764 = vmatprep.subr.bf16.mxu0 %v7642_v13  ;;  %v8317_v44 = vrot.slane %v1338_v39, %v8313_v42  ;;  %v1353_v45 = vcombine.high %v1345_v43, %v1345_v43  ;;  %v1361_v46 = vrot.slane %v1345_v43, %v8313_v42  ;;  %v7666_v50 = vld [vmem:[%s8275_s19 + $0x180] sm:$0xff]   ;;  %v7667_v53 = vld [vmem:[%s8275_s19 + $0x148] sm:$0xff]   ;;  %v7671_v59 = vld [vmem:[%s8275_s19 + $0x150] sm:$0xff]  }
  0x24   : > { %6786 = vmatprep.subr.bf16.mxu1 %v7643_v14  ;;  %v7668_v55 = vld [vmem:[%s8275_s19 + $0x108] sm:$0xff]   ;;  %v7672_v60 = vld [vmem:[%s8275_s19 + $0x110] sm:$0xff]   ;;  %v7675_v63 = vld [vmem:[%s8275_s19 + $0x158] sm:$0xff]  }
  0x25   : > { %v1354_v47 = vcombine.high %v8317_v44, %v8317_v44  ;;  %v1375_v49 = vrot.slane %v1353_v45, %v8313_v42  ;;  %v1383_v52 = vcombine.high %v1361_v46, %v1361_v46  ;;  %v7669_v56 = vld [vmem:[%s8275_s19 + $0x1c8] sm:$0xff]   ;;  %v7673_v61 = vld [vmem:[%s8275_s19 + $0x1d0] sm:$0xff]   ;;  %v7676_v0 = vld [vmem:[%s8275_s19 + $0x118] sm:$0xff]  }
  0x26   : > { %6765 = vmatpush3.bf16.msra.mxu0 %v7644_v15  ;;  %v7670_v58 = vld [vmem:[%s8275_s19 + $0x188] sm:$0xff]   ;;  %v7674_v62 = vld [vmem:[%s8275_s19 + $0x190] sm:$0xff]   ;;  %v7677_v1 = vld [vmem:[%s8275_s19 + $0x1d8] sm:$0xff]  }
  0x27   : > { %6787 = vmatpush3.bf16.msra.mxu1 %v7645_v16  ;;  %6766 = vmatprep.subr.bf16.mxu0 %v7646_v17  ;;  %v1382_v51 = vrot.slane %v1354_v47, %v8313_v42  ;;  %v1385_v54 = vcombine.high %v1375_v49, %v1375_v49  ;;  %v7678_v2 = vld [vmem:[%s8275_s19 + $0x198] sm:$0xff]   ;;  %v7679_v3 = vld [vmem:[%s8275_s19 + $0x160] sm:$0xff]   ;;  %v7683_v7 = vld [vmem:[%s8275_s19 + $0x168] sm:$0xff]  }
  0x28   : > { %6788 = vmatprep.subr.bf16.mxu1 %v7647_v18  ;;  %4741 = vmatprep.mubr.bf16.mxu0 %v1375_v49  ;;  %v7680_v4 = vld [vmem:[%s8275_s19 + $0x120] sm:$0xff]   ;;  %v7684_v8 = vld [vmem:[%s8275_s19 + $0x128] sm:$0xff]   ;;  %v7687_v11 = vld [vmem:[%s8275_s19 + $0x170] sm:$0xff]  }
  0x29   : > { %v1386_v57 = vcombine.high %v1382_v51, %v1382_v51  ;;  %4781 = vmatprep.mubr.bf16.mxu1 %v1385_v54  ;;  %v7681_v5 = vld [vmem:[%s8275_s19 + $0x1e0] sm:$0xff]   ;;  %v7685_v9 = vld [vmem:[%s8275_s19 + $0x1e8] sm:$0xff]   ;;  %v7688_v12 = vld [vmem:[%s8275_s19 + $0x130] sm:$0xff]  }
  0x2a   : > { %6767 = vmatpush3.bf16.msra.mxu0 %v7648_v19  ;;  %v7682_v6 = vld [vmem:[%s8275_s19 + $0x1a0] sm:$0xff]   ;;  %v7686_v10 = vld [vmem:[%s8275_s19 + $0x1a8] sm:$0xff]   ;;  %v7689_v13 = vld [vmem:[%s8275_s19 + $0x1f0] sm:$0xff]   ;;  %v1368_v19 = vrot.slane %v8317_v44, %v8313_v42 }
  0x2b   : > { %6789 = vmatpush3.bf16.msra.mxu1 %v7649_v20  ;;  %6768 = vmatprep.subr.bf16.mxu0 %v7650_v21  ;;  %v7690_v14 = vld [vmem:[%s8275_s19 + $0x1b0] sm:$0xff]   ;;  %v7691_v15 = vld [vmem:[%s8275_s19 + $0x178] sm:$0xff]   ;;  %v7695_v20 = vld [vmem:[%s8275_s19 + $0x240] sm:$0xff]  }
  0x2c   : > { %6790 = vmatprep.subr.bf16.mxu1 %v7651_v22  ;;  %v7692_v16 = vld [vmem:[%s8275_s19 + $0x138] sm:$0xff]   ;;  %v7696_v21 = vld [vmem:[%s8275_s19 + $0x200] sm:$0xff]   ;;  %v7704_v30 = vld [vmem:[%s8275_s19 + $0x210] sm:$0xff]  }
  0x2d   : > { %v7693_v17 = vld [vmem:[%s8275_s19 + $0x1f8] sm:$0xff]   ;;  %v7697_v22 = vld [vmem:[%s8275_s19 + $0x2c0] sm:$0xff]   ;;  %v7716_v43 = vld [vmem:[%s8275_s19 + $0x228] sm:$0xff]  }
  0x2e   : > { %6769 = vmatpush3.bf16.msra.mxu0 %v7652_v23  ;;  %v7694_v18 = vld [vmem:[%s8275_s19 + $0x1b8] sm:$0xff]   ;;  %v7698_v23 = vld [vmem:[%s8275_s19 + $0x280] sm:$0xff]   ;;  %v7717_v44 = vld [vmem:[%s8275_s19 + $0x2e8] sm:$0xff]  }
  0x2f   : > { %6791 = vmatpush3.bf16.msra.mxu1 %v7653_v24  ;;  %6770 = vmatprep.subr.bf16.mxu0 %v7654_v25  ;;  %v1384_v24 = vcombine.high %v1368_v19, %v1368_v19  ;;  %v7699_v25 = vld [vmem:[%s8275_s19 + $0x248] sm:$0xff]   ;;  %v7708_v34 = vld [vmem:[%s8275_s19 + $0x218] sm:$0xff]   ;;  %v7711_v37 = vld [vmem:[%s8275_s19 + $0x260] sm:$0xff]  }
  0x30   : > { %6792 = vmatprep.subr.bf16.mxu1 %v7655_v26  ;;  %v7700_v26 = vld [vmem:[%s8275_s19 + $0x208] sm:$0xff]   ;;  %v7710_v36 = vld [vmem:[%s8275_s19 + $0x298] sm:$0xff]   ;;  %v7712_v38 = vld [vmem:[%s8275_s19 + $0x220] sm:$0xff]  }
  0x31   : > { %v7713_v39 = vld [vmem:[%s8275_s19 + $0x2e0] sm:$0xff]   ;;  %v7718_v45 = vld [vmem:[%s8275_s19 + $0x2a8] sm:$0xff]   ;;  %v7719_v47 = vld [vmem:[%s8275_s19 + $0x270] sm:$0xff]  }
  0x32   : > { %6771 = vmatpush3.bf16.msra.mxu0 %v7656_v27  ;;  %v7701_v27 = vld [vmem:[%s8275_s19 + $0x2c8] sm:$0xff]   ;;  %v7714_v40 = vld [vmem:[%s8275_s19 + $0x2a0] sm:$0xff]   ;;  %v7722_v54 = vld [vmem:[%s8275_s19 + $0x2b0] sm:$0xff]  }
  0x33   : > { %6793 = vmatpush3.bf16.msra.mxu1 %v7657_v28  ;;  %6772 = vmatprep.subr.bf16.mxu0 %v7658_v29  ;;  %v7702_v28 = vld [vmem:[%s8275_s19 + $0x288] sm:$0xff]   ;;  %v7703_v29 = vld [vmem:[%s8275_s19 + $0x250] sm:$0xff]  }
  0x34   : > { %6794 = vmatprep.subr.bf16.mxu1 %v7659_v31  ;;  %v7705_v31 = vld [vmem:[%s8275_s19 + $0x2d0] sm:$0xff]  }
  0x36   : > { %6773 = vmatpush3.bf16.msra.mxu0 %v7660_v32  ;;  %v7706_v32 = vld [vmem:[%s8275_s19 + $0x290] sm:$0xff]  }
  0x37   : > { %6795 = vmatpush3.bf16.msra.mxu1 %v7661_v33  ;;  %6802 = vmatprep.subr.bf16.mxu0 %v7663_v35  ;;  %v7707_v33 = vld [vmem:[%s8275_s19 + $0x258] sm:$0xff]  }
  0x38   : > { %6824 = vmatprep.subr.bf16.mxu1 %v7665_v41  ;;  %v7709_v35 = vld [vmem:[%s8275_s19 + $0x2d8] sm:$0xff]   ;;  %v7715_v41 = vld [vmem:[%s8275_s19 + $0x268] sm:$0xff]  }
  0x39   : > { %4742 = vmatmul.mubr.bf16.vlgmr.msra.gmra.mrb[0].mxu0 %v1361_v46  ;;  %v347_v46 = vld [vmem:[%s8270_s15 + $0x8] sm:$0xff] }
  0x3a   : > { %6803 = vmatpush3.bf16.msra.mxu0 %v7664_v48  ;;  %4782 = vmatmul.mubr.bf16.vlgmr.msra.gmra.mrb[0].mxu1 %v1383_v52  ;;  %v1394_v48 = vrot.slane %v347_v46, %v8313_v42  ;;  %v1387_v49 = vcombine.high %v347_v46, %v347_v46  ;;  %v7769_v46 = vld [vmem:[%s8275_s19 + $0x410] sm:$0xff]  }
  0x3b   : > { %6804 = vmatprep.subr.bf16.mxu0 %v7667_v53  ;;  %6825 = vmatpush3.bf16.msra.mxu1 %v7666_v50  ;;  %v7720_v50 = vld [vmem:[%s8275_s19 + $0x230] sm:$0xff]  }
  0x3c   : > { %4821 = vmatprep.mubr.bf16.mxu0 %v1382_v51  ;;  %6826 = vmatprep.subr.bf16.mxu1 %v7669_v56  ;;  %v7721_v51 = vld [vmem:[%s8275_s19 + $0x2f0] sm:$0xff]   ;;  %v1402_v52 = vcombine.high %v1394_v48, %v1394_v48  ;;  %v8386_v53 = vrot.slane %v1387_v49, %v8313_v42  ;;  %v7772_v49 = vld [vmem:[%s8275_s19 + $0x458] sm:$0xff]  }
  0x3d   : > { %4861 = vmatprep.mubr.bf16.mxu1 %v1386_v57  ;;  %v7724_v57 = vld [vmem:[%s8275_s19 + $0x238] sm:$0xff]  }
  0x3e   : > { %6805 = vmatpush3.bf16.msra.mxu0 %v7668_v55  ;;  %v7723_v55 = vld [vmem:[%s8275_s19 + $0x278] sm:$0xff]   ;;  %v1424_v56 = vrot.slane %v1402_v52, %v8313_v42 }
  0x3f   : > { %6806 = vmatprep.subr.bf16.mxu0 %v7671_v59  ;;  %6827 = vmatpush3.bf16.msra.mxu1 %v7670_v58  ;;  %v1403_v58 = vcombine.high %v8386_v53, %v8386_v53  ;;  %v7725_v59 = vld [vmem:[%s8275_s19 + $0x2f8] sm:$0xff]  }
  0x40   : > { %6828 = vmatprep.subr.bf16.mxu1 %v7673_v61  ;;  %v7726_v61 = vld [vmem:[%s8275_s19 + $0x2b8] sm:$0xff]  }
  0x41   : > { %v7775_v52 = vld [vmem:[%s8275_s19 + $0x498] sm:$0xff]  }
  0x42   : > { %6807 = vmatpush3.bf16.msra.mxu0 %v7672_v60  ;;  %v1434_v60 = vcombine.high %v1424_v56, %v1424_v56 }
  0x43   : > { %6808 = vmatprep.subr.bf16.mxu0 %v7675_v63  ;;  %6829 = vmatpush3.bf16.msra.mxu1 %v7674_v62  ;;  %v1410_v62 = vrot.slane %v1394_v48, %v8313_v42  ;;  %v7727_v63 = vld [vmem:[%s8275_s19 + $0x340] sm:$0xff]   ;;  %v7771_v48 = vld [vmem:[%s8275_s19 + $0x490] sm:$0xff]  }
  0x44   : > { %6830 = vmatprep.subr.bf16.mxu1 %v7677_v1  ;;  %v1431_v1 = vrot.slane %v1403_v58, %v8313_v42  ;;  %v7781_v58 = vld [vmem:[%s8275_s19 + $0x428] sm:$0xff]  }
  0x46   : > { %6809 = vmatpush3.bf16.msra.mxu0 %v7676_v0  ;;  %v7728_v0 = vld [vmem:[%s8275_s19 + $0x300] sm:$0xff]  }
  0x47   : > { %6810 = vmatprep.subr.bf16.mxu0 %v7679_v3  ;;  %6831 = vmatpush3.bf16.msra.mxu1 %v7678_v2  ;;  %v7729_v2 = vld [vmem:[%s8275_s19 + $0x3c0] sm:$0xff]  }
  0x48   : > { %6832 = vmatprep.subr.bf16.mxu1 %v7681_v5  ;;  %v7730_v3 = vld [vmem:[%s8275_s19 + $0x380] sm:$0xff]   ;;  %v7731_v5 = vld [vmem:[%s8275_s19 + $0x348] sm:$0xff]  }
  0x4a   : > { %6811 = vmatpush3.bf16.msra.mxu0 %v7680_v4  ;;  %v1432_v4 = vcombine.high %v1410_v62, %v1410_v62 }
  0x4b   : > { %6812 = vmatprep.subr.bf16.mxu0 %v7683_v7  ;;  %6833 = vmatpush3.bf16.msra.mxu1 %v7682_v6  ;;  %v7732_v6 = vld [vmem:[%s8275_s19 + $0x308] sm:$0xff]   ;;  %v1435_v7 = vcombine.high %v1431_v1, %v1431_v1 }
  0x4c   : > { %6834 = vmatprep.subr.bf16.mxu1 %v7685_v9  ;;  %v7734_v9 = vld [vmem:[%s8275_s19 + $0x388] sm:$0xff]  }
  0x4e   : > { %6813 = vmatpush3.bf16.msra.mxu0 %v7684_v8  ;;  %v7733_v8 = vld [vmem:[%s8275_s19 + $0x3c8] sm:$0xff]  }
  0x4f   : > { %6814 = vmatprep.subr.bf16.mxu0 %v7687_v11  ;;  %6835 = vmatpush3.bf16.msra.mxu1 %v7686_v10  ;;  %v7735_v10 = vld [vmem:[%s8275_s19 + $0x350] sm:$0xff]  }
  0x50   : > { %6836 = vmatprep.subr.bf16.mxu1 %v7689_v13  ;;  %v7736_v11 = vld [vmem:[%s8275_s19 + $0x310] sm:$0xff]  }
  0x51   : > { %v7738_v13 = vld [vmem:[%s8275_s19 + $0x390] sm:$0xff]  }
  0x52   : > { %6815 = vmatpush3.bf16.msra.mxu0 %v7688_v12  ;;  %v7737_v12 = vld [vmem:[%s8275_s19 + $0x3d0] sm:$0xff]  }
  0x53   : > { %6816 = vmatprep.subr.bf16.mxu0 %v7691_v15  ;;  %6837 = vmatpush3.bf16.msra.mxu1 %v7690_v14  ;;  %v7739_v14 = vld [vmem:[%s8275_s19 + $0x358] sm:$0xff]  }
  0x54   : > { %6838 = vmatprep.subr.bf16.mxu1 %v7693_v17  ;;  %v7740_v15 = vld [vmem:[%s8275_s19 + $0x318] sm:$0xff]  }
  0x55   : > { %v7742_v17 = vld [vmem:[%s8275_s19 + $0x398] sm:$0xff]  }
  0x56   : > { %6817 = vmatpush3.bf16.msra.mxu0 %v7692_v16  ;;  %v7741_v16 = vld [vmem:[%s8275_s19 + $0x3d8] sm:$0xff]  }
  0x57   : > { %6846 = vmatprep.subr.bf16.mxu0 %v7695_v20  ;;  %6839 = vmatpush3.bf16.msra.mxu1 %v7694_v18  ;;  %v7743_v18 = vld [vmem:[%s8275_s19 + $0x360] sm:$0xff]  }
  0x58   : > { %6868 = vmatprep.subr.bf16.mxu1 %v7697_v22  ;;  %v7745_v20 = vld [vmem:[%s8275_s19 + $0x3e0] sm:$0xff]   ;;  %v7747_v22 = vld [vmem:[%s8275_s19 + $0x368] sm:$0xff]  }
  0x59   : > { %4822 = vmatmul.mubr.bf16.vlgmr.msra.gmra.mrb[4].mxu0 %v1368_v19  ;;  %v7744_v19 = vld [vmem:[%s8275_s19 + $0x320] sm:$0xff]  }
  0x5a   : > { %6847 = vmatpush3.bf16.msra.mxu0 %v7696_v21  ;;  %4862 = vmatmul.mubr.bf16.vlgmr.msra.gmra.mrb[4].mxu1 %v1384_v24  ;;  %v7746_v21 = vld [vmem:[%s8275_s19 + $0x3a0] sm:$0xff]   ;;  %v7749_v24 = vld [vmem:[%s8275_s19 + $0x3e8] sm:$0xff]  }
  0x5b   : > { %6848 = vmatprep.subr.bf16.mxu0 %v7699_v25  ;;  %6869 = vmatpush3.bf16.msra.mxu1 %v7698_v23  ;;  %v7748_v23 = vld [vmem:[%s8275_s19 + $0x328] sm:$0xff]  }
  0x5c   : > { %6870 = vmatprep.subr.bf16.mxu1 %v7701_v27  ;;  %4901 = vmatprep.mubr.bf16.mxu0 %v1424_v56  ;;  %v7750_v25 = vld [vmem:[%s8275_s19 + $0x3a8] sm:$0xff]   ;;  %v7752_v27 = vld [vmem:[%s8275_s19 + $0x330] sm:$0xff]   ;;  %v7779_v56 = vld [vmem:[%s8275_s19 + $0x4a0] sm:$0xff]  }
  0x5d   : > { %4941 = vmatprep.mubr.bf16.mxu1 %v1434_v60  ;;  %v7783_v60 = vld [vmem:[%s8275_s19 + $0x4a8] sm:$0xff]  }
  0x5e   : > { %6849 = vmatpush3.bf16.msra.mxu0 %v7700_v26  ;;  %v7751_v26 = vld [vmem:[%s8275_s19 + $0x370] sm:$0xff]  }
  0x5f   : > { %6850 = vmatprep.subr.bf16.mxu0 %v7703_v29  ;;  %6871 = vmatpush3.bf16.msra.mxu1 %v7702_v28  ;;  %v7753_v28 = vld [vmem:[%s8275_s19 + $0x3f0] sm:$0xff]  }
  0x60   : > { %6872 = vmatprep.subr.bf16.mxu1 %v7705_v31  ;;  %v7754_v29 = vld [vmem:[%s8275_s19 + $0x3b0] sm:$0xff]   ;;  %v7756_v31 = vld [vmem:[%s8275_s19 + $0x338] sm:$0xff]  }
  0x62   : > { %6851 = vmatpush3.bf16.msra.mxu0 %v7704_v30  ;;  %v7755_v30 = vld [vmem:[%s8275_s19 + $0x378] sm:$0xff]  }
  0x63   : > { %6852 = vmatprep.subr.bf16.mxu0 %v7707_v33  ;;  %6873 = vmatpush3.bf16.msra.mxu1 %v7706_v32  ;;  %v7757_v32 = vld [vmem:[%s8275_s19 + $0x3f8] sm:$0xff]  }
  0x64   : > { %6874 = vmatprep.subr.bf16.mxu1 %v7709_v35  ;;  %v7759_v33 = vld [vmem:[%s8275_s19 + $0x3b8] sm:$0xff]   ;;  %v7760_v35 = vld [vmem:[%s8275_s19 + $0x440] sm:$0xff]  }
  0x66   : > { %6853 = vmatpush3.bf16.msra.mxu0 %v7708_v34  ;;  %v1417_v34 = vrot.slane %v8386_v53, %v8313_v42  ;;  %v7776_v53 = vld [vmem:[%s8275_s19 + $0x460] sm:$0xff]  }
  0x67   : > { %6854 = vmatprep.subr.bf16.mxu0 %v7711_v37  ;;  %6875 = vmatpush3.bf16.msra.mxu1 %v7710_v36  ;;  %v7761_v36 = vld [vmem:[%s8275_s19 + $0x400] sm:$0xff]  }
  0x68   : > { %6876 = vmatprep.subr.bf16.mxu1 %v7713_v39  ;;  %v7762_v37 = vld [vmem:[%s8275_s19 + $0x4c0] sm:$0xff]   ;;  %v1433_v39 = vcombine.high %v1417_v34, %v1417_v34 }
  0x6a   : > { %6855 = vmatpush3.bf16.msra.mxu0 %v7712_v38  ;;  %v7763_v38 = vld [vmem:[%s8275_s19 + $0x480] sm:$0xff]  }
  0x6b   : > { %6856 = vmatprep.subr.bf16.mxu0 %v7715_v41  ;;  %6877 = vmatpush3.bf16.msra.mxu1 %v7714_v40  ;;  %v7764_v40 = vld [vmem:[%s8275_s19 + $0x448] sm:$0xff]  }
  0x6c   : > { %6878 = vmatprep.subr.bf16.mxu1 %v7717_v44  ;;  %v7765_v41 = vld [vmem:[%s8275_s19 + $0x408] sm:$0xff]  }
  0x6d   : > { %v7767_v44 = vld [vmem:[%s8275_s19 + $0x488] sm:$0xff]  }
  0x6e   : > { %6857 = vmatpush3.bf16.msra.mxu0 %v7716_v43  ;;  %v7766_v43 = vld [vmem:[%s8275_s19 + $0x4c8] sm:$0xff]  }
  0x6f   : > { %6858 = vmatprep.subr.bf16.mxu0 %v7719_v47  ;;  %6879 = vmatpush3.bf16.msra.mxu1 %v7718_v45  ;;  %v7768_v45 = vld [vmem:[%s8275_s19 + $0x450] sm:$0xff]  }
  0x70   : > { %6880 = vmatprep.subr.bf16.mxu1 %v7721_v51  ;;  %v7770_v47 = vld [vmem:[%s8275_s19 + $0x4d0] sm:$0xff]   ;;  %v7774_v51 = vld [vmem:[%s8275_s19 + $0x4d8] sm:$0xff]  }
  0x72   : > { %6859 = vmatpush3.bf16.msra.mxu0 %v7720_v50  ;;  %v7773_v50 = vld [vmem:[%s8275_s19 + $0x418] sm:$0xff]  }
  0x73   : > { %6860 = vmatprep.subr.bf16.mxu0 %v7723_v55  ;;  %6881 = vmatpush3.bf16.msra.mxu1 %v7722_v54  ;;  %v7777_v54 = vld [vmem:[%s8275_s19 + $0x420] sm:$0xff]  }
  0x74   : > { %6882 = vmatprep.subr.bf16.mxu1 %v7725_v59  ;;  %v7778_v55 = vld [vmem:[%s8275_s19 + $0x4e0] sm:$0xff]   ;;  %v7782_v59 = vld [vmem:[%s8275_s19 + $0x4e8] sm:$0xff]  }
  0x76   : > { %6861 = vmatpush3.bf16.msra.mxu0 %v7724_v57  ;;  %v7780_v57 = vld [vmem:[%s8275_s19 + $0x468] sm:$0xff]  }
  0x77   : > { %6890 = vmatprep.subr.bf16.mxu0 %v7727_v63  ;;  %6883 = vmatpush3.bf16.msra.mxu1 %v7726_v61  ;;  %v348_v61 = vld [vmem:[%s8270_s15 + $0x10] sm:$0xff] }
  0x78   : > { %6912 = vmatprep.subr.bf16.mxu1 %v7729_v2  ;;  %v1443_v63 = vrot.slane %v348_v61, %v8313_v42  ;;  %v7786_v2 = vld [vmem:[%s8275_s19 + $0x4f0] sm:$0xff]  }
  0x79   : > { %4902 = vmatmul.mubr.bf16.vlgmr.msra.gmra.mrb[8].mxu0 %v1410_v62  ;;  %v7784_v62 = vld [vmem:[%s8275_s19 + $0x470] sm:$0xff]  }
  0x7a   : > { %6891 = vmatpush3.bf16.msra.mxu0 %v7728_v0  ;;  %4981 = vmatprep.mubr.bf16.mxu0 %v1431_v1  ;;  %v1436_v0 = vcombine.high %v348_v61, %v348_v61  ;;  %v7785_v1 = vld [vmem:[%s8275_s19 + $0x430] sm:$0xff]  }
  0x7b   : > { %4942 = vmatmul.mubr.bf16.vlgmr.msra.gmra.mrb[8].mxu1 %v1432_v4  ;;  %6892 = vmatprep.subr.bf16.mxu0 %v7731_v5  ;;  %v7787_v5 = vld [vmem:[%s8275_s19 + $0x4b0] sm:$0xff]  }
  0x7c   : > { %6913 = vmatpush3.bf16.msra.mxu1 %v7730_v3  ;;  %5021 = vmatprep.mubr.bf16.mxu1 %v1435_v7  ;;  %v1451_v3 = vcombine.high %v1443_v63, %v1443_v63  ;;  %v8462_v4 = vrot.slane %v1436_v0, %v8313_v42  ;;  %v7834_v61 = vld [vmem:[%s8275_s19 + $0x610] sm:$0xff]   ;;  %v7837_v0 = vld [vmem:[%s8275_s19 + $0x658] sm:$0xff]  }
  0x7d   : > { %6914 = vmatprep.subr.bf16.mxu1 %v7733_v8  ;;  %v7789_v8 = vld [vmem:[%s8275_s19 + $0x438] sm:$0xff]  }
  0x7e   : > { %6893 = vmatpush3.bf16.msra.mxu0 %v7732_v6  ;;  %v7788_v6 = vld [vmem:[%s8275_s19 + $0x478] sm:$0xff]   ;;  %v1473_v7 = vrot.slane %v1451_v3, %v8313_v42 }
  0x7f   : > { %6894 = vmatprep.subr.bf16.mxu0 %v7735_v10  ;;  %v7790_v10 = vld [vmem:[%s8275_s19 + $0x4f8] sm:$0xff]  }
  0x80   : > { %6915 = vmatpush3.bf16.msra.mxu1 %v7734_v9  ;;  %v1452_v9 = vcombine.high %v8462_v4, %v8462_v4  ;;  %v7840_v3 = vld [vmem:[%s8275_s19 + $0x698] sm:$0xff]  }
  0x81   : > { %6916 = vmatprep.subr.bf16.mxu1 %v7737_v12  ;;  %v7791_v12 = vld [vmem:[%s8275_s19 + $0x4b8] sm:$0xff]  }
  0x82   : > { %6895 = vmatpush3.bf16.msra.mxu0 %v7736_v11  ;;  %v1483_v11 = vcombine.high %v1473_v7, %v1473_v7 }
  0x83   : > { %6896 = vmatprep.subr.bf16.mxu0 %v7739_v14  ;;  %v7792_v14 = vld [vmem:[%s8275_s19 + $0x540] sm:$0xff]  }
  0x84   : > { %6917 = vmatpush3.bf16.msra.mxu1 %v7738_v13  ;;  %v1459_v13 = vrot.slane %v1443_v63, %v8313_v42  ;;  %v7836_v63 = vld [vmem:[%s8275_s19 + $0x690] sm:$0xff]  }
  0x85   : > { %6918 = vmatprep.subr.bf16.mxu1 %v7741_v16  ;;  %v1480_v16 = vrot.slane %v1452_v9, %v8313_v42  ;;  %v7846_v9 = vld [vmem:[%s8275_s19 + $0x628] sm:$0xff]  }
  0x86   : > { %6897 = vmatpush3.bf16.msra.mxu0 %v7740_v15  ;;  %v7793_v15 = vld [vmem:[%s8275_s19 + $0x500] sm:$0xff]  }
  0x87   : > { %6898 = vmatprep.subr.bf16.mxu0 %v7743_v18  ;;  %v7795_v18 = vld [vmem:[%s8275_s19 + $0x580] sm:$0xff]  }
  0x88   : > { %6919 = vmatpush3.bf16.msra.mxu1 %v7742_v17  ;;  %v7794_v17 = vld [vmem:[%s8275_s19 + $0x5c0] sm:$0xff]  }
  0x89   : > { %6920 = vmatprep.subr.bf16.mxu1 %v7745_v20  ;;  %v7796_v20 = vld [vmem:[%s8275_s19 + $0x548] sm:$0xff]  }
  0x8a   : > { %6899 = vmatpush3.bf16.msra.mxu0 %v7744_v19  ;;  %v1481_v19 = vcombine.high %v1459_v13, %v1459_v13 }
  0x8b   : > { %6900 = vmatprep.subr.bf16.mxu0 %v7747_v22  ;;  %v1484_v22 = vcombine.high %v1480_v16, %v1480_v16 }
  0x8c   : > { %6921 = vmatpush3.bf16.msra.mxu1 %v7746_v21  ;;  %v7797_v21 = vld [vmem:[%s8275_s19 + $0x508] sm:$0xff]  }
  0x8d   : > { %6922 = vmatprep.subr.bf16.mxu1 %v7749_v24  ;;  %v7799_v24 = vld [vmem:[%s8275_s19 + $0x588] sm:$0xff]  }
  0x8e   : > { %6901 = vmatpush3.bf16.msra.mxu0 %v7748_v23  ;;  %v7798_v23 = vld [vmem:[%s8275_s19 + $0x5c8] sm:$0xff]  }
  0x8f   : > { %6902 = vmatprep.subr.bf16.mxu0 %v7751_v26  ;;  %v7801_v26 = vld [vmem:[%s8275_s19 + $0x510] sm:$0xff]  }
  0x90   : > { %6923 = vmatpush3.bf16.msra.mxu1 %v7750_v25  ;;  %v7800_v25 = vld [vmem:[%s8275_s19 + $0x550] sm:$0xff]  }
  0x91   : > { %6924 = vmatprep.subr.bf16.mxu1 %v7753_v28  ;;  %v7803_v28 = vld [vmem:[%s8275_s19 + $0x590] sm:$0xff]  }
  0x92   : > { %6903 = vmatpush3.bf16.msra.mxu0 %v7752_v27  ;;  %v7802_v27 = vld [vmem:[%s8275_s19 + $0x5d0] sm:$0xff]  }
  0x93   : > { %6904 = vmatprep.subr.bf16.mxu0 %v7755_v30  ;;  %v7805_v30 = vld [vmem:[%s8275_s19 + $0x518] sm:$0xff]  }
  0x94   : > { %6925 = vmatpush3.bf16.msra.mxu1 %v7754_v29  ;;  %v7804_v29 = vld [vmem:[%s8275_s19 + $0x558] sm:$0xff]  }
  0x95   : > { %6926 = vmatprep.subr.bf16.mxu1 %v7757_v32  ;;  %v7807_v32 = vld [vmem:[%s8275_s19 + $0x598] sm:$0xff]  }
  0x96   : > { %6905 = vmatpush3.bf16.msra.mxu0 %v7756_v31  ;;  %v7806_v31 = vld [vmem:[%s8275_s19 + $0x5d8] sm:$0xff]  }
  0x97   : > { %6934 = vmatprep.subr.bf16.mxu0 %v7760_v35  ;;  %v7810_v35 = vld [vmem:[%s8275_s19 + $0x5e0] sm:$0xff]  }
  0x98   : > { %6927 = vmatpush3.bf16.msra.mxu1 %v7759_v33  ;;  %v7808_v33 = vld [vmem:[%s8275_s19 + $0x560] sm:$0xff]  }
  0x99   : > { %4982 = vmatmul.mubr.bf16.vlgmr.msra.gmra.mrb[12].mxu0 %v1417_v34  ;;  %6956 = vmatprep.subr.bf16.mxu1 %v7762_v37  ;;  %v7809_v34 = vld [vmem:[%s8275_s19 + $0x520] sm:$0xff]   ;;  %v7812_v37 = vld [vmem:[%s8275_s19 + $0x568] sm:$0xff]  }
  0x9a   : > { %6935 = vmatpush3.bf16.msra.mxu0 %v7761_v36  ;;  %5061 = vmatprep.mubr.bf16.mxu0 %v1473_v7  ;;  %v7811_v36 = vld [vmem:[%s8275_s19 + $0x5a0] sm:$0xff]  }
  0x9b   : > { %5022 = vmatmul.mubr.bf16.vlgmr.msra.gmra.mrb[12].mxu1 %v1433_v39  ;;  %6936 = vmatprep.subr.bf16.mxu0 %v7764_v40  ;;  %v7814_v39 = vld [vmem:[%s8275_s19 + $0x5e8] sm:$0xff]   ;;  %v7844_v7 = vld [vmem:[%s8275_s19 + $0x6a0] sm:$0xff]  }
  0x9c   : > { %6957 = vmatpush3.bf16.msra.mxu1 %v7763_v38  ;;  %5101 = vmatprep.mubr.bf16.mxu1 %v1483_v11  ;;  %v7813_v38 = vld [vmem:[%s8275_s19 + $0x528] sm:$0xff]  }
  0x9d   : > { %6958 = vmatprep.subr.bf16.mxu1 %v7766_v43  ;;  %v7815_v40 = vld [vmem:[%s8275_s19 + $0x5a8] sm:$0xff]   ;;  %v7817_v43 = vld [vmem:[%s8275_s19 + $0x530] sm:$0xff]  }
  0x9e   : > { %6937 = vmatpush3.bf16.msra.mxu0 %v7765_v41  ;;  %v7816_v41 = vld [vmem:[%s8275_s19 + $0x570] sm:$0xff]   ;;  %v7848_v11 = vld [vmem:[%s8275_s19 + $0x6a8] sm:$0xff]  }
  0x9f   : > { %6938 = vmatprep.subr.bf16.mxu0 %v7768_v45  ;;  %v7819_v45 = vld [vmem:[%s8275_s19 + $0x5b0] sm:$0xff]  }
  0xa0   : > { %6959 = vmatpush3.bf16.msra.mxu1 %v7767_v44  ;;  %v7818_v44 = vld [vmem:[%s8275_s19 + $0x5f0] sm:$0xff]  }
  0xa1   : > { %6960 = vmatprep.subr.bf16.mxu1 %v7770_v47  ;;  %v7821_v47 = vld [vmem:[%s8275_s19 + $0x538] sm:$0xff]  }
  0xa2   : > { %6939 = vmatpush3.bf16.msra.mxu0 %v7769_v46  ;;  %v7820_v46 = vld [vmem:[%s8275_s19 + $0x578] sm:$0xff]  }
  0xa3   : > { %6940 = vmatprep.subr.bf16.mxu0 %v7772_v49  ;;  %v7824_v49 = vld [vmem:[%s8275_s19 + $0x5b8] sm:$0xff]  }
  0xa4   : > { %6961 = vmatpush3.bf16.msra.mxu1 %v7771_v48  ;;  %v7822_v48 = vld [vmem:[%s8275_s19 + $0x5f8] sm:$0xff]  }
  0xa5   : > { %6962 = vmatprep.subr.bf16.mxu1 %v7774_v51  ;;  %v7825_v51 = vld [vmem:[%s8275_s19 + $0x640] sm:$0xff]  }
  0xa6   : > { %6941 = vmatpush3.bf16.msra.mxu0 %v7773_v50  ;;  %v1466_v50 = vrot.slane %v8462_v4, %v8313_v42  ;;  %v7841_v4 = vld [vmem:[%s8275_s19 + $0x660] sm:$0xff]  }
  0xa7   : > { %6942 = vmatprep.subr.bf16.mxu0 %v7776_v53  ;;  %v7827_v53 = vld [vmem:[%s8275_s19 + $0x6c0] sm:$0xff]  }
  0xa8   : > { %6963 = vmatpush3.bf16.msra.mxu1 %v7775_v52  ;;  %v7826_v52 = vld [vmem:[%s8275_s19 + $0x600] sm:$0xff]  }
  0xa9   : > { %6964 = vmatprep.subr.bf16.mxu1 %v7778_v55  ;;  %v1482_v55 = vcombine.high %v1466_v50, %v1466_v50 }
  0xaa   : > { %6943 = vmatpush3.bf16.msra.mxu0 %v7777_v54  ;;  %v7828_v54 = vld [vmem:[%s8275_s19 + $0x680] sm:$0xff]  }
  0xab   : > { %6944 = vmatprep.subr.bf16.mxu0 %v7780_v57  ;;  %v7830_v57 = vld [vmem:[%s8275_s19 + $0x608] sm:$0xff]  }
  0xac   : > { %6965 = vmatpush3.bf16.msra.mxu1 %v7779_v56  ;;  %v7829_v56 = vld [vmem:[%s8275_s19 + $0x648] sm:$0xff]  }
  0xad   : > { %6966 = vmatprep.subr.bf16.mxu1 %v7782_v59  ;;  %v7832_v59 = vld [vmem:[%s8275_s19 + $0x688] sm:$0xff]  }
  0xae   : > { %6945 = vmatpush3.bf16.msra.mxu0 %v7781_v58  ;;  %v7831_v58 = vld [vmem:[%s8275_s19 + $0x6c8] sm:$0xff]  }
  0xaf   : > { %6946 = vmatprep.subr.bf16.mxu0 %v7784_v62  ;;  %v7835_v62 = vld [vmem:[%s8275_s19 + $0x6d0] sm:$0xff]  }
  0xb0   : > { %6967 = vmatpush3.bf16.msra.mxu1 %v7783_v60  ;;  %v7833_v60 = vld [vmem:[%s8275_s19 + $0x650] sm:$0xff]  }
  0xb1   : > { %6968 = vmatprep.subr.bf16.mxu1 %v7786_v2  ;;  %v7839_v2 = vld [vmem:[%s8275_s19 + $0x6d8] sm:$0xff]  }
  0xb2   : > { %6947 = vmatpush3.bf16.msra.mxu0 %v7785_v1  ;;  %v7838_v1 = vld [vmem:[%s8275_s19 + $0x618] sm:$0xff]  }
  0xb3   : > { %6948 = vmatprep.subr.bf16.mxu0 %v7788_v6  ;;  %v7843_v6 = vld [vmem:[%s8275_s19 + $0x6e0] sm:$0xff]  }
  0xb4   : > { %6969 = vmatpush3.bf16.msra.mxu1 %v7787_v5  ;;  %v7842_v5 = vld [vmem:[%s8275_s19 + $0x620] sm:$0xff]  }
  0xb5   : > { %6970 = vmatprep.subr.bf16.mxu1 %v7790_v10  ;;  %v7847_v10 = vld [vmem:[%s8275_s19 + $0x6e8] sm:$0xff]  }
  0xb6   : > { %6949 = vmatpush3.bf16.msra.mxu0 %v7789_v8  ;;  %v7845_v8 = vld [vmem:[%s8275_s19 + $0x668] sm:$0xff]  }
  0xb7   : > { %6978 = vmatprep.subr.bf16.mxu0 %v7792_v14  ;;  %v7850_v14 = vld [vmem:[%s8275_s19 + $0x630] sm:$0xff]  }
  0xb8   : > { %6971 = vmatpush3.bf16.msra.mxu1 %v7791_v12  ;;  %v7849_v12 = vld [vmem:[%s8275_s19 + $0x670] sm:$0xff]  }
  0xb9   : > { %5062 = vmatmul.mubr.bf16.vlgmr.msra.gmra.mrb[16].mxu0 %v1459_v13  ;;  %7000 = vmatprep.subr.bf16.mxu1 %v7794_v17  ;;  %v349_v13 = vld [vmem:[%s8270_s15 + $0x18] sm:$0xff]  ;;  %v7851_v17 = vld [vmem:[%s8275_s19 + $0x6f0] sm:$0xff]  }
  0xba   : > { %6979 = vmatpush3.bf16.msra.mxu0 %v7793_v15  ;;  %5141 = vmatprep.mubr.bf16.mxu0 %v1480_v16  ;;  %v1492_v15 = vrot.slane %v349_v13, %v8313_v42  ;;  %v1485_v16 = vcombine.high %v349_v13, %v349_v13  ;;  %v7890_v13 = vld [vmem:[%s8275_s19 + $0x840] sm:$0xff]  }
  0xbb   : > { %5102 = vmatmul.mubr.bf16.vlgmr.msra.gmra.mrb[16].mxu1 %v1481_v19  ;;  %6980 = vmatprep.subr.bf16.mxu0 %v7796_v20 }
  0xbc   : > { %7001 = vmatpush3.bf16.msra.mxu1 %v7795_v18  ;;  %5181 = vmatprep.mubr.bf16.mxu1 %v1484_v22  ;;  %v7852_v18 = vld [vmem:[%s8275_s19 + $0x6b0] sm:$0xff]   ;;  %v1500_v19 = vcombine.high %v1492_v15, %v1492_v15  ;;  %v8539_v20 = vrot.slane %v1485_v16, %v8313_v42  ;;  %v7854_v22 = vld [vmem:[%s8275_s19 + $0x638] sm:$0xff]   ;;  %v7893_v16 = vld [vmem:[%s8275_s19 + $0x880] sm:$0xff]  }
  0xbd   : > { %7002 = vmatprep.subr.bf16.mxu1 %v7798_v23 }
  0xbe   : > { %6981 = vmatpush3.bf16.msra.mxu0 %v7797_v21  ;;  %v7853_v21 = vld [vmem:[%s8275_s19 + $0x678] sm:$0xff]   ;;  %v1522_v23 = vrot.slane %v1500_v19, %v8313_v42  ;;  %v7895_v19 = vld [vmem:[%s8275_s19 + $0x808] sm:$0xff]  }
  0xbf   : > { %6982 = vmatprep.subr.bf16.mxu0 %v7800_v25  ;;  %v7855_v25 = vld [vmem:[%s8275_s19 + $0x6f8] sm:$0xff]  }
  0xc0   : > { %7003 = vmatpush3.bf16.msra.mxu1 %v7799_v24  ;;  %v1501_v24 = vcombine.high %v8539_v20, %v8539_v20 }
  0xc1   : > { %7004 = vmatprep.subr.bf16.mxu1 %v7802_v27  ;;  %v1532_v27 = vcombine.high %v1522_v23, %v1522_v23 }
  0xc2   : > { %6983 = vmatpush3.bf16.msra.mxu0 %v7801_v26  ;;  %v7856_v26 = vld [vmem:[%s8275_s19 + $0x6b8] sm:$0xff]  }
  0xc3   : > { %6984 = vmatprep.subr.bf16.mxu0 %v7804_v29  ;;  %v7857_v29 = vld [vmem:[%s8275_s19 + $0x740] sm:$0xff]  }
  0xc4   : > { %7005 = vmatpush3.bf16.msra.mxu1 %v7803_v28  ;;  %v1508_v28 = vrot.slane %v1492_v15, %v8313_v42  ;;  %v7892_v15 = vld [vmem:[%s8275_s19 + $0x8c0] sm:$0xff]  }
  0xc5   : > { %7006 = vmatprep.subr.bf16.mxu1 %v7806_v31  ;;  %v1529_v31 = vrot.slane %v1501_v24, %v8313_v42  ;;  %v7900_v24 = vld [vmem:[%s8275_s19 + $0x8d0] sm:$0xff]  }
  0xc6   : > { %6985 = vmatpush3.bf16.msra.mxu0 %v7805_v30  ;;  %v7858_v30 = vld [vmem:[%s8275_s19 + $0x700] sm:$0xff]  }
  0xc7   : > { %6986 = vmatprep.subr.bf16.mxu0 %v7808_v33  ;;  %v7860_v33 = vld [vmem:[%s8275_s19 + $0x780] sm:$0xff]  }
  0xc8   : > { %7007 = vmatpush3.bf16.msra.mxu1 %v7807_v32  ;;  %v7859_v32 = vld [vmem:[%s8275_s19 + $0x7c0] sm:$0xff]  }
  0xc9   : > { %7008 = vmatprep.subr.bf16.mxu1 %v7810_v35  ;;  %v7861_v35 = vld [vmem:[%s8275_s19 + $0x748] sm:$0xff]  }
  0xca   : > { %6987 = vmatpush3.bf16.msra.mxu0 %v7809_v34  ;;  %v1530_v34 = vcombine.high %v1508_v28, %v1508_v28 }
  0xcb   : > { %6988 = vmatprep.subr.bf16.mxu0 %v7812_v37  ;;  %v1533_v37 = vcombine.high %v1529_v31, %v1529_v31 }
  0xcc   : > { %7009 = vmatpush3.bf16.msra.mxu1 %v7811_v36  ;;  %v7862_v36 = vld [vmem:[%s8275_s19 + $0x708] sm:$0xff]  }
  0xcd   : > { %7010 = vmatprep.subr.bf16.mxu1 %v7814_v39  ;;  %v7864_v39 = vld [vmem:[%s8275_s19 + $0x788] sm:$0xff]  }
  0xce   : > { %6989 = vmatpush3.bf16.msra.mxu0 %v7813_v38  ;;  %v7863_v38 = vld [vmem:[%s8275_s19 + $0x7c8] sm:$0xff]  }
  0xcf   : > { %6990 = vmatprep.subr.bf16.mxu0 %v7816_v41  ;;  %v7866_v41 = vld [vmem:[%s8275_s19 + $0x710] sm:$0xff]  }
  0xd0   : > { %7011 = vmatpush3.bf16.msra.mxu1 %v7815_v40  ;;  %v7865_v40 = vld [vmem:[%s8275_s19 + $0x750] sm:$0xff]  }
  0xd1   : > { %7012 = vmatprep.subr.bf16.mxu1 %v7818_v44  ;;  %v7868_v44 = vld [vmem:[%s8275_s19 + $0x790] sm:$0xff]  }
  0xd2   : > { %6991 = vmatpush3.bf16.msra.mxu0 %v7817_v43  ;;  %v7867_v43 = vld [vmem:[%s8275_s19 + $0x7d0] sm:$0xff]  }
  0xd3   : > { %6992 = vmatprep.subr.bf16.mxu0 %v7820_v46  ;;  %v7870_v46 = vld [vmem:[%s8275_s19 + $0x718] sm:$0xff]  }
  0xd4   : > { %7013 = vmatpush3.bf16.msra.mxu1 %v7819_v45  ;;  %v7869_v45 = vld [vmem:[%s8275_s19 + $0x758] sm:$0xff]  }
  0xd5   : > { %7014 = vmatprep.subr.bf16.mxu1 %v7822_v48  ;;  %v7872_v48 = vld [vmem:[%s8275_s19 + $0x798] sm:$0xff]  }
  0xd6   : > { %6993 = vmatpush3.bf16.msra.mxu0 %v7821_v47  ;;  %v7871_v47 = vld [vmem:[%s8275_s19 + $0x7d8] sm:$0xff]  }
  0xd7   : > { %7022 = vmatprep.subr.bf16.mxu0 %v7825_v51  ;;  %v7875_v51 = vld [vmem:[%s8275_s19 + $0x7e0] sm:$0xff]  }
  0xd8   : > { %7015 = vmatpush3.bf16.msra.mxu1 %v7824_v49  ;;  %v7873_v49 = vld [vmem:[%s8275_s19 + $0x760] sm:$0xff]  }
  0xd9   : > { %5142 = vmatmul.mubr.bf16.vlgmr.msra.gmra.mrb[20].mxu0 %v1466_v50  ;;  %7044 = vmatprep.subr.bf16.mxu1 %v7827_v53  ;;  %v7874_v50 = vld [vmem:[%s8275_s19 + $0x720] sm:$0xff]   ;;  %v7877_v53 = vld [vmem:[%s8275_s19 + $0x768] sm:$0xff]  }
  0xda   : > { %7023 = vmatpush3.bf16.msra.mxu0 %v7826_v52  ;;  %5221 = vmatprep.mubr.bf16.mxu0 %v1522_v23  ;;  %v7876_v52 = vld [vmem:[%s8275_s19 + $0x7a0] sm:$0xff]   ;;  %v7899_v23 = vld [vmem:[%s8275_s19 + $0x810] sm:$0xff]  }
  0xdb   : > { %5182 = vmatmul.mubr.bf16.vlgmr.msra.gmra.mrb[20].mxu1 %v1482_v55  ;;  %7024 = vmatprep.subr.bf16.mxu0 %v7829_v56  ;;  %v7879_v55 = vld [vmem:[%s8275_s19 + $0x7e8] sm:$0xff]  }
  0xdc   : > { %7045 = vmatpush3.bf16.msra.mxu1 %v7828_v54  ;;  %5261 = vmatprep.mubr.bf16.mxu1 %v1532_v27  ;;  %v7878_v54 = vld [vmem:[%s8275_s19 + $0x728] sm:$0xff]   ;;  %v7903_v27 = vld [vmem:[%s8275_s19 + $0x818] sm:$0xff]  }
  0xdd   : > { %7046 = vmatprep.subr.bf16.mxu1 %v7831_v58  ;;  %v7880_v56 = vld [vmem:[%s8275_s19 + $0x7a8] sm:$0xff]  }
  0xde   : > { %7025 = vmatpush3.bf16.msra.mxu0 %v7830_v57  ;;  %v7881_v57 = vld [vmem:[%s8275_s19 + $0x770] sm:$0xff]  }
  0xdf   : > { %7026 = vmatprep.subr.bf16.mxu0 %v7833_v60 }
  0xe0   : > { %7047 = vmatpush3.bf16.msra.mxu1 %v7832_v59  ;;  %v7882_v59 = vld [vmem:[%s8275_s19 + $0x730] sm:$0xff]  }
  0xe1   : > { %7048 = vmatprep.subr.bf16.mxu1 %v7835_v62 }
  0xe2   : > { %7027 = vmatpush3.bf16.msra.mxu0 %v7834_v61  ;;  %v7883_v61 = vld [vmem:[%s8275_s19 + $0x7f0] sm:$0xff]  }
  0xe3   : > { %7028 = vmatprep.subr.bf16.mxu0 %v7837_v0 }
  0xe4   : > { %7049 = vmatpush3.bf16.msra.mxu1 %v7836_v63 }
  0xe5   : > { %7050 = vmatprep.subr.bf16.mxu1 %v7839_v2  ;;  %v7885_v2 = vld [vmem:[%s8275_s19 + $0x778] sm:$0xff]  }
  0xe6   : > { %7029 = vmatpush3.bf16.msra.mxu0 %v7838_v1  ;;  %v7884_v1 = vld [vmem:[%s8275_s19 + $0x7b0] sm:$0xff]  }
  0xe7   : > { %7030 = vmatprep.subr.bf16.mxu0 %v7841_v4 }
  0xe8   : > { %7051 = vmatpush3.bf16.msra.mxu1 %v7840_v3 }
  0xe9   : > { %7052 = vmatprep.subr.bf16.mxu1 %v7843_v6  ;;  %v7886_v6 = vld [vmem:[%s8275_s19 + $0x738] sm:$0xff]  }
  0xea   : > { %7031 = vmatpush3.bf16.msra.mxu0 %v7842_v5 }
  0xeb   : > { %7032 = vmatprep.subr.bf16.mxu0 %v7845_v8  ;;  %v7887_v8 = vld [vmem:[%s8275_s19 + $0x7f8] sm:$0xff]  }
  0xec   : > { %7053 = vmatpush3.bf16.msra.mxu1 %v7844_v7 }
  0xed   : > { %7054 = vmatprep.subr.bf16.mxu1 %v7847_v10 }
  0xee   : > { %7033 = vmatpush3.bf16.msra.mxu0 %v7846_v9 }
  0xef   : > { %7034 = vmatprep.subr.bf16.mxu0 %v7849_v12  ;;  %v1515_v12 = vrot.slane %v8539_v20, %v8313_v42  ;;  %v7896_v20 = vld [vmem:[%s8275_s19 + $0x8c8] sm:$0xff]  }
  0xf0   : > { %7055 = vmatpush3.bf16.msra.mxu1 %v7848_v11  ;;  %v7889_v11 = vld [vmem:[%s8275_s19 + $0x7b8] sm:$0xff]  }
  0xf1   : > { %7056 = vmatprep.subr.bf16.mxu1 %v7851_v17  ;;  %v1531_v17 = vcombine.high %v1515_v12, %v1515_v12 }
  0xf2   : > { %7035 = vmatpush3.bf16.msra.mxu0 %v7850_v14  ;;  %v7891_v14 = vld [vmem:[%s8275_s19 + $0x800] sm:$0xff]  }
  0xf3   : > { %7036 = vmatprep.subr.bf16.mxu0 %v7853_v21  ;;  %v7897_v21 = vld [vmem:[%s8275_s19 + $0x888] sm:$0xff]  }
  0xf4   : > { %7057 = vmatpush3.bf16.msra.mxu1 %v7852_v18  ;;  %v7894_v18 = vld [vmem:[%s8275_s19 + $0x848] sm:$0xff]  }
  0xf5   : > { %7058 = vmatprep.subr.bf16.mxu1 %v7855_v25  ;;  %v7901_v25 = vld [vmem:[%s8275_s19 + $0x890] sm:$0xff]  }
  0xf6   : > { %7037 = vmatpush3.bf16.msra.mxu0 %v7854_v22  ;;  %v7898_v22 = vld [vmem:[%s8275_s19 + $0x850] sm:$0xff]  }
  0xf7   : > { %7066 = vmatprep.subr.bf16.mxu0 %v7857_v29  ;;  %v7905_v29 = vld [vmem:[%s8275_s19 + $0x898] sm:$0xff]  }
  0xf8   : > { %7059 = vmatpush3.bf16.msra.mxu1 %v7856_v26  ;;  %v7902_v26 = vld [vmem:[%s8275_s19 + $0x858] sm:$0xff]  }
  0xf9   : > { %5222 = vmatmul.mubr.bf16.vlgmr.msra.gmra.mrb[24].mxu0 %v1508_v28  ;;  %7088 = vmatprep.subr.bf16.mxu1 %v7859_v32  ;;  %v7904_v28 = vld [vmem:[%s8275_s19 + $0x8d8] sm:$0xff]   ;;  %v7908_v32 = vld [vmem:[%s8275_s19 + $0x8e0] sm:$0xff]  }
  0xfa   : > { %7067 = vmatpush3.bf16.msra.mxu0 %v7858_v30  ;;  %5301 = vmatprep.mubr.bf16.mxu0 %v1529_v31  ;;  %v7906_v30 = vld [vmem:[%s8275_s19 + $0x860] sm:$0xff]  }
  0xfb   : > { %5262 = vmatmul.mubr.bf16.vlgmr.msra.gmra.mrb[24].mxu1 %v1530_v34  ;;  %7068 = vmatprep.subr.bf16.mxu0 %v7861_v35  ;;  %v7907_v31 = vld [vmem:[%s8275_s19 + $0x820] sm:$0xff]   ;;  %v7910_v34 = vld [vmem:[%s8275_s19 + $0x868] sm:$0xff]  }
  0xfc   : > { %7089 = vmatpush3.bf16.msra.mxu1 %v7860_v33  ;;  %5341 = vmatprep.mubr.bf16.mxu1 %v1533_v37  ;;  %v7909_v33 = vld [vmem:[%s8275_s19 + $0x8a0] sm:$0xff]   ;;  %v7911_v35 = vld [vmem:[%s8275_s19 + $0x828] sm:$0xff]  }
  0xfd   : > { %7090 = vmatprep.subr.bf16.mxu1 %v7863_v38  ;;  %v7913_v37 = vld [vmem:[%s8275_s19 + $0x8a8] sm:$0xff]   ;;  %v7914_v38 = vld [vmem:[%s8275_s19 + $0x870] sm:$0xff]  }
  0xfe   : > { %7069 = vmatpush3.bf16.msra.mxu0 %v7862_v36  ;;  %v7912_v36 = vld [vmem:[%s8275_s19 + $0x8e8] sm:$0xff]  }
  0xff   : > { %7070 = vmatprep.subr.bf16.mxu0 %v7865_v40 }
 0x100   : > { %7091 = vmatpush3.bf16.msra.mxu1 %v7864_v39  ;;  %v350_v39 = vld [vmem:[%s8270_s15 + $0x20] sm:$0xff] }
 0x101   : > { %7092 = vmatprep.subr.bf16.mxu1 %v7867_v43  ;;  %v1541_v43 = vrot.slane %v350_v39, %v8313_v42 }
 0x102   : > { %7071 = vmatpush3.bf16.msra.mxu0 %v7866_v41  ;;  %v7915_v41 = vld [vmem:[%s8275_s19 + $0x830] sm:$0xff]  }
 0x103   : > { %7072 = vmatprep.subr.bf16.mxu0 %v7869_v45 }
 0x104   : > { %7093 = vmatpush3.bf16.msra.mxu1 %v7868_v44  ;;  %v1534_v44 = vcombine.high %v350_v39, %v350_v39  ;;  %v7949_v39 = vld [vmem:[%s8275_s19 + $0x9b0] sm:$0xff]  }
 0x105   : > { %7094 = vmatprep.subr.bf16.mxu1 %v7871_v47 }
 0x106   : > { %7073 = vmatpush3.bf16.msra.mxu0 %v7870_v46  ;;  %v7916_v46 = vld [vmem:[%s8275_s19 + $0x8f0] sm:$0xff]  }
 0x107   : > { %7074 = vmatprep.subr.bf16.mxu0 %v7873_v49 }
 0x108   : > { %7095 = vmatpush3.bf16.msra.mxu1 %v7872_v48 }
 0x109   : > { %7096 = vmatprep.subr.bf16.mxu1 %v7875_v51  ;;  %v8616_v51 = vrot.slane %v1534_v44, %v8313_v42 }
 0x10a   : > { %7075 = vmatpush3.bf16.msra.mxu0 %v7874_v50  ;;  %v1549_v50 = vcombine.high %v1541_v43, %v1541_v43 }
 0x10b   : > { %7076 = vmatprep.subr.bf16.mxu0 %v7877_v53 }
 0x10c   : > { %v6774_v58 = vpop.f32.mrb[0].mxu0  ;;  %7097 = vmatpush3.bf16.msra.mxu1 %v7876_v52 }
 0x10d   : > { %v6775_v60 = vpop.f32.mrb[1].mxu0  ;;  %7098 = vmatprep.subr.bf16.mxu1 %v7879_v55  ;;  %v6796_v62 = vpop.f32.mrb[0].mxu1  ;;  %v7918_v55 = vld [vmem:[%s8275_s19 + $0x878] sm:$0xff]  }
 0x10e   : > { %v6776_v63 = vadd.f32 %v6775_v60, %v6774_v58  ;;  %v6777_v0 = vpop.f32.mrb[2].mxu0  ;;  %7077 = vmatpush3.bf16.msra.mxu0 %v7878_v54  ;;  %v6797_v3 = vpop.f32.mrb[1].mxu1  ;;  %v7917_v54 = vld [vmem:[%s8275_s19 + $0x8b0] sm:$0xff]   ;;  %v7919_v58 = vld [vmem:[%s8275_s19 + $0x838] sm:$0xff]  }
 0x10f   : > { %v6778_v4 = vpop.f32.mrb[3].mxu0  ;;  %7078 = vmatprep.subr.bf16.mxu0 %v7881_v57  ;;  %v6798_v5 = vadd.f32 %v6797_v3, %v6796_v62  ;;  %v6799_v7 = vpop.f32.mrb[2].mxu1  ;;  %v7920_v60 = vld [vmem:[%s8275_s19 + $0x8f8] sm:$0xff]   ;;  %v1550_v62 = vcombine.high %v8616_v51, %v8616_v51  ;;  %v1557_v3 = vrot.slane %v1541_v43, %v8313_v42 }
 0x110   : > { %7099 = vmatpush3.bf16.msra.mxu1 %v7880_v56  ;;  %v6800_v9 = vpop.f32.mrb[3].mxu1  ;;  %v7921_v0 = vld [vmem:[%s8275_s19 + $0x8b8] sm:$0xff]   ;;  %v7922_v4 = vld [vmem:[%s8275_s19 + $0x940] sm:$0xff]  }
 0x111   : > { %7100 = vmatprep.subr.bf16.mxu1 %v7883_v61  ;;  %v8581_v10 = vadd.f32 %v6798_v5, %v6776_v63  ;;  %v7923_v5 = vld [vmem:[%s8275_s19 + $0x900] sm:$0xff]   ;;  %v1579_v9 = vcombine.high %v1557_v3, %v1557_v3 }
 0x112   : > { %7079 = vmatpush3.bf16.msra.mxu0 %v7882_v59  ;;  %v1571_v59 = vrot.slane %v1549_v50, %v8313_v42  ;;  %v7924_v7 = vld [vmem:[%s8275_s19 + $0x9c0] sm:$0xff]  }
 0x113   : > { %7080 = vmatprep.subr.bf16.mxu0 %v7885_v2 }
 0x114   : > { %7101 = vmatpush3.bf16.msra.mxu1 %v7884_v1  ;;  %v1581_v1 = vcombine.high %v1571_v59, %v1571_v59 }
 0x115   : > { %7102 = vmatprep.subr.bf16.mxu1 %v7887_v8  ;;  %v7925_v8 = vld [vmem:[%s8275_s19 + $0x980] sm:$0xff]  }
 0x116   : > { %7081 = vmatpush3.bf16.msra.mxu0 %v7886_v6  ;;  %v1578_v6 = vrot.slane %v1550_v62, %v8313_v42  ;;  %v7963_v62 = vld [vmem:[%s8275_s19 + $0xa50] sm:$0xff]  }
 0x117   : > { %7110 = vmatprep.subr.bf16.mxu0 %v7890_v13  ;;  %v7928_v13 = vld [vmem:[%s8275_s19 + $0x9c8] sm:$0xff]  }
 0x118   : > { %7103 = vmatpush3.bf16.msra.mxu1 %v7889_v11  ;;  %v7927_v11 = vld [vmem:[%s8275_s19 + $0x908] sm:$0xff]  }
 0x119   : > { %5302 = vmatmul.mubr.bf16.vlgmr.msra.gmra.mrb[28].mxu0 %v1515_v12  ;;  %7132 = vmatprep.subr.bf16.mxu1 %v7892_v15  ;;  %v1582_v12 = vcombine.high %v1578_v6, %v1578_v6  ;;  %v7930_v15 = vld [vmem:[%s8275_s19 + $0x950] sm:$0xff]  }
 0x11a   : > { %7111 = vmatpush3.bf16.msra.mxu0 %v7891_v14  ;;  %5381 = vmatprep.mubr.bf16.mxu0 %v1571_v59  ;;  %v7929_v14 = vld [vmem:[%s8275_s19 + $0x988] sm:$0xff]  }
 0x11b   : > { %5342 = vmatmul.mubr.bf16.vlgmr.msra.gmra.mrb[28].mxu1 %v1531_v17  ;;  %7112 = vmatprep.subr.bf16.mxu0 %v7894_v18  ;;  %v7932_v17 = vld [vmem:[%s8275_s19 + $0x9d0] sm:$0xff]   ;;  %v7959_v59 = vld [vmem:[%s8275_s19 + $0xa48] sm:$0xff]  }
 0x11c   : > { %7133 = vmatpush3.bf16.msra.mxu1 %v7893_v16  ;;  %5421 = vmatprep.mubr.bf16.mxu1 %v1581_v1  ;;  %v7931_v16 = vld [vmem:[%s8275_s19 + $0x910] sm:$0xff]  }
 0x11d   : > { %7134 = vmatprep.subr.bf16.mxu1 %v7896_v20  ;;  %v7933_v18 = vld [vmem:[%s8275_s19 + $0x990] sm:$0xff]   ;;  %v7935_v20 = vld [vmem:[%s8275_s19 + $0x918] sm:$0xff]  }
 0x11e   : > { %7113 = vmatpush3.bf16.msra.mxu0 %v7895_v19  ;;  %v7934_v19 = vld [vmem:[%s8275_s19 + $0x958] sm:$0xff]   ;;  %v7966_v1 = vld [vmem:[%s8275_s19 + $0xa90] sm:$0xff]  }
 0x11f   : > { %7114 = vmatprep.subr.bf16.mxu0 %v7898_v22  ;;  %v7937_v22 = vld [vmem:[%s8275_s19 + $0x998] sm:$0xff]  }
 0x120   : > { %7135 = vmatpush3.bf16.msra.mxu1 %v7897_v21  ;;  %v7936_v21 = vld [vmem:[%s8275_s19 + $0x9d8] sm:$0xff]  }
 0x121   : > { %7136 = vmatprep.subr.bf16.mxu1 %v7900_v24  ;;  %v7939_v24 = vld [vmem:[%s8275_s19 + $0x920] sm:$0xff]  }
 0x122   : > { %7115 = vmatpush3.bf16.msra.mxu0 %v7899_v23  ;;  %v7938_v23 = vld [vmem:[%s8275_s19 + $0x960] sm:$0xff]  }
 0x123   : > { %7116 = vmatprep.subr.bf16.mxu0 %v7902_v26  ;;  %v7941_v26 = vld [vmem:[%s8275_s19 + $0x9a0] sm:$0xff]  }
 0x124   : > { %7137 = vmatpush3.bf16.msra.mxu1 %v7901_v25  ;;  %v7940_v25 = vld [vmem:[%s8275_s19 + $0x9e0] sm:$0xff]  }
 0x125   : > { %7138 = vmatprep.subr.bf16.mxu1 %v7904_v28  ;;  %v7943_v28 = vld [vmem:[%s8275_s19 + $0x928] sm:$0xff]  }
 0x126   : > { %7117 = vmatpush3.bf16.msra.mxu0 %v7903_v27  ;;  %v7942_v27 = vld [vmem:[%s8275_s19 + $0x968] sm:$0xff]  }
 0x127   : > { %7118 = vmatprep.subr.bf16.mxu0 %v7906_v30  ;;  %v7945_v30 = vld [vmem:[%s8275_s19 + $0x9a8] sm:$0xff]  }
 0x128   : > { %7139 = vmatpush3.bf16.msra.mxu1 %v7905_v29  ;;  %v7944_v29 = vld [vmem:[%s8275_s19 + $0x9e8] sm:$0xff]  }
 0x129   : > { %7140 = vmatprep.subr.bf16.mxu1 %v7908_v32 }
 0x12a   : > { %7119 = vmatpush3.bf16.msra.mxu0 %v7907_v31  ;;  %v7946_v31 = vld [vmem:[%s8275_s19 + $0x970] sm:$0xff]  }
 0x12b   : > { %7120 = vmatprep.subr.bf16.mxu0 %v7910_v34 }
 0x12c   : > { %v6818_v40 = vpop.f32.mrb[4].mxu0  ;;  %7141 = vmatpush3.bf16.msra.mxu1 %v7909_v33  ;;  %v7947_v33 = vld [vmem:[%s8275_s19 + $0x930] sm:$0xff]  }
 0x12d   : > { %v6819_v45 = vpop.f32.mrb[5].mxu0  ;;  %7142 = vmatprep.subr.bf16.mxu1 %v7912_v36  ;;  %v6840_v49 = vpop.f32.mrb[4].mxu1 }
 0x12e   : > { %v6820_v47 = vadd.f32 %v6819_v45, %v6818_v40  ;;  %v6821_v48 = vpop.f32.mrb[6].mxu0  ;;  %7121 = vmatpush3.bf16.msra.mxu0 %v7911_v35  ;;  %v6841_v53 = vpop.f32.mrb[5].mxu1  ;;  %v7948_v35 = vld [vmem:[%s8275_s19 + $0x9f0] sm:$0xff]   ;;  %v7950_v40 = vld [vmem:[%s8275_s19 + $0x978] sm:$0xff]  }
 0x12f   : > { %v6822_v52 = vpop.f32.mrb[7].mxu0  ;;  %7122 = vmatprep.subr.bf16.mxu0 %v7914_v38  ;;  %v6842_v57 = vadd.f32 %v6841_v53, %v6840_v49  ;;  %v6843_v61 = vpop.f32.mrb[6].mxu1  ;;  %v7952_v48 = vld [vmem:[%s8275_s19 + $0x9f8] sm:$0xff]   ;;  %v1564_v53 = vrot.slane %v8616_v51, %v8313_v42  ;;  %v7961_v51 = vld [vmem:[%s8275_s19 + $0xac8] sm:$0xff]  }
 0x130   : > { %v4824_v56 = vadd.f32 %v6820_v47, %v8581_v10  ;;  %7143 = vmatpush3.bf16.msra.mxu1 %v7913_v37  ;;  %v6844_v2 = vpop.f32.mrb[7].mxu1  ;;  %v7926_v10 = vld [vmem:[%s8275_s19 + $0x948] sm:$0xff]   ;;  %v7954_v52 = vld [vmem:[%s8275_s19 + $0x9b8] sm:$0xff]  }
 0x131   : > { %7144 = vmatprep.subr.bf16.mxu1 %v7916_v46  ;;  %v7951_v46 = vld [vmem:[%s8275_s19 + $0x938] sm:$0xff]   ;;  %v7962_v61 = vld [vmem:[%s8275_s19 + $0xa88] sm:$0xff]  }
 0x132   : > { %v8626_v63 = vadd.f32 %v6842_v57, %v4824_v56  ;;  %7123 = vmatpush3.bf16.msra.mxu0 %v7915_v41  ;;  %v7957_v56 = vld [vmem:[%s8275_s19 + $0xac0] sm:$0xff]   ;;  %v7967_v2 = vld [vmem:[%s8275_s19 + $0xa58] sm:$0xff]  }
 0x133   : > { %7124 = vmatprep.subr.bf16.mxu0 %v7918_v55  ;;  %v7956_v55 = vld [vmem:[%s8275_s19 + $0xa00] sm:$0xff]  }
 0x134   : > { %7145 = vmatpush3.bf16.msra.mxu1 %v7917_v54  ;;  %v7955_v54 = vld [vmem:[%s8275_s19 + $0xa40] sm:$0xff]  }
 0x135   : > { %7146 = vmatprep.subr.bf16.mxu1 %v7920_v60  ;;  %v7958_v57 = vld [vmem:[%s8275_s19 + $0xa80] sm:$0xff]   ;;  %v7960_v60 = vld [vmem:[%s8275_s19 + $0xa08] sm:$0xff]  }
 0x136   : > { %7125 = vmatpush3.bf16.msra.mxu0 %v7919_v58  ;;  %v1580_v58 = vcombine.high %v1564_v53, %v1564_v53 }
 0x137   : > { %7154 = vmatprep.subr.bf16.mxu0 %v7922_v4  ;;  %v7969_v4 = vld [vmem:[%s8275_s19 + $0xad8] sm:$0xff]  }
 0x138   : > { %7147 = vmatpush3.bf16.msra.mxu1 %v7921_v0  ;;  %v7965_v0 = vld [vmem:[%s8275_s19 + $0xad0] sm:$0xff]  }
 0x139   : > { %5382 = vmatmul.mubr.bf16.vlgmr.msra.gmra.mrb[32].mxu0 %v1557_v3  ;;  %7176 = vmatprep.subr.bf16.mxu1 %v7924_v7  ;;  %v7968_v3 = vld [vmem:[%s8275_s19 + $0xa18] sm:$0xff]   ;;  %v7972_v7 = vld [vmem:[%s8275_s19 + $0xa20] sm:$0xff]  }
 0x13a   : > { %7155 = vmatpush3.bf16.msra.mxu0 %v7923_v5  ;;  %5461 = vmatprep.mubr.bf16.mxu0 %v1578_v6  ;;  %v7970_v5 = vld [vmem:[%s8275_s19 + $0xa98] sm:$0xff]   ;;  %v7971_v6 = vld [vmem:[%s8275_s19 + $0xa60] sm:$0xff]  }
 0x13b   : > { %5422 = vmatmul.mubr.bf16.vlgmr.msra.gmra.mrb[32].mxu1 %v1579_v9  ;;  %7156 = vmatprep.subr.bf16.mxu0 %v7926_v10  ;;  %v7974_v9 = vld [vmem:[%s8275_s19 + $0xaa0] sm:$0xff]   ;;  %v7975_v10 = vld [vmem:[%s8275_s19 + $0xa68] sm:$0xff]  }
 0x13c   : > { %7177 = vmatpush3.bf16.msra.mxu1 %v7925_v8  ;;  %5501 = vmatprep.mubr.bf16.mxu1 %v1582_v12  ;;  %v7973_v8 = vld [vmem:[%s8275_s19 + $0xae0] sm:$0xff]   ;;  %v7977_v12 = vld [vmem:[%s8275_s19 + $0xae8] sm:$0xff]  }
 0x13d   : > { %7178 = vmatprep.subr.bf16.mxu1 %v7928_v13  ;;  %v7978_v13 = vld [vmem:[%s8275_s19 + $0xaa8] sm:$0xff]  }
 0x13e   : > { %7157 = vmatpush3.bf16.msra.mxu0 %v7927_v11  ;;  %v7976_v11 = vld [vmem:[%s8275_s19 + $0xa28] sm:$0xff]  }
 0x13f   : > { %7158 = vmatprep.subr.bf16.mxu0 %v7930_v15 }
 0x140   : > { %7179 = vmatpush3.bf16.msra.mxu1 %v7929_v14  ;;  %v7979_v14 = vld [vmem:[%s8275_s19 + $0xa70] sm:$0xff]  }
 0x141   : > { %7180 = vmatprep.subr.bf16.mxu1 %v7932_v17  ;;  %v351_v17 = vld [vmem:[%s8270_s15 + $0x28] sm:$0xff] }
 0x142   : > { %7159 = vmatpush3.bf16.msra.mxu0 %v7931_v16  ;;  %v7980_v16 = vld [vmem:[%s8275_s19 + $0xa30] sm:$0xff]  }
 0x143   : > { %7160 = vmatprep.subr.bf16.mxu0 %v7934_v19  ;;  %v7981_v19 = vld [vmem:[%s8275_s19 + $0xaf0] sm:$0xff]  }
 0x144   : > { %7181 = vmatpush3.bf16.msra.mxu1 %v7933_v18 }
 0x145   : > { %7182 = vmatprep.subr.bf16.mxu1 %v7936_v21  ;;  %v1583_v21 = vcombine.high %v351_v17, %v351_v17 }
 0x146   : > { %7161 = vmatpush3.bf16.msra.mxu0 %v7935_v20  ;;  %v1590_v20 = vrot.slane %v351_v17, %v8313_v42 }
 0x147   : > { %7162 = vmatprep.subr.bf16.mxu0 %v7938_v23 }
 0x148   : > { %7183 = vmatpush3.bf16.msra.mxu1 %v7937_v22 }
 0x149   : > { %7184 = vmatprep.subr.bf16.mxu1 %v7940_v25 }
 0x14a   : > { %7163 = vmatpush3.bf16.msra.mxu0 %v7939_v24 }
 0x14b   : > { %7164 = vmatprep.subr.bf16.mxu0 %v7942_v27  ;;  %v7982_v27 = vld [vmem:[%s8275_s19 + $0xab0] sm:$0xff]  }
 0x14c   : > { %v6862_v32 = vpop.f32.mrb[8].mxu0  ;;  %7185 = vmatpush3.bf16.msra.mxu1 %v7941_v26 }
 0x14d   : > { %v6863_v34 = vpop.f32.mrb[9].mxu0  ;;  %7186 = vmatprep.subr.bf16.mxu1 %v7944_v29  ;;  %v1598_v29 = vcombine.high %v1590_v20, %v1590_v20 }
 0x14e   : > { %v6864_v36 = vadd.f32 %v6863_v34, %v6862_v32  ;;  %v6865_v37 = vpop.f32.mrb[10].mxu0  ;;  %v6884_v38 = vpop.f32.mrb[8].mxu1  ;;  %7165 = vmatpush3.bf16.msra.mxu0 %v7943_v28  ;;  %v7983_v28 = vld [vmem:[%s8275_s19 + $0xa78] sm:$0xff]  }
 0x14f   : > { %v6866_v41 = vpop.f32.mrb[11].mxu0  ;;  %v6885_v43 = vpop.f32.mrb[9].mxu1  ;;  %7166 = vmatprep.subr.bf16.mxu0 %v7946_v31  ;;  %v7985_v34 = vld [vmem:[%s8275_s19 + $0xaf8] sm:$0xff]  }
 0x150   : > { %v4904_v44 = vadd.f32 %v6864_v36, %v8626_v63  ;;  %v6886_v45 = vadd.f32 %v6885_v43, %v6884_v38  ;;  %7187 = vmatpush3.bf16.msra.mxu1 %v7945_v30  ;;  %v6887_v47 = vpop.f32.mrb[10].mxu1  ;;  %v7964_v63 = vld [vmem:[%s8275_s19 + $0xa10] sm:$0xff]   ;;  %v8700_v30 = vrot.slane %v1583_v21, %v8313_v42  ;;  %v1606_v41 = vrot.slane %v1590_v20, %v8313_v42  ;;  %v7987_v43 = vld [vmem:[%s8275_s19 + $0xb40] sm:$0xff]   ;;  %v8016_v21 = vld [vmem:[%s8275_s19 + $0xb38] sm:$0xff]  }
 0x151   : > { %7188 = vmatprep.subr.bf16.mxu1 %v7948_v35  ;;  %v6888_v49 = vpop.f32.mrb[11].mxu1  ;;  %v1620_v35 = vrot.slane %v1598_v29, %v8313_v42  ;;  %v7989_v47 = vld [vmem:[%s8275_s19 + $0xbc0] sm:$0xff]  }
 0x152   : > { %v8663_v50 = vadd.f32 %v6886_v45, %v4904_v44  ;;  %7167 = vmatpush3.bf16.msra.mxu0 %v7947_v33  ;;  %v7984_v33 = vld [vmem:[%s8275_s19 + $0xa38] sm:$0xff]   ;;  %v1599_v37 = vcombine.high %v8700_v30, %v8700_v30  ;;  %v7988_v45 = vld [vmem:[%s8275_s19 + $0xb00] sm:$0xff]   ;;  %v1628_v49 = vcombine.high %v1606_v41, %v1606_v41 }
 0x153   : > { %7168 = vmatprep.subr.bf16.mxu0 %v7950_v40  ;;  %v1630_v44 = vcombine.high %v1620_v35, %v1620_v35  ;;  %v8021_v29 = vld [vmem:[%s8275_s19 + $0xc00] sm:$0xff]  }
 0x154   : > { %7189 = vmatpush3.bf16.msra.mxu1 %v7949_v39  ;;  %v7986_v39 = vld [vmem:[%s8275_s19 + $0xab8] sm:$0xff]  }
 0x155   : > { %7190 = vmatprep.subr.bf16.mxu1 %v7952_v48  ;;  %v7990_v48 = vld [vmem:[%s8275_s19 + $0xb80] sm:$0xff]  }
 0x156   : > { %7169 = vmatpush3.bf16.msra.mxu0 %v7951_v46  ;;  %v1627_v46 = vrot.slane %v1599_v37, %v8313_v42  ;;  %v8028_v37 = vld [vmem:[%s8275_s19 + $0xc50] sm:$0xff]  }
 0x157   : > { %7198 = vmatprep.subr.bf16.mxu0 %v7955_v54  ;;  %v7993_v54 = vld [vmem:[%s8275_s19 + $0xbc8] sm:$0xff]  }
 0x158   : > { %7191 = vmatpush3.bf16.msra.mxu1 %v7954_v52  ;;  %v7992_v52 = vld [vmem:[%s8275_s19 + $0xb08] sm:$0xff]  }
 0x159   : > { %5462 = vmatmul.mubr.bf16.vlgmr.msra.gmra.mrb[36].mxu0 %v1564_v53  ;;  %7220 = vmatprep.subr.bf16.mxu1 %v7957_v56  ;;  %v1631_v53 = vcombine.high %v1627_v46, %v1627_v46  ;;  %v7995_v56 = vld [vmem:[%s8275_s19 + $0xb50] sm:$0xff]  }
 0x15a   : > { %7199 = vmatpush3.bf16.msra.mxu0 %v7956_v55  ;;  %5541 = vmatprep.mubr.bf16.mxu0 %v1620_v35  ;;  %v7994_v55 = vld [vmem:[%s8275_s19 + $0xb88] sm:$0xff]  }
 0x15b   : > { %5502 = vmatmul.mubr.bf16.vlgmr.msra.gmra.mrb[36].mxu1 %v1580_v58  ;;  %7200 = vmatprep.subr.bf16.mxu0 %v7959_v59  ;;  %v7997_v58 = vld [vmem:[%s8275_s19 + $0xbd0] sm:$0xff]   ;;  %v8025_v35 = vld [vmem:[%s8275_s19 + $0xc08] sm:$0xff]  }
 0x15c   : > { %7221 = vmatpush3.bf16.msra.mxu1 %v7958_v57  ;;  %5581 = vmatprep.mubr.bf16.mxu1 %v1630_v44  ;;  %v7996_v57 = vld [vmem:[%s8275_s19 + $0xb10] sm:$0xff]   ;;  %v8034_v44 = vld [vmem:[%s8275_s19 + $0xcd8] sm:$0xff]  }
 0x15d   : > { %7222 = vmatprep.subr.bf16.mxu1 %v7961_v51  ;;  %v7998_v59 = vld [vmem:[%s8275_s19 + $0xb90] sm:$0xff]   ;;  %v8000_v51 = vld [vmem:[%s8275_s19 + $0xb18] sm:$0xff]  }
 0x15e   : > { %7201 = vmatpush3.bf16.msra.mxu0 %v7960_v60  ;;  %v7999_v60 = vld [vmem:[%s8275_s19 + $0xb58] sm:$0xff]  }
 0x15f   : > { %7202 = vmatprep.subr.bf16.mxu0 %v7963_v62  ;;  %v8002_v62 = vld [vmem:[%s8275_s19 + $0xb98] sm:$0xff]  }
 0x160   : > { %7223 = vmatpush3.bf16.msra.mxu1 %v7962_v61  ;;  %v8001_v61 = vld [vmem:[%s8275_s19 + $0xbd8] sm:$0xff]  }
 0x161   : > { %7224 = vmatprep.subr.bf16.mxu1 %v7965_v0  ;;  %v8004_v0 = vld [vmem:[%s8275_s19 + $0xb20] sm:$0xff]  }
 0x162   : > { %7203 = vmatpush3.bf16.msra.mxu0 %v7964_v63  ;;  %v8003_v63 = vld [vmem:[%s8275_s19 + $0xb60] sm:$0xff]  }
 0x163   : > { %7204 = vmatprep.subr.bf16.mxu0 %v7967_v2  ;;  %v8006_v2 = vld [vmem:[%s8275_s19 + $0xba0] sm:$0xff]  }
 0x164   : > { %7225 = vmatpush3.bf16.msra.mxu1 %v7966_v1  ;;  %v8005_v1 = vld [vmem:[%s8275_s19 + $0xbe0] sm:$0xff]  }
 0x165   : > { %7226 = vmatprep.subr.bf16.mxu1 %v7969_v4  ;;  %v8008_v4 = vld [vmem:[%s8275_s19 + $0xb28] sm:$0xff]  }
 0x166   : > { %7205 = vmatpush3.bf16.msra.mxu0 %v7968_v3  ;;  %v8007_v3 = vld [vmem:[%s8275_s19 + $0xb68] sm:$0xff]  }
 0x167   : > { %7206 = vmatprep.subr.bf16.mxu0 %v7971_v6  ;;  %v8010_v6 = vld [vmem:[%s8275_s19 + $0xba8] sm:$0xff]  }
 0x168   : > { %7227 = vmatpush3.bf16.msra.mxu1 %v7970_v5  ;;  %v8009_v5 = vld [vmem:[%s8275_s19 + $0xbe8] sm:$0xff]  }
 0x169   : > { %7228 = vmatprep.subr.bf16.mxu1 %v7973_v8 }
 0x16a   : > { %7207 = vmatpush3.bf16.msra.mxu0 %v7972_v7  ;;  %v8011_v7 = vld [vmem:[%s8275_s19 + $0xb70] sm:$0xff]  }
 0x16b   : > { %7208 = vmatprep.subr.bf16.mxu0 %v7975_v10 }
 0x16c   : > { %v6906_v15 = vpop.f32.mrb[12].mxu0  ;;  %7229 = vmatpush3.bf16.msra.mxu1 %v7974_v9  ;;  %v8012_v9 = vld [vmem:[%s8275_s19 + $0xb30] sm:$0xff]  }
 0x16d   : > { %v6907_v18 = vpop.f32.mrb[13].mxu0  ;;  %7230 = vmatprep.subr.bf16.mxu1 %v7977_v12 }
 0x16e   : > { %v6908_v22 = vadd.f32 %v6907_v18, %v6906_v15  ;;  %v6909_v23 = vpop.f32.mrb[14].mxu0  ;;  %v6928_v24 = vpop.f32.mrb[12].mxu1  ;;  %7209 = vmatpush3.bf16.msra.mxu0 %v7976_v11  ;;  %v8013_v11 = vld [vmem:[%s8275_s19 + $0xbf0] sm:$0xff]  }
 0x16f   : > { %v6910_v25 = vpop.f32.mrb[15].mxu0  ;;  %v6929_v26 = vpop.f32.mrb[13].mxu1  ;;  %7210 = vmatprep.subr.bf16.mxu0 %v7979_v14  ;;  %v8014_v15 = vld [vmem:[%s8275_s19 + $0xbb0] sm:$0xff]   ;;  %v8017_v23 = vld [vmem:[%s8275_s19 + $0xbf8] sm:$0xff]  }
 0x170   : > { %v4984_v31 = vadd.f32 %v6908_v22, %v8663_v50  ;;  %v6930_v32 = vadd.f32 %v6929_v26, %v6928_v24  ;;  %7231 = vmatpush3.bf16.msra.mxu1 %v7978_v13  ;;  %v6931_v36 = vpop.f32.mrb[14].mxu1  ;;  %v7991_v50 = vld [vmem:[%s8275_s19 + $0xb48] sm:$0xff]   ;;  %v8019_v26 = vld [vmem:[%s8275_s19 + $0xbb8] sm:$0xff]  }
 0x171   : > { %7232 = vmatprep.subr.bf16.mxu1 %v7981_v19  ;;  %v6932_v40 = vpop.f32.mrb[15].mxu1  ;;  %v8027_v36 = vld [vmem:[%s8275_s19 + $0xc88] sm:$0xff]  }
 0x172   : > { %v8708_v38 = vadd.f32 %v6930_v32, %v4984_v31  ;;  %7211 = vmatpush3.bf16.msra.mxu0 %v7980_v16  ;;  %v8015_v16 = vld [vmem:[%s8275_s19 + $0xb78] sm:$0xff]   ;;  %v8022_v31 = vld [vmem:[%s8275_s19 + $0xcc0] sm:$0xff]   ;;  %v8031_v40 = vld [vmem:[%s8275_s19 + $0xc90] sm:$0xff]  }
 0x173   : > { %7212 = vmatprep.subr.bf16.mxu0 %v7983_v28  ;;  %v8020_v28 = vld [vmem:[%s8275_s19 + $0xc40] sm:$0xff]  }
 0x174   : > { %7233 = vmatpush3.bf16.msra.mxu1 %v7982_v27  ;;  %v1613_v27 = vrot.slane %v8700_v30, %v8313_v42  ;;  %v8023_v32 = vld [vmem:[%s8275_s19 + $0xc80] sm:$0xff]   ;;  %v8026_v30 = vld [vmem:[%s8275_s19 + $0xcc8] sm:$0xff]  }
 0x175   : > { %7234 = vmatprep.subr.bf16.mxu1 %v7985_v34  ;;  %v8024_v34 = vld [vmem:[%s8275_s19 + $0xc48] sm:$0xff]  }
 0x176   : > { %7213 = vmatpush3.bf16.msra.mxu0 %v7984_v33  ;;  %v1629_v33 = vcombine.high %v1613_v27, %v1613_v27 }
 0x177   : > { %7242 = vmatprep.subr.bf16.mxu0 %v7987_v43  ;;  %v8033_v43 = vld [vmem:[%s8275_s19 + $0xc18] sm:$0xff]  }
 0x178   : > { %7235 = vmatpush3.bf16.msra.mxu1 %v7986_v39  ;;  %v8030_v39 = vld [vmem:[%s8275_s19 + $0xcd0] sm:$0xff]  }
 0x179   : > { %5542 = vmatmul.mubr.bf16.vlgmr.msra.gmra.mrb[40].mxu0 %v1606_v41  ;;  %7264 = vmatprep.subr.bf16.mxu1 %v7989_v47  ;;  %v8032_v41 = vld [vmem:[%s8275_s19 + $0xc58] sm:$0xff]   ;;  %v8037_v47 = vld [vmem:[%s8275_s19 + $0xc20] sm:$0xff]  }
 0x17a   : > { %7243 = vmatpush3.bf16.msra.mxu0 %v7988_v45  ;;  %5621 = vmatprep.mubr.bf16.mxu0 %v1627_v46  ;;  %v8035_v45 = vld [vmem:[%s8275_s19 + $0xc98] sm:$0xff]   ;;  %v8036_v46 = vld [vmem:[%s8275_s19 + $0xc60] sm:$0xff]  }
 0x17b   : > { %5582 = vmatmul.mubr.bf16.vlgmr.msra.gmra.mrb[40].mxu1 %v1628_v49  ;;  %7244 = vmatprep.subr.bf16.mxu0 %v7991_v50  ;;  %v8039_v49 = vld [vmem:[%s8275_s19 + $0xca0] sm:$0xff]   ;;  %v8040_v50 = vld [vmem:[%s8275_s19 + $0xc68] sm:$0xff]  }
 0x17c   : > { %7265 = vmatpush3.bf16.msra.mxu1 %v7990_v48  ;;  %5661 = vmatprep.mubr.bf16.mxu1 %v1631_v53  ;;  %v8038_v48 = vld [vmem:[%s8275_s19 + $0xce0] sm:$0xff]   ;;  %v8042_v53 = vld [vmem:[%s8275_s19 + $0xce8] sm:$0xff]  }
 0x17d   : > { %7266 = vmatprep.subr.bf16.mxu1 %v7993_v54  ;;  %v8043_v54 = vld [vmem:[%s8275_s19 + $0xca8] sm:$0xff]  }
 0x17e   : > { %7245 = vmatpush3.bf16.msra.mxu0 %v7992_v52  ;;  %v8041_v52 = vld [vmem:[%s8275_s19 + $0xc28] sm:$0xff]  }
 0x17f   : > { %7246 = vmatprep.subr.bf16.mxu0 %v7995_v56 }
 0x180   : > { %7267 = vmatpush3.bf16.msra.mxu1 %v7994_v55  ;;  %v8044_v55 = vld [vmem:[%s8275_s19 + $0xc70] sm:$0xff]  }
 0x181   : > { %7268 = vmatprep.subr.bf16.mxu1 %v7997_v58 }
 0x182   : > { %7247 = vmatpush3.bf16.msra.mxu0 %v7996_v57  ;;  %v8045_v57 = vld [vmem:[%s8275_s19 + $0xc30] sm:$0xff]  }
 0x183   : > { %7248 = vmatprep.subr.bf16.mxu0 %v7999_v60  ;;  %v352_v60 = vld [vmem:[%s8270_s15 + $0x30] sm:$0xff] }
 0x184   : > { %7269 = vmatpush3.bf16.msra.mxu1 %v7998_v59  ;;  %v8046_v59 = vld [vmem:[%s8275_s19 + $0xcf0] sm:$0xff]  }
 0x185   : > { %7270 = vmatprep.subr.bf16.mxu1 %v8001_v61 }
 0x186   : > { %7249 = vmatpush3.bf16.msra.mxu0 %v8000_v51 }
 0x187   : > { %7250 = vmatprep.subr.bf16.mxu0 %v8003_v63  ;;  %v1639_v63 = vrot.slane %v352_v60, %v8313_v42 }
 0x188   : > { %7271 = vmatpush3.bf16.msra.mxu1 %v8002_v62 }
 0x189   : > { %7272 = vmatprep.subr.bf16.mxu1 %v8005_v1 }
 0x18a   : > { %7251 = vmatpush3.bf16.msra.mxu0 %v8004_v0  ;;  %v1632_v0 = vcombine.high %v352_v60, %v352_v60 }
 0x18b   : > { %7252 = vmatprep.subr.bf16.mxu0 %v8007_v3  ;;  %v8047_v3 = vld [vmem:[%s8275_s19 + $0xcb0] sm:$0xff]  }
 0x18c   : > { %v6950_v8 = vpop.f32.mrb[16].mxu0  ;;  %7273 = vmatpush3.bf16.msra.mxu1 %v8006_v2 }
 0x18d   : > { %v6951_v10 = vpop.f32.mrb[17].mxu0  ;;  %7274 = vmatprep.subr.bf16.mxu1 %v8009_v5 }
 0x18e   : > { %v6952_v12 = vadd.f32 %v6951_v10, %v6950_v8  ;;  %v6953_v13 = vpop.f32.mrb[18].mxu0  ;;  %v6972_v14 = vpop.f32.mrb[16].mxu1  ;;  %7253 = vmatpush3.bf16.msra.mxu0 %v8008_v4  ;;  %v8048_v4 = vld [vmem:[%s8275_s19 + $0xc78] sm:$0xff]   ;;  %v1647_v8 = vcombine.high %v1639_v63, %v1639_v63 }
 0x18f   : > { %v6954_v17 = vpop.f32.mrb[19].mxu0  ;;  %v6973_v18 = vpop.f32.mrb[17].mxu1  ;;  %7254 = vmatprep.subr.bf16.mxu0 %v8011_v7  ;;  %v8049_v7 = vld [vmem:[%s8275_s19 + $0xc38] sm:$0xff]  }
 0x190   : > { %v5064_v19 = vadd.f32 %v6952_v12, %v8708_v38  ;;  %v6974_v20 = vadd.f32 %v6973_v18, %v6972_v14  ;;  %7275 = vmatpush3.bf16.msra.mxu1 %v8010_v6  ;;  %v6975_v22 = vpop.f32.mrb[18].mxu1  ;;  %v8029_v38 = vld [vmem:[%s8275_s19 + $0xc10] sm:$0xff]   ;;  %v1669_v13 = vrot.slane %v1647_v8, %v8313_v42  ;;  %v8051_v14 = vld [vmem:[%s8275_s19 + $0xcb8] sm:$0xff]   ;;  %v8052_v17 = vld [vmem:[%s8275_s19 + $0xd40] sm:$0xff]  }
 0x191   : > { %7276 = vmatprep.subr.bf16.mxu1 %v8013_v11  ;;  %v6976_v24 = vpop.f32.mrb[19].mxu1  ;;  %v8785_v11 = vrot.slane %v1632_v0, %v8313_v42 }
 0x192   : > { %v8745_v25 = vadd.f32 %v6974_v20, %v5064_v19  ;;  %7255 = vmatpush3.bf16.msra.mxu0 %v8012_v9  ;;  %v8050_v9 = vld [vmem:[%s8275_s19 + $0xcf8] sm:$0xff]   ;;  %v1679_v19 = vcombine.high %v1669_v13, %v1669_v13  ;;  %v8053_v20 = vld [vmem:[%s8275_s19 + $0xd00] sm:$0xff]  }
 0x193   : > { %7256 = vmatprep.subr.bf16.mxu0 %v8015_v16  ;;  %v1655_v16 = vrot.slane %v1639_v63, %v8313_v42  ;;  %v1648_v18 = vcombine.high %v8785_v11, %v8785_v11  ;;  %v8082_v63 = vld [vmem:[%s8275_s19 + $0xdf8] sm:$0xff]  }
 0x194   : > { %7277 = vmatpush3.bf16.msra.mxu1 %v8014_v15 }
 0x195   : > { %7278 = vmatprep.subr.bf16.mxu1 %v8017_v23  ;;  %v1676_v22 = vrot.slane %v1648_v18, %v8313_v42  ;;  %v8055_v23 = vld [vmem:[%s8275_s19 + $0xd80] sm:$0xff]   ;;  %v1677_v24 = vcombine.high %v1655_v16, %v1655_v16  ;;  %v8098_v18 = vld [vmem:[%s8275_s19 + $0xe18] sm:$0xff]  }
 0x196   : > { %7257 = vmatpush3.bf16.msra.mxu0 %v8016_v21  ;;  %v8054_v21 = vld [vmem:[%s8275_s19 + $0xdc0] sm:$0xff]  }
 0x197   : > { %7286 = vmatprep.subr.bf16.mxu0 %v8020_v28  ;;  %v8058_v28 = vld [vmem:[%s8275_s19 + $0xdc8] sm:$0xff]  }
 0x198   : > { %7279 = vmatpush3.bf16.msra.mxu1 %v8019_v26  ;;  %v8057_v26 = vld [vmem:[%s8275_s19 + $0xd08] sm:$0xff]  }
 0x199   : > { %5622 = vmatmul.mubr.bf16.vlgmr.msra.gmra.mrb[44].mxu0 %v1613_v27  ;;  %7308 = vmatprep.subr.bf16.mxu1 %v8022_v31  ;;  %v1680_v27 = vcombine.high %v1676_v22, %v1676_v22  ;;  %v8060_v31 = vld [vmem:[%s8275_s19 + $0xd50] sm:$0xff]  }
 0x19a   : > { %7287 = vmatpush3.bf16.msra.mxu0 %v8021_v29  ;;  %5701 = vmatprep.mubr.bf16.mxu0 %v1669_v13  ;;  %v8059_v29 = vld [vmem:[%s8275_s19 + $0xd88] sm:$0xff]   ;;  %v8093_v13 = vld [vmem:[%s8275_s19 + $0xe50] sm:$0xff]  }
 0x19b   : > { %5662 = vmatmul.mubr.bf16.vlgmr.msra.gmra.mrb[44].mxu1 %v1629_v33  ;;  %7288 = vmatprep.subr.bf16.mxu0 %v8024_v34  ;;  %v8062_v33 = vld [vmem:[%s8275_s19 + $0xdd0] sm:$0xff]  }
 0x19c   : > { %7309 = vmatpush3.bf16.msra.mxu1 %v8023_v32  ;;  %5741 = vmatprep.mubr.bf16.mxu1 %v1679_v19  ;;  %v8061_v32 = vld [vmem:[%s8275_s19 + $0xd10] sm:$0xff]   ;;  %v8099_v19 = vld [vmem:[%s8275_s19 + $0xed8] sm:$0xff]  }
 0x19d   : > { %7310 = vmatprep.subr.bf16.mxu1 %v8026_v30  ;;  %v8063_v34 = vld [vmem:[%s8275_s19 + $0xd90] sm:$0xff]   ;;  %v8065_v30 = vld [vmem:[%s8275_s19 + $0xd18] sm:$0xff]  }
 0x19e   : > { %7289 = vmatpush3.bf16.msra.mxu0 %v8025_v35  ;;  %v8064_v35 = vld [vmem:[%s8275_s19 + $0xd58] sm:$0xff]  }
 0x19f   : > { %7290 = vmatprep.subr.bf16.mxu0 %v8028_v37  ;;  %v8067_v37 = vld [vmem:[%s8275_s19 + $0xd98] sm:$0xff]  }
 0x1a0   : > { %7311 = vmatpush3.bf16.msra.mxu1 %v8027_v36  ;;  %v8066_v36 = vld [vmem:[%s8275_s19 + $0xdd8] sm:$0xff]  }
 0x1a1   : > { %7312 = vmatprep.subr.bf16.mxu1 %v8030_v39  ;;  %v8069_v39 = vld [vmem:[%s8275_s19 + $0xd20] sm:$0xff]  }
 0x1a2   : > { %7291 = vmatpush3.bf16.msra.mxu0 %v8029_v38  ;;  %v8068_v38 = vld [vmem:[%s8275_s19 + $0xd60] sm:$0xff]  }
 0x1a3   : > { %7292 = vmatprep.subr.bf16.mxu0 %v8032_v41  ;;  %v8071_v41 = vld [vmem:[%s8275_s19 + $0xda0] sm:$0xff]  }
 0x1a4   : > { %7313 = vmatpush3.bf16.msra.mxu1 %v8031_v40  ;;  %v8070_v40 = vld [vmem:[%s8275_s19 + $0xde0] sm:$0xff]  }
 0x1a5   : > { %7314 = vmatprep.subr.bf16.mxu1 %v8034_v44  ;;  %v8073_v44 = vld [vmem:[%s8275_s19 + $0xd28] sm:$0xff]  }
 0x1a6   : > { %7293 = vmatpush3.bf16.msra.mxu0 %v8033_v43  ;;  %v8072_v43 = vld [vmem:[%s8275_s19 + $0xd68] sm:$0xff]  }
 0x1a7   : > { %7294 = vmatprep.subr.bf16.mxu0 %v8036_v46  ;;  %v8075_v46 = vld [vmem:[%s8275_s19 + $0xda8] sm:$0xff]  }
 0x1a8   : > { %7315 = vmatpush3.bf16.msra.mxu1 %v8035_v45  ;;  %v8074_v45 = vld [vmem:[%s8275_s19 + $0xde8] sm:$0xff]  }
 0x1a9   : > { %7316 = vmatprep.subr.bf16.mxu1 %v8038_v48 }
 0x1aa   : > { %7295 = vmatpush3.bf16.msra.mxu0 %v8037_v47  ;;  %v8076_v47 = vld [vmem:[%s8275_s19 + $0xd70] sm:$0xff]  }
 0x1ab   : > { %7296 = vmatprep.subr.bf16.mxu0 %v8040_v50 }
 0x1ac   : > { %v6994_v56 = vpop.f32.mrb[20].mxu0  ;;  %7317 = vmatpush3.bf16.msra.mxu1 %v8039_v49  ;;  %v8077_v49 = vld [vmem:[%s8275_s19 + $0xd30] sm:$0xff]  }
 0x1ad   : > { %v6995_v58 = vpop.f32.mrb[21].mxu0  ;;  %7318 = vmatprep.subr.bf16.mxu1 %v8042_v53 }
 0x1ae   : > { %v6996_v51 = vadd.f32 %v6995_v58, %v6994_v56  ;;  %v6997_v61 = vpop.f32.mrb[22].mxu0  ;;  %v7016_v62 = vpop.f32.mrb[20].mxu1  ;;  %7297 = vmatpush3.bf16.msra.mxu0 %v8041_v52  ;;  %v8078_v52 = vld [vmem:[%s8275_s19 + $0xdf0] sm:$0xff]  }
 0x1af   : > { %v6998_v1 = vpop.f32.mrb[23].mxu0  ;;  %v7017_v2 = vpop.f32.mrb[21].mxu1  ;;  %7298 = vmatprep.subr.bf16.mxu0 %v8044_v55  ;;  %v8079_v56 = vld [vmem:[%s8275_s19 + $0xdb0] sm:$0xff]   ;;  %v8081_v61 = vld [vmem:[%s8275_s19 + $0xd38] sm:$0xff]  }
 0x1b0   : > { %v5144_v5 = vadd.f32 %v6996_v51, %v8745_v25  ;;  %v7018_v6 = vadd.f32 %v7017_v2, %v7016_v62  ;;  %7319 = vmatpush3.bf16.msra.mxu1 %v8043_v54  ;;  %v7019_v10 = vpop.f32.mrb[22].mxu1  ;;  %v8056_v25 = vld [vmem:[%s8275_s19 + $0xd48] sm:$0xff]   ;;  %v8084_v2 = vld [vmem:[%s8275_s19 + $0xdb8] sm:$0xff]  }
 0x1b1   : > { %7320 = vmatprep.subr.bf16.mxu1 %v8046_v59  ;;  %v7020_v15 = vpop.f32.mrb[23].mxu1  ;;  %v8090_v10 = vld [vmem:[%s8275_s19 + $0xe08] sm:$0xff]  }
 0x1b2   : > { %v8787_v12 = vadd.f32 %v7018_v6, %v5144_v5  ;;  %7299 = vmatpush3.bf16.msra.mxu0 %v8045_v57  ;;  %v8080_v57 = vld [vmem:[%s8275_s19 + $0xd78] sm:$0xff]   ;;  %v8086_v5 = vld [vmem:[%s8275_s19 + $0xe00] sm:$0xff]   ;;  %v8095_v15 = vld [vmem:[%s8275_s19 + $0xed0] sm:$0xff]  }
 0x1b3   : > { %7300 = vmatprep.subr.bf16.mxu0 %v8048_v4  ;;  %v8085_v4 = vld [vmem:[%s8275_s19 + $0xe40] sm:$0xff]  }
 0x1b4   : > { %7321 = vmatpush3.bf16.msra.mxu1 %v8047_v3  ;;  %v1662_v3 = vrot.slane %v8785_v11, %v8313_v42  ;;  %v8087_v6 = vld [vmem:[%s8275_s19 + $0xec0] sm:$0xff]   ;;  %v8091_v11 = vld [vmem:[%s8275_s19 + $0xec8] sm:$0xff]  }
 0x1b5   : > { %7322 = vmatprep.subr.bf16.mxu1 %v8050_v9  ;;  %v8089_v9 = vld [vmem:[%s8275_s19 + $0xe48] sm:$0xff]  }
 0x1b6   : > { %7301 = vmatpush3.bf16.msra.mxu0 %v8049_v7  ;;  %v8088_v7 = vld [vmem:[%s8275_s19 + $0xe80] sm:$0xff]   ;;  %v1678_v8 = vcombine.high %v1662_v3, %v1662_v3 }
 0x1b7   : > { %7330 = vmatprep.subr.bf16.mxu0 %v8052_v17  ;;  %v8097_v17 = vld [vmem:[%s8275_s19 + $0xe58] sm:$0xff]  }
 0x1b8   : > { %7323 = vmatpush3.bf16.msra.mxu1 %v8051_v14  ;;  %v8094_v14 = vld [vmem:[%s8275_s19 + $0xe10] sm:$0xff]  }
 0x1b9   : > { %5702 = vmatmul.mubr.bf16.vlgmr.msra.gmra.mrb[48].mxu0 %v1655_v16  ;;  %7352 = vmatprep.subr.bf16.mxu1 %v8054_v21  ;;  %v8096_v16 = vld [vmem:[%s8275_s19 + $0xe90] sm:$0xff]   ;;  %v8101_v21 = vld [vmem:[%s8275_s19 + $0xe60] sm:$0xff]  }
 0x1ba   : > { %7331 = vmatpush3.bf16.msra.mxu0 %v8053_v20  ;;  %5781 = vmatprep.mubr.bf16.mxu0 %v1676_v22  ;;  %v8100_v20 = vld [vmem:[%s8275_s19 + $0xe98] sm:$0xff]   ;;  %v8102_v22 = vld [vmem:[%s8275_s19 + $0xe20] sm:$0xff]  }
 0x1bb   : > { %5742 = vmatmul.mubr.bf16.vlgmr.msra.gmra.mrb[48].mxu1 %v1677_v24  ;;  %7332 = vmatprep.subr.bf16.mxu0 %v8056_v25  ;;  %v8104_v24 = vld [vmem:[%s8275_s19 + $0xea0] sm:$0xff]   ;;  %v8105_v25 = vld [vmem:[%s8275_s19 + $0xe68] sm:$0xff]  }
 0x1bc   : > { %7353 = vmatpush3.bf16.msra.mxu1 %v8055_v23  ;;  %5821 = vmatprep.mubr.bf16.mxu1 %v1680_v27  ;;  %v8103_v23 = vld [vmem:[%s8275_s19 + $0xee0] sm:$0xff]   ;;  %v8107_v27 = vld [vmem:[%s8275_s19 + $0xee8] sm:$0xff]  }
 0x1bd   : > { %7354 = vmatprep.subr.bf16.mxu1 %v8058_v28  ;;  %v8108_v28 = vld [vmem:[%s8275_s19 + $0xea8] sm:$0xff]  }
 0x1be   : > { %7333 = vmatpush3.bf16.msra.mxu0 %v8057_v26  ;;  %v8106_v26 = vld [vmem:[%s8275_s19 + $0xe28] sm:$0xff]  }
 0x1bf   : > { %7334 = vmatprep.subr.bf16.mxu0 %v8060_v31 }
 0x1c0   : > { %7355 = vmatpush3.bf16.msra.mxu1 %v8059_v29  ;;  %v8109_v29 = vld [vmem:[%s8275_s19 + $0xe70] sm:$0xff]  }
 0x1c1   : > { %7356 = vmatprep.subr.bf16.mxu1 %v8062_v33 }
 0x1c2   : > { %7335 = vmatpush3.bf16.msra.mxu0 %v8061_v32  ;;  %v8110_v32 = vld [vmem:[%s8275_s19 + $0xe30] sm:$0xff]  }
 0x1c3   : > { %7336 = vmatprep.subr.bf16.mxu0 %v8064_v35 }
 0x1c4   : > { %7357 = vmatpush3.bf16.msra.mxu1 %v8063_v34  ;;  %v8111_v34 = vld [vmem:[%s8275_s19 + $0xef0] sm:$0xff]  }
 0x1c5   : > { %7358 = vmatprep.subr.bf16.mxu1 %v8066_v36 }
 0x1c6   : > { %7337 = vmatpush3.bf16.msra.mxu0 %v8065_v30 }
 0x1c7   : > { %7338 = vmatprep.subr.bf16.mxu0 %v8068_v38  ;;  %v8113_v38 = vld [vmem:[%s8275_s19 + $0xe78] sm:$0xff]  }
 0x1c8   : > { %7359 = vmatpush3.bf16.msra.mxu1 %v8067_v37  ;;  %v8112_v37 = vld [vmem:[%s8275_s19 + $0xeb0] sm:$0xff]  }
 0x1c9   : > { %7360 = vmatprep.subr.bf16.mxu1 %v8070_v40 }
 0x1ca   : > { %7339 = vmatpush3.bf16.msra.mxu0 %v8069_v39 }
 0x1cb   : > { %7340 = vmatprep.subr.bf16.mxu0 %v8072_v43 }
 0x1cc   : > { %v7038_v48 = vpop.f32.mrb[24].mxu0  ;;  %7361 = vmatpush3.bf16.msra.mxu1 %v8071_v41  ;;  %v353_v41 = vld [vmem:[%s8270_s15 + $0x38] sm:$0x1f] }
 0x1cd   : > { %v7039_v50 = vpop.f32.mrb[25].mxu0  ;;  %7362 = vmatprep.subr.bf16.mxu1 %v8074_v45  ;;  %v1688_v45 = vrot.slane %v353_v41, %v8313_v42 }
 0x1ce   : > { %v7040_v53 = vadd.f32 %v7039_v50, %v7038_v48  ;;  %v7041_v54 = vpop.f32.mrb[26].mxu0  ;;  %v7060_v55 = vpop.f32.mrb[24].mxu1  ;;  %7341 = vmatpush3.bf16.msra.mxu0 %v8073_v44 }
 0x1cf   : > { %v7042_v58 = vpop.f32.mrb[27].mxu0  ;;  %v7061_v59 = vpop.f32.mrb[25].mxu1  ;;  %7342 = vmatprep.subr.bf16.mxu0 %v8076_v47  ;;  %v1696_v50 = vcombine.high %v1688_v45, %v1688_v45 }
 0x1d0   : > { %v5224_v60 = vadd.f32 %v7040_v53, %v8787_v12  ;;  %v7062_v51 = vadd.f32 %v7061_v59, %v7060_v55  ;;  %7363 = vmatpush3.bf16.msra.mxu1 %v8075_v46  ;;  %v7063_v62 = vpop.f32.mrb[26].mxu1  ;;  %v8092_v12 = vld [vmem:[%s8275_s19 + $0xe88] sm:$0xff]   ;;  %v8115_v46 = vld [vmem:[%s8275_s19 + $0xef8] sm:$0xff]   ;;  %v1703_v53 = vrot.slane %v1688_v45, %v8313_v42  ;;  %v8198_v58 = vmov 0.0  }
 0x1d1   : > { %7364 = vmatprep.subr.bf16.mxu1 %v8078_v52  ;;  %v7064_v0 = vpop.f32.mrb[27].mxu1  ;;  %v1717_v54 = vrot.slane %v1696_v50, %v8313_v42  ;;  %v8117_v55 = vld [vmem:[%s8275_s19 + $0xeb8] sm:$0xff]   ;;  %v8122_v62 = vld [vmem:[%s8275_s19 + $0xf20] sm:$0xff]  }
 0x1d2   : > { %v8827_v1 = vadd.f32 %v7062_v51, %v5224_v60  ;;  %7343 = vmatpush3.bf16.msra.mxu0 %v8077_v49  ;;  %v8114_v49 = vld [vmem:[%s8275_s19 + $0xe38] sm:$0xff]   ;;  %v1718_v59 = vcombine.high %v1703_v53, %v1703_v53  ;;  %v8119_v60 = vld [vmem:[%s8275_s19 + $0xf08] sm:$0xff]   ;;  %v8120_v51 = vld [vmem:[%s8275_s19 + $0xf10] sm:$0xff]  }
 0x1d3   : > { %7344 = vmatprep.subr.bf16.mxu0 %v8080_v57  ;;  %v8118_v57 = vld [vmem:[%s8275_s19 + $0xf00] sm:$0xff]  }
 0x1d4   : > { %7365 = vmatpush3.bf16.msra.mxu1 %v8079_v56  ;;  %v1719_v56 = vcombine.high %v1717_v54, %v1717_v54 }
 0x1d5   : > { %7366 = vmatprep.subr.bf16.mxu1 %v8082_v63  ;;  %v8123_v63 = vld [vmem:[%s8275_s19 + $0xf28] sm:$0xff]  }
 0x1d6   : > { %7345 = vmatpush3.bf16.msra.mxu0 %v8081_v61  ;;  %v8121_v61 = vld [vmem:[%s8275_s19 + $0xf18] sm:$0xff]  }
 0x1d7   : > { %7374 = vmatprep.subr.bf16.mxu0 %v8085_v4 }
 0x1d8   : > { %7367 = vmatpush3.bf16.msra.mxu1 %v8084_v2 }
 0x1d9   : > { %5782 = vmatmul.mubr.bf16.vlgmr.msra.gmra.mrb[52].mxu0 %v1662_v3  ;;  %7396 = vmatprep.subr.bf16.mxu1 %v8087_v6  ;;  %v8124_v6 = vld [vmem:[%s8275_s19 + $0xf30] sm:$0xff]  }
 0x1da   : > { %7375 = vmatpush3.bf16.msra.mxu0 %v8086_v5  ;;  %5861 = vmatprep.mubr.bf16.mxu0 %v1717_v54 }
 0x1db   : > { %5822 = vmatmul.mubr.bf16.vlgmr.msra.gmra.mrb[52].mxu1 %v1678_v8  ;;  %7376 = vmatprep.subr.bf16.mxu0 %v8089_v9 }
 0x1dc   : > { %7397 = vmatpush3.bf16.msra.mxu1 %v8088_v7  ;;  %5901 = vmatprep.mubr.bf16.mxu1 %v1719_v56 }
 0x1dd   : > { %7398 = vmatprep.subr.bf16.mxu1 %v8091_v11 }
 0x1de   : > { %7377 = vmatpush3.bf16.msra.mxu0 %v8090_v10 }
 0x1df   : > { %7378 = vmatprep.subr.bf16.mxu0 %v8093_v13 }
 0x1e0   : > { %7399 = vmatpush3.bf16.msra.mxu1 %v8092_v12 }
 0x1e1   : > { %7400 = vmatprep.subr.bf16.mxu1 %v8095_v15  ;;  %v8125_v15 = vld [vmem:[%s8275_s19 + $0xf38] sm:$0xff]  }
 0x1e2   : > { %7379 = vmatpush3.bf16.msra.mxu0 %v8094_v14 }
 0x1e3   : > { %7380 = vmatprep.subr.bf16.mxu0 %v8097_v17 }
 0x1e4   : > { %7401 = vmatpush3.bf16.msra.mxu1 %v8096_v16 }
 0x1e5   : > { %7402 = vmatprep.subr.bf16.mxu1 %v8099_v19 }
 0x1e6   : > { %7381 = vmatpush3.bf16.msra.mxu0 %v8098_v18 }
 0x1e7   : > { %7382 = vmatprep.subr.bf16.mxu0 %v8101_v21 }
 0x1e8   : > { %7403 = vmatpush3.bf16.msra.mxu1 %v8100_v20 }
 0x1e9   : > { %7404 = vmatprep.subr.bf16.mxu1 %v8103_v23 }
 0x1ea   : > { %7383 = vmatpush3.bf16.msra.mxu0 %v8102_v22 }
 0x1eb   : > { %7384 = vmatprep.subr.bf16.mxu0 %v8105_v25 }
 0x1ec   : > { %v7082_v31 = vpop.f32.mrb[28].mxu0  ;;  %7405 = vmatpush3.bf16.msra.mxu1 %v8104_v24 }
 0x1ed   : > { %v7083_v33 = vpop.f32.mrb[29].mxu0  ;;  %7406 = vmatprep.subr.bf16.mxu1 %v8107_v27 }
 0x1ee   : > { %v7084_v35 = vadd.f32 %v7083_v33, %v7082_v31  ;;  %v7085_v30 = vpop.f32.mrb[30].mxu0  ;;  %v7104_v36 = vpop.f32.mrb[28].mxu1  ;;  %7385 = vmatpush3.bf16.msra.mxu0 %v8106_v26 }
 0x1ef   : > { %v7086_v39 = vpop.f32.mrb[31].mxu0  ;;  %v7105_v40 = vpop.f32.mrb[29].mxu1  ;;  %7386 = vmatprep.subr.bf16.mxu0 %v8109_v29 }
 0x1f0   : > { %v5304_v43 = vadd.f32 %v7084_v35, %v8827_v1  ;;  %v7106_v44 = vadd.f32 %v7105_v40, %v7104_v36  ;;  %7407 = vmatpush3.bf16.msra.mxu1 %v8108_v28  ;;  %v7107_v47 = vpop.f32.mrb[30].mxu1  ;;  %v1681_v1 = vcombine.high %v353_v41, %v353_v41 }
 0x1f1   : > { %7408 = vmatprep.subr.bf16.mxu1 %v8111_v34  ;;  %v7108_v52 = vpop.f32.mrb[31].mxu1 }
 0x1f2   : > { %v5344_v48 = vadd.f32 %v7106_v44, %v5304_v43  ;;  %7387 = vmatpush3.bf16.msra.mxu0 %v8110_v32  ;;  %v1695_v12 = vrot.slane %v1681_v1, %v8313_v42 }
 0x1f3   : > { %7388 = vmatprep.subr.bf16.mxu0 %v8113_v38 }
 0x1f4   : > { %7409 = vmatpush3.bf16.msra.mxu1 %v8112_v37  ;;  %v1710_v16 = vrot.slane %v1695_v12, %v8313_v42 }
 0x1f5   : > { %7410 = vmatprep.subr.bf16.mxu1 %v8115_v46 }
 0x1f6   : > { %7389 = vmatpush3.bf16.msra.mxu0 %v8114_v49 }
 0x1f7   : > { %7461 = vmatprep.subr.bf16.mxu0 %v8198_v58 }
 0x1f8   : > { %7411 = vmatpush3.bf16.msra.mxu1 %v8117_v55 }
 0x1f9   : > { %5862 = vmatmul.mubr.bf16.vlgmr.msra.gmra.mrb[56].mxu0 %v1703_v53 }
 0x1fa   : > { %7462 = vmatpush3.bf16.msra.mxu0 %v8118_v57  ;;  %7477 = vmatprep.mubr.msk.bf16.mxu0 %vm8199_vm0, %v8198_v58 }
 0x1fb   : > { %5902 = vmatmul.mubr.bf16.vlgmr.msra.gmra.mrb[56].mxu1 %v1718_v59  ;;  %7463 = vmatprep.subr.bf16.mxu0 %v8198_v58 }
 0x1fe   : > { %7464 = vmatpush3.bf16.msra.mxu0 %v8119_v60 }
 0x1ff   : > { %7465 = vmatprep.subr.bf16.mxu0 %v8198_v58 }
 0x202   : > { %7466 = vmatpush3.bf16.msra.mxu0 %v8120_v51 }
 0x203   : > { %7467 = vmatprep.subr.bf16.mxu0 %v8198_v58 }
 0x206   : > { %7468 = vmatpush3.bf16.msra.mxu0 %v8121_v61 }
 0x207   : > { %7469 = vmatprep.subr.bf16.mxu0 %v8198_v58 }
 0x20a   : > { %7470 = vmatpush3.bf16.msra.mxu0 %v8122_v62 }
 0x20b   : > { %7471 = vmatprep.subr.bf16.mxu0 %v8198_v58 }
 0x20c   : > { %v7126_v0 = vpop.f32.mrb[32].mxu0 }
 0x20d   : > { %v7127_v2 = vpop.f32.mrb[33].mxu0 }
 0x20e   : > { %v7128_v3 = vadd.f32 %v7127_v2, %v7126_v0  ;;  %v7129_v4 = vpop.f32.mrb[34].mxu0  ;;  %v7148_v5 = vpop.f32.mrb[32].mxu1  ;;  %7472 = vmatpush3.bf16.msra.mxu0 %v8123_v63 }
 0x20f   : > { %v7130_v7 = vpop.f32.mrb[35].mxu0  ;;  %v7149_v8 = vpop.f32.mrb[33].mxu1  ;;  %7473 = vmatprep.subr.bf16.mxu0 %v8198_v58 }
 0x210   : > { %v5384_v9 = vadd.f32 %v7128_v3, %v5344_v48  ;;  %v7150_v10 = vadd.f32 %v7149_v8, %v7148_v5  ;;  %v7151_v11 = vpop.f32.mrb[34].mxu1 }
 0x211   : > { %v7152_v13 = vpop.f32.mrb[35].mxu1 }
 0x212   : > { %v5424_v14 = vadd.f32 %v7150_v10, %v5384_v9  ;;  %7474 = vmatpush3.bf16.msra.mxu0 %v8124_v6 }
 0x213   : > { %7475 = vmatprep.subr.bf16.mxu0 %v8198_v58 }
 0x216   : > { %7476 = vmatpush3.bf16.msra.mxu0 %v8125_v15 }
 0x219   : > { %7478 = vmatmul.mubr.bf16.vlgmr.msra.gmra.mrb[60].mxu0 %v1710_v16 }
 0x22c   : > { %v7170_v17 = vpop.f32.mrb[36].mxu0 }
 0x22d   : > { %v7171_v18 = vpop.f32.mrb[37].mxu0 }
 0x22e   : > { %v7172_v19 = vadd.f32 %v7171_v18, %v7170_v17  ;;  %v7173_v20 = vpop.f32.mrb[38].mxu0  ;;  %v7192_v21 = vpop.f32.mrb[36].mxu1 }
 0x22f   : > { %v7174_v22 = vpop.f32.mrb[39].mxu0  ;;  %v7193_v23 = vpop.f32.mrb[37].mxu1 }
 0x230   : > { %v5464_v24 = vadd.f32 %v7172_v19, %v5424_v14  ;;  %v7194_v25 = vadd.f32 %v7193_v23, %v7192_v21  ;;  %v7195_v26 = vpop.f32.mrb[38].mxu1 }
 0x231   : > { %v7196_v27 = vpop.f32.mrb[39].mxu1 }
 0x232   : > { %v5504_v28 = vadd.f32 %v7194_v25, %v5464_v24  ;;  %v345_v25 = vld [vmem:[#allocation2] sm:$0x3] }
 0x24c   : > { %v7214_v29 = vpop.f32.mrb[40].mxu0 }
 0x24d   : > { %v7215_v31 = vpop.f32.mrb[41].mxu0 }
 0x24e   : > { %v7216_v32 = vadd.f32 %v7215_v31, %v7214_v29  ;;  %v7217_v33 = vpop.f32.mrb[42].mxu0  ;;  %v7236_v34 = vpop.f32.mrb[40].mxu1 }
 0x24f   : > { %v7218_v42 = vpop.f32.mrb[43].mxu0  ;;  %v7237_v35 = vpop.f32.mrb[41].mxu1  ;;  %v6058_v33 = vld [vmem:[%s9057_s5] sm:$0xff] (!%p6747_p6) }
 0x250   : > { %v5544_v30 = vadd.f32 %v7216_v32, %v5504_v28  ;;  %v7238_v36 = vadd.f32 %v7237_v35, %v7236_v34  ;;  %v7239_v37 = vpop.f32.mrb[42].mxu1  ;;  %v6059_v34 = vld [vmem:[%s9057_s5 + $0x8] sm:$0xff] (!%p6747_p6)  ;;  %v6060_v42 = vld [vmem:[%s9057_s5 + $0x10] sm:$0xff] (!%p6747_p6)  ;;  %v8200_v35 = vmov (!%p6747_p6), 0.0|0.0  }
 0x251   : > { %v7240_v38 = vpop.f32.mrb[43].mxu1  ;;  %7575 = vmatprep.subr.bf16.mxu1 (!%p6747_p6), %v8200_v35  ;;  %7551 = vmatprep.subr.bf16.mxu0 (!%p6747_p6), %v8200_v35  ;;  %v5965_v37 = vld [vmem:[%s9055_s3] sm:$0xff] (!%p6747_p6) }
 0x252   : > { %v5584_v39 = vadd.f32 %v7238_v36, %v5544_v30  ;;  %v7576_v30 = vpack.c.bf16 (!%p6747_p6), %v6059_v34, %v6058_v33  ;;  %v6061_v36 = vld [vmem:[%s9057_s5 + $0x18] sm:$0xff] (!%p6747_p6)  ;;  %v5966_v38 = vld [vmem:[%s9055_s3 + $0x8] sm:$0xff] (!%p6747_p6) }
 0x254   : > { %7577 = vmatpush3.bf16.msra.mxu1 (!%p6747_p6), %v7576_v30 }
 0x255   : > { %7578 = vmatprep.subr.bf16.mxu1 (!%p6747_p6), %v8200_v35 }
 0x26c   : > { %v7258_v40 = vpop.f32.mrb[44].mxu0 }
 0x26d   : > { %v7259_v41 = vpop.f32.mrb[45].mxu0 }
 0x26e   : > { %v7260_v43 = vadd.f32 %v7259_v41, %v7258_v40  ;;  %v7261_v44 = vpop.f32.mrb[46].mxu0  ;;  %v7280_v45 = vpop.f32.mrb[44].mxu1  ;;  %v7579_v40 = vpack.c.bf16 (!%p6747_p6), %v6061_v36, %v6060_v42  ;;  %v7552_v41 = vpack.c.bf16 (!%p6747_p6), %v5966_v38, %v5965_v37 }
 0x26f   : > { %v7262_v46 = vpop.f32.mrb[47].mxu0  ;;  %v7281_v47 = vpop.f32.mrb[45].mxu1  ;;  %v5968_v44 = vld [vmem:[%s9055_s3 + $0x18] sm:$0xff] (!%p6747_p6) }
 0x270   : > { %v5624_v48 = vadd.f32 %v7260_v43, %v5584_v39  ;;  %v7282_v49 = vadd.f32 %v7281_v47, %v7280_v45  ;;  %v7283_v50 = vpop.f32.mrb[46].mxu1  ;;  %v8202_v39 = vmov (!%p6747_p6), 0.0   ;;  %v5967_v43 = vld [vmem:[%s9055_s3 + $0x10] sm:$0xff] (!%p6747_p6)  ;;  %v6062_v45 = vld [vmem:[%s9057_s5 + $0x20] sm:$0xff] (!%p6747_p6)  ;;  %v6063_v46 = vld [vmem:[%s9057_s5 + $0x28] sm:$0xff] (!%p6747_p6)  ;;  %7553 = vmatpush3.bf16.msra.mxu0 (!%p6747_p6), %v7552_v41  ;;  %7580 = vmatpush3.bf16.msra.mxu1 (!%p6747_p6), %v7579_v40 }
 0x271   : > { %v7284_v52 = vpop.f32.mrb[47].mxu1  ;;  %7548 = vmatprep.mubr.msk.f32.mxu1 (!%p6747_p6), %vm8201_vm1, %v8202_v39  ;;  %7513 = vmatprep.mubr.msk.f32.mxu0 (!%p6747_p6), %vm8201_vm1, %v8202_v39  ;;  %v7555_v47 = vpack.c.bf16 (!%p6747_p6), %v5968_v44, %v5967_v43  ;;  %v7582_v50 = vpack.c.bf16 (!%p6747_p6), %v6063_v46, %v6062_v45 }
 0x272   : > { %v5664_v53 = vadd.f32 %v7282_v49, %v5624_v48  ;;  %7554 = vmatprep.subr.bf16.mxu0 (!%p6747_p6), %v8200_v35  ;;  %v5969_v48 = vld [vmem:[%s9055_s3 + $0x20] sm:$0xff] (!%p6747_p6)  ;;  %v5970_v49 = vld [vmem:[%s9055_s3 + $0x28] sm:$0xff] (!%p6747_p6)  ;;  %7581 = vmatprep.subr.bf16.mxu1 (!%p6747_p6), %v8200_v35  ;;  %v6064_v52 = vld [vmem:[%s9057_s5 + $0x30] sm:$0xff] (!%p6747_p6) }
 0x274   : > { %7556 = vmatpush3.bf16.msra.mxu0 (!%p6747_p6), %v7555_v47  ;;  %7583 = vmatpush3.bf16.msra.mxu1 (!%p6747_p6), %v7582_v50 }
 0x275   : > { %7557 = vmatprep.subr.bf16.mxu0 (!%p6747_p6), %v8200_v35  ;;  %7584 = vmatprep.subr.bf16.mxu1 (!%p6747_p6), %v8200_v35 }
 0x28c   : > { %v7302_v54 = vpop.f32.mrb[48].mxu0 }
 0x28d   : > { %v7303_v55 = vpop.f32.mrb[49].mxu0 }
 0x28e   : > { %v7304_v56 = vadd.f32 %v7303_v55, %v7302_v54  ;;  %v7305_v57 = vpop.f32.mrb[50].mxu0  ;;  %v7324_v58 = vpop.f32.mrb[48].mxu1  ;;  %v7558_v54 = vpack.c.bf16 (!%p6747_p6), %v5970_v49, %v5969_v48  ;;  %v5971_v55 = vld [vmem:[%s9055_s3 + $0x30] sm:$0xff] (!%p6747_p6) }
 0x28f   : > { %v7306_v59 = vpop.f32.mrb[51].mxu0  ;;  %v7325_v60 = vpop.f32.mrb[49].mxu1 }
 0x290   : > { %v5704_v51 = vadd.f32 %v7304_v56, %v5664_v53  ;;  %v7326_v61 = vadd.f32 %v7325_v60, %v7324_v58  ;;  %v7327_v62 = vpop.f32.mrb[50].mxu1  ;;  %v6065_v53 = vld [vmem:[%s9057_s5 + $0x38] sm:$0xff] (!%p6747_p6)  ;;  %v6066_v58 = vld [vmem:[%s9057_s5 + $0x40] sm:$0xff] (!%p6747_p6)  ;;  %v6067_v59 = vld [vmem:[%s9057_s5 + $0x48] sm:$0xff] (!%p6747_p6)  ;;  %7559 = vmatpush3.bf16.msra.mxu0 (!%p6747_p6), %v7558_v54 }
 0x291   : > { %v7328_v63 = vpop.f32.mrb[51].mxu1  ;;  %v5972_v56 = vld [vmem:[%s9055_s3 + $0x38] sm:$0xff] (!%p6747_p6)  ;;  %v7585_v57 = vpack.c.bf16 (!%p6747_p6), %v6065_v53, %v6064_v52  ;;  %7560 = vmatprep.subr.bf16.mxu0 (!%p6747_p6), %v8200_v35  ;;  %v7588_v62 = vpack.c.bf16 (!%p6747_p6), %v6067_v59, %v6066_v58 }
 0x292   : > { %v5744_v0 = vadd.f32 %v7326_v61, %v5704_v51  ;;  %v7561_v60 = vpack.c.bf16 (!%p6747_p6), %v5972_v56, %v5971_v55  ;;  %v5973_v51 = vld [vmem:[%s9055_s3 + $0x40] sm:$0xff] (!%p6747_p6)  ;;  %v5974_v61 = vld [vmem:[%s9055_s3 + $0x48] sm:$0xff] (!%p6747_p6)  ;;  %v6068_v63 = vld [vmem:[%s9057_s5 + $0x50] sm:$0xff] (!%p6747_p6) }
 0x293   : > { %7586 = vmatpush3.bf16.msra.mxu1 (!%p6747_p6), %v7585_v57 }
 0x294   : > { %7587 = vmatprep.subr.bf16.mxu1 (!%p6747_p6), %v8200_v35  ;;  %7562 = vmatpush3.bf16.msra.mxu0 (!%p6747_p6), %v7561_v60 }
 0x295   : > { %7563 = vmatprep.subr.bf16.mxu0 (!%p6747_p6), %v8200_v35 }
 0x297   : > { %7589 = vmatpush3.bf16.msra.mxu1 (!%p6747_p6), %v7588_v62 }
 0x298   : > { %7590 = vmatprep.subr.bf16.mxu1 (!%p6747_p6), %v8200_v35 }
 0x2ac   : > { %v7346_v1 = vpop.f32.mrb[52].mxu0 }
 0x2ad   : > { %v7347_v2 = vpop.f32.mrb[53].mxu0 }
 0x2ae   : > { %v7348_v3 = vadd.f32 %v7347_v2, %v7346_v1  ;;  %v7349_v4 = vpop.f32.mrb[54].mxu0  ;;  %v7368_v5 = vpop.f32.mrb[52].mxu1  ;;  %v7564_v1 = vpack.c.bf16 (!%p6747_p6), %v5974_v61, %v5973_v51  ;;  %v5975_v2 = vld [vmem:[%s9055_s3 + $0x50] sm:$0xff] (!%p6747_p6) }
 0x2af   : > { %v7350_v6 = vpop.f32.mrb[55].mxu0  ;;  %v7369_v7 = vpop.f32.mrb[53].mxu1 }
 0x2b0   : > { %v5784_v8 = vadd.f32 %v7348_v3, %v5744_v0  ;;  %v7370_v9 = vadd.f32 %v7369_v7, %v7368_v5  ;;  %v7371_v10 = vpop.f32.mrb[54].mxu1  ;;  %v6069_v0 = vld [vmem:[%s9057_s5 + $0x58] sm:$0xff] (!%p6747_p6)  ;;  %v6070_v5 = vld [vmem:[%s9057_s5 + $0x60] sm:$0xff] (!%p6747_p6)  ;;  %v6071_v6 = vld [vmem:[%s9057_s5 + $0x68] sm:$0xff] (!%p6747_p6)  ;;  %7565 = vmatpush3.bf16.msra.mxu0 (!%p6747_p6), %v7564_v1 }
 0x2b1   : > { %v7372_v11 = vpop.f32.mrb[55].mxu1  ;;  %v5976_v3 = vld [vmem:[%s9055_s3 + $0x58] sm:$0xff] (!%p6747_p6)  ;;  %v7591_v4 = vpack.c.bf16 (!%p6747_p6), %v6069_v0, %v6068_v63  ;;  %7566 = vmatprep.subr.bf16.mxu0 (!%p6747_p6), %v8200_v35  ;;  %v7594_v10 = vpack.c.bf16 (!%p6747_p6), %v6071_v6, %v6070_v5 }
 0x2b2   : > { %v5824_v12 = vadd.f32 %v7370_v9, %v5784_v8  ;;  %v7567_v7 = vpack.c.bf16 (!%p6747_p6), %v5976_v3, %v5975_v2  ;;  %v5977_v8 = vld [vmem:[%s9055_s3 + $0x60] sm:$0xff] (!%p6747_p6)  ;;  %v5978_v9 = vld [vmem:[%s9055_s3 + $0x68] sm:$0xff] (!%p6747_p6) }
 0x2b3   : > { %7592 = vmatpush3.bf16.msra.mxu1 (!%p6747_p6), %v7591_v4 }
 0x2b4   : > { %7593 = vmatprep.subr.bf16.mxu1 (!%p6747_p6), %v8200_v35  ;;  %7568 = vmatpush3.bf16.msra.mxu0 (!%p6747_p6), %v7567_v7 }
 0x2b5   : > { %7569 = vmatprep.subr.bf16.mxu0 (!%p6747_p6), %v8200_v35 }
 0x2b7   : > { %7595 = vmatpush3.bf16.msra.mxu1 (!%p6747_p6), %v7594_v10 }
 0x2b8   : > { %7596 = vmatprep.subr.bf16.mxu1 (!%p6747_p6), %v8200_v35 }
 0x2cc   : > { %v7390_v13 = vpop.f32.mrb[56].mxu0 }
 0x2cd   : > { %v7391_v14 = vpop.f32.mrb[57].mxu0 }
 0x2ce   : > { %v7392_v15 = vadd.f32 %v7391_v14, %v7390_v13  ;;  %v7393_v16 = vpop.f32.mrb[58].mxu0  ;;  %v7412_v17 = vpop.f32.mrb[56].mxu1  ;;  %v6072_v13 = vld [vmem:[%s9057_s5 + $0x70] sm:$0xff] (!%p6747_p6)  ;;  %v6073_v14 = vld [vmem:[%s9057_s5 + $0x78] sm:$0xff] (!%p6747_p6) }
 0x2cf   : > { %v7394_v18 = vpop.f32.mrb[59].mxu0  ;;  %v7413_v19 = vpop.f32.mrb[57].mxu1 }
 0x2d0   : > { %v5864_v20 = vadd.f32 %v7392_v15, %v5824_v12  ;;  %v7414_v21 = vadd.f32 %v7413_v19, %v7412_v17  ;;  %v7415_v22 = vpop.f32.mrb[58].mxu1  ;;  %v6748_v12 = vld [vmem:[%s9054_s2] ss:$0 sm:$0xff] (!%p6747_p6)  ;;  %v7570_v15 = vpack.c.bf16 (!%p6747_p6), %v5978_v9, %v5977_v8  ;;  %v5979_v17 = vld [vmem:[%s9055_s3 + $0x70] sm:$0xff] (!%p6747_p6)  ;;  %v5980_v18 = vld [vmem:[%s9055_s3 + $0x78] sm:$0xff] (!%p6747_p6)  ;;  %v7597_v19 = vpack.c.bf16 (!%p6747_p6), %v6073_v14, %v6072_v13 }
 0x2d1   : > { %v7416_v23 = vpop.f32.mrb[59].mxu1  ;;  %v6750_v22 = vld [vmem:[%s9058_s6] ss:$0 sm:$0xff] (!%p6747_p6) }
 0x2d2   : > { %v5904_v24 = vadd.f32 %v7414_v21, %v5864_v20  ;;  %7571 = vmatpush3.bf16.msra.mxu0 (!%p6747_p6), %v7570_v15  ;;  %v7573_v20 = vpack.c.bf16 (!%p6747_p6), %v5980_v18, %v5979_v17  ;;  %7598 = vmatpush3.bf16.msra.mxu1 (!%p6747_p6), %v7597_v19 }
 0x2d3   : > { %7572 = vmatprep.subr.bf16.mxu0 (!%p6747_p6), %v8200_v35 }
 0x2d6   : > { %7574 = vmatpush3.bf16.msra.mxu0 (!%p6747_p6), %v7573_v20 }
 0x2eb   : > { %5954 = sbr.rel (%p6747_p6) target bundleno = 1207 (0x4b7), region = 60 }
 0x2ec   : > { %v5943_v26 = vpop.f32.mrb[60].mxu0 }
 0x2ed   : > { %v5944_v27 = vadd.f32 %v5943_v26, %v5904_v24  ;;  %v7479_v28 = vpop.f32.mrb[61].mxu0 }
 0x2ee   : > { %v5946_v29 = vpop.f32.mrb[62].mxu0 }
 0x2ef   : > { %v5949_v31 = vadd.f32 %v5944_v27, %v345_v25  ;;  %v7480_v32 = vpop.f32.mrb[63].mxu0  ;;  %v6749_v29 = vld [vmem:[%s9056_s4] ss:$0 sm:$0xff] (!%p6747_p6) }
 0x2f0   : > { %v6153_v32 = vld [vmem:[%s9059_s7] sm:$0x3] (!%p6747_p6) }
 0x2f1   : > { %5950 = vst [vmem:[#allocation2] sm:$0x3] %v5949_v31 }
 0x2f8   : > { %v5955_v11 = vld [vmem:[#allocation2] sm:$0x3] }
 0x2f9   : > { %v5963_v16 = vadd.f32 %v6748_v12, %v5955_v11 }
 0x2fb   : > { %v5964_v21 = vmax.f32 %v5963_v16, 0.0 }
 0x2fd   : > { %7549 = vmatmul.mubr.f32.vlgmr.msra.gmra.mrb[0].mxu1 %v5964_v21  ;;  %7514 = vmatmul.mubr.f32.vlgmr.msra.gmra.mrb[0].mxu0 %v5964_v21 }
 0x3d0   : > { %v6147_v23 = vpop.f32.mrb[0].mxu1  ;;  %v6054_v26 = vpop.f32.mrb[0].mxu0 }
 0x3d1   : > { %v6148_v24 = vadd.f32 %v6750_v22, %v6147_v23  ;;  %v7550_v25 = vpop.f32.mrb[1].mxu1  ;;  %v7515_v28 = vpop.f32.mrb[1].mxu0  ;;  %v6055_v31 = vadd.f32 %v6749_v29, %v6054_v26 }
 0x3d3   : > { %v6151_v27 = vmul.f32 1.442695, %v6148_v24  ;;  %v6159_v33 = vmul.f32 %v6055_v31, %v6055_v31 }
 0x3d5   : > { %8126 = vpow2.f32 %v6151_v27 }
 0x3df   : > { %v8127_v34 = vpop.eup %8126 }
 0x3e0   : > { %v6154_v42 = vmul.f32 %v8127_v34, %v6153_v32  ;;  %v6158_v35 = vmul.f32 %v8127_v34, %v8127_v34 }
 0x3e2   : > { %v6155_v30 = vadd.f32 %v6154_v42, %v6055_v31  ;;  %v6160_v36 = vadd.f32 %v6159_v33, %v6158_v35 }
 0x3e4   : > { %6157 = vst.msk [vmem:[#allocation3] sm:$0x3] %vm6156_vm2, %v6155_v30  ;;  %v6161_v37 = vsub.f32 %v6160_v36, %v6148_v24 }
 0x3e6   : > { %v6751_v38 = vadd.f32 -0.5, %v6161_v37 }
 0x3e8   : > { %v6163_v39 = vsel %vm6156_vm2, %v6751_v38, 0.0 }
 0x3e9   : > { %6164 = vadd.xlane.f32.xlu0 %v6163_v39 }
 0x476   : > { %v6165_v40 = vpop.xlane.xlu0 %6164 }
 0x477   : > { %v6166_v41 = vrot.slane %v6165_v40, 4 }
 0x479   : > { %v6167_v43 = vadd.f32 %v6166_v41, %v6165_v40 }
 0x47b   : > { %v6168_v44 = vrot.slane %v6167_v43, 2 }
 0x47d   : > { %v6169_v45 = vadd.f32 %v6168_v44, %v6167_v43 }
 0x47f   : > { %v6170_v46 = vrot.slane %v6169_v45, 1 }
 0x481   : > { %v6171_v47 = vadd.f32 %v6170_v46, %v6169_v45 }
 0x483   : > { %7599 = vpush %v6171_v47 }
 0x4b4   : > { %s7600_s16 = spop %7599 }
 0x4b5   : > { %v6173_v48 = vstv %s7600_s16 }
 0x4b6   : > { %6175 = vst.msk [vmem:[#allocation5] sm:$0x1] %vm6174_vm3, %v6173_v48 }
 0x4b7 PF: > { %p7609_p7 = scmp.eq.s32.totalorder %s8261_s10, 2  ;;  %s8203_s17 = smov [#allocation3]  }
 0x4b8   : > { %s6183_s18 = sshll.u32 %s8203_s17, 4  ;;  %s8204_s19 = smov [#allocation5]   ;;  %s6184_s18 = int_to_ptr.vmem [resolvable:$true] %s6183_s18 }
 0x4b9   : > { %s6194_s20 = sshll.u32 %s8204_s19, 4  ;;  %s8128_s21 = scalar_lea.vmem %s6184_s18, 32  ;;  %s6195_s20 = int_to_ptr.vmem [resolvable:$true] %s6194_s20 }
 0x4ba   : > { %p8129_p8 = scmp.ne.s32.totalorder %s6184_s18, %s8128_s21  ;;  %p8135_p11 = scmp.lt.s32.totalorder %s6184_s18, %s6184_s18 }
 0x4bb   : > { %p8136_p12 = scmp.lt.s32.totalorder %s8128_s21, %s8128_s21 }
 0x4bc   : > { %p8130_p9 = pnand %p8129_p8, %p7609_p7 }
 0x4bd   : > { %p8137_p13 = por %p8136_p12, %p8135_p11 }
 0x4be   : > { %p8131_p10 = pneg %p8130_p9 }
 0x4c0   : > { %p8138_p0 = pnand %p8137_p13, %p8131_p10 }
 0x4c2   : > { %8141 = shalt.err (!%p8138_p0)
}
 0x4c3   : > { %s8142_s24 = scalar_lea.hbm %s9060_s8, 32 }
 0x4c4   : > { %p8143_p1 = scmp.ne.s32.totalorder %s9060_s8, %s8142_s24  ;;  %p8148_p4 = scmp.lt.u32.totalorder %s8142_s24, %s9060_s8 }
 0x4c6   : > { %p8144_p2 = pnand %p8143_p1, %p7609_p7 }
 0x4c8   : > { %p8145_p3 = pneg %p8144_p2 }
 0x4ca   : > { %p8150_p5 = pnand %p8148_p4, %p8145_p3 }
 0x4cc   : > { %8153 = shalt.err (!%p8150_p5)
}
 0x4cd   : > { %7602 = dma.vmem_to_hbm [thread:$0]  (%p7609_p7), %s6184_s18, 32, %s9060_s8, [#allocation4]  }
 0x4ce   : > { %s8154_s12 = scalar_lea.vmem %s6195_s20, 16  ;;  %s8160_s13 = scalar_lea.vmem %s6195_s20, 32 }
 0x4cf   : > { %p8155_p6 = scmp.ne.s32.totalorder %s6195_s20, %s8154_s12  ;;  %p8161_p10 = scmp.lt.s32.totalorder %s6195_s20, %s6195_s20 }
 0x4d0   : > { %p8162_p11 = scmp.lt.s32.totalorder %s8160_s13, %s8154_s12 }
 0x4d1   : > { %p8156_p8 = pnand %p8155_p6, %p7609_p7 }
 0x4d2   : > { %p8163_p12 = por %p8162_p11, %p8161_p10 }
 0x4d3   : > { %p8157_p9 = pneg %p8156_p8 }
 0x4d5   : > { %p8164_p13 = pnand %p8163_p12, %p8157_p9 }
 0x4d7   : > { %8167 = shalt.err (!%p8164_p13)
}
 0x4d8   : > { %s8168_s16 = scalar_lea.hbm %s9061_s9, 16 }
 0x4d9   : > { %p8169_p0 = scmp.ne.s32.totalorder %s9061_s9, %s8168_s16  ;;  %p8174_p3 = scmp.lt.u32.totalorder %s8168_s16, %s9061_s9 }
 0x4db   : > { %p8170_p1 = pnand %p8169_p0, %p7609_p7 }
 0x4dd   : > { %p8171_p2 = pneg %p8170_p1 }
 0x4df   : > { %p8176_p4 = pnand %p8174_p3, %p8171_p2 }
 0x4e1   : > { %8179 = shalt.err (!%p8176_p4)
}
 0x4e2   : > { %7604 = dma.vmem_to_hbm [thread:$0]  (%p7609_p7), %s6195_s20, 16, %s9061_s9, [#allocation6]  }
 0x4e3   : > { %8185 = dma.done.wait (%p7609_p7), [#allocation4], 32  }
 0x4e4   : > { %8187 = vsyncadd (%p7609_p7), [#allocation4], 4294967264 }
 0x4e5   : > { %8189 = dma.done.wait (%p7609_p7), [#allocation6], 16  }
 0x4e6   : > { %8191 = vsyncadd (%p7609_p7), [#allocation6], 4294967280 }
 0x4e7 PF: > { %s22_s30 = sadd.s32 1, %s8194_s30  }
 0x4e8   : > { %p19_p5 = scmp.ge.s32.totalorder %s22_s30, 5  }
 0x4ea   :  { %21 = sbr.rel (!%p19_p5) target bundleno = 2 (0x2), region = 98 }
 0x4f1   :  { %6211 = vsyncpa [#allocation4], 1 }
 0x4f2   :  { %6213 = vsyncpa [#allocation4 + $0x1], 1 }
 0x4f3   :  { %6214 = vsyncpa [#allocation6], 1 }

</bundles_post_ra>
